<compile_context>
chip_gen: v6e
topology: v6e:2x2x1
jax: 0.10.0
libtpu: 0.0.40
codegen_flags: <defaults>
</compile_context>

<pallas_src>
import jax
import jax.numpy as jnp
from jax import lax
from jax.experimental import pallas as pl
from jax.experimental.pallas import tpu as pltpu

# ------------------------- config (mirrors `args`) --------------------------
VOCAB = 50
EMSIZE = 16
NHID_QUERY = 16
NHID_DOC = 16
NHID_SESSION = 32
BIDIRECTION = True
NUM_DIRECTIONS = 2 if BIDIRECTION else 1
POOL_TYPE = "max"
MODEL = "LSTM"
REGULARIZE = 0.0
# TODO(synk): regularize > 0 branch (entropy penalty) of compute_decoding_loss
#             is not implemented; this config uses regularize = 0.

GP = 128  # per-gate lane padding: every gate slice is 128-lane (vreg) aligned


# ------------------------------ small helpers -------------------------------
def _round_up(n, m):
    return ((n + m - 1) // m) * m


def _pad_axis(a, target, axis):
    amt = target - a.shape[axis]
    if amt == 0:
        return a
    widths = [(0, 0)] * a.ndim
    widths[axis] = (0, amt)
    return jnp.pad(a, widths)


def _mm_nt(a, b):
    # a: (M, K), b: (N, K) -> a @ b.T on the MXU with f32 accumulation.
    return lax.dot_general(a, b, (((1,), (1,)), ((), ())),
                           preferred_element_type=jnp.float32)


def _lstm_step(xg_t, h, c, whh):
    """One LSTM step.  xg_t = precomputed x @ W_ih^T + b (gate-padded to GP);
    per-step work is a single h @ W_hh^T matmul plus vreg-aligned gate math."""
    gates = xg_t + _mm_nt(h, whh)                     # (N, 4*GP)
    i = jax.nn.sigmoid(gates[:, 0 * GP:1 * GP])
    f = jax.nn.sigmoid(gates[:, 1 * GP:2 * GP])
    g = jnp.tanh(gates[:, 2 * GP:3 * GP])
    o = jax.nn.sigmoid(gates[:, 3 * GP:4 * GP])
    c_new = f * c + i * g
    h_new = o * jnp.tanh(c_new)
    return h_new, c_new


def _pad_gate_rows(w, hid):
    # (4*hid, K) -> (4*GP, K): zero-pad each gate block to 128 output rows.
    k = w.shape[1]
    return jnp.pad(w.reshape(4, hid, k),
                   ((0, 0), (0, GP - hid), (0, 0))).reshape(4 * GP, k)


def _pad_lstm_weights(p, hid):
    """PyTorch-order (i,f,g,o) weights -> gate-padded [W_ih], [W_hh], [b]."""
    wih = _pad_gate_rows(p["wih"], hid)                          # (4GP, In)
    whh = _pad_gate_rows(_pad_axis(p["whh"], GP, 1), hid)        # (4GP, GP)
    b = jnp.pad(p["b"].reshape(4, hid),
                ((0, 0), (0, GP - hid))).reshape(1, 4 * GP)      # (1, 4GP)
    return wih, whh, b


# ------------------------------- Pallas kernels ------------------------------
def _make_enc_kernel(L_max, N_pad, hid):
    """grid = (streams, dirs).  One invocation runs the whole recurrence."""

    def kernel(x_ref, len_ref, tmax_ref, wih_ref, whh_ref, b_ref, out_ref):
        d = pl.program_id(1)
        # cuDNN-style hoist: one input GEMM (+bias) covering every timestep.
        xg = _mm_nt(x_ref[...], wih_ref[...]) + b_ref[...]       # (L*Np, 4GP)
        whh = whh_ref[...]
        lengths = len_ref[...]                                   # (Np, 1)
        tmax = tmax_ref[...]                                     # (1, 1)

        h = jnp.zeros((N_pad, GP), jnp.float32)
        c = jnp.zeros((N_pad, GP), jnp.float32)
        mx = jnp.full((N_pad, GP), -jnp.inf, jnp.float32)
        for t in range(L_max):                                   # fully unrolled
            h, c = _lstm_step(xg[t * N_pad:(t + 1) * N_pad, :], h, c, whh)
            # pad_packed_sequence semantics: positions < length carry RNN
            # outputs, positions in [length, max(length)) carry zeros, later
            # padding positions must not enter the max-pool at all.
            valid = t < lengths                                  # (Np, 1) bool
            fill = jnp.where(t < tmax, 0.0, -jnp.inf)            # (1, 1)
            mx = jnp.maximum(mx, jnp.where(valid, h, fill))

        # fwd / bwd lanes pack into one (N_pad, 2*hid) output block (the block
        # index ignores the dir axis, so the buffer stays resident across d).
        @pl.when(d == 0)
        def _():
            out_ref[:, 0:hid] = mx[:, :hid]

        @pl.when(d == 1)
        def _():
            out_ref[:, hid:2 * hid] = mx[:, :hid]

    return kernel


def _make_sess_dec_kernel(S, B, B_pad, D, Lq, Ndec, V):
    """grid = (1,).  Session loop + decoder loop fused in one invocation."""

    def kernel(q_ref, d_ref, lab_ref, swih_ref, swhh_ref, sb_ref,
               pwq_ref, pwh_ref, pb_ref,
               dx_ref, tgt_ref, dlen_ref, dwih_ref, dwhh_ref, db_ref,
               wo_ref, bo_ref,
               click_ref, dloss_ref, h_store, c_store):
        f32 = jnp.float32
        # Hoisted input GEMMs (one MXU matmul each, covering all steps).
        xg_s = _mm_nt(q_ref[...], swih_ref[...]) + sb_ref[...]   # (S*Bp, 4GP)
        xp_s = _mm_nt(q_ref[...], pwq_ref[...]) + pb_ref[...]    # (S*Bp, Hd2)
        xg_d = _mm_nt(dx_ref[...], dwih_ref[...]) + db_ref[...]  # ((Lq-1)*Nd, 4GP)
        swhh = swhh_ref[...]
        pwh = pwh_ref[...]
        dwhh = dwhh_ref[...]
        wo = wo_ref[...]
        bo = bo_ref[...]

        # rows b >= B are batch padding and must not enter the click loss.
        bmask = (lax.broadcasted_iota(jnp.int32, (B_pad, 1), 0) < B).astype(f32)

        # ---- session loop: projection + click BCE + session LSTM cell ----
        h = jnp.zeros((B_pad, GP), f32)
        c = jnp.zeros((B_pad, GP), f32)
        click = jnp.zeros((1, 1), f32)
        for t in range(S):
            proj = jnp.tanh(xp_s[t * B_pad:(t + 1) * B_pad, :]
                            + _mm_nt(h, pwh))                    # (Bp, Hd2)
            docs = d_ref[t]                                      # (Bp, D, Hd2)
            y = lab_ref[t]                                       # (Bp, D)
            score = jnp.sum(proj[:, None, :] * docs, axis=-1)    # (Bp, D)
            bce = (jnp.maximum(score, 0.0) - score * y
                   + jnp.log(1.0 + jnp.exp(-jnp.abs(score))))
            click += jnp.reshape(jnp.sum(bce * bmask), (1, 1))
            h, c = _lstm_step(xg_s[t * B_pad:(t + 1) * B_pad, :], h, c, swhh)
            if t < S - 1:                                        # static cond
                h_store[t * B_pad:(t + 1) * B_pad, :] = h
                c_store[t * B_pad:(t + 1) * B_pad, :] = c
        # reference: sum_t mean_{B*D}(bce_t) / S
        click_ref[...] = click * (1.0 / float(S * B * D))

        # ---- decoder loop: LSTM cell + vocab logits + masked NLL ----
        # TODO(synk): at production vocab sizes the (V, GP) weight must be
        #             blocked along V with an online logsumexp (VMEM limit).
        hd = h_store[...]                                        # (Ndec, GP)
        cd = c_store[...]
        dlen = dlen_ref[...]                                     # (Ndec, 1)
        dloss = jnp.zeros((1, 1), f32)
        dcnt = jnp.zeros((1, 1), f32)
        for t in range(Lq - 1):
            hd, cd = _lstm_step(xg_d[t * Ndec:(t + 1) * Ndec, :], hd, cd, dwhh)
            logits = _mm_nt(hd, wo) + bo                         # (Ndec, V)
            m = jnp.max(logits, axis=-1, keepdims=True)
            lse = m + jnp.log(jnp.sum(jnp.exp(logits - m), axis=-1,
                                      keepdims=True))
            logp = logits - lse
            tgt = tgt_ref[t]                                     # (Ndec, 1)
            onehot = (lax.broadcasted_iota(jnp.int32, (Ndec, V), 1)
                      == tgt).astype(f32)
            nll = -jnp.sum(logp * onehot, axis=-1, keepdims=True)  # (Ndec, 1)
            maskf = (t < dlen).astype(f32)                       # mask(len, idx)
            dloss += jnp.reshape(jnp.sum(nll * maskf), (1, 1))
            dcnt += jnp.reshape(jnp.sum(maskf), (1, 1))
        dloss_ref[...] = jnp.where(dcnt > 0.0, dloss / dcnt, dloss)

    return kernel


# ------------------------------ kernel wrappers ------------------------------
def _reverse_within_length(emb, lengths):
    # pack_padded_sequence semantics for the backward direction: token order
    # reversed inside each sequence's true length (padding stays at the tail).
    N, L, E = emb.shape
    t = jnp.arange(L, dtype=jnp.int32)[None, :]
    idx = jnp.clip(lengths[:, None] - 1 - t, 0, L - 1)           # (N, L)
    idx = jnp.broadcast_to(idx[:, :, None], (N, L, E))
    return jnp.take_along_axis(emb, idx, axis=1)


def bidir_encode_pool(streams, hid):
    """One fused Pallas call: bidirectional LSTM encoder + masked max-pool.

    streams: list of (emb (N, L, E), lengths (N,), p_fwd, p_bwd).
    Returns a list of pooled encodings (N, 2*hid), one per stream.
    """
    E = streams[0][0].shape[-1]
    L_max = max(s[0].shape[1] for s in streams)
    N_pad = max(_round_up(s[0].shape[0], 8) for s in streams)
    n_streams = len(streams)

    xs, lens, tmaxs, wihs, whhs, bs = [], [], [], [], [], []
    for emb, lengths, p_f, p_b in streams:
        N, L, Es = emb.shape
        assert Es == E
        lengths = lengths.astype(jnp.int32)
        emb_rev = _reverse_within_length(emb, lengths)
        lane_x, lane_wih, lane_whh, lane_b = [], [], [], []
        for e, p in ((emb, p_f), (emb_rev, p_b)):
            e = jnp.pad(e, ((0, N_pad - N), (0, L_max - L), (0, 0)))
            # flatten time-outer so per-step slices are sublane-aligned reads
            lane_x.append(jnp.swapaxes(e, 0, 1).reshape(L_max * N_pad, E))
            wih_p, whh_p, b_p = _pad_lstm_weights(p, hid)
            lane_wih.append(wih_p)
            lane_whh.append(whh_p)
            lane_b.append(b_p)
        xs.append(jnp.stack(lane_x))
        wihs.append(jnp.stack(lane_wih))
        whhs.append(jnp.stack(lane_whh))
        bs.append(jnp.stack(lane_b))
        lens.append(jnp.pad(lengths, (0, N_pad - N))[:, None])
        tmaxs.append(jnp.max(lengths).reshape(1, 1))

    x = jnp.stack(xs)        # (ns, 2, L_max*N_pad, E)
    ln = jnp.stack(lens)     # (ns, N_pad, 1)
    tm = jnp.stack(tmaxs)    # (ns, 1, 1)
    wih = jnp.stack(wihs)    # (ns, 2, 4GP, E)
    whh = jnp.stack(whhs)    # (ns, 2, 4GP, GP)
    b = jnp.stack(bs)        # (ns, 2, 1, 4GP)

    out = pl.pallas_call(
        _make_enc_kernel(L_max, N_pad, hid),
        grid=(n_streams, 2),
        in_specs=[
            pl.BlockSpec((None, None, L_max * N_pad, E),
                         lambda s, d: (s, d, 0, 0)),
            pl.BlockSpec((None, N_pad, 1), lambda s, d: (s, 0, 0)),
            pl.BlockSpec((None, 1, 1), lambda s, d: (s, 0, 0)),
            pl.BlockSpec((None, None, 4 * GP, E), lambda s, d: (s, d, 0, 0)),
            pl.BlockSpec((None, None, 4 * GP, GP), lambda s, d: (s, d, 0, 0)),
            pl.BlockSpec((None, None, 1, 4 * GP), lambda s, d: (s, d, 0, 0)),
        ],
        out_specs=pl.BlockSpec((None, N_pad, 2 * hid), lambda s, d: (s, 0, 0)),
        out_shape=jax.ShapeDtypeStruct((n_streams, N_pad, 2 * hid),
                                       jnp.float32),
        compiler_params=pltpu.CompilerParams(
            dimension_semantics=("parallel", "arbitrary")),
    )(x, ln, tm, wih, whh, b)

    pooled = []
    for s_idx, (emb, _, _, _) in enumerate(streams):
        pooled.append(out[s_idx, :emb.shape[0], :])
    return pooled


def _full_spec(a):
    nd = a.ndim
    return pl.BlockSpec(a.shape, lambda i, nd=nd: (0,) * nd)


# ------------------------------- NSRF forward --------------------------------
def nsrf_forward(params, session_queries, session_query_length, rel_docs,
                 rel_docs_length, doc_labels):
    B, S, Lq = session_queries.shape
    _, _, D, Ld = rel_docs.shape
    E = params["embedding"].shape[1]
    Hs = NHID_SESSION
    Hq2 = NUM_DIRECTIONS * NHID_QUERY
    Hd2 = NUM_DIRECTIONS * NHID_DOC
    V = params["dec_out_w"].shape[0]

    # ----- embedding lookup (XLA gather; kept outside Pallas) ---------------
    emb_q = params["embedding"][session_queries.reshape(-1, Lq)]   # (B*S,Lq,E)
    emb_d = params["embedding"][rel_docs.reshape(-1, Ld)]          # (B*S*D,Ld,E)
    q_len = session_query_length.reshape(-1).astype(jnp.int32)
    d_len = rel_docs_length.reshape(-1).astype(jnp.int32)

    # ----- fused bidirectional encoders + max pooling (1 pallas_call) -------
    if NHID_QUERY == NHID_DOC:
        pooled_q, pooled_d = bidir_encode_pool(
            [(emb_q, q_len, params["q_fwd"], params["q_bwd"]),
             (emb_d, d_len, params["d_fwd"], params["d_bwd"])],
            hid=NHID_QUERY)
    else:  # fall back to one call per encoder when hidden sizes differ
        (pooled_q,) = bidir_encode_pool(
            [(emb_q, q_len, params["q_fwd"], params["q_bwd"])], hid=NHID_QUERY)
        (pooled_d,) = bidir_encode_pool(
            [(emb_d, d_len, params["d_fwd"], params["d_bwd"])], hid=NHID_DOC)
    enc_q = pooled_q.reshape(B, S, Hq2)
    enc_d = pooled_d.reshape(B, S, D, Hd2)

    # ----- fused session + decoder kernel (1 pallas_call) -------------------
    B_pad = _round_up(B, 8)
    Ndec = (S - 1) * B_pad

    # session inputs, time-outer, batch padded to B_pad
    q_tb = _pad_axis(jnp.swapaxes(enc_q, 0, 1), B_pad, 1)        # (S,Bp,Hq2)
    q_all = q_tb.reshape(S * B_pad, Hq2)
    d_tb = _pad_axis(jnp.swapaxes(enc_d, 0, 1), B_pad, 1)        # (S,Bp,D,Hd2)
    lab_tb = _pad_axis(jnp.swapaxes(doc_labels.astype(jnp.float32), 0, 1),
                       B_pad, 1)                                 # (S,Bp,D)

    # decoder inputs: row r = sess_step * B_pad + b  (b >= B are pad rows)
    emb_q4 = emb_q.reshape(B, S, Lq, E)
    dx = jnp.transpose(emb_q4[:, 1:, :Lq - 1, :], (2, 1, 0, 3))  # (Lq-1,S-1,B,E)
    dx = _pad_axis(dx, B_pad, 2)
    dec_x_all = dx.reshape((Lq - 1) * Ndec, E)

    dt = jnp.transpose(session_queries[:, 1:, 1:].astype(jnp.int32), (2, 1, 0))
    dt = _pad_axis(dt, B_pad, 2)                                 # (Lq-1,S-1,Bp)
    dec_tgt = dt.reshape(Lq - 1, Ndec)[..., None]                # (Lq-1,Ndec,1)

    dl = jnp.transpose(session_query_length[:, 1:].astype(jnp.int32), (1, 0))
    dl = _pad_axis(dl, B_pad, 1)                                 # (S-1,Bp)
    dec_len = dl.reshape(Ndec, 1)

    # gate-padded weights (128 lanes per gate) + split projection weight
    s_wih, s_whh, s_b = _pad_lstm_weights(params["sess"], Hs)
    d_wih, d_whh, d_b = _pad_lstm_weights(params["dec"], Hs)
    p_wq = params["proj_w"][:, :Hq2]                             # (Hd2, Hq2)
    p_wh = _pad_axis(params["proj_w"][:, Hq2:], GP, 1)           # (Hd2, GP)
    p_b = params["proj_b"]
    wo_p = _pad_axis(params["dec_out_w"], GP, 1)                 # (V, GP)
    bo = params["dec_out_b"]

    args = (q_all, d_tb, lab_tb, s_wih, s_whh, s_b, p_wq, p_wh, p_b,
            dec_x_all, dec_tgt, dec_len, d_wih, d_whh, d_b, wo_p, bo)

    click, dloss = pl.pallas_call(
        _make_sess_dec_kernel(S, B, B_pad, D, Lq, Ndec, V),
        grid=(1,),
        in_specs=[_full_spec(a) for a in args],
        out_specs=(pl.BlockSpec((1, 1), lambda i: (0, 0)),
                   pl.BlockSpec((1, 1), lambda i: (0, 0))),
        out_shape=(jax.ShapeDtypeStruct((1, 1), jnp.float32),
                   jax.ShapeDtypeStruct((1, 1), jnp.float32)),
        scratch_shapes=[pltpu.VMEM((Ndec, GP), jnp.float32),
                        pltpu.VMEM((Ndec, GP), jnp.float32)],
        compiler_params=pltpu.CompilerParams(
            dimension_semantics=("arbitrary",)),
    )(*args)

    return click[0, 0] + dloss[0, 0]


# ----------------------------- deterministic init ----------------------------
def _init(key, shape, scale=0.1):
    return scale * jax.random.normal(key, shape, dtype=jnp.float32)


def make_lstm_params(key, in_dim, hid):
    k1, k2, k3 = jax.random.split(key, 3)
    return dict(wih=_init(k1, (4 * hid, in_dim)),
                whh=_init(k2, (4 * hid, hid)),
                b=_init(k3, (1, 4 * hid)))


def make_params(key):
    ks = jax.random.split(key, 10)
    emb = _init(ks[0], (VOCAB, EMSIZE))
    emb = emb.at[0].set(0.0)                      # padding_idx=0
    proj_in = NHID_QUERY * NUM_DIRECTIONS + NHID_SESSION
    proj_out = NHID_DOC * NUM_DIRECTIONS
    return dict(
        embedding=emb,
        q_fwd=make_lstm_params(ks[1], EMSIZE, NHID_QUERY),
        q_bwd=make_lstm_params(ks[2], EMSIZE, NHID_QUERY),
        d_fwd=make_lstm_params(ks[3], EMSIZE, NHID_DOC),
        d_bwd=make_lstm_params(ks[4], EMSIZE, NHID_DOC),
        sess=make_lstm_params(ks[5], NHID_QUERY * NUM_DIRECTIONS, NHID_SESSION),
        proj_w=_init(ks[6], (proj_out, proj_in)),
        proj_b=_init(ks[7], (1, proj_out)),
        dec=make_lstm_params(ks[8], EMSIZE, NHID_SESSION),
        dec_out_w=_init(ks[9], (VOCAB, NHID_SESSION)),
        dec_out_b=jnp.zeros((1, VOCAB), jnp.float32),
    )


# ------------------------------------ main -----------------------------------
if __name__ == "__main__":
    B, S, D, Lq, Ld = 2, 3, 3, 6, 7
    key = jax.random.PRNGKey(0)
    kp, k1, k2, k3, k4, k5 = jax.random.split(key, 6)

    params = make_params(kp)

    session_queries = jax.random.randint(k1, (B, S, Lq), 1, VOCAB, jnp.int32)
    session_query_length = jax.random.randint(k2, (B, S), 2, Lq + 1, jnp.int32)
    rel_docs = jax.random.randint(k3, (B, S, D, Ld), 1, VOCAB, jnp.int32)
    rel_docs_length = jax.random.randint(k4, (B, S, D), 2, Ld + 1, jnp.int32)
    doc_labels = jax.random.bernoulli(k5, 0.5, (B, S, D)).astype(jnp.float32)

    fwd = jax.jit(nsrf_forward)
    loss = fwd(params, session_queries, session_query_length, rel_docs,
               rel_docs_length, doc_labels)
    jax.block_until_ready(loss)
    assert loss.shape == () and jnp.isfinite(loss)
    print("KERNEL_OK")
</pallas_src>

<mosaic_0001>
module attributes {stable_mosaic.version = 11 : i64} {
  func.func @kernel(%arg0: i32, %arg1: i32, %arg2: memref<1x1x168x16xf32, #tpu.memory_space<vmem>>, %arg3: memref<1x24x1xi32, #tpu.memory_space<vmem>>, %arg4: memref<1x1x1xi32, #tpu.memory_space<vmem>>, %arg5: memref<1x1x512x16xf32, #tpu.memory_space<vmem>>, %arg6: memref<1x1x512x128xf32, #tpu.memory_space<vmem>>, %arg7: memref<1x1x1x512xf32, #tpu.memory_space<vmem>>, %arg8: memref<1x24x32xf32, #tpu.memory_space<vmem>>) attributes {dimension_semantics = [#tpu.dimension_semantics<parallel>, #tpu.dimension_semantics<arbitrary>], iteration_bounds = array<i64: 2, 2>, scalar_prefetch = 0 : i64, scratch_operands = 0 : i64, tpu.core_type = #tpu.core_type<tc>, window_params = [{transform_indices = @transform_0, window_bounds = array<i64: 1, 1, 168, 16>}, {transform_indices = @transform_1, window_bounds = array<i64: 1, 24, 1>}, {transform_indices = @transform_2, window_bounds = array<i64: 1, 1, 1>}, {transform_indices = @transform_3, window_bounds = array<i64: 1, 1, 512, 16>}, {transform_indices = @transform_4, window_bounds = array<i64: 1, 1, 512, 128>}, {transform_indices = @transform_5, window_bounds = array<i64: 1, 1, 1, 512>}, {transform_indices = @transform_6, window_bounds = array<i64: 1, 24, 32>}]} {
    %c0 = arith.constant 0 : index
    %c0_0 = arith.constant 0 : index
    %c0_1 = arith.constant 0 : index
    %c0_2 = arith.constant 0 : index
    %0 = vector.load %arg2[%c0, %c0_0, %c0_1, %c0_2] : memref<1x1x168x16xf32, #tpu.memory_space<vmem>>, vector<1x1x168x16xf32>
    %1 = vector.shape_cast %0 : vector<1x1x168x16xf32> to vector<168x16xf32>
    %c0_3 = arith.constant 0 : index
    %c0_4 = arith.constant 0 : index
    %c0_5 = arith.constant 0 : index
    %c0_6 = arith.constant 0 : index
    %2 = vector.load %arg5[%c0_3, %c0_4, %c0_5, %c0_6] : memref<1x1x512x16xf32, #tpu.memory_space<vmem>>, vector<1x1x512x16xf32>
    %3 = vector.shape_cast %2 : vector<1x1x512x16xf32> to vector<512x16xf32>
    %cst = arith.constant dense<0.000000e+00> : vector<168x512xf32>
    %4 = tpu.matmul %1, %3, %cst {dimension_numbers = #tpu.dot_dimension_numbers<[1], [1], [0], [0], [0, 0, 1, 0], [], []>} : vector<168x16xf32>, vector<512x16xf32>, vector<168x512xf32> -> vector<168x512xf32>
    %c0_7 = arith.constant 0 : index
    %c0_8 = arith.constant 0 : index
    %c0_9 = arith.constant 0 : index
    %c0_10 = arith.constant 0 : index
    %5 = vector.load %arg7[%c0_7, %c0_8, %c0_9, %c0_10] : memref<1x1x1x512xf32, #tpu.memory_space<vmem>>, vector<1x1x1x512xf32>
    %6 = vector.shape_cast %5 : vector<1x1x1x512xf32> to vector<1x512xf32>
    %7 = vector.broadcast %6 : vector<1x512xf32> to vector<168x512xf32>
    %8 = arith.addf %4, %7 : vector<168x512xf32>
    %c0_11 = arith.constant 0 : index
    %c0_12 = arith.constant 0 : index
    %c0_13 = arith.constant 0 : index
    %c0_14 = arith.constant 0 : index
    %9 = vector.load %arg6[%c0_11, %c0_12, %c0_13, %c0_14] : memref<1x1x512x128xf32, #tpu.memory_space<vmem>>, vector<1x1x512x128xf32>
    %10 = vector.shape_cast %9 : vector<1x1x512x128xf32> to vector<512x128xf32>
    %c0_15 = arith.constant 0 : index
    %c0_16 = arith.constant 0 : index
    %c0_17 = arith.constant 0 : index
    %11 = vector.load %arg3[%c0_15, %c0_16, %c0_17] : memref<1x24x1xi32, #tpu.memory_space<vmem>>, vector<1x24x1xi32>
    %12 = vector.shape_cast %11 : vector<1x24x1xi32> to vector<24x1xi32>
    %c0_18 = arith.constant 0 : index
    %c0_19 = arith.constant 0 : index
    %c0_20 = arith.constant 0 : index
    %13 = vector.load %arg4[%c0_18, %c0_19, %c0_20] : memref<1x1x1xi32, #tpu.memory_space<vmem>>, vector<1x1x1xi32>
    %14 = vector.shape_cast %13 : vector<1x1x1xi32> to vector<1x1xi32>
    %cst_21 = arith.constant 0.000000e+00 : f32
    %15 = vector.broadcast %cst_21 : f32 to vector<24x128xf32>
    %cst_22 = arith.constant 0.000000e+00 : f32
    %16 = vector.broadcast %cst_22 : f32 to vector<24x128xf32>
    %cst_23 = arith.constant 0xFF800000 : f32
    %17 = vector.broadcast %cst_23 : f32 to vector<24x128xf32>
    %18 = vector.extract_strided_slice %8 {offsets = [0, 0], sizes = [24, 512], strides = [1, 1]} : vector<168x512xf32> to vector<24x512xf32>
    %cst_24 = arith.constant dense<0.000000e+00> : vector<24x512xf32>
    %19 = tpu.matmul %15, %10, %cst_24 {dimension_numbers = #tpu.dot_dimension_numbers<[1], [1], [0], [0], [0, 0, 1, 0], [], []>} : vector<24x128xf32>, vector<512x128xf32>, vector<24x512xf32> -> vector<24x512xf32>
    %20 = arith.addf %18, %19 : vector<24x512xf32>
    %21 = vector.extract_strided_slice %20 {offsets = [0, 0], sizes = [24, 128], strides = [1, 1]} : vector<24x512xf32> to vector<24x128xf32>
    %22 = arith.negf %21 : vector<24x128xf32>
    %23 = math.exp %22 : vector<24x128xf32>
    %cst_25 = arith.constant 1.000000e+00 : f32
    %24 = vector.broadcast %cst_25 : f32 to vector<24x128xf32>
    %25 = arith.addf %24, %23 : vector<24x128xf32>
    %26 = arith.divf %24, %25 : vector<24x128xf32>
    %27 = vector.extract_strided_slice %20 {offsets = [0, 128], sizes = [24, 128], strides = [1, 1]} : vector<24x512xf32> to vector<24x128xf32>
    %28 = arith.negf %27 : vector<24x128xf32>
    %29 = math.exp %28 : vector<24x128xf32>
    %cst_26 = arith.constant 1.000000e+00 : f32
    %30 = vector.broadcast %cst_26 : f32 to vector<24x128xf32>
    %31 = arith.addf %30, %29 : vector<24x128xf32>
    %32 = arith.divf %30, %31 : vector<24x128xf32>
    %33 = vector.extract_strided_slice %20 {offsets = [0, 256], sizes = [24, 128], strides = [1, 1]} : vector<24x512xf32> to vector<24x128xf32>
    %34 = math.tanh %33 : vector<24x128xf32>
    %35 = vector.extract_strided_slice %20 {offsets = [0, 384], sizes = [24, 128], strides = [1, 1]} : vector<24x512xf32> to vector<24x128xf32>
    %36 = arith.negf %35 : vector<24x128xf32>
    %37 = math.exp %36 : vector<24x128xf32>
    %cst_27 = arith.constant 1.000000e+00 : f32
    %38 = vector.broadcast %cst_27 : f32 to vector<24x128xf32>
    %39 = arith.addf %38, %37 : vector<24x128xf32>
    %40 = arith.divf %38, %39 : vector<24x128xf32>
    %41 = arith.mulf %32, %16 : vector<24x128xf32>
    %42 = arith.mulf %26, %34 : vector<24x128xf32>
    %43 = arith.addf %41, %42 : vector<24x128xf32>
    %44 = math.tanh %43 : vector<24x128xf32>
    %45 = arith.mulf %40, %44 : vector<24x128xf32>
    %c0_i32 = arith.constant 0 : i32
    %46 = vector.broadcast %c0_i32 : i32 to vector<24x1xi32>
    %47 = arith.cmpi sgt, %12, %46 : vector<24x1xi32>
    %c0_i32_28 = arith.constant 0 : i32
    %48 = vector.broadcast %c0_i32_28 : i32 to vector<1x1xi32>
    %49 = arith.cmpi sgt, %14, %48 : vector<1x1xi32>
    %cst_29 = arith.constant 0.000000e+00 : f32
    %cst_30 = arith.constant 0xFF800000 : f32
    %50 = vector.broadcast %cst_29 : f32 to vector<1x1xf32>
    %51 = vector.broadcast %cst_30 : f32 to vector<1x1xf32>
    %52 = arith.select %49, %50, %51 : vector<1x1xi1>, vector<1x1xf32>
    %53 = vector.shape_cast %47 : vector<24x1xi1> to vector<24x1xi1>
    %54 = vector.broadcast %53 : vector<24x1xi1> to vector<24x128xi1>
    %55 = vector.shape_cast %52 : vector<1x1xf32> to vector<1x1xf32>
    %56 = vector.broadcast %55 : vector<1x1xf32> to vector<24x128xf32>
    %57 = arith.select %54, %45, %56 : vector<24x128xi1>, vector<24x128xf32>
    %58 = arith.maximumf %17, %57 : vector<24x128xf32>
    %59 = vector.extract_strided_slice %8 {offsets = [24, 0], sizes = [24, 512], strides = [1, 1]} : vector<168x512xf32> to vector<24x512xf32>
    %cst_31 = arith.constant dense<0.000000e+00> : vector<24x512xf32>
    %60 = tpu.matmul %45, %10, %cst_31 {dimension_numbers = #tpu.dot_dimension_numbers<[1], [1], [0], [0], [0, 0, 1, 0], [], []>} : vector<24x128xf32>, vector<512x128xf32>, vector<24x512xf32> -> vector<24x512xf32>
    %61 = arith.addf %59, %60 : vector<24x512xf32>
    %62 = vector.extract_strided_slice %61 {offsets = [0, 0], sizes = [24, 128], strides = [1, 1]} : vector<24x512xf32> to vector<24x128xf32>
    %63 = arith.negf %62 : vector<24x128xf32>
    %64 = math.exp %63 : vector<24x128xf32>
    %cst_32 = arith.constant 1.000000e+00 : f32
    %65 = vector.broadcast %cst_32 : f32 to vector<24x128xf32>
    %66 = arith.addf %65, %64 : vector<24x128xf32>
    %67 = arith.divf %65, %66 : vector<24x128xf32>
    %68 = vector.extract_strided_slice %61 {offsets = [0, 128], sizes = [24, 128], strides = [1, 1]} : vector<24x512xf32> to vector<24x128xf32>
    %69 = arith.negf %68 : vector<24x128xf32>
    %70 = math.exp %69 : vector<24x128xf32>
    %cst_33 = arith.constant 1.000000e+00 : f32
    %71 = vector.broadcast %cst_33 : f32 to vector<24x128xf32>
    %72 = arith.addf %71, %70 : vector<24x128xf32>
    %73 = arith.divf %71, %72 : vector<24x128xf32>
    %74 = vector.extract_strided_slice %61 {offsets = [0, 256], sizes = [24, 128], strides = [1, 1]} : vector<24x512xf32> to vector<24x128xf32>
    %75 = math.tanh %74 : vector<24x128xf32>
    %76 = vector.extract_strided_slice %61 {offsets = [0, 384], sizes = [24, 128], strides = [1, 1]} : vector<24x512xf32> to vector<24x128xf32>
    %77 = arith.negf %76 : vector<24x128xf32>
    %78 = math.exp %77 : vector<24x128xf32>
    %cst_34 = arith.constant 1.000000e+00 : f32
    %79 = vector.broadcast %cst_34 : f32 to vector<24x128xf32>
    %80 = arith.addf %79, %78 : vector<24x128xf32>
    %81 = arith.divf %79, %80 : vector<24x128xf32>
    %82 = arith.mulf %73, %43 : vector<24x128xf32>
    %83 = arith.mulf %67, %75 : vector<24x128xf32>
    %84 = arith.addf %82, %83 : vector<24x128xf32>
    %85 = math.tanh %84 : vector<24x128xf32>
    %86 = arith.mulf %81, %85 : vector<24x128xf32>
    %c1_i32 = arith.constant 1 : i32
    %87 = vector.broadcast %c1_i32 : i32 to vector<24x1xi32>
    %88 = arith.cmpi sgt, %12, %87 : vector<24x1xi32>
    %c1_i32_35 = arith.constant 1 : i32
    %89 = vector.broadcast %c1_i32_35 : i32 to vector<1x1xi32>
    %90 = arith.cmpi sgt, %14, %89 : vector<1x1xi32>
    %cst_36 = arith.constant 0.000000e+00 : f32
    %cst_37 = arith.constant 0xFF800000 : f32
    %91 = vector.broadcast %cst_36 : f32 to vector<1x1xf32>
    %92 = vector.broadcast %cst_37 : f32 to vector<1x1xf32>
    %93 = arith.select %90, %91, %92 : vector<1x1xi1>, vector<1x1xf32>
    %94 = vector.shape_cast %88 : vector<24x1xi1> to vector<24x1xi1>
    %95 = vector.broadcast %94 : vector<24x1xi1> to vector<24x128xi1>
    %96 = vector.shape_cast %93 : vector<1x1xf32> to vector<1x1xf32>
    %97 = vector.broadcast %96 : vector<1x1xf32> to vector<24x128xf32>
    %98 = arith.select %95, %86, %97 : vector<24x128xi1>, vector<24x128xf32>
    %99 = arith.maximumf %58, %98 : vector<24x128xf32>
    %100 = vector.extract_strided_slice %8 {offsets = [48, 0], sizes = [24, 512], strides = [1, 1]} : vector<168x512xf32> to vector<24x512xf32>
    %cst_38 = arith.constant dense<0.000000e+00> : vector<24x512xf32>
    %101 = tpu.matmul %86, %10, %cst_38 {dimension_numbers = #tpu.dot_dimension_numbers<[1], [1], [0], [0], [0, 0, 1, 0], [], []>} : vector<24x128xf32>, vector<512x128xf32>, vector<24x512xf32> -> vector<24x512xf32>
    %102 = arith.addf %100, %101 : vector<24x512xf32>
    %103 = vector.extract_strided_slice %102 {offsets = [0, 0], sizes = [24, 128], strides = [1, 1]} : vector<24x512xf32> to vector<24x128xf32>
    %104 = arith.negf %103 : vector<24x128xf32>
    %105 = math.exp %104 : vector<24x128xf32>
    %cst_39 = arith.constant 1.000000e+00 : f32
    %106 = vector.broadcast %cst_39 : f32 to vector<24x128xf32>
    %107 = arith.addf %106, %105 : vector<24x128xf32>
    %108 = arith.divf %106, %107 : vector<24x128xf32>
    %109 = vector.extract_strided_slice %102 {offsets = [0, 128], sizes = [24, 128], strides = [1, 1]} : vector<24x512xf32> to vector<24x128xf32>
    %110 = arith.negf %109 : vector<24x128xf32>
    %111 = math.exp %110 : vector<24x128xf32>
    %cst_40 = arith.constant 1.000000e+00 : f32
    %112 = vector.broadcast %cst_40 : f32 to vector<24x128xf32>
    %113 = arith.addf %112, %111 : vector<24x128xf32>
    %114 = arith.divf %112, %113 : vector<24x128xf32>
    %115 = vector.extract_strided_slice %102 {offsets = [0, 256], sizes = [24, 128], strides = [1, 1]} : vector<24x512xf32> to vector<24x128xf32>
    %116 = math.tanh %115 : vector<24x128xf32>
    %117 = vector.extract_strided_slice %102 {offsets = [0, 384], sizes = [24, 128], strides = [1, 1]} : vector<24x512xf32> to vector<24x128xf32>
    %118 = arith.negf %117 : vector<24x128xf32>
    %119 = math.exp %118 : vector<24x128xf32>
    %cst_41 = arith.constant 1.000000e+00 : f32
    %120 = vector.broadcast %cst_41 : f32 to vector<24x128xf32>
    %121 = arith.addf %120, %119 : vector<24x128xf32>
    %122 = arith.divf %120, %121 : vector<24x128xf32>
    %123 = arith.mulf %114, %84 : vector<24x128xf32>
    %124 = arith.mulf %108, %116 : vector<24x128xf32>
    %125 = arith.addf %123, %124 : vector<24x128xf32>
    %126 = math.tanh %125 : vector<24x128xf32>
    %127 = arith.mulf %122, %126 : vector<24x128xf32>
    %c2_i32 = arith.constant 2 : i32
    %128 = vector.broadcast %c2_i32 : i32 to vector<24x1xi32>
    %129 = arith.cmpi sgt, %12, %128 : vector<24x1xi32>
    %c2_i32_42 = arith.constant 2 : i32
    %130 = vector.broadcast %c2_i32_42 : i32 to vector<1x1xi32>
    %131 = arith.cmpi sgt, %14, %130 : vector<1x1xi32>
    %cst_43 = arith.constant 0.000000e+00 : f32
    %cst_44 = arith.constant 0xFF800000 : f32
    %132 = vector.broadcast %cst_43 : f32 to vector<1x1xf32>
    %133 = vector.broadcast %cst_44 : f32 to vector<1x1xf32>
    %134 = arith.select %131, %132, %133 : vector<1x1xi1>, vector<1x1xf32>
    %135 = vector.shape_cast %129 : vector<24x1xi1> to vector<24x1xi1>
    %136 = vector.broadcast %135 : vector<24x1xi1> to vector<24x128xi1>
    %137 = vector.shape_cast %134 : vector<1x1xf32> to vector<1x1xf32>
    %138 = vector.broadcast %137 : vector<1x1xf32> to vector<24x128xf32>
    %139 = arith.select %136, %127, %138 : vector<24x128xi1>, vector<24x128xf32>
    %140 = arith.maximumf %99, %139 : vector<24x128xf32>
    %141 = vector.extract_strided_slice %8 {offsets = [72, 0], sizes = [24, 512], strides = [1, 1]} : vector<168x512xf32> to vector<24x512xf32>
    %cst_45 = arith.constant dense<0.000000e+00> : vector<24x512xf32>
    %142 = tpu.matmul %127, %10, %cst_45 {dimension_numbers = #tpu.dot_dimension_numbers<[1], [1], [0], [0], [0, 0, 1, 0], [], []>} : vector<24x128xf32>, vector<512x128xf32>, vector<24x512xf32> -> vector<24x512xf32>
    %143 = arith.addf %141, %142 : vector<24x512xf32>
    %144 = vector.extract_strided_slice %143 {offsets = [0, 0], sizes = [24, 128], strides = [1, 1]} : vector<24x512xf32> to vector<24x128xf32>
    %145 = arith.negf %144 : vector<24x128xf32>
    %146 = math.exp %145 : vector<24x128xf32>
    %cst_46 = arith.constant 1.000000e+00 : f32
    %147 = vector.broadcast %cst_46 : f32 to vector<24x128xf32>
    %148 = arith.addf %147, %146 : vector<24x128xf32>
    %149 = arith.divf %147, %148 : vector<24x128xf32>
    %150 = vector.extract_strided_slice %143 {offsets = [0, 128], sizes = [24, 128], strides = [1, 1]} : vector<24x512xf32> to vector<24x128xf32>
    %151 = arith.negf %150 : vector<24x128xf32>
    %152 = math.exp %151 : vector<24x128xf32>
    %cst_47 = arith.constant 1.000000e+00 : f32
    %153 = vector.broadcast %cst_47 : f32 to vector<24x128xf32>
    %154 = arith.addf %153, %152 : vector<24x128xf32>
    %155 = arith.divf %153, %154 : vector<24x128xf32>
    %156 = vector.extract_strided_slice %143 {offsets = [0, 256], sizes = [24, 128], strides = [1, 1]} : vector<24x512xf32> to vector<24x128xf32>
    %157 = math.tanh %156 : vector<24x128xf32>
    %158 = vector.extract_strided_slice %143 {offsets = [0, 384], sizes = [24, 128], strides = [1, 1]} : vector<24x512xf32> to vector<24x128xf32>
    %159 = arith.negf %158 : vector<24x128xf32>
    %160 = math.exp %159 : vector<24x128xf32>
    %cst_48 = arith.constant 1.000000e+00 : f32
    %161 = vector.broadcast %cst_48 : f32 to vector<24x128xf32>
    %162 = arith.addf %161, %160 : vector<24x128xf32>
    %163 = arith.divf %161, %162 : vector<24x128xf32>
    %164 = arith.mulf %155, %125 : vector<24x128xf32>
    %165 = arith.mulf %149, %157 : vector<24x128xf32>
    %166 = arith.addf %164, %165 : vector<24x128xf32>
    %167 = math.tanh %166 : vector<24x128xf32>
    %168 = arith.mulf %163, %167 : vector<24x128xf32>
    %c3_i32 = arith.constant 3 : i32
    %169 = vector.broadcast %c3_i32 : i32 to vector<24x1xi32>
    %170 = arith.cmpi sgt, %12, %169 : vector<24x1xi32>
    %c3_i32_49 = arith.constant 3 : i32
    %171 = vector.broadcast %c3_i32_49 : i32 to vector<1x1xi32>
    %172 = arith.cmpi sgt, %14, %171 : vector<1x1xi32>
    %cst_50 = arith.constant 0.000000e+00 : f32
    %cst_51 = arith.constant 0xFF800000 : f32
    %173 = vector.broadcast %cst_50 : f32 to vector<1x1xf32>
    %174 = vector.broadcast %cst_51 : f32 to vector<1x1xf32>
    %175 = arith.select %172, %173, %174 : vector<1x1xi1>, vector<1x1xf32>
    %176 = vector.shape_cast %170 : vector<24x1xi1> to vector<24x1xi1>
    %177 = vector.broadcast %176 : vector<24x1xi1> to vector<24x128xi1>
    %178 = vector.shape_cast %175 : vector<1x1xf32> to vector<1x1xf32>
    %179 = vector.broadcast %178 : vector<1x1xf32> to vector<24x128xf32>
    %180 = arith.select %177, %168, %179 : vector<24x128xi1>, vector<24x128xf32>
    %181 = arith.maximumf %140, %180 : vector<24x128xf32>
    %182 = vector.extract_strided_slice %8 {offsets = [96, 0], sizes = [24, 512], strides = [1, 1]} : vector<168x512xf32> to vector<24x512xf32>
    %cst_52 = arith.constant dense<0.000000e+00> : vector<24x512xf32>
    %183 = tpu.matmul %168, %10, %cst_52 {dimension_numbers = #tpu.dot_dimension_numbers<[1], [1], [0], [0], [0, 0, 1, 0], [], []>} : vector<24x128xf32>, vector<512x128xf32>, vector<24x512xf32> -> vector<24x512xf32>
    %184 = arith.addf %182, %183 : vector<24x512xf32>
    %185 = vector.extract_strided_slice %184 {offsets = [0, 0], sizes = [24, 128], strides = [1, 1]} : vector<24x512xf32> to vector<24x128xf32>
    %186 = arith.negf %185 : vector<24x128xf32>
    %187 = math.exp %186 : vector<24x128xf32>
    %cst_53 = arith.constant 1.000000e+00 : f32
    %188 = vector.broadcast %cst_53 : f32 to vector<24x128xf32>
    %189 = arith.addf %188, %187 : vector<24x128xf32>
    %190 = arith.divf %188, %189 : vector<24x128xf32>
    %191 = vector.extract_strided_slice %184 {offsets = [0, 128], sizes = [24, 128], strides = [1, 1]} : vector<24x512xf32> to vector<24x128xf32>
    %192 = arith.negf %191 : vector<24x128xf32>
    %193 = math.exp %192 : vector<24x128xf32>
    %cst_54 = arith.constant 1.000000e+00 : f32
    %194 = vector.broadcast %cst_54 : f32 to vector<24x128xf32>
    %195 = arith.addf %194, %193 : vector<24x128xf32>
    %196 = arith.divf %194, %195 : vector<24x128xf32>
    %197 = vector.extract_strided_slice %184 {offsets = [0, 256], sizes = [24, 128], strides = [1, 1]} : vector<24x512xf32> to vector<24x128xf32>
    %198 = math.tanh %197 : vector<24x128xf32>
    %199 = vector.extract_strided_slice %184 {offsets = [0, 384], sizes = [24, 128], strides = [1, 1]} : vector<24x512xf32> to vector<24x128xf32>
    %200 = arith.negf %199 : vector<24x128xf32>
    %201 = math.exp %200 : vector<24x128xf32>
    %cst_55 = arith.constant 1.000000e+00 : f32
    %202 = vector.broadcast %cst_55 : f32 to vector<24x128xf32>
    %203 = arith.addf %202, %201 : vector<24x128xf32>
    %204 = arith.divf %202, %203 : vector<24x128xf32>
    %205 = arith.mulf %196, %166 : vector<24x128xf32>
    %206 = arith.mulf %190, %198 : vector<24x128xf32>
    %207 = arith.addf %205, %206 : vector<24x128xf32>
    %208 = math.tanh %207 : vector<24x128xf32>
    %209 = arith.mulf %204, %208 : vector<24x128xf32>
    %c4_i32 = arith.constant 4 : i32
    %210 = vector.broadcast %c4_i32 : i32 to vector<24x1xi32>
    %211 = arith.cmpi sgt, %12, %210 : vector<24x1xi32>
    %c4_i32_56 = arith.constant 4 : i32
    %212 = vector.broadcast %c4_i32_56 : i32 to vector<1x1xi32>
    %213 = arith.cmpi sgt, %14, %212 : vector<1x1xi32>
    %cst_57 = arith.constant 0.000000e+00 : f32
    %cst_58 = arith.constant 0xFF800000 : f32
    %214 = vector.broadcast %cst_57 : f32 to vector<1x1xf32>
    %215 = vector.broadcast %cst_58 : f32 to vector<1x1xf32>
    %216 = arith.select %213, %214, %215 : vector<1x1xi1>, vector<1x1xf32>
    %217 = vector.shape_cast %211 : vector<24x1xi1> to vector<24x1xi1>
    %218 = vector.broadcast %217 : vector<24x1xi1> to vector<24x128xi1>
    %219 = vector.shape_cast %216 : vector<1x1xf32> to vector<1x1xf32>
    %220 = vector.broadcast %219 : vector<1x1xf32> to vector<24x128xf32>
    %221 = arith.select %218, %209, %220 : vector<24x128xi1>, vector<24x128xf32>
    %222 = arith.maximumf %181, %221 : vector<24x128xf32>
    %223 = vector.extract_strided_slice %8 {offsets = [120, 0], sizes = [24, 512], strides = [1, 1]} : vector<168x512xf32> to vector<24x512xf32>
    %cst_59 = arith.constant dense<0.000000e+00> : vector<24x512xf32>
    %224 = tpu.matmul %209, %10, %cst_59 {dimension_numbers = #tpu.dot_dimension_numbers<[1], [1], [0], [0], [0, 0, 1, 0], [], []>} : vector<24x128xf32>, vector<512x128xf32>, vector<24x512xf32> -> vector<24x512xf32>
    %225 = arith.addf %223, %224 : vector<24x512xf32>
    %226 = vector.extract_strided_slice %225 {offsets = [0, 0], sizes = [24, 128], strides = [1, 1]} : vector<24x512xf32> to vector<24x128xf32>
    %227 = arith.negf %226 : vector<24x128xf32>
    %228 = math.exp %227 : vector<24x128xf32>
    %cst_60 = arith.constant 1.000000e+00 : f32
    %229 = vector.broadcast %cst_60 : f32 to vector<24x128xf32>
    %230 = arith.addf %229, %228 : vector<24x128xf32>
    %231 = arith.divf %229, %230 : vector<24x128xf32>
    %232 = vector.extract_strided_slice %225 {offsets = [0, 128], sizes = [24, 128], strides = [1, 1]} : vector<24x512xf32> to vector<24x128xf32>
    %233 = arith.negf %232 : vector<24x128xf32>
    %234 = math.exp %233 : vector<24x128xf32>
    %cst_61 = arith.constant 1.000000e+00 : f32
    %235 = vector.broadcast %cst_61 : f32 to vector<24x128xf32>
    %236 = arith.addf %235, %234 : vector<24x128xf32>
    %237 = arith.divf %235, %236 : vector<24x128xf32>
    %238 = vector.extract_strided_slice %225 {offsets = [0, 256], sizes = [24, 128], strides = [1, 1]} : vector<24x512xf32> to vector<24x128xf32>
    %239 = math.tanh %238 : vector<24x128xf32>
    %240 = vector.extract_strided_slice %225 {offsets = [0, 384], sizes = [24, 128], strides = [1, 1]} : vector<24x512xf32> to vector<24x128xf32>
    %241 = arith.negf %240 : vector<24x128xf32>
    %242 = math.exp %241 : vector<24x128xf32>
    %cst_62 = arith.constant 1.000000e+00 : f32
    %243 = vector.broadcast %cst_62 : f32 to vector<24x128xf32>
    %244 = arith.addf %243, %242 : vector<24x128xf32>
    %245 = arith.divf %243, %244 : vector<24x128xf32>
    %246 = arith.mulf %237, %207 : vector<24x128xf32>
    %247 = arith.mulf %231, %239 : vector<24x128xf32>
    %248 = arith.addf %246, %247 : vector<24x128xf32>
    %249 = math.tanh %248 : vector<24x128xf32>
    %250 = arith.mulf %245, %249 : vector<24x128xf32>
    %c5_i32 = arith.constant 5 : i32
    %251 = vector.broadcast %c5_i32 : i32 to vector<24x1xi32>
    %252 = arith.cmpi sgt, %12, %251 : vector<24x1xi32>
    %c5_i32_63 = arith.constant 5 : i32
    %253 = vector.broadcast %c5_i32_63 : i32 to vector<1x1xi32>
    %254 = arith.cmpi sgt, %14, %253 : vector<1x1xi32>
    %cst_64 = arith.constant 0.000000e+00 : f32
    %cst_65 = arith.constant 0xFF800000 : f32
    %255 = vector.broadcast %cst_64 : f32 to vector<1x1xf32>
    %256 = vector.broadcast %cst_65 : f32 to vector<1x1xf32>
    %257 = arith.select %254, %255, %256 : vector<1x1xi1>, vector<1x1xf32>
    %258 = vector.shape_cast %252 : vector<24x1xi1> to vector<24x1xi1>
    %259 = vector.broadcast %258 : vector<24x1xi1> to vector<24x128xi1>
    %260 = vector.shape_cast %257 : vector<1x1xf32> to vector<1x1xf32>
    %261 = vector.broadcast %260 : vector<1x1xf32> to vector<24x128xf32>
    %262 = arith.select %259, %250, %261 : vector<24x128xi1>, vector<24x128xf32>
    %263 = arith.maximumf %222, %262 : vector<24x128xf32>
    %264 = vector.extract_strided_slice %8 {offsets = [144, 0], sizes = [24, 512], strides = [1, 1]} : vector<168x512xf32> to vector<24x512xf32>
    %cst_66 = arith.constant dense<0.000000e+00> : vector<24x512xf32>
    %265 = tpu.matmul %250, %10, %cst_66 {dimension_numbers = #tpu.dot_dimension_numbers<[1], [1], [0], [0], [0, 0, 1, 0], [], []>} : vector<24x128xf32>, vector<512x128xf32>, vector<24x512xf32> -> vector<24x512xf32>
    %266 = arith.addf %264, %265 : vector<24x512xf32>
    %267 = vector.extract_strided_slice %266 {offsets = [0, 0], sizes = [24, 128], strides = [1, 1]} : vector<24x512xf32> to vector<24x128xf32>
    %268 = arith.negf %267 : vector<24x128xf32>
    %269 = math.exp %268 : vector<24x128xf32>
    %cst_67 = arith.constant 1.000000e+00 : f32
    %270 = vector.broadcast %cst_67 : f32 to vector<24x128xf32>
    %271 = arith.addf %270, %269 : vector<24x128xf32>
    %272 = arith.divf %270, %271 : vector<24x128xf32>
    %273 = vector.extract_strided_slice %266 {offsets = [0, 128], sizes = [24, 128], strides = [1, 1]} : vector<24x512xf32> to vector<24x128xf32>
    %274 = arith.negf %273 : vector<24x128xf32>
    %275 = math.exp %274 : vector<24x128xf32>
    %cst_68 = arith.constant 1.000000e+00 : f32
    %276 = vector.broadcast %cst_68 : f32 to vector<24x128xf32>
    %277 = arith.addf %276, %275 : vector<24x128xf32>
    %278 = arith.divf %276, %277 : vector<24x128xf32>
    %279 = vector.extract_strided_slice %266 {offsets = [0, 256], sizes = [24, 128], strides = [1, 1]} : vector<24x512xf32> to vector<24x128xf32>
    %280 = math.tanh %279 : vector<24x128xf32>
    %281 = vector.extract_strided_slice %266 {offsets = [0, 384], sizes = [24, 128], strides = [1, 1]} : vector<24x512xf32> to vector<24x128xf32>
    %282 = arith.negf %281 : vector<24x128xf32>
    %283 = math.exp %282 : vector<24x128xf32>
    %cst_69 = arith.constant 1.000000e+00 : f32
    %284 = vector.broadcast %cst_69 : f32 to vector<24x128xf32>
    %285 = arith.addf %284, %283 : vector<24x128xf32>
    %286 = arith.divf %284, %285 : vector<24x128xf32>
    %287 = arith.mulf %278, %248 : vector<24x128xf32>
    %288 = arith.mulf %272, %280 : vector<24x128xf32>
    %289 = arith.addf %287, %288 : vector<24x128xf32>
    %290 = math.tanh %289 : vector<24x128xf32>
    %291 = arith.mulf %286, %290 : vector<24x128xf32>
    %c6_i32 = arith.constant 6 : i32
    %292 = vector.broadcast %c6_i32 : i32 to vector<24x1xi32>
    %293 = arith.cmpi sgt, %12, %292 : vector<24x1xi32>
    %c6_i32_70 = arith.constant 6 : i32
    %294 = vector.broadcast %c6_i32_70 : i32 to vector<1x1xi32>
    %295 = arith.cmpi sgt, %14, %294 : vector<1x1xi32>
    %cst_71 = arith.constant 0.000000e+00 : f32
    %cst_72 = arith.constant 0xFF800000 : f32
    %296 = vector.broadcast %cst_71 : f32 to vector<1x1xf32>
    %297 = vector.broadcast %cst_72 : f32 to vector<1x1xf32>
    %298 = arith.select %295, %296, %297 : vector<1x1xi1>, vector<1x1xf32>
    %299 = vector.shape_cast %293 : vector<24x1xi1> to vector<24x1xi1>
    %300 = vector.broadcast %299 : vector<24x1xi1> to vector<24x128xi1>
    %301 = vector.shape_cast %298 : vector<1x1xf32> to vector<1x1xf32>
    %302 = vector.broadcast %301 : vector<1x1xf32> to vector<24x128xf32>
    %303 = arith.select %300, %291, %302 : vector<24x128xi1>, vector<24x128xf32>
    %304 = arith.maximumf %263, %303 : vector<24x128xf32>
    %c0_i32_73 = arith.constant 0 : i32
    %305 = arith.cmpi eq, %arg1, %c0_i32_73 : i32
    %306 = arith.extui %305 : i1 to i32
    %c0_i32_74 = arith.constant 0 : i32
    %307 = arith.cmpi ne, %306, %c0_i32_74 : i32
    scf.if %307 {
      %311 = vector.extract_strided_slice %304 {offsets = [0, 0], sizes = [24, 16], strides = [1, 1]} : vector<24x128xf32> to vector<24x16xf32>
      %c0_77 = arith.constant 0 : index
      %c0_78 = arith.constant 0 : index
      %c0_79 = arith.constant 0 : index
      %312 = vector.load %arg8[%c0_77, %c0_78, %c0_79] : memref<1x24x32xf32, #tpu.memory_space<vmem>>, vector<1x24x16xf32>
      %313 = vector.shape_cast %312 : vector<1x24x16xf32> to vector<24x16xf32>
      %314 = vector.shape_cast %311 : vector<24x16xf32> to vector<1x24x16xf32>
      tpu.vector_store %arg8[%c0_77, %c0_78, %c0_79], %314 {strides = array<i32>} : memref<1x24x32xf32, #tpu.memory_space<vmem>>, vector<1x24x16xf32>,
    } else {
    }
    %c1_i32_75 = arith.constant 1 : i32
    %308 = arith.cmpi eq, %arg1, %c1_i32_75 : i32
    %309 = arith.extui %308 : i1 to i32
    %c0_i32_76 = arith.constant 0 : i32
    %310 = arith.cmpi ne, %309, %c0_i32_76 : i32
    scf.if %310 {
      %311 = vector.extract_strided_slice %304 {offsets = [0, 0], sizes = [24, 16], strides = [1, 1]} : vector<24x128xf32> to vector<24x16xf32>
      %c0_77 = arith.constant 0 : index
      %c0_78 = arith.constant 0 : index
      %c16 = arith.constant 16 : index
      %312 = vector.load %arg8[%c0_77, %c0_78, %c16] : memref<1x24x32xf32, #tpu.memory_space<vmem>>, vector<1x24x16xf32>
      %313 = vector.shape_cast %312 : vector<1x24x16xf32> to vector<24x16xf32>
      %314 = vector.shape_cast %311 : vector<24x16xf32> to vector<1x24x16xf32>
      tpu.vector_store %arg8[%c0_77, %c0_78, %c16], %314 {strides = array<i32>} : memref<1x24x32xf32, #tpu.memory_space<vmem>>, vector<1x24x16xf32>,
    } else {
    }
    return
  }
  func.func @transform_0(%arg0: i32, %arg1: i32) -> (i32, i32, i32, i32) {
    %c0_i32 = arith.constant 0 : i32
    %c0_i32_0 = arith.constant 0 : i32
    %c0_i32_1 = arith.constant 0 : i32
    return %arg0, %arg1, %c0_i32, %c0_i32_0 : i32, i32, i32, i32
  }
  func.func @transform_1(%arg0: i32, %arg1: i32) -> (i32, i32, i32) {
    %c0_i32 = arith.constant 0 : i32
    %c0_i32_0 = arith.constant 0 : i32
    %c0_i32_1 = arith.constant 0 : i32
    return %arg0, %c0_i32, %c0_i32_0 : i32, i32, i32
  }
  func.func @transform_2(%arg0: i32, %arg1: i32) -> (i32, i32, i32) {
    %c0_i32 = arith.constant 0 : i32
    %c0_i32_0 = arith.constant 0 : i32
    %c0_i32_1 = arith.constant 0 : i32
    return %arg0, %c0_i32, %c0_i32_0 : i32, i32, i32
  }
  func.func @transform_3(%arg0: i32, %arg1: i32) -> (i32, i32, i32, i32) {
    %c0_i32 = arith.constant 0 : i32
    %c0_i32_0 = arith.constant 0 : i32
    %c0_i32_1 = arith.constant 0 : i32
    return %arg0, %arg1, %c0_i32, %c0_i32_0 : i32, i32, i32, i32
  }
  func.func @transform_4(%arg0: i32, %arg1: i32) -> (i32, i32, i32, i32) {
    %c0_i32 = arith.constant 0 : i32
    %c0_i32_0 = arith.constant 0 : i32
    %c0_i32_1 = arith.constant 0 : i32
    return %arg0, %arg1, %c0_i32, %c0_i32_0 : i32, i32, i32, i32
  }
  func.func @transform_5(%arg0: i32, %arg1: i32) -> (i32, i32, i32, i32) {
    %c0_i32 = arith.constant 0 : i32
    %c0_i32_0 = arith.constant 0 : i32
    %c0_i32_1 = arith.constant 0 : i32
    return %arg0, %arg1, %c0_i32, %c0_i32_0 : i32, i32, i32, i32
  }
  func.func @transform_6(%arg0: i32, %arg1: i32) -> (i32, i32, i32) {
    %c0_i32 = arith.constant 0 : i32
    %c0_i32_0 = arith.constant 0 : i32
    %c0_i32_1 = arith.constant 0 : i32
    return %arg0, %c0_i32, %c0_i32_0 : i32, i32, i32
  }
}

module attributes {stable_mosaic.version = 11 : i64} {
  func.func @kernel(%arg0: i32, %arg1: memref<24x32xf32, #tpu.memory_space<vmem>>, %arg2: memref<3x8x3x32xf32, #tpu.memory_space<vmem>>, %arg3: memref<3x8x3xf32, #tpu.memory_space<vmem>>, %arg4: memref<512x32xf32, #tpu.memory_space<vmem>>, %arg5: memref<512x128xf32, #tpu.memory_space<vmem>>, %arg6: memref<1x512xf32, #tpu.memory_space<vmem>>, %arg7: memref<32x32xf32, #tpu.memory_space<vmem>>, %arg8: memref<32x128xf32, #tpu.memory_space<vmem>>, %arg9: memref<1x32xf32, #tpu.memory_space<vmem>>, %arg10: memref<80x16xf32, #tpu.memory_space<vmem>>, %arg11: memref<5x16x1xi32, #tpu.memory_space<vmem>>, %arg12: memref<16x1xi32, #tpu.memory_space<vmem>>, %arg13: memref<512x16xf32, #tpu.memory_space<vmem>>, %arg14: memref<512x128xf32, #tpu.memory_space<vmem>>, %arg15: memref<1x512xf32, #tpu.memory_space<vmem>>, %arg16: memref<50x128xf32, #tpu.memory_space<vmem>>, %arg17: memref<1x50xf32, #tpu.memory_space<vmem>>, %arg18: memref<1x1xf32, #tpu.memory_space<vmem>>, %arg19: memref<1x1xf32, #tpu.memory_space<vmem>>, %arg20: memref<16x128xf32, #tpu.memory_space<vmem>>, %arg21: memref<16x128xf32, #tpu.memory_space<vmem>>) attributes {dimension_semantics = [#tpu.dimension_semantics<arbitrary>], iteration_bounds = array<i64: 1>, scalar_prefetch = 0 : i64, scratch_operands = 2 : i64, tpu.core_type = #tpu.core_type<tc>, window_params = [{pipeline_mode = #tpu.pipeline_mode<synchronous>, transform_indices = @transform_0, window_bounds = array<i64: 24, 32>}, {pipeline_mode = #tpu.pipeline_mode<synchronous>, transform_indices = @transform_1, window_bounds = array<i64: 3, 8, 3, 32>}, {pipeline_mode = #tpu.pipeline_mode<synchronous>, transform_indices = @transform_2, window_bounds = array<i64: 3, 8, 3>}, {pipeline_mode = #tpu.pipeline_mode<synchronous>, transform_indices = @transform_3, window_bounds = array<i64: 512, 32>}, {pipeline_mode = #tpu.pipeline_mode<synchronous>, transform_indices = @transform_4, window_bounds = array<i64: 512, 128>}, {pipeline_mode = #tpu.pipeline_mode<synchronous>, transform_indices = @transform_5, window_bounds = array<i64: 1, 512>}, {pipeline_mode = #tpu.pipeline_mode<synchronous>, transform_indices = @transform_6, window_bounds = array<i64: 32, 32>}, {pipeline_mode = #tpu.pipeline_mode<synchronous>, transform_indices = @transform_7, window_bounds = array<i64: 32, 128>}, {pipeline_mode = #tpu.pipeline_mode<synchronous>, transform_indices = @transform_8, window_bounds = array<i64: 1, 32>}, {pipeline_mode = #tpu.pipeline_mode<synchronous>, transform_indices = @transform_9, window_bounds = array<i64: 80, 16>}, {pipeline_mode = #tpu.pipeline_mode<synchronous>, transform_indices = @transform_10, window_bounds = array<i64: 5, 16, 1>}, {pipeline_mode = #tpu.pipeline_mode<synchronous>, transform_indices = @transform_11, window_bounds = array<i64: 16, 1>}, {pipeline_mode = #tpu.pipeline_mode<synchronous>, transform_indices = @transform_12, window_bounds = array<i64: 512, 16>}, {pipeline_mode = #tpu.pipeline_mode<synchronous>, transform_indices = @transform_13, window_bounds = array<i64: 512, 128>}, {pipeline_mode = #tpu.pipeline_mode<synchronous>, transform_indices = @transform_14, window_bounds = array<i64: 1, 512>}, {pipeline_mode = #tpu.pipeline_mode<synchronous>, transform_indices = @transform_15, window_bounds = array<i64: 50, 128>}, {pipeline_mode = #tpu.pipeline_mode<synchronous>, transform_indices = @transform_16, window_bounds = array<i64: 1, 50>}, {pipeline_mode = #tpu.pipeline_mode<synchronous>, transform_indices = @transform_17, window_bounds = array<i64: 1, 1>}, {pipeline_mode = #tpu.pipeline_mode<synchronous>, transform_indices = @transform_18, window_bounds = array<i64: 1, 1>}]} {
    %c0 = arith.constant 0 : index
    %c0_0 = arith.constant 0 : index
    %0 = vector.load %arg1[%c0, %c0_0] : memref<24x32xf32, #tpu.memory_space<vmem>>, vector<24x32xf32>
    %c0_1 = arith.constant 0 : index
    %c0_2 = arith.constant 0 : index
    %1 = vector.load %arg4[%c0_1, %c0_2] : memref<512x32xf32, #tpu.memory_space<vmem>>, vector<512x32xf32>
    %cst = arith.constant dense<0.000000e+00> : vector<24x512xf32>
    %2 = tpu.matmul %0, %1, %cst {dimension_numbers = #tpu.dot_dimension_numbers<[1], [1], [0], [0], [0, 0, 1, 0], [], []>} : vector<24x32xf32>, vector<512x32xf32>, vector<24x512xf32> -> vector<24x512xf32>
    %c0_3 = arith.constant 0 : index
    %c0_4 = arith.constant 0 : index
    %3 = vector.load %arg6[%c0_3, %c0_4] : memref<1x512xf32, #tpu.memory_space<vmem>>, vector<1x512xf32>
    %4 = vector.broadcast %3 : vector<1x512xf32> to vector<24x512xf32>
    %5 = arith.addf %2, %4 : vector<24x512xf32>
    %c0_5 = arith.constant 0 : index
    %c0_6 = arith.constant 0 : index
    %6 = vector.load %arg1[%c0_5, %c0_6] : memref<24x32xf32, #tpu.memory_space<vmem>>, vector<24x32xf32>
    %c0_7 = arith.constant 0 : index
    %c0_8 = arith.constant 0 : index
    %7 = vector.load %arg7[%c0_7, %c0_8] : memref<32x32xf32, #tpu.memory_space<vmem>>, vector<32x32xf32>
    %cst_9 = arith.constant dense<0.000000e+00> : vector<24x32xf32>
    %8 = tpu.matmul %6, %7, %cst_9 {dimension_numbers = #tpu.dot_dimension_numbers<[1], [1], [0], [0], [0, 0, 1, 0], [], []>} : vector<24x32xf32>, vector<32x32xf32>, vector<24x32xf32> -> vector<24x32xf32>
    %c0_10 = arith.constant 0 : index
    %c0_11 = arith.constant 0 : index
    %9 = vector.load %arg9[%c0_10, %c0_11] : memref<1x32xf32, #tpu.memory_space<vmem>>, vector<1x32xf32>
    %10 = vector.broadcast %9 : vector<1x32xf32> to vector<24x32xf32>
    %11 = arith.addf %8, %10 : vector<24x32xf32>
    %c0_12 = arith.constant 0 : index
    %c0_13 = arith.constant 0 : index
    %12 = vector.load %arg10[%c0_12, %c0_13] : memref<80x16xf32, #tpu.memory_space<vmem>>, vector<80x16xf32>
    %c0_14 = arith.constant 0 : index
    %c0_15 = arith.constant 0 : index
    %13 = vector.load %arg13[%c0_14, %c0_15] : memref<512x16xf32, #tpu.memory_space<vmem>>, vector<512x16xf32>
    %cst_16 = arith.constant dense<0.000000e+00> : vector<80x512xf32>
    %14 = tpu.matmul %12, %13, %cst_16 {dimension_numbers = #tpu.dot_dimension_numbers<[1], [1], [0], [0], [0, 0, 1, 0], [], []>} : vector<80x16xf32>, vector<512x16xf32>, vector<80x512xf32> -> vector<80x512xf32>
    %c0_17 = arith.constant 0 : index
    %c0_18 = arith.constant 0 : index
    %15 = vector.load %arg15[%c0_17, %c0_18] : memref<1x512xf32, #tpu.memory_space<vmem>>, vector<1x512xf32>
    %16 = vector.broadcast %15 : vector<1x512xf32> to vector<80x512xf32>
    %17 = arith.addf %14, %16 : vector<80x512xf32>
    %c0_19 = arith.constant 0 : index
    %c0_20 = arith.constant 0 : index
    %18 = vector.load %arg5[%c0_19, %c0_20] : memref<512x128xf32, #tpu.memory_space<vmem>>, vector<512x128xf32>
    %c0_21 = arith.constant 0 : index
    %c0_22 = arith.constant 0 : index
    %19 = vector.load %arg8[%c0_21, %c0_22] : memref<32x128xf32, #tpu.memory_space<vmem>>, vector<32x128xf32>
    %c0_23 = arith.constant 0 : index
    %c0_24 = arith.constant 0 : index
    %20 = vector.load %arg14[%c0_23, %c0_24] : memref<512x128xf32, #tpu.memory_space<vmem>>, vector<512x128xf32>
    %c0_25 = arith.constant 0 : index
    %c0_26 = arith.constant 0 : index
    %21 = vector.load %arg16[%c0_25, %c0_26] : memref<50x128xf32, #tpu.memory_space<vmem>>, vector<50x128xf32>
    %c0_27 = arith.constant 0 : index
    %c0_28 = arith.constant 0 : index
    %22 = vector.load %arg17[%c0_27, %c0_28] : memref<1x50xf32, #tpu.memory_space<vmem>>, vector<1x50xf32>
    %23 = tpu.iota {dimensions = array<i32: 0>} : vector<8x1xi32>
    %c2_i32 = arith.constant 2 : i32
    %24 = vector.broadcast %c2_i32 : i32 to vector<8x1xi32>
    %25 = arith.cmpi slt, %23, %24 : vector<8x1xi32>
    %26 = arith.extui %25 : vector<8x1xi1> to vector<8x1xi32>
    %27 = arith.sitofp %26 : vector<8x1xi32> to vector<8x1xf32>
    %cst_29 = arith.constant 0.000000e+00 : f32
    %28 = vector.broadcast %cst_29 : f32 to vector<8x128xf32>
    %cst_30 = arith.constant 0.000000e+00 : f32
    %29 = vector.broadcast %cst_30 : f32 to vector<8x128xf32>
    %cst_31 = arith.constant 0.000000e+00 : f32
    %30 = vector.broadcast %cst_31 : f32 to vector<1x1xf32>
    %31 = vector.extract_strided_slice %11 {offsets = [0, 0], sizes = [8, 32], strides = [1, 1]} : vector<24x32xf32> to vector<8x32xf32>
    %cst_32 = arith.constant dense<0.000000e+00> : vector<8x32xf32>
    %32 = tpu.matmul %28, %19, %cst_32 {dimension_numbers = #tpu.dot_dimension_numbers<[1], [1], [0], [0], [0, 0, 1, 0], [], []>} : vector<8x128xf32>, vector<32x128xf32>, vector<8x32xf32> -> vector<8x32xf32>
    %33 = arith.addf %31, %32 : vector<8x32xf32>
    %34 = math.tanh %33 : vector<8x32xf32>
    %c0_33 = arith.constant 0 : index
    %c0_34 = arith.constant 0 : index
    %c0_35 = arith.constant 0 : index
    %c0_36 = arith.constant 0 : index
    %35 = vector.load %arg2[%c0_33, %c0_34, %c0_35, %c0_36] : memref<3x8x3x32xf32, #tpu.memory_space<vmem>>, vector<1x8x3x32xf32>
    %36 = vector.shape_cast %35 : vector<1x8x3x32xf32> to vector<8x3x32xf32>
    %c0_37 = arith.constant 0 : index
    %c0_38 = arith.constant 0 : index
    %c0_39 = arith.constant 0 : index
    %37 = vector.load %arg3[%c0_37, %c0_38, %c0_39] : memref<3x8x3xf32, #tpu.memory_space<vmem>>, vector<1x8x3xf32>
    %38 = vector.shape_cast %37 : vector<1x8x3xf32> to vector<8x3xf32>
    %39 = vector.shape_cast %34 : vector<8x32xf32> to vector<8x1x32xf32>
    %40 = vector.broadcast %39 : vector<8x1x32xf32> to vector<8x3x32xf32>
    %41 = arith.mulf %40, %36 : vector<8x3x32xf32>
    %cst_40 = arith.constant dense<0.000000e+00> : vector<8x3xf32>
    %42 = vector.multi_reduction <add>, %41, %cst_40 [2] : vector<8x3x32xf32> to vector<8x3xf32>
    %cst_41 = arith.constant 0.000000e+00 : f32
    %43 = vector.broadcast %cst_41 : f32 to vector<8x3xf32>
    %44 = arith.maximumf %42, %43 : vector<8x3xf32>
    %45 = arith.mulf %42, %38 : vector<8x3xf32>
    %46 = arith.subf %44, %45 : vector<8x3xf32>
    %47 = math.absf %42 : vector<8x3xf32>
    %cst_42 = arith.constant 0.000000e+00 : f32
    %48 = vector.broadcast %cst_42 : f32 to vector<8x3xf32>
    %49 = arith.subf %48, %47 : vector<8x3xf32>
    %50 = math.exp %49 : vector<8x3xf32>
    %cst_43 = arith.constant 1.000000e+00 : f32
    %51 = vector.broadcast %cst_43 : f32 to vector<8x3xf32>
    %52 = arith.addf %51, %50 : vector<8x3xf32>
    %53 = math.log %52 : vector<8x3xf32>
    %54 = arith.addf %46, %53 : vector<8x3xf32>
    %55 = vector.broadcast %27 : vector<8x1xf32> to vector<8x3xf32>
    %56 = arith.mulf %54, %55 : vector<8x3xf32>
    %57 = vector.shape_cast %56 : vector<8x3xf32> to vector<1x8x3xf32>
    %cst_44 = arith.constant dense<0.000000e+00> : vector<1xf32>
    %58 = vector.multi_reduction <add>, %57, %cst_44 [1, 2] : vector<1x8x3xf32> to vector<1xf32>
    %59 = vector.shape_cast %58 : vector<1xf32> to vector<1x1x1xf32>
    %60 = vector.extract %59[0, 0, 0] : f32 from vector<1x1x1xf32>
    %61 = vector.broadcast %60 : f32 to vector<1x1xf32>
    %62 = arith.addf %30, %61 : vector<1x1xf32>
    %63 = vector.extract_strided_slice %5 {offsets = [0, 0], sizes = [8, 512], strides = [1, 1]} : vector<24x512xf32> to vector<8x512xf32>
    %cst_45 = arith.constant dense<0.000000e+00> : vector<8x512xf32>
    %64 = tpu.matmul %28, %18, %cst_45 {dimension_numbers = #tpu.dot_dimension_numbers<[1], [1], [0], [0], [0, 0, 1, 0], [], []>} : vector<8x128xf32>, vector<512x128xf32>, vector<8x512xf32> -> vector<8x512xf32>
    %65 = arith.addf %63, %64 : vector<8x512xf32>
    %66 = vector.extract_strided_slice %65 {offsets = [0, 0], sizes = [8, 128], strides = [1, 1]} : vector<8x512xf32> to vector<8x128xf32>
    %67 = arith.negf %66 : vector<8x128xf32>
    %68 = math.exp %67 : vector<8x128xf32>
    %cst_46 = arith.constant 1.000000e+00 : f32
    %69 = vector.broadcast %cst_46 : f32 to vector<8x128xf32>
    %70 = arith.addf %69, %68 : vector<8x128xf32>
    %71 = arith.divf %69, %70 : vector<8x128xf32>
    %72 = vector.extract_strided_slice %65 {offsets = [0, 128], sizes = [8, 128], strides = [1, 1]} : vector<8x512xf32> to vector<8x128xf32>
    %73 = arith.negf %72 : vector<8x128xf32>
    %74 = math.exp %73 : vector<8x128xf32>
    %cst_47 = arith.constant 1.000000e+00 : f32
    %75 = vector.broadcast %cst_47 : f32 to vector<8x128xf32>
    %76 = arith.addf %75, %74 : vector<8x128xf32>
    %77 = arith.divf %75, %76 : vector<8x128xf32>
    %78 = vector.extract_strided_slice %65 {offsets = [0, 256], sizes = [8, 128], strides = [1, 1]} : vector<8x512xf32> to vector<8x128xf32>
    %79 = math.tanh %78 : vector<8x128xf32>
    %80 = vector.extract_strided_slice %65 {offsets = [0, 384], sizes = [8, 128], strides = [1, 1]} : vector<8x512xf32> to vector<8x128xf32>
    %81 = arith.negf %80 : vector<8x128xf32>
    %82 = math.exp %81 : vector<8x128xf32>
    %cst_48 = arith.constant 1.000000e+00 : f32
    %83 = vector.broadcast %cst_48 : f32 to vector<8x128xf32>
    %84 = arith.addf %83, %82 : vector<8x128xf32>
    %85 = arith.divf %83, %84 : vector<8x128xf32>
    %86 = arith.mulf %77, %29 : vector<8x128xf32>
    %87 = arith.mulf %71, %79 : vector<8x128xf32>
    %88 = arith.addf %86, %87 : vector<8x128xf32>
    %89 = math.tanh %88 : vector<8x128xf32>
    %90 = arith.mulf %85, %89 : vector<8x128xf32>
    %c0_49 = arith.constant 0 : index
    %c0_50 = arith.constant 0 : index
    %91 = vector.load %arg20[%c0_49, %c0_50] : memref<16x128xf32, #tpu.memory_space<vmem>>, vector<8x128xf32>
    tpu.vector_store %arg20[%c0_49, %c0_50], %90 {strides = array<i32>} : memref<16x128xf32, #tpu.memory_space<vmem>>, vector<8x128xf32>,
    %c0_51 = arith.constant 0 : index
    %c0_52 = arith.constant 0 : index
    %92 = vector.load %arg21[%c0_51, %c0_52] : memref<16x128xf32, #tpu.memory_space<vmem>>, vector<8x128xf32>
    tpu.vector_store %arg21[%c0_51, %c0_52], %88 {strides = array<i32>} : memref<16x128xf32, #tpu.memory_space<vmem>>, vector<8x128xf32>,
    %93 = vector.extract_strided_slice %11 {offsets = [8, 0], sizes = [8, 32], strides = [1, 1]} : vector<24x32xf32> to vector<8x32xf32>
    %cst_53 = arith.constant dense<0.000000e+00> : vector<8x32xf32>
    %94 = tpu.matmul %90, %19, %cst_53 {dimension_numbers = #tpu.dot_dimension_numbers<[1], [1], [0], [0], [0, 0, 1, 0], [], []>} : vector<8x128xf32>, vector<32x128xf32>, vector<8x32xf32> -> vector<8x32xf32>
    %95 = arith.addf %93, %94 : vector<8x32xf32>
    %96 = math.tanh %95 : vector<8x32xf32>
    %c1 = arith.constant 1 : index
    %c0_54 = arith.constant 0 : index
    %c0_55 = arith.constant 0 : index
    %c0_56 = arith.constant 0 : index
    %97 = vector.load %arg2[%c1, %c0_54, %c0_55, %c0_56] : memref<3x8x3x32xf32, #tpu.memory_space<vmem>>, vector<1x8x3x32xf32>
    %98 = vector.shape_cast %97 : vector<1x8x3x32xf32> to vector<8x3x32xf32>
    %c1_57 = arith.constant 1 : index
    %c0_58 = arith.constant 0 : index
    %c0_59 = arith.constant 0 : index
    %99 = vector.load %arg3[%c1_57, %c0_58, %c0_59] : memref<3x8x3xf32, #tpu.memory_space<vmem>>, vector<1x8x3xf32>
    %100 = vector.shape_cast %99 : vector<1x8x3xf32> to vector<8x3xf32>
    %101 = vector.shape_cast %96 : vector<8x32xf32> to vector<8x1x32xf32>
    %102 = vector.broadcast %101 : vector<8x1x32xf32> to vector<8x3x32xf32>
    %103 = arith.mulf %102, %98 : vector<8x3x32xf32>
    %cst_60 = arith.constant dense<0.000000e+00> : vector<8x3xf32>
    %104 = vector.multi_reduction <add>, %103, %cst_60 [2] : vector<8x3x32xf32> to vector<8x3xf32>
    %cst_61 = arith.constant 0.000000e+00 : f32
    %105 = vector.broadcast %cst_61 : f32 to vector<8x3xf32>
    %106 = arith.maximumf %104, %105 : vector<8x3xf32>
    %107 = arith.mulf %104, %100 : vector<8x3xf32>
    %108 = arith.subf %106, %107 : vector<8x3xf32>
    %109 = math.absf %104 : vector<8x3xf32>
    %cst_62 = arith.constant 0.000000e+00 : f32
    %110 = vector.broadcast %cst_62 : f32 to vector<8x3xf32>
    %111 = arith.subf %110, %109 : vector<8x3xf32>
    %112 = math.exp %111 : vector<8x3xf32>
    %cst_63 = arith.constant 1.000000e+00 : f32
    %113 = vector.broadcast %cst_63 : f32 to vector<8x3xf32>
    %114 = arith.addf %113, %112 : vector<8x3xf32>
    %115 = math.log %114 : vector<8x3xf32>
    %116 = arith.addf %108, %115 : vector<8x3xf32>
    %117 = vector.broadcast %27 : vector<8x1xf32> to vector<8x3xf32>
    %118 = arith.mulf %116, %117 : vector<8x3xf32>
    %119 = vector.shape_cast %118 : vector<8x3xf32> to vector<1x8x3xf32>
    %cst_64 = arith.constant dense<0.000000e+00> : vector<1xf32>
    %120 = vector.multi_reduction <add>, %119, %cst_64 [1, 2] : vector<1x8x3xf32> to vector<1xf32>
    %121 = vector.shape_cast %120 : vector<1xf32> to vector<1x1x1xf32>
    %122 = vector.extract %121[0, 0, 0] : f32 from vector<1x1x1xf32>
    %123 = vector.broadcast %122 : f32 to vector<1x1xf32>
    %124 = arith.addf %62, %123 : vector<1x1xf32>
    %125 = vector.extract_strided_slice %5 {offsets = [8, 0], sizes = [8, 512], strides = [1, 1]} : vector<24x512xf32> to vector<8x512xf32>
    %cst_65 = arith.constant dense<0.000000e+00> : vector<8x512xf32>
    %126 = tpu.matmul %90, %18, %cst_65 {dimension_numbers = #tpu.dot_dimension_numbers<[1], [1], [0], [0], [0, 0, 1, 0], [], []>} : vector<8x128xf32>, vector<512x128xf32>, vector<8x512xf32> -> vector<8x512xf32>
    %127 = arith.addf %125, %126 : vector<8x512xf32>
    %128 = vector.extract_strided_slice %127 {offsets = [0, 0], sizes = [8, 128], strides = [1, 1]} : vector<8x512xf32> to vector<8x128xf32>
    %129 = arith.negf %128 : vector<8x128xf32>
    %130 = math.exp %129 : vector<8x128xf32>
    %cst_66 = arith.constant 1.000000e+00 : f32
    %131 = vector.broadcast %cst_66 : f32 to vector<8x128xf32>
    %132 = arith.addf %131, %130 : vector<8x128xf32>
    %133 = arith.divf %131, %132 : vector<8x128xf32>
    %134 = vector.extract_strided_slice %127 {offsets = [0, 128], sizes = [8, 128], strides = [1, 1]} : vector<8x512xf32> to vector<8x128xf32>
    %135 = arith.negf %134 : vector<8x128xf32>
    %136 = math.exp %135 : vector<8x128xf32>
    %cst_67 = arith.constant 1.000000e+00 : f32
    %137 = vector.broadcast %cst_67 : f32 to vector<8x128xf32>
    %138 = arith.addf %137, %136 : vector<8x128xf32>
    %139 = arith.divf %137, %138 : vector<8x128xf32>
    %140 = vector.extract_strided_slice %127 {offsets = [0, 256], sizes = [8, 128], strides = [1, 1]} : vector<8x512xf32> to vector<8x128xf32>
    %141 = math.tanh %140 : vector<8x128xf32>
    %142 = vector.extract_strided_slice %127 {offsets = [0, 384], sizes = [8, 128], strides = [1, 1]} : vector<8x512xf32> to vector<8x128xf32>
    %143 = arith.negf %142 : vector<8x128xf32>
    %144 = math.exp %143 : vector<8x128xf32>
    %cst_68 = arith.constant 1.000000e+00 : f32
    %145 = vector.broadcast %cst_68 : f32 to vector<8x128xf32>
    %146 = arith.addf %145, %144 : vector<8x128xf32>
    %147 = arith.divf %145, %146 : vector<8x128xf32>
    %148 = arith.mulf %139, %88 : vector<8x128xf32>
    %149 = arith.mulf %133, %141 : vector<8x128xf32>
    %150 = arith.addf %148, %149 : vector<8x128xf32>
    %151 = math.tanh %150 : vector<8x128xf32>
    %152 = arith.mulf %147, %151 : vector<8x128xf32>
    %c8 = arith.constant 8 : index
    %c0_69 = arith.constant 0 : index
    %153 = vector.load %arg20[%c8, %c0_69] : memref<16x128xf32, #tpu.memory_space<vmem>>, vector<8x128xf32>
    tpu.vector_store %arg20[%c8, %c0_69], %152 {strides = array<i32>} : memref<16x128xf32, #tpu.memory_space<vmem>>, vector<8x128xf32>,
    %c8_70 = arith.constant 8 : index
    %c0_71 = arith.constant 0 : index
    %154 = vector.load %arg21[%c8_70, %c0_71] : memref<16x128xf32, #tpu.memory_space<vmem>>, vector<8x128xf32>
    tpu.vector_store %arg21[%c8_70, %c0_71], %150 {strides = array<i32>} : memref<16x128xf32, #tpu.memory_space<vmem>>, vector<8x128xf32>,
    %155 = vector.extract_strided_slice %11 {offsets = [16, 0], sizes = [8, 32], strides = [1, 1]} : vector<24x32xf32> to vector<8x32xf32>
    %cst_72 = arith.constant dense<0.000000e+00> : vector<8x32xf32>
    %156 = tpu.matmul %152, %19, %cst_72 {dimension_numbers = #tpu.dot_dimension_numbers<[1], [1], [0], [0], [0, 0, 1, 0], [], []>} : vector<8x128xf32>, vector<32x128xf32>, vector<8x32xf32> -> vector<8x32xf32>
    %157 = arith.addf %155, %156 : vector<8x32xf32>
    %158 = math.tanh %157 : vector<8x32xf32>
    %c2 = arith.constant 2 : index
    %c0_73 = arith.constant 0 : index
    %c0_74 = arith.constant 0 : index
    %c0_75 = arith.constant 0 : index
    %159 = vector.load %arg2[%c2, %c0_73, %c0_74, %c0_75] : memref<3x8x3x32xf32, #tpu.memory_space<vmem>>, vector<1x8x3x32xf32>
    %160 = vector.shape_cast %159 : vector<1x8x3x32xf32> to vector<8x3x32xf32>
    %c2_76 = arith.constant 2 : index
    %c0_77 = arith.constant 0 : index
    %c0_78 = arith.constant 0 : index
    %161 = vector.load %arg3[%c2_76, %c0_77, %c0_78] : memref<3x8x3xf32, #tpu.memory_space<vmem>>, vector<1x8x3xf32>
    %162 = vector.shape_cast %161 : vector<1x8x3xf32> to vector<8x3xf32>
    %163 = vector.shape_cast %158 : vector<8x32xf32> to vector<8x1x32xf32>
    %164 = vector.broadcast %163 : vector<8x1x32xf32> to vector<8x3x32xf32>
    %165 = arith.mulf %164, %160 : vector<8x3x32xf32>
    %cst_79 = arith.constant dense<0.000000e+00> : vector<8x3xf32>
    %166 = vector.multi_reduction <add>, %165, %cst_79 [2] : vector<8x3x32xf32> to vector<8x3xf32>
    %cst_80 = arith.constant 0.000000e+00 : f32
    %167 = vector.broadcast %cst_80 : f32 to vector<8x3xf32>
    %168 = arith.maximumf %166, %167 : vector<8x3xf32>
    %169 = arith.mulf %166, %162 : vector<8x3xf32>
    %170 = arith.subf %168, %169 : vector<8x3xf32>
    %171 = math.absf %166 : vector<8x3xf32>
    %cst_81 = arith.constant 0.000000e+00 : f32
    %172 = vector.broadcast %cst_81 : f32 to vector<8x3xf32>
    %173 = arith.subf %172, %171 : vector<8x3xf32>
    %174 = math.exp %173 : vector<8x3xf32>
    %cst_82 = arith.constant 1.000000e+00 : f32
    %175 = vector.broadcast %cst_82 : f32 to vector<8x3xf32>
    %176 = arith.addf %175, %174 : vector<8x3xf32>
    %177 = math.log %176 : vector<8x3xf32>
    %178 = arith.addf %170, %177 : vector<8x3xf32>
    %179 = vector.broadcast %27 : vector<8x1xf32> to vector<8x3xf32>
    %180 = arith.mulf %178, %179 : vector<8x3xf32>
    %181 = vector.shape_cast %180 : vector<8x3xf32> to vector<1x8x3xf32>
    %cst_83 = arith.constant dense<0.000000e+00> : vector<1xf32>
    %182 = vector.multi_reduction <add>, %181, %cst_83 [1, 2] : vector<1x8x3xf32> to vector<1xf32>
    %183 = vector.shape_cast %182 : vector<1xf32> to vector<1x1x1xf32>
    %184 = vector.extract %183[0, 0, 0] : f32 from vector<1x1x1xf32>
    %185 = vector.broadcast %184 : f32 to vector<1x1xf32>
    %186 = arith.addf %124, %185 : vector<1x1xf32>
    %cst_84 = arith.constant 0.055555556 : f32
    %187 = vector.broadcast %cst_84 : f32 to vector<1x1xf32>
    %188 = arith.mulf %186, %187 : vector<1x1xf32>
    %c0_85 = arith.constant 0 : index
    %c0_86 = arith.constant 0 : index
    %189 = vector.load %arg18[%c0_85, %c0_86] : memref<1x1xf32, #tpu.memory_space<vmem>>, vector<1x1xf32>
    tpu.vector_store %arg18[%c0_85, %c0_86], %188 {strides = array<i32>} : memref<1x1xf32, #tpu.memory_space<vmem>>, vector<1x1xf32>,
    %c0_87 = arith.constant 0 : index
    %c0_88 = arith.constant 0 : index
    %190 = vector.load %arg20[%c0_87, %c0_88] : memref<16x128xf32, #tpu.memory_space<vmem>>, vector<16x128xf32>
    %c0_89 = arith.constant 0 : index
    %c0_90 = arith.constant 0 : index
    %191 = vector.load %arg21[%c0_89, %c0_90] : memref<16x128xf32, #tpu.memory_space<vmem>>, vector<16x128xf32>
    %c0_91 = arith.constant 0 : index
    %c0_92 = arith.constant 0 : index
    %192 = vector.load %arg12[%c0_91, %c0_92] : memref<16x1xi32, #tpu.memory_space<vmem>>, vector<16x1xi32>
    %cst_93 = arith.constant 0.000000e+00 : f32
    %193 = vector.broadcast %cst_93 : f32 to vector<1x1xf32>
    %cst_94 = arith.constant 0.000000e+00 : f32
    %194 = vector.broadcast %cst_94 : f32 to vector<1x1xf32>
    %195 = vector.extract_strided_slice %17 {offsets = [0, 0], sizes = [16, 512], strides = [1, 1]} : vector<80x512xf32> to vector<16x512xf32>
    %cst_95 = arith.constant dense<0.000000e+00> : vector<16x512xf32>
    %196 = tpu.matmul %190, %20, %cst_95 {dimension_numbers = #tpu.dot_dimension_numbers<[1], [1], [0], [0], [0, 0, 1, 0], [], []>} : vector<16x128xf32>, vector<512x128xf32>, vector<16x512xf32> -> vector<16x512xf32>
    %197 = arith.addf %195, %196 : vector<16x512xf32>
    %198 = vector.extract_strided_slice %197 {offsets = [0, 0], sizes = [16, 128], strides = [1, 1]} : vector<16x512xf32> to vector<16x128xf32>
    %199 = arith.negf %198 : vector<16x128xf32>
    %200 = math.exp %199 : vector<16x128xf32>
    %cst_96 = arith.constant 1.000000e+00 : f32
    %201 = vector.broadcast %cst_96 : f32 to vector<16x128xf32>
    %202 = arith.addf %201, %200 : vector<16x128xf32>
    %203 = arith.divf %201, %202 : vector<16x128xf32>
    %204 = vector.extract_strided_slice %197 {offsets = [0, 128], sizes = [16, 128], strides = [1, 1]} : vector<16x512xf32> to vector<16x128xf32>
    %205 = arith.negf %204 : vector<16x128xf32>
    %206 = math.exp %205 : vector<16x128xf32>
    %cst_97 = arith.constant 1.000000e+00 : f32
    %207 = vector.broadcast %cst_97 : f32 to vector<16x128xf32>
    %208 = arith.addf %207, %206 : vector<16x128xf32>
    %209 = arith.divf %207, %208 : vector<16x128xf32>
    %210 = vector.extract_strided_slice %197 {offsets = [0, 256], sizes = [16, 128], strides = [1, 1]} : vector<16x512xf32> to vector<16x128xf32>
    %211 = math.tanh %210 : vector<16x128xf32>
    %212 = vector.extract_strided_slice %197 {offsets = [0, 384], sizes = [16, 128], strides = [1, 1]} : vector<16x512xf32> to vector<16x128xf32>
    %213 = arith.negf %212 : vector<16x128xf32>
    %214 = math.exp %213 : vector<16x128xf32>
    %cst_98 = arith.constant 1.000000e+00 : f32
    %215 = vector.broadcast %cst_98 : f32 to vector<16x128xf32>
    %216 = arith.addf %215, %214 : vector<16x128xf32>
    %217 = arith.divf %215, %216 : vector<16x128xf32>
    %218 = arith.mulf %209, %191 : vector<16x128xf32>
    %219 = arith.mulf %203, %211 : vector<16x128xf32>
    %220 = arith.addf %218, %219 : vector<16x128xf32>
    %221 = math.tanh %220 : vector<16x128xf32>
    %222 = arith.mulf %217, %221 : vector<16x128xf32>
    %cst_99 = arith.constant dense<0.000000e+00> : vector<16x50xf32>
    %223 = tpu.matmul %222, %21, %cst_99 {dimension_numbers = #tpu.dot_dimension_numbers<[1], [1], [0], [0], [0, 0, 1, 0], [], []>} : vector<16x128xf32>, vector<50x128xf32>, vector<16x50xf32> -> vector<16x50xf32>
    %224 = vector.broadcast %22 : vector<1x50xf32> to vector<16x50xf32>
    %225 = arith.addf %223, %224 : vector<16x50xf32>
    %cst_100 = arith.constant dense<0xFF800000> : vector<16xf32>
    %226 = vector.multi_reduction <maximumf>, %225, %cst_100 [1] : vector<16x50xf32> to vector<16xf32>
    %227 = vector.shape_cast %226 : vector<16xf32> to vector<16x1xf32>
    %228 = vector.broadcast %227 : vector<16x1xf32> to vector<16x50xf32>
    %229 = arith.subf %225, %228 : vector<16x50xf32>
    %230 = math.exp %229 : vector<16x50xf32>
    %cst_101 = arith.constant dense<0.000000e+00> : vector<16xf32>
    %231 = vector.multi_reduction <add>, %230, %cst_101 [1] : vector<16x50xf32> to vector<16xf32>
    %232 = vector.shape_cast %231 : vector<16xf32> to vector<16x1xf32>
    %233 = math.log %232 : vector<16x1xf32>
    %234 = arith.addf %227, %233 : vector<16x1xf32>
    %235 = vector.broadcast %234 : vector<16x1xf32> to vector<16x50xf32>
    %236 = arith.subf %225, %235 : vector<16x50xf32>
    %c0_102 = arith.constant 0 : index
    %c0_103 = arith.constant 0 : index
    %c0_104 = arith.constant 0 : index
    %237 = vector.load %arg11[%c0_102, %c0_103, %c0_104] : memref<5x16x1xi32, #tpu.memory_space<vmem>>, vector<1x16x1xi32>
    %238 = vector.shape_cast %237 : vector<1x16x1xi32> to vector<16x1xi32>
    %239 = tpu.iota {dimensions = array<i32: 1>} : vector<16x50xi32>
    %240 = vector.broadcast %238 : vector<16x1xi32> to vector<16x50xi32>
    %241 = arith.cmpi eq, %239, %240 : vector<16x50xi32>
    %242 = arith.extui %241 : vector<16x50xi1> to vector<16x50xi32>
    %243 = arith.sitofp %242 : vector<16x50xi32> to vector<16x50xf32>
    %244 = arith.mulf %236, %243 : vector<16x50xf32>
    %cst_105 = arith.constant dense<0.000000e+00> : vector<16xf32>
    %245 = vector.multi_reduction <add>, %244, %cst_105 [1] : vector<16x50xf32> to vector<16xf32>
    %246 = vector.shape_cast %245 : vector<16xf32> to vector<16x1xf32>
    %cst_106 = arith.constant 0.000000e+00 : f32
    %247 = vector.broadcast %cst_106 : f32 to vector<16x1xf32>
    %248 = arith.subf %247, %246 : vector<16x1xf32>
    %c0_i32 = arith.constant 0 : i32
    %249 = vector.broadcast %c0_i32 : i32 to vector<16x1xi32>
    %250 = arith.cmpi sgt, %192, %249 : vector<16x1xi32>
    %251 = arith.extui %250 : vector<16x1xi1> to vector<16x1xi32>
    %252 = arith.sitofp %251 : vector<16x1xi32> to vector<16x1xf32>
    %253 = arith.mulf %248, %252 : vector<16x1xf32>
    %254 = vector.shape_cast %253 : vector<16x1xf32> to vector<1x16x1xf32>
    %cst_107 = arith.constant dense<0.000000e+00> : vector<1xf32>
    %255 = vector.multi_reduction <add>, %254, %cst_107 [1, 2] : vector<1x16x1xf32> to vector<1xf32>
    %256 = vector.shape_cast %255 : vector<1xf32> to vector<1x1x1xf32>
    %257 = vector.extract %256[0, 0, 0] : f32 from vector<1x1x1xf32>
    %258 = vector.broadcast %257 : f32 to vector<1x1xf32>
    %259 = arith.addf %193, %258 : vector<1x1xf32>
    %260 = vector.shape_cast %252 : vector<16x1xf32> to vector<1x16x1xf32>
    %cst_108 = arith.constant dense<0.000000e+00> : vector<1xf32>
    %261 = vector.multi_reduction <add>, %260, %cst_108 [1, 2] : vector<1x16x1xf32> to vector<1xf32>
    %262 = vector.shape_cast %261 : vector<1xf32> to vector<1x1x1xf32>
    %263 = vector.extract %262[0, 0, 0] : f32 from vector<1x1x1xf32>
    %264 = vector.broadcast %263 : f32 to vector<1x1xf32>
    %265 = arith.addf %194, %264 : vector<1x1xf32>
    %266 = vector.extract_strided_slice %17 {offsets = [16, 0], sizes = [16, 512], strides = [1, 1]} : vector<80x512xf32> to vector<16x512xf32>
    %cst_109 = arith.constant dense<0.000000e+00> : vector<16x512xf32>
    %267 = tpu.matmul %222, %20, %cst_109 {dimension_numbers = #tpu.dot_dimension_numbers<[1], [1], [0], [0], [0, 0, 1, 0], [], []>} : vector<16x128xf32>, vector<512x128xf32>, vector<16x512xf32> -> vector<16x512xf32>
    %268 = arith.addf %266, %267 : vector<16x512xf32>
    %269 = vector.extract_strided_slice %268 {offsets = [0, 0], sizes = [16, 128], strides = [1, 1]} : vector<16x512xf32> to vector<16x128xf32>
    %270 = arith.negf %269 : vector<16x128xf32>
    %271 = math.exp %270 : vector<16x128xf32>
    %cst_110 = arith.constant 1.000000e+00 : f32
    %272 = vector.broadcast %cst_110 : f32 to vector<16x128xf32>
    %273 = arith.addf %272, %271 : vector<16x128xf32>
    %274 = arith.divf %272, %273 : vector<16x128xf32>
    %275 = vector.extract_strided_slice %268 {offsets = [0, 128], sizes = [16, 128], strides = [1, 1]} : vector<16x512xf32> to vector<16x128xf32>
    %276 = arith.negf %275 : vector<16x128xf32>
    %277 = math.exp %276 : vector<16x128xf32>
    %cst_111 = arith.constant 1.000000e+00 : f32
    %278 = vector.broadcast %cst_111 : f32 to vector<16x128xf32>
    %279 = arith.addf %278, %277 : vector<16x128xf32>
    %280 = arith.divf %278, %279 : vector<16x128xf32>
    %281 = vector.extract_strided_slice %268 {offsets = [0, 256], sizes = [16, 128], strides = [1, 1]} : vector<16x512xf32> to vector<16x128xf32>
    %282 = math.tanh %281 : vector<16x128xf32>
    %283 = vector.extract_strided_slice %268 {offsets = [0, 384], sizes = [16, 128], strides = [1, 1]} : vector<16x512xf32> to vector<16x128xf32>
    %284 = arith.negf %283 : vector<16x128xf32>
    %285 = math.exp %284 : vector<16x128xf32>
    %cst_112 = arith.constant 1.000000e+00 : f32
    %286 = vector.broadcast %cst_112 : f32 to vector<16x128xf32>
    %287 = arith.addf %286, %285 : vector<16x128xf32>
    %288 = arith.divf %286, %287 : vector<16x128xf32>
    %289 = arith.mulf %280, %220 : vector<16x128xf32>
    %290 = arith.mulf %274, %282 : vector<16x128xf32>
    %291 = arith.addf %289, %290 : vector<16x128xf32>
    %292 = math.tanh %291 : vector<16x128xf32>
    %293 = arith.mulf %288, %292 : vector<16x128xf32>
    %cst_113 = arith.constant dense<0.000000e+00> : vector<16x50xf32>
    %294 = tpu.matmul %293, %21, %cst_113 {dimension_numbers = #tpu.dot_dimension_numbers<[1], [1], [0], [0], [0, 0, 1, 0], [], []>} : vector<16x128xf32>, vector<50x128xf32>, vector<16x50xf32> -> vector<16x50xf32>
    %295 = vector.broadcast %22 : vector<1x50xf32> to vector<16x50xf32>
    %296 = arith.addf %294, %295 : vector<16x50xf32>
    %cst_114 = arith.constant dense<0xFF800000> : vector<16xf32>
    %297 = vector.multi_reduction <maximumf>, %296, %cst_114 [1] : vector<16x50xf32> to vector<16xf32>
    %298 = vector.shape_cast %297 : vector<16xf32> to vector<16x1xf32>
    %299 = vector.broadcast %298 : vector<16x1xf32> to vector<16x50xf32>
    %300 = arith.subf %296, %299 : vector<16x50xf32>
    %301 = math.exp %300 : vector<16x50xf32>
    %cst_115 = arith.constant dense<0.000000e+00> : vector<16xf32>
    %302 = vector.multi_reduction <add>, %301, %cst_115 [1] : vector<16x50xf32> to vector<16xf32>
    %303 = vector.shape_cast %302 : vector<16xf32> to vector<16x1xf32>
    %304 = math.log %303 : vector<16x1xf32>
    %305 = arith.addf %298, %304 : vector<16x1xf32>
    %306 = vector.broadcast %305 : vector<16x1xf32> to vector<16x50xf32>
    %307 = arith.subf %296, %306 : vector<16x50xf32>
    %c1_116 = arith.constant 1 : index
    %c0_117 = arith.constant 0 : index
    %c0_118 = arith.constant 0 : index
    %308 = vector.load %arg11[%c1_116, %c0_117, %c0_118] : memref<5x16x1xi32, #tpu.memory_space<vmem>>, vector<1x16x1xi32>
    %309 = vector.shape_cast %308 : vector<1x16x1xi32> to vector<16x1xi32>
    %310 = tpu.iota {dimensions = array<i32: 1>} : vector<16x50xi32>
    %311 = vector.broadcast %309 : vector<16x1xi32> to vector<16x50xi32>
    %312 = arith.cmpi eq, %310, %311 : vector<16x50xi32>
    %313 = arith.extui %312 : vector<16x50xi1> to vector<16x50xi32>
    %314 = arith.sitofp %313 : vector<16x50xi32> to vector<16x50xf32>
    %315 = arith.mulf %307, %314 : vector<16x50xf32>
    %cst_119 = arith.constant dense<0.000000e+00> : vector<16xf32>
    %316 = vector.multi_reduction <add>, %315, %cst_119 [1] : vector<16x50xf32> to vector<16xf32>
    %317 = vector.shape_cast %316 : vector<16xf32> to vector<16x1xf32>
    %cst_120 = arith.constant 0.000000e+00 : f32
    %318 = vector.broadcast %cst_120 : f32 to vector<16x1xf32>
    %319 = arith.subf %318, %317 : vector<16x1xf32>
    %c1_i32 = arith.constant 1 : i32
    %320 = vector.broadcast %c1_i32 : i32 to vector<16x1xi32>
    %321 = arith.cmpi sgt, %192, %320 : vector<16x1xi32>
    %322 = arith.extui %321 : vector<16x1xi1> to vector<16x1xi32>
    %323 = arith.sitofp %322 : vector<16x1xi32> to vector<16x1xf32>
    %324 = arith.mulf %319, %323 : vector<16x1xf32>
    %325 = vector.shape_cast %324 : vector<16x1xf32> to vector<1x16x1xf32>
    %cst_121 = arith.constant dense<0.000000e+00> : vector<1xf32>
    %326 = vector.multi_reduction <add>, %325, %cst_121 [1, 2] : vector<1x16x1xf32> to vector<1xf32>
    %327 = vector.shape_cast %326 : vector<1xf32> to vector<1x1x1xf32>
    %328 = vector.extract %327[0, 0, 0] : f32 from vector<1x1x1xf32>
    %329 = vector.broadcast %328 : f32 to vector<1x1xf32>
    %330 = arith.addf %259, %329 : vector<1x1xf32>
    %331 = vector.shape_cast %323 : vector<16x1xf32> to vector<1x16x1xf32>
    %cst_122 = arith.constant dense<0.000000e+00> : vector<1xf32>
    %332 = vector.multi_reduction <add>, %331, %cst_122 [1, 2] : vector<1x16x1xf32> to vector<1xf32>
    %333 = vector.shape_cast %332 : vector<1xf32> to vector<1x1x1xf32>
    %334 = vector.extract %333[0, 0, 0] : f32 from vector<1x1x1xf32>
    %335 = vector.broadcast %334 : f32 to vector<1x1xf32>
    %336 = arith.addf %265, %335 : vector<1x1xf32>
    %337 = vector.extract_strided_slice %17 {offsets = [32, 0], sizes = [16, 512], strides = [1, 1]} : vector<80x512xf32> to vector<16x512xf32>
    %cst_123 = arith.constant dense<0.000000e+00> : vector<16x512xf32>
    %338 = tpu.matmul %293, %20, %cst_123 {dimension_numbers = #tpu.dot_dimension_numbers<[1], [1], [0], [0], [0, 0, 1, 0], [], []>} : vector<16x128xf32>, vector<512x128xf32>, vector<16x512xf32> -> vector<16x512xf32>
    %339 = arith.addf %337, %338 : vector<16x512xf32>
    %340 = vector.extract_strided_slice %339 {offsets = [0, 0], sizes = [16, 128], strides = [1, 1]} : vector<16x512xf32> to vector<16x128xf32>
    %341 = arith.negf %340 : vector<16x128xf32>
    %342 = math.exp %341 : vector<16x128xf32>
    %cst_124 = arith.constant 1.000000e+00 : f32
    %343 = vector.broadcast %cst_124 : f32 to vector<16x128xf32>
    %344 = arith.addf %343, %342 : vector<16x128xf32>
    %345 = arith.divf %343, %344 : vector<16x128xf32>
    %346 = vector.extract_strided_slice %339 {offsets = [0, 128], sizes = [16, 128], strides = [1, 1]} : vector<16x512xf32> to vector<16x128xf32>
    %347 = arith.negf %346 : vector<16x128xf32>
    %348 = math.exp %347 : vector<16x128xf32>
    %cst_125 = arith.constant 1.000000e+00 : f32
    %349 = vector.broadcast %cst_125 : f32 to vector<16x128xf32>
    %350 = arith.addf %349, %348 : vector<16x128xf32>
    %351 = arith.divf %349, %350 : vector<16x128xf32>
    %352 = vector.extract_strided_slice %339 {offsets = [0, 256], sizes = [16, 128], strides = [1, 1]} : vector<16x512xf32> to vector<16x128xf32>
    %353 = math.tanh %352 : vector<16x128xf32>
    %354 = vector.extract_strided_slice %339 {offsets = [0, 384], sizes = [16, 128], strides = [1, 1]} : vector<16x512xf32> to vector<16x128xf32>
    %355 = arith.negf %354 : vector<16x128xf32>
    %356 = math.exp %355 : vector<16x128xf32>
    %cst_126 = arith.constant 1.000000e+00 : f32
    %357 = vector.broadcast %cst_126 : f32 to vector<16x128xf32>
    %358 = arith.addf %357, %356 : vector<16x128xf32>
    %359 = arith.divf %357, %358 : vector<16x128xf32>
    %360 = arith.mulf %351, %291 : vector<16x128xf32>
    %361 = arith.mulf %345, %353 : vector<16x128xf32>
    %362 = arith.addf %360, %361 : vector<16x128xf32>
    %363 = math.tanh %362 : vector<16x128xf32>
    %364 = arith.mulf %359, %363 : vector<16x128xf32>
    %cst_127 = arith.constant dense<0.000000e+00> : vector<16x50xf32>
    %365 = tpu.matmul %364, %21, %cst_127 {dimension_numbers = #tpu.dot_dimension_numbers<[1], [1], [0], [0], [0, 0, 1, 0], [], []>} : vector<16x128xf32>, vector<50x128xf32>, vector<16x50xf32> -> vector<16x50xf32>
    %366 = vector.broadcast %22 : vector<1x50xf32> to vector<16x50xf32>
    %367 = arith.addf %365, %366 : vector<16x50xf32>
    %cst_128 = arith.constant dense<0xFF800000> : vector<16xf32>
    %368 = vector.multi_reduction <maximumf>, %367, %cst_128 [1] : vector<16x50xf32> to vector<16xf32>
    %369 = vector.shape_cast %368 : vector<16xf32> to vector<16x1xf32>
    %370 = vector.broadcast %369 : vector<16x1xf32> to vector<16x50xf32>
    %371 = arith.subf %367, %370 : vector<16x50xf32>
    %372 = math.exp %371 : vector<16x50xf32>
    %cst_129 = arith.constant dense<0.000000e+00> : vector<16xf32>
    %373 = vector.multi_reduction <add>, %372, %cst_129 [1] : vector<16x50xf32> to vector<16xf32>
    %374 = vector.shape_cast %373 : vector<16xf32> to vector<16x1xf32>
    %375 = math.log %374 : vector<16x1xf32>
    %376 = arith.addf %369, %375 : vector<16x1xf32>
    %377 = vector.broadcast %376 : vector<16x1xf32> to vector<16x50xf32>
    %378 = arith.subf %367, %377 : vector<16x50xf32>
    %c2_130 = arith.constant 2 : index
    %c0_131 = arith.constant 0 : index
    %c0_132 = arith.constant 0 : index
    %379 = vector.load %arg11[%c2_130, %c0_131, %c0_132] : memref<5x16x1xi32, #tpu.memory_space<vmem>>, vector<1x16x1xi32>
    %380 = vector.shape_cast %379 : vector<1x16x1xi32> to vector<16x1xi32>
    %381 = tpu.iota {dimensions = array<i32: 1>} : vector<16x50xi32>
    %382 = vector.broadcast %380 : vector<16x1xi32> to vector<16x50xi32>
    %383 = arith.cmpi eq, %381, %382 : vector<16x50xi32>
    %384 = arith.extui %383 : vector<16x50xi1> to vector<16x50xi32>
    %385 = arith.sitofp %384 : vector<16x50xi32> to vector<16x50xf32>
    %386 = arith.mulf %378, %385 : vector<16x50xf32>
    %cst_133 = arith.constant dense<0.000000e+00> : vector<16xf32>
    %387 = vector.multi_reduction <add>, %386, %cst_133 [1] : vector<16x50xf32> to vector<16xf32>
    %388 = vector.shape_cast %387 : vector<16xf32> to vector<16x1xf32>
    %cst_134 = arith.constant 0.000000e+00 : f32
    %389 = vector.broadcast %cst_134 : f32 to vector<16x1xf32>
    %390 = arith.subf %389, %388 : vector<16x1xf32>
    %c2_i32_135 = arith.constant 2 : i32
    %391 = vector.broadcast %c2_i32_135 : i32 to vector<16x1xi32>
    %392 = arith.cmpi sgt, %192, %391 : vector<16x1xi32>
    %393 = arith.extui %392 : vector<16x1xi1> to vector<16x1xi32>
    %394 = arith.sitofp %393 : vector<16x1xi32> to vector<16x1xf32>
    %395 = arith.mulf %390, %394 : vector<16x1xf32>
    %396 = vector.shape_cast %395 : vector<16x1xf32> to vector<1x16x1xf32>
    %cst_136 = arith.constant dense<0.000000e+00> : vector<1xf32>
    %397 = vector.multi_reduction <add>, %396, %cst_136 [1, 2] : vector<1x16x1xf32> to vector<1xf32>
    %398 = vector.shape_cast %397 : vector<1xf32> to vector<1x1x1xf32>
    %399 = vector.extract %398[0, 0, 0] : f32 from vector<1x1x1xf32>
    %400 = vector.broadcast %399 : f32 to vector<1x1xf32>
    %401 = arith.addf %330, %400 : vector<1x1xf32>
    %402 = vector.shape_cast %394 : vector<16x1xf32> to vector<1x16x1xf32>
    %cst_137 = arith.constant dense<0.000000e+00> : vector<1xf32>
    %403 = vector.multi_reduction <add>, %402, %cst_137 [1, 2] : vector<1x16x1xf32> to vector<1xf32>
    %404 = vector.shape_cast %403 : vector<1xf32> to vector<1x1x1xf32>
    %405 = vector.extract %404[0, 0, 0] : f32 from vector<1x1x1xf32>
    %406 = vector.broadcast %405 : f32 to vector<1x1xf32>
    %407 = arith.addf %336, %406 : vector<1x1xf32>
    %408 = vector.extract_strided_slice %17 {offsets = [48, 0], sizes = [16, 512], strides = [1, 1]} : vector<80x512xf32> to vector<16x512xf32>
    %cst_138 = arith.constant dense<0.000000e+00> : vector<16x512xf32>
    %409 = tpu.matmul %364, %20, %cst_138 {dimension_numbers = #tpu.dot_dimension_numbers<[1], [1], [0], [0], [0, 0, 1, 0], [], []>} : vector<16x128xf32>, vector<512x128xf32>, vector<16x512xf32> -> vector<16x512xf32>
    %410 = arith.addf %408, %409 : vector<16x512xf32>
    %411 = vector.extract_strided_slice %410 {offsets = [0, 0], sizes = [16, 128], strides = [1, 1]} : vector<16x512xf32> to vector<16x128xf32>
    %412 = arith.negf %411 : vector<16x128xf32>
    %413 = math.exp %412 : vector<16x128xf32>
    %cst_139 = arith.constant 1.000000e+00 : f32
    %414 = vector.broadcast %cst_139 : f32 to vector<16x128xf32>
    %415 = arith.addf %414, %413 : vector<16x128xf32>
    %416 = arith.divf %414, %415 : vector<16x128xf32>
    %417 = vector.extract_strided_slice %410 {offsets = [0, 128], sizes = [16, 128], strides = [1, 1]} : vector<16x512xf32> to vector<16x128xf32>
    %418 = arith.negf %417 : vector<16x128xf32>
    %419 = math.exp %418 : vector<16x128xf32>
    %cst_140 = arith.constant 1.000000e+00 : f32
    %420 = vector.broadcast %cst_140 : f32 to vector<16x128xf32>
    %421 = arith.addf %420, %419 : vector<16x128xf32>
    %422 = arith.divf %420, %421 : vector<16x128xf32>
    %423 = vector.extract_strided_slice %410 {offsets = [0, 256], sizes = [16, 128], strides = [1, 1]} : vector<16x512xf32> to vector<16x128xf32>
    %424 = math.tanh %423 : vector<16x128xf32>
    %425 = vector.extract_strided_slice %410 {offsets = [0, 384], sizes = [16, 128], strides = [1, 1]} : vector<16x512xf32> to vector<16x128xf32>
    %426 = arith.negf %425 : vector<16x128xf32>
    %427 = math.exp %426 : vector<16x128xf32>
    %cst_141 = arith.constant 1.000000e+00 : f32
    %428 = vector.broadcast %cst_141 : f32 to vector<16x128xf32>
    %429 = arith.addf %428, %427 : vector<16x128xf32>
    %430 = arith.divf %428, %429 : vector<16x128xf32>
    %431 = arith.mulf %422, %362 : vector<16x128xf32>
    %432 = arith.mulf %416, %424 : vector<16x128xf32>
    %433 = arith.addf %431, %432 : vector<16x128xf32>
    %434 = math.tanh %433 : vector<16x128xf32>
    %435 = arith.mulf %430, %434 : vector<16x128xf32>
    %cst_142 = arith.constant dense<0.000000e+00> : vector<16x50xf32>
    %436 = tpu.matmul %435, %21, %cst_142 {dimension_numbers = #tpu.dot_dimension_numbers<[1], [1], [0], [0], [0, 0, 1, 0], [], []>} : vector<16x128xf32>, vector<50x128xf32>, vector<16x50xf32> -> vector<16x50xf32>
    %437 = vector.broadcast %22 : vector<1x50xf32> to vector<16x50xf32>
    %438 = arith.addf %436, %437 : vector<16x50xf32>
    %cst_143 = arith.constant dense<0xFF800000> : vector<16xf32>
    %439 = vector.multi_reduction <maximumf>, %438, %cst_143 [1] : vector<16x50xf32> to vector<16xf32>
    %440 = vector.shape_cast %439 : vector<16xf32> to vector<16x1xf32>
    %441 = vector.broadcast %440 : vector<16x1xf32> to vector<16x50xf32>
    %442 = arith.subf %438, %441 : vector<16x50xf32>
    %443 = math.exp %442 : vector<16x50xf32>
    %cst_144 = arith.constant dense<0.000000e+00> : vector<16xf32>
    %444 = vector.multi_reduction <add>, %443, %cst_144 [1] : vector<16x50xf32> to vector<16xf32>
    %445 = vector.shape_cast %444 : vector<16xf32> to vector<16x1xf32>
    %446 = math.log %445 : vector<16x1xf32>
    %447 = arith.addf %440, %446 : vector<16x1xf32>
    %448 = vector.broadcast %447 : vector<16x1xf32> to vector<16x50xf32>
    %449 = arith.subf %438, %448 : vector<16x50xf32>
    %c3 = arith.constant 3 : index
    %c0_145 = arith.constant 0 : index
    %c0_146 = arith.constant 0 : index
    %450 = vector.load %arg11[%c3, %c0_145, %c0_146] : memref<5x16x1xi32, #tpu.memory_space<vmem>>, vector<1x16x1xi32>
    %451 = vector.shape_cast %450 : vector<1x16x1xi32> to vector<16x1xi32>
    %452 = tpu.iota {dimensions = array<i32: 1>} : vector<16x50xi32>
    %453 = vector.broadcast %451 : vector<16x1xi32> to vector<16x50xi32>
    %454 = arith.cmpi eq, %452, %453 : vector<16x50xi32>
    %455 = arith.extui %454 : vector<16x50xi1> to vector<16x50xi32>
    %456 = arith.sitofp %455 : vector<16x50xi32> to vector<16x50xf32>
    %457 = arith.mulf %449, %456 : vector<16x50xf32>
    %cst_147 = arith.constant dense<0.000000e+00> : vector<16xf32>
    %458 = vector.multi_reduction <add>, %457, %cst_147 [1] : vector<16x50xf32> to vector<16xf32>
    %459 = vector.shape_cast %458 : vector<16xf32> to vector<16x1xf32>
    %cst_148 = arith.constant 0.000000e+00 : f32
    %460 = vector.broadcast %cst_148 : f32 to vector<16x1xf32>
    %461 = arith.subf %460, %459 : vector<16x1xf32>
    %c3_i32 = arith.constant 3 : i32
    %462 = vector.broadcast %c3_i32 : i32 to vector<16x1xi32>
    %463 = arith.cmpi sgt, %192, %462 : vector<16x1xi32>
    %464 = arith.extui %463 : vector<16x1xi1> to vector<16x1xi32>
    %465 = arith.sitofp %464 : vector<16x1xi32> to vector<16x1xf32>
    %466 = arith.mulf %461, %465 : vector<16x1xf32>
    %467 = vector.shape_cast %466 : vector<16x1xf32> to vector<1x16x1xf32>
    %cst_149 = arith.constant dense<0.000000e+00> : vector<1xf32>
    %468 = vector.multi_reduction <add>, %467, %cst_149 [1, 2] : vector<1x16x1xf32> to vector<1xf32>
    %469 = vector.shape_cast %468 : vector<1xf32> to vector<1x1x1xf32>
    %470 = vector.extract %469[0, 0, 0] : f32 from vector<1x1x1xf32>
    %471 = vector.broadcast %470 : f32 to vector<1x1xf32>
    %472 = arith.addf %401, %471 : vector<1x1xf32>
    %473 = vector.shape_cast %465 : vector<16x1xf32> to vector<1x16x1xf32>
    %cst_150 = arith.constant dense<0.000000e+00> : vector<1xf32>
    %474 = vector.multi_reduction <add>, %473, %cst_150 [1, 2] : vector<1x16x1xf32> to vector<1xf32>
    %475 = vector.shape_cast %474 : vector<1xf32> to vector<1x1x1xf32>
    %476 = vector.extract %475[0, 0, 0] : f32 from vector<1x1x1xf32>
    %477 = vector.broadcast %476 : f32 to vector<1x1xf32>
    %478 = arith.addf %407, %477 : vector<1x1xf32>
    %479 = vector.extract_strided_slice %17 {offsets = [64, 0], sizes = [16, 512], strides = [1, 1]} : vector<80x512xf32> to vector<16x512xf32>
    %cst_151 = arith.constant dense<0.000000e+00> : vector<16x512xf32>
    %480 = tpu.matmul %435, %20, %cst_151 {dimension_numbers = #tpu.dot_dimension_numbers<[1], [1], [0], [0], [0, 0, 1, 0], [], []>} : vector<16x128xf32>, vector<512x128xf32>, vector<16x512xf32> -> vector<16x512xf32>
    %481 = arith.addf %479, %480 : vector<16x512xf32>
    %482 = vector.extract_strided_slice %481 {offsets = [0, 0], sizes = [16, 128], strides = [1, 1]} : vector<16x512xf32> to vector<16x128xf32>
    %483 = arith.negf %482 : vector<16x128xf32>
    %484 = math.exp %483 : vector<16x128xf32>
    %cst_152 = arith.constant 1.000000e+00 : f32
    %485 = vector.broadcast %cst_152 : f32 to vector<16x128xf32>
    %486 = arith.addf %485, %484 : vector<16x128xf32>
    %487 = arith.divf %485, %486 : vector<16x128xf32>
    %488 = vector.extract_strided_slice %481 {offsets = [0, 128], sizes = [16, 128], strides = [1, 1]} : vector<16x512xf32> to vector<16x128xf32>
    %489 = arith.negf %488 : vector<16x128xf32>
    %490 = math.exp %489 : vector<16x128xf32>
    %cst_153 = arith.constant 1.000000e+00 : f32
    %491 = vector.broadcast %cst_153 : f32 to vector<16x128xf32>
    %492 = arith.addf %491, %490 : vector<16x128xf32>
    %493 = arith.divf %491, %492 : vector<16x128xf32>
    %494 = vector.extract_strided_slice %481 {offsets = [0, 256], sizes = [16, 128], strides = [1, 1]} : vector<16x512xf32> to vector<16x128xf32>
    %495 = math.tanh %494 : vector<16x128xf32>
    %496 = vector.extract_strided_slice %481 {offsets = [0, 384], sizes = [16, 128], strides = [1, 1]} : vector<16x512xf32> to vector<16x128xf32>
    %497 = arith.negf %496 : vector<16x128xf32>
    %498 = math.exp %497 : vector<16x128xf32>
    %cst_154 = arith.constant 1.000000e+00 : f32
    %499 = vector.broadcast %cst_154 : f32 to vector<16x128xf32>
    %500 = arith.addf %499, %498 : vector<16x128xf32>
    %501 = arith.divf %499, %500 : vector<16x128xf32>
    %502 = arith.mulf %493, %433 : vector<16x128xf32>
    %503 = arith.mulf %487, %495 : vector<16x128xf32>
    %504 = arith.addf %502, %503 : vector<16x128xf32>
    %505 = math.tanh %504 : vector<16x128xf32>
    %506 = arith.mulf %501, %505 : vector<16x128xf32>
    %cst_155 = arith.constant dense<0.000000e+00> : vector<16x50xf32>
    %507 = tpu.matmul %506, %21, %cst_155 {dimension_numbers = #tpu.dot_dimension_numbers<[1], [1], [0], [0], [0, 0, 1, 0], [], []>} : vector<16x128xf32>, vector<50x128xf32>, vector<16x50xf32> -> vector<16x50xf32>
    %508 = vector.broadcast %22 : vector<1x50xf32> to vector<16x50xf32>
    %509 = arith.addf %507, %508 : vector<16x50xf32>
    %cst_156 = arith.constant dense<0xFF800000> : vector<16xf32>
    %510 = vector.multi_reduction <maximumf>, %509, %cst_156 [1] : vector<16x50xf32> to vector<16xf32>
    %511 = vector.shape_cast %510 : vector<16xf32> to vector<16x1xf32>
    %512 = vector.broadcast %511 : vector<16x1xf32> to vector<16x50xf32>
    %513 = arith.subf %509, %512 : vector<16x50xf32>
    %514 = math.exp %513 : vector<16x50xf32>
    %cst_157 = arith.constant dense<0.000000e+00> : vector<16xf32>
    %515 = vector.multi_reduction <add>, %514, %cst_157 [1] : vector<16x50xf32> to vector<16xf32>
    %516 = vector.shape_cast %515 : vector<16xf32> to vector<16x1xf32>
    %517 = math.log %516 : vector<16x1xf32>
    %518 = arith.addf %511, %517 : vector<16x1xf32>
    %519 = vector.broadcast %518 : vector<16x1xf32> to vector<16x50xf32>
    %520 = arith.subf %509, %519 : vector<16x50xf32>
    %c4 = arith.constant 4 : index
    %c0_158 = arith.constant 0 : index
    %c0_159 = arith.constant 0 : index
    %521 = vector.load %arg11[%c4, %c0_158, %c0_159] : memref<5x16x1xi32, #tpu.memory_space<vmem>>, vector<1x16x1xi32>
    %522 = vector.shape_cast %521 : vector<1x16x1xi32> to vector<16x1xi32>
    %523 = tpu.iota {dimensions = array<i32: 1>} : vector<16x50xi32>
    %524 = vector.broadcast %522 : vector<16x1xi32> to vector<16x50xi32>
    %525 = arith.cmpi eq, %523, %524 : vector<16x50xi32>
    %526 = arith.extui %525 : vector<16x50xi1> to vector<16x50xi32>
    %527 = arith.sitofp %526 : vector<16x50xi32> to vector<16x50xf32>
    %528 = arith.mulf %520, %527 : vector<16x50xf32>
    %cst_160 = arith.constant dense<0.000000e+00> : vector<16xf32>
    %529 = vector.multi_reduction <add>, %528, %cst_160 [1] : vector<16x50xf32> to vector<16xf32>
    %530 = vector.shape_cast %529 : vector<16xf32> to vector<16x1xf32>
    %cst_161 = arith.constant 0.000000e+00 : f32
    %531 = vector.broadcast %cst_161 : f32 to vector<16x1xf32>
    %532 = arith.subf %531, %530 : vector<16x1xf32>
    %c4_i32 = arith.constant 4 : i32
    %533 = vector.broadcast %c4_i32 : i32 to vector<16x1xi32>
    %534 = arith.cmpi sgt, %192, %533 : vector<16x1xi32>
    %535 = arith.extui %534 : vector<16x1xi1> to vector<16x1xi32>
    %536 = arith.sitofp %535 : vector<16x1xi32> to vector<16x1xf32>
    %537 = arith.mulf %532, %536 : vector<16x1xf32>
    %538 = vector.shape_cast %537 : vector<16x1xf32> to vector<1x16x1xf32>
    %cst_162 = arith.constant dense<0.000000e+00> : vector<1xf32>
    %539 = vector.multi_reduction <add>, %538, %cst_162 [1, 2] : vector<1x16x1xf32> to vector<1xf32>
    %540 = vector.shape_cast %539 : vector<1xf32> to vector<1x1x1xf32>
    %541 = vector.extract %540[0, 0, 0] : f32 from vector<1x1x1xf32>
    %542 = vector.broadcast %541 : f32 to vector<1x1xf32>
    %543 = arith.addf %472, %542 : vector<1x1xf32>
    %544 = vector.shape_cast %536 : vector<16x1xf32> to vector<1x16x1xf32>
    %cst_163 = arith.constant dense<0.000000e+00> : vector<1xf32>
    %545 = vector.multi_reduction <add>, %544, %cst_163 [1, 2] : vector<1x16x1xf32> to vector<1xf32>
    %546 = vector.shape_cast %545 : vector<1xf32> to vector<1x1x1xf32>
    %547 = vector.extract %546[0, 0, 0] : f32 from vector<1x1x1xf32>
    %548 = vector.broadcast %547 : f32 to vector<1x1xf32>
    %549 = arith.addf %478, %548 : vector<1x1xf32>
    %cst_164 = arith.constant 0.000000e+00 : f32
    %550 = vector.broadcast %cst_164 : f32 to vector<1x1xf32>
    %551 = arith.cmpf ogt, %549, %550 : vector<1x1xf32>
    %552 = arith.divf %543, %549 : vector<1x1xf32>
    %553 = arith.select %551, %552, %543 : vector<1x1xi1>, vector<1x1xf32>
    %c0_165 = arith.constant 0 : index
    %c0_166 = arith.constant 0 : index
    %554 = vector.load %arg19[%c0_165, %c0_166] : memref<1x1xf32, #tpu.memory_space<vmem>>, vector<1x1xf32>
    tpu.vector_store %arg19[%c0_165, %c0_166], %553 {strides = array<i32>} : memref<1x1xf32, #tpu.memory_space<vmem>>, vector<1x1xf32>,
    return
  }
  func.func @transform_0(%arg0: i32) -> (i32, i32) {
    %c0_i32 = arith.constant 0 : i32
    %c0_i32_0 = arith.constant 0 : i32
    %c0_i32_1 = arith.constant 0 : i32
    return %c0_i32, %c0_i32_0 : i32, i32
  }
  func.func @transform_1(%arg0: i32) -> (i32, i32, i32, i32) {
    %c0_i32 = arith.constant 0 : i32
    %c0_i32_0 = arith.constant 0 : i32
    %c0_i32_1 = arith.constant 0 : i32
    %c0_i32_2 = arith.constant 0 : i32
    %c0_i32_3 = arith.constant 0 : i32
    return %c0_i32, %c0_i32_0, %c0_i32_1, %c0_i32_2 : i32, i32, i32, i32
  }
  func.func @transform_2(%arg0: i32) -> (i32, i32, i32) {
    %c0_i32 = arith.constant 0 : i32
    %c0_i32_0 = arith.constant 0 : i32
    %c0_i32_1 = arith.constant 0 : i32
    %c0_i32_2 = arith.constant 0 : i32
    return %c0_i32, %c0_i32_0, %c0_i32_1 : i32, i32, i32
  }
  func.func @transform_3(%arg0: i32) -> (i32, i32) {
    %c0_i32 = arith.constant 0 : i32
    %c0_i32_0 = arith.constant 0 : i32
    %c0_i32_1 = arith.constant 0 : i32
    return %c0_i32, %c0_i32_0 : i32, i32
  }
  func.func @transform_4(%arg0: i32) -> (i32, i32) {
    %c0_i32 = arith.constant 0 : i32
    %c0_i32_0 = arith.constant 0 : i32
    %c0_i32_1 = arith.constant 0 : i32
    return %c0_i32, %c0_i32_0 : i32, i32
  }
  func.func @transform_5(%arg0: i32) -> (i32, i32) {
    %c0_i32 = arith.constant 0 : i32
    %c0_i32_0 = arith.constant 0 : i32
    %c0_i32_1 = arith.constant 0 : i32
    return %c0_i32, %c0_i32_0 : i32, i32
  }
  func.func @transform_6(%arg0: i32) -> (i32, i32) {
    %c0_i32 = arith.constant 0 : i32
    %c0_i32_0 = arith.constant 0 : i32
    %c0_i32_1 = arith.constant 0 : i32
    return %c0_i32, %c0_i32_0 : i32, i32
  }
  func.func @transform_7(%arg0: i32) -> (i32, i32) {
    %c0_i32 = arith.constant 0 : i32
    %c0_i32_0 = arith.constant 0 : i32
    %c0_i32_1 = arith.constant 0 : i32
    return %c0_i32, %c0_i32_0 : i32, i32
  }
  func.func @transform_8(%arg0: i32) -> (i32, i32) {
    %c0_i32 = arith.constant 0 : i32
    %c0_i32_0 = arith.constant 0 : i32
    %c0_i32_1 = arith.constant 0 : i32
    return %c0_i32, %c0_i32_0 : i32, i32
  }
  func.func @transform_9(%arg0: i32) -> (i32, i32) {
    %c0_i32 = arith.constant 0 : i32
    %c0_i32_0 = arith.constant 0 : i32
    %c0_i32_1 = arith.constant 0 : i32
    return %c0_i32, %c0_i32_0 : i32, i32
  }
  func.func @transform_10(%arg0: i32) -> (i32, i32, i32) {
    %c0_i32 = arith.constant 0 : i32
    %c0_i32_0 = arith.constant 0 : i32
    %c0_i32_1 = arith.constant 0 : i32
    %c0_i32_2 = arith.constant 0 : i32
    return %c0_i32, %c0_i32_0, %c0_i32_1 : i32, i32, i32
  }
  func.func @transform_11(%arg0: i32) -> (i32, i32) {
    %c0_i32 = arith.constant 0 : i32
    %c0_i32_0 = arith.constant 0 : i32
    %c0_i32_1 = arith.constant 0 : i32
    return %c0_i32, %c0_i32_0 : i32, i32
  }
  func.func @transform_12(%arg0: i32) -> (i32, i32) {
    %c0_i32 = arith.constant 0 : i32
    %c0_i32_0 = arith.constant 0 : i32
    %c0_i32_1 = arith.constant 0 : i32
    return %c0_i32, %c0_i32_0 : i32, i32
  }
  func.func @transform_13(%arg0: i32) -> (i32, i32) {
    %c0_i32 = arith.constant 0 : i32
    %c0_i32_0 = arith.constant 0 : i32
    %c0_i32_1 = arith.constant 0 : i32
    return %c0_i32, %c0_i32_0 : i32, i32
  }
  func.func @transform_14(%arg0: i32) -> (i32, i32) {
    %c0_i32 = arith.constant 0 : i32
    %c0_i32_0 = arith.constant 0 : i32
    %c0_i32_1 = arith.constant 0 : i32
    return %c0_i32, %c0_i32_0 : i32, i32
  }
  func.func @transform_15(%arg0: i32) -> (i32, i32) {
    %c0_i32 = arith.constant 0 : i32
    %c0_i32_0 = arith.constant 0 : i32
    %c0_i32_1 = arith.constant 0 : i32
    return %c0_i32, %c0_i32_0 : i32, i32
  }
  func.func @transform_16(%arg0: i32) -> (i32, i32) {
    %c0_i32 = arith.constant 0 : i32
    %c0_i32_0 = arith.constant 0 : i32
    %c0_i32_1 = arith.constant 0 : i32
    return %c0_i32, %c0_i32_0 : i32, i32
  }
  func.func @transform_17(%arg0: i32) -> (i32, i32) {
    %c0_i32 = arith.constant 0 : i32
    %c0_i32_0 = arith.constant 0 : i32
    %c0_i32_1 = arith.constant 0 : i32
    return %c0_i32, %c0_i32_0 : i32, i32
  }
  func.func @transform_18(%arg0: i32) -> (i32, i32) {
    %c0_i32 = arith.constant 0 : i32
    %c0_i32_0 = arith.constant 0 : i32
    %c0_i32_1 = arith.constant 0 : i32
    return %c0_i32, %c0_i32_0 : i32, i32
  }
}

</mosaic_0001>

<bundles_post_ra>
// kernel: squeeze.5
= control target key start
LH: loop header
LB: loop body
LE: loop exit
PB: predicated region body
PF: predicated region fallthrough
CT: control target
= control target key end

     0   :  { %vm3_vm0 = vcmask 261120   ;;  %s115_s0 = inlined_call_operand.vmem [shape: f32[1,18,32], index: 0, kind: input, shape index: {}]   ;;  %s116_s1 = inlined_call_operand.vmem [shape: f32[2,3,3,32], index: 1, kind: output, shape index: {}]  }
   0x1   :  { %v2_v0 = vld [vmem:[%s115_s0] sm:$0xff]   ;;  %v71_v1 = vld [vmem:[%s115_s0 + $0x8] sm:$0xff]   ;;  %v72_v2 = vld [vmem:[%s115_s0 + $0x10] sm:$0x3]  }
   0x2   :  { %4 = vst.msk [vmem:[#allocation0] sm:$0x7] %vm3_vm0, %v2_v0   ;;  %6 = vst.msk [vmem:[#allocation0 + $0x5] sm:$0x38] %vm3_vm0, %v2_v0  }
   0x3   :  { %8 = vst.msk [vmem:[#allocation0 + $0xa] sm:$0xc0] %vm3_vm0, %v2_v0   ;;  %13 = vst.msk [vmem:[#allocation0 + $0x12] ss:$6 sm:$0x3] %vm3_vm0, %v71_v1  }
   0x4   :  { %15 = vst.msk [vmem:[#allocation0 + $0x17] sm:$0xc] %vm3_vm0, %v71_v1   ;;  %17 = vst.msk [vmem:[#allocation0 + $0x1c] sm:$0x70] %vm3_vm0, %v71_v1  }
   0x5   :  { %19 = vst.msk [vmem:[#allocation0 + $0x21] sm:$0x80] %vm3_vm0, %v71_v1   ;;  %24 = vst.msk [vmem:[#allocation0 + $0x29] sm:$0x3] %vm3_vm0, %v72_v2  }
   0x9   :  { %v29_v3 = vld [vmem:[#allocation0] sm:$0xf]  ;;  %v34_v4 = vld [vmem:[#allocation0 + $0x8] sm:$0xf] }
   0xa   :  { %v40_v5 = vld [vmem:[#allocation0 + $0x10] sm:$0xf]  ;;  %32 = vst [vmem:[%s116_s1] sm:$0xf] %v29_v3  ;;  %73 = vst [vmem:[%s116_s1 + $0x4] sm:$0xf] %v34_v4 }
   0xb   :  { %74 = vst [vmem:[%s116_s1 + $0x8] sm:$0xf] %v40_v5  ;;  %v47_v6 = vld [vmem:[#allocation0 + $0x18] sm:$0xf]  ;;  %v54_v7 = vld [vmem:[#allocation0 + $0x20] sm:$0xf] }
   0xc   :  { %v61_v8 = vld [vmem:[#allocation0 + $0x28] sm:$0xf]  ;;  %75 = vst [vmem:[%s116_s1 + $0xc] sm:$0xf] %v47_v6  ;;  %76 = vst [vmem:[%s116_s1 + $0x10] sm:$0xf] %v54_v7 }
   0xd   :  { %77 = vst [vmem:[%s116_s1 + $0x14] sm:$0xf] %v61_v8 }

// kernel: squeeze.4
= control target key start
LH: loop header
LB: loop body
LE: loop exit
PB: predicated region body
PF: predicated region fallthrough
CT: control target
= control target key end

     0   :  { %vm3_vm0 = vcmask 261120   ;;  %s41_s0 = inlined_call_operand.vmem [shape: f32[1,6,32], index: 0, kind: input, shape index: {}]   ;;  %s42_s1 = inlined_call_operand.vmem [shape: f32[2,3,32], index: 1, kind: output, shape index: {}]  }
   0x1   :  { %v2_v0 = vld [vmem:[%s41_s0] sm:$0x3f]  }
   0x2   :  { %4 = vst.msk [vmem:[#allocation0] sm:$0x7] %vm3_vm0, %v2_v0   ;;  %6 = vst.msk [vmem:[#allocation0 + $0x5] sm:$0x38] %vm3_vm0, %v2_v0  }
   0x9   :  { %v11_v1 = vld [vmem:[#allocation0] sm:$0xf]  ;;  %v16_v2 = vld [vmem:[#allocation0 + $0x8] sm:$0xf] }
   0xa   :  { %14 = vst [vmem:[%s42_s1] sm:$0xf] %v11_v1  ;;  %21 = vst [vmem:[%s42_s1 + $0x4] sm:$0xf] %v16_v2 }

// kernel: nsrf_forward.2
= control target key start
LH: loop header
LB: loop body
LE: loop exit
PB: predicated region body
PF: predicated region fallthrough
CT: control target
= control target key end

     0   :  { %s4882_s21 = smov 0   ;;  %s4884_s22 = smov 0   ;;  %s6767_s0 = inlined_call_operand.vmem [shape: f32[2,2,168,16], index: 0, kind: input, shape index: {}]   ;;  %s6768_s1 = inlined_call_operand.vmem [shape: s32[2,24,1], index: 1, kind: input, shape index: {}]   ;;  %s6769_s2 = inlined_call_operand.vmem [shape: s32[2,1,1], index: 2, kind: input, shape index: {}]   ;;  %s6770_s3 = inlined_call_operand.vmem [shape: f32[2,2,512,16], index: 3, kind: input, shape index: {}]   ;;  %s6771_s4 = inlined_call_operand.vmem [shape: f32[2,2,512,128], index: 4, kind: input, shape index: {}]   ;;  %s6772_s5 = inlined_call_operand.vmem [shape: f32[2,2,1,512], index: 5, kind: input, shape index: {}]   ;;  %s6773_s6 = inlined_call_operand.vmem [shape: f32[2,24,32], index: 6, kind: output, shape index: {}]  }
   0x1   :  { %s4886_s23 = smov 0   ;;  %s4888_s24 = smov 0  }
   0x2   :  { %s4890_s25 = smov 0  }
   0x3 LB: > { %s25_s26 = sadd.s32 1, %s4833_s23  ;;  %s28_s27 = sadd.s32 1, %s4837_s24  ;;  %s4841_s25 = sphi %s4890_s25, %s16_s25   ;;  %s4837_s24 = sphi %s4888_s24, %s7213_s24   ;;  %s4833_s23 = sphi %s4886_s23, %s7212_s23   ;;  %s4829_s22 = sphi %s4884_s22, %s7211_s22   ;;  %s4825_s21 = sphi %s4882_s21, %s7210_s21  }
   0x4   : > { %p26_p0 = scmp.ge.s32.totalorder %s25_s26, 2  ;;  %p3403_p1 = scmp.ge.s32.totalorder %s4841_s25, 1 }
   0x5   : > { %p295_p2 = scmp.lt.s32.totalorder %s4841_s25, 5 }
   0x6   : > { %s7215_s26 = smov (%p26_p0, %s25_s26), 0  ;;  %s7217_s27 = smov (!%p26_p0, %s28_s27), %s4837_s24 }
   0x7   : > { %p296_p3 = pnand %p3403_p1, %p295_p2  ;;  %p30_p4 = scmp.ge.s32.totalorder %s7217_s27, 2 }
   0x9   : > { %s7219_s27 = smov (%p30_p4, %s7217_s27), 0  ;;  %299 = sbr.rel (%p296_p3) target bundleno = 2061 (0x80d), region = 44 }
   0xe   : > { %p363_p5 = scmp.lt.s32.totalorder %s4829_s22, 1  ;;  %p365_p6 = scmp.lt.s32.totalorder %s4825_s21, 1  ;;  %vm518_vm0 = vcmask 130048  }
   0xf   : > { %p3584_p7 = scmp.ne.s32.totalorder %s4825_s21, 0 }
  0x10   : > { %s7221_s22 = smov (!%p363_p5, %s4829_s22), 1 }
  0x11   : > { %s4918_s28 = scalar_select %p365_p6, %s4825_s21, 1 }
  0x12   : > { %s3407_s29 = sshll.u32 %s7221_s22, 7  ;;  %s4269_s12 = smul.u32 42, %s7221_s22 }
  0x13   : > { %s3406_s30 = sshll.u32 %s4918_s28, 6  ;;  %s4268_s13 = smul.u32 21, %s4918_s28 }
  0x14   : > { %s4922_s7 = sadd.s32 %s3407_s29, %s3406_s30  ;;  %s4270_s30 = smul.u32 24, %s7221_s22 }
  0x15   : > { %s3408_s8 = sshll.u32 %s4922_s7, 3  ;;  %s369_s14 = sadd.s32 %s4269_s12, %s4268_s13 }
  0x16   : > { %s4930_s11 = scalar_lea.vmem %s6770_s3, %s3408_s8  ;;  %s3404_s15 = sshll.u32 %s369_s14, 3 }
  0x17   : > { %v463_v0 = vld [vmem:[%s4930_s11 + $0xf8] sm:$0xff]  ;;  %v462_v4 = vld [vmem:[%s4930_s11 + $0xf0] sm:$0xff]  ;;  %v461_v8 = vld [vmem:[%s4930_s11 + $0xe8] sm:$0xff]  ;;  %s4979_s18 = scalar_lea.vmem %s6767_s0, %s3404_s15  ;;  %s5071_s29 = scalar_lea.vmem %s6771_s4, %s3408_s8 }
  0x18   : > { %v495_v1 = vld [vmem:[%s4930_s11 + $0x1f8] sm:$0xff]  ;;  %3588 = vmatprep.subr.msk.mxu0 %vm518_vm0, %v463_v0  ;;  %v494_v5 = vld [vmem:[%s4930_s11 + $0x1f0] sm:$0xff]  ;;  %v493_v9 = vld [vmem:[%s4930_s11 + $0x1e8] sm:$0xff]  ;;  %s5438_s9 = scalar_lea.vmem %s6768_s1, %s4270_s30  ;;  %s5444_s12 = scalar_lea.vmem %s6769_s2, %s7221_s22 }
  0x19   : > { %v447_v2 = vld [vmem:[%s4930_s11 + $0x78] sm:$0xff]  ;;  %3662 = vmatprep.subr.msk.mxu1 %vm518_vm0, %v495_v1  ;;  %v446_v6 = vld [vmem:[%s4930_s11 + $0x70] sm:$0xff]  ;;  %v445_v10 = vld [vmem:[%s4930_s11 + $0x68] sm:$0xff]  ;;  %s5470_s15 = scalar_lea.vmem %s6773_s6, %s4270_s30  ;;  %s3412_s16 = sshll.u32 %s4918_s28, 2 }
  0x1a   : > { %v479_v3 = vld [vmem:[%s4930_s11 + $0x178] sm:$0xff]  ;;  %3589 = vmatpush3.xpose.msk.msra.mxu0 %vm518_vm0, %v447_v2  ;;  %v478_v7 = vld [vmem:[%s4930_s11 + $0x170] sm:$0xff]  ;;  %v477_v11 = vld [vmem:[%s4930_s11 + $0x168] sm:$0xff]  ;;  %s3413_s17 = sshll.u32 %s7221_s22, 3 }
  0x1b   : > { %3663 = vmatpush3.xpose.msk.msra.mxu1 %vm518_vm0, %v479_v3  ;;  %3590 = vmatprep.subr.msk.mxu0 %vm518_vm0, %v462_v4  ;;  %v460_v12 = vld [vmem:[%s4930_s11 + $0xe0] sm:$0xff]  ;;  %v459_v16 = vld [vmem:[%s4930_s11 + $0xd8] sm:$0xff]  ;;  %v458_v20 = vld [vmem:[%s4930_s11 + $0xd0] sm:$0xff] }
  0x1c   : > { %3664 = vmatprep.subr.msk.mxu1 %vm518_vm0, %v494_v5  ;;  %v492_v13 = vld [vmem:[%s4930_s11 + $0x1e0] sm:$0xff]  ;;  %v491_v17 = vld [vmem:[%s4930_s11 + $0x1d8] sm:$0xff]  ;;  %v490_v21 = vld [vmem:[%s4930_s11 + $0x1d0] sm:$0xff] }
  0x1d   : > { %v444_v14 = vld [vmem:[%s4930_s11 + $0x60] sm:$0xff]  ;;  %v443_v18 = vld [vmem:[%s4930_s11 + $0x58] sm:$0xff]  ;;  %v442_v22 = vld [vmem:[%s4930_s11 + $0x50] sm:$0xff] }
  0x1e   : > { %3591 = vmatpush3.xpose.msk.msra.mxu0 %vm518_vm0, %v446_v6  ;;  %v476_v15 = vld [vmem:[%s4930_s11 + $0x160] sm:$0xff]  ;;  %v475_v19 = vld [vmem:[%s4930_s11 + $0x158] sm:$0xff]  ;;  %v474_v23 = vld [vmem:[%s4930_s11 + $0x150] sm:$0xff] }
  0x1f   : > { %3665 = vmatpush3.xpose.msk.msra.mxu1 %vm518_vm0, %v478_v7  ;;  %3592 = vmatprep.subr.msk.mxu0 %vm518_vm0, %v461_v8  ;;  %v457_v24 = vld [vmem:[%s4930_s11 + $0xc8] sm:$0xff]  ;;  %v4988_v26 = vld [vmem:[%s4979_s18] sm:$0xff]  ;;  %v455_v33 = vld [vmem:[%s4930_s11 + $0xb8] sm:$0xff] }
  0x20   : > { %3666 = vmatprep.subr.msk.mxu1 %vm518_vm0, %v493_v9  ;;  %v489_v25 = vld [vmem:[%s4930_s11 + $0x1c8] sm:$0xff]  ;;  %v456_v29 = vld [vmem:[%s4930_s11 + $0xc0] sm:$0xff]  ;;  %3620 = vmatprep.mubr.msk.f32.mxu0 %vm518_vm0, %v4988_v26  ;;  %v487_v34 = vld [vmem:[%s4930_s11 + $0x1b8] sm:$0xff] }
  0x21   : > { %v441_v27 = vld [vmem:[%s4930_s11 + $0x48] sm:$0xff]  ;;  %v488_v30 = vld [vmem:[%s4930_s11 + $0x1c0] sm:$0xff]  ;;  %3694 = vmatprep.mubr.msk.f32.mxu1 %vm518_vm0, %v4988_v26  ;;  %v439_v35 = vld [vmem:[%s4930_s11 + $0x38] sm:$0xff] }
  0x22   : > { %3593 = vmatpush3.xpose.msk.msra.mxu0 %vm518_vm0, %v445_v10  ;;  %v473_v28 = vld [vmem:[%s4930_s11 + $0x148] sm:$0xff]  ;;  %v440_v31 = vld [vmem:[%s4930_s11 + $0x40] sm:$0xff]  ;;  %v471_v36 = vld [vmem:[%s4930_s11 + $0x138] sm:$0xff] }
  0x23   : > { %3667 = vmatpush3.xpose.msk.msra.mxu1 %vm518_vm0, %v477_v11  ;;  %3594 = vmatprep.subr.msk.mxu0 %vm518_vm0, %v460_v12  ;;  %v472_v32 = vld [vmem:[%s4930_s11 + $0x140] sm:$0xff]  ;;  %v454_v37 = vld [vmem:[%s4930_s11 + $0xb0] sm:$0xff]  ;;  %v453_v41 = vld [vmem:[%s4930_s11 + $0xa8] sm:$0xff] }
  0x24   : > { %3668 = vmatprep.subr.msk.mxu1 %vm518_vm0, %v492_v13  ;;  %v486_v38 = vld [vmem:[%s4930_s11 + $0x1b0] sm:$0xff]  ;;  %v485_v42 = vld [vmem:[%s4930_s11 + $0x1a8] sm:$0xff]  ;;  %v452_v45 = vld [vmem:[%s4930_s11 + $0xa0] sm:$0xff] }
  0x25   : > { %v438_v39 = vld [vmem:[%s4930_s11 + $0x30] sm:$0xff]  ;;  %v437_v43 = vld [vmem:[%s4930_s11 + $0x28] sm:$0xff]  ;;  %v484_v46 = vld [vmem:[%s4930_s11 + $0x1a0] sm:$0xff] }
  0x26   : > { %3595 = vmatpush3.xpose.msk.msra.mxu0 %vm518_vm0, %v444_v14  ;;  %v470_v40 = vld [vmem:[%s4930_s11 + $0x130] sm:$0xff]  ;;  %v469_v44 = vld [vmem:[%s4930_s11 + $0x128] sm:$0xff]  ;;  %v436_v47 = vld [vmem:[%s4930_s11 + $0x20] sm:$0xff] }
  0x27   : > { %3669 = vmatpush3.xpose.msk.msra.mxu1 %vm518_vm0, %v476_v15  ;;  %3596 = vmatprep.subr.msk.mxu0 %vm518_vm0, %v459_v16  ;;  %v468_v48 = vld [vmem:[%s4930_s11 + $0x120] sm:$0xff]  ;;  %v451_v49 = vld [vmem:[%s4930_s11 + $0x98] sm:$0xff]  ;;  %v450_v53 = vld [vmem:[%s4930_s11 + $0x90] sm:$0xff] }
  0x28   : > { %3670 = vmatprep.subr.msk.mxu1 %vm518_vm0, %v491_v17  ;;  %v483_v50 = vld [vmem:[%s4930_s11 + $0x198] sm:$0xff]  ;;  %v482_v54 = vld [vmem:[%s4930_s11 + $0x190] sm:$0xff]  ;;  %v449_v57 = vld [vmem:[%s4930_s11 + $0x88] sm:$0xff] }
  0x29   : > { %v435_v51 = vld [vmem:[%s4930_s11 + $0x18] sm:$0xff]  ;;  %v434_v55 = vld [vmem:[%s4930_s11 + $0x10] sm:$0xff]  ;;  %v481_v58 = vld [vmem:[%s4930_s11 + $0x188] sm:$0xff] }
  0x2a   : > { %3597 = vmatpush3.xpose.msk.msra.mxu0 %vm518_vm0, %v443_v18  ;;  %v467_v52 = vld [vmem:[%s4930_s11 + $0x118] sm:$0xff]  ;;  %v466_v56 = vld [vmem:[%s4930_s11 + $0x110] sm:$0xff]  ;;  %v433_v59 = vld [vmem:[%s4930_s11 + $0x8] sm:$0xff] }
  0x2b   : > { %3671 = vmatpush3.xpose.msk.msra.mxu1 %vm518_vm0, %v475_v19  ;;  %3598 = vmatprep.subr.msk.mxu0 %vm518_vm0, %v458_v20  ;;  %v465_v60 = vld [vmem:[%s4930_s11 + $0x108] sm:$0xff]  ;;  %v448_v61 = vld [vmem:[%s4930_s11 + $0x80] sm:$0xff]  ;;  %v5080_v1 = vld [vmem:[%s5071_s29 + $0xf8] sm:$0xff] }
  0x2c   : > { %3672 = vmatprep.subr.msk.mxu1 %vm518_vm0, %v490_v21  ;;  %v480_v62 = vld [vmem:[%s4930_s11 + $0x180] sm:$0xff]  ;;  %6905 = vst [vmem:[#allocation2_spill] sm:$0xff] %v5080_v1  ;;  %v5083_v2 = vld [vmem:[%s5071_s29 + $0x1f8] sm:$0xff]  ;;  %v412_v4 = vld [vmem:[%s4979_s18 + $0x8] sm:$0xff] }
  0x2d   : > { %v432_v63 = vld [vmem:[%s4930_s11] sm:$0xff]  ;;  %6906 = vst [vmem:[#allocation3_spill] sm:$0xff] %v5083_v2  ;;  %v5089_v3 = vld [vmem:[%s5071_s29 + $0x78] sm:$0xff]  ;;  %v5094_v5 = vld [vmem:[%s5071_s29 + $0xf0] sm:$0xff] }
  0x2e   : > { %3599 = vmatpush3.xpose.msk.msra.mxu0 %vm518_vm0, %v442_v22  ;;  %v464_v0 = vld [vmem:[%s4930_s11 + $0x100] sm:$0xff]  ;;  %v5101_v6 = vld [vmem:[%s5071_s29 + $0x178] sm:$0xff]  ;;  %v413_v7 = vld [vmem:[%s4979_s18 + $0x10] sm:$0xff] }
  0x2f   : > { %3673 = vmatpush3.xpose.msk.msra.mxu1 %vm518_vm0, %v474_v23  ;;  %3600 = vmatprep.subr.msk.mxu0 %vm518_vm0, %v457_v24  ;;  %v5109_v8 = vld [vmem:[%s5071_s29 + $0x70] sm:$0xff]  ;;  %v5118_v10 = vld [vmem:[%s5071_s29 + $0xe8] sm:$0xff]  ;;  %v414_v12 = vld [vmem:[%s4979_s18 + $0x18] sm:$0xff] }
  0x30   : > { %3674 = vmatprep.subr.msk.mxu1 %vm518_vm0, %v489_v25  ;;  %v5113_v9 = vld [vmem:[%s5071_s29 + $0x1f0] sm:$0xff]  ;;  %v5130_v13 = vld [vmem:[%s5071_s29 + $0x68] sm:$0xff]  ;;  %v5139_v15 = vld [vmem:[%s5071_s29 + $0xe0] sm:$0xff] }
  0x31   : > { %v5121_v11 = vld [vmem:[%s5071_s29 + $0x170] sm:$0xff]  ;;  %v5134_v14 = vld [vmem:[%s5071_s29 + $0x1e8] sm:$0xff]  ;;  %v415_v17 = vld [vmem:[%s4979_s18 + $0x20] sm:$0xff] }
  0x32   : > { %3601 = vmatpush3.xpose.msk.msra.mxu0 %vm518_vm0, %v441_v27  ;;  %v5142_v16 = vld [vmem:[%s5071_s29 + $0x168] sm:$0xff]  ;;  %v5151_v18 = vld [vmem:[%s5071_s29 + $0x60] sm:$0xff]  ;;  %v5160_v20 = vld [vmem:[%s5071_s29 + $0xd8] sm:$0xff] }
  0x33   : > { %3675 = vmatpush3.xpose.msk.msra.mxu1 %vm518_vm0, %v473_v28  ;;  %3602 = vmatprep.subr.msk.mxu0 %vm518_vm0, %v456_v29  ;;  %v5155_v19 = vld [vmem:[%s5071_s29 + $0x1e0] sm:$0xff]  ;;  %v416_v22 = vld [vmem:[%s4979_s18 + $0x28] sm:$0xff]  ;;  %v5172_v23 = vld [vmem:[%s5071_s29 + $0x58] sm:$0xff] }
  0x34   : > { %3676 = vmatprep.subr.msk.mxu1 %vm518_vm0, %v488_v30  ;;  %v5163_v21 = vld [vmem:[%s5071_s29 + $0x160] sm:$0xff]  ;;  %v5176_v24 = vld [vmem:[%s5071_s29 + $0x1d8] sm:$0xff]  ;;  %v5181_v25 = vld [vmem:[%s5071_s29 + $0xd0] sm:$0xff] }
  0x35   : > { %v417_v27 = vld [vmem:[%s4979_s18 + $0x30] sm:$0xff]  ;;  %v5202_v30 = vld [vmem:[%s5071_s29 + $0xc8] sm:$0xff] }
  0x36   : > { %3603 = vmatpush3.xpose.msk.msra.mxu0 %vm518_vm0, %v440_v31  ;;  %v5193_v28 = vld [vmem:[%s5071_s29 + $0x50] sm:$0xff] }
  0x37   : > { %3677 = vmatpush3.xpose.msk.msra.mxu1 %vm518_vm0, %v472_v32  ;;  %3604 = vmatprep.subr.msk.mxu0 %vm518_vm0, %v455_v33  ;;  %v5197_v29 = vld [vmem:[%s5071_s29 + $0x1d0] sm:$0xff]  ;;  %v418_v32 = vld [vmem:[%s4979_s18 + $0x38] sm:$0xff]  ;;  %v5214_v33 = vld [vmem:[%s5071_s29 + $0x48] sm:$0xff] }
  0x38   : > { %3678 = vmatprep.subr.msk.mxu1 %vm518_vm0, %v487_v34  ;;  %v5205_v31 = vld [vmem:[%s5071_s29 + $0x150] sm:$0xff]  ;;  %v5218_v34 = vld [vmem:[%s5071_s29 + $0x1c8] sm:$0xff] }
  0x3a   : > { %3605 = vmatpush3.xpose.msk.msra.mxu0 %vm518_vm0, %v439_v35  ;;  %v5223_v35 = vld [vmem:[%s5071_s29 + $0xc0] sm:$0xff] }
  0x3b   : > { %3679 = vmatpush3.xpose.msk.msra.mxu1 %vm518_vm0, %v471_v36  ;;  %3606 = vmatprep.subr.msk.mxu0 %vm518_vm0, %v454_v37  ;;  %v5226_v36 = vld [vmem:[%s5071_s29 + $0x148] sm:$0xff]  ;;  %v419_v37 = vld [vmem:[%s4979_s18 + $0x40] sm:$0xff] }
  0x3c   : > { %3680 = vmatprep.subr.msk.mxu1 %vm518_vm0, %v486_v38  ;;  %v5235_v38 = vld [vmem:[%s5071_s29 + $0x40] sm:$0xff] }
  0x3e   : > { %3607 = vmatpush3.xpose.msk.msra.mxu0 %vm518_vm0, %v438_v39  ;;  %v5239_v39 = vld [vmem:[%s5071_s29 + $0x1c0] sm:$0xff] }
  0x3f   : > { %3681 = vmatpush3.xpose.msk.msra.mxu1 %vm518_vm0, %v470_v40  ;;  %3608 = vmatprep.subr.msk.mxu0 %vm518_vm0, %v453_v41  ;;  %v5244_v40 = vld [vmem:[%s5071_s29 + $0xb8] sm:$0xff]  ;;  %v5247_v41 = vld [vmem:[%s5071_s29 + $0x140] sm:$0xff] }
  0x40   : > { %3682 = vmatprep.subr.msk.mxu1 %vm518_vm0, %v485_v42  ;;  %v420_v42 = vld [vmem:[%s4979_s18 + $0x48] sm:$0xff] }
  0x42   : > { %3609 = vmatpush3.xpose.msk.msra.mxu0 %vm518_vm0, %v437_v43  ;;  %v5256_v43 = vld [vmem:[%s5071_s29 + $0x38] sm:$0xff] }
  0x43   : > { %3683 = vmatpush3.xpose.msk.msra.mxu1 %vm518_vm0, %v469_v44  ;;  %3610 = vmatprep.subr.msk.mxu0 %vm518_vm0, %v452_v45  ;;  %v5260_v44 = vld [vmem:[%s5071_s29 + $0x1b8] sm:$0xff]  ;;  %v5265_v45 = vld [vmem:[%s5071_s29 + $0xb0] sm:$0xff] }
  0x44   : > { %3684 = vmatprep.subr.msk.mxu1 %vm518_vm0, %v484_v46  ;;  %v5268_v46 = vld [vmem:[%s5071_s29 + $0x138] sm:$0xff] }
  0x46   : > { %3611 = vmatpush3.xpose.msk.msra.mxu0 %vm518_vm0, %v436_v47  ;;  %v421_v47 = vld [vmem:[%s4979_s18 + $0x50] sm:$0xff] }
  0x47   : > { %3685 = vmatpush3.xpose.msk.msra.mxu1 %vm518_vm0, %v468_v48  ;;  %3612 = vmatprep.subr.msk.mxu0 %vm518_vm0, %v451_v49  ;;  %v5277_v48 = vld [vmem:[%s5071_s29 + $0x30] sm:$0xff] }
  0x48   : > { %3686 = vmatprep.subr.msk.mxu1 %vm518_vm0, %v483_v50  ;;  %v5281_v49 = vld [vmem:[%s5071_s29 + $0x1b0] sm:$0xff]  ;;  %v5286_v50 = vld [vmem:[%s5071_s29 + $0xa8] sm:$0xff] }
  0x4a   : > { %3613 = vmatpush3.xpose.msk.msra.mxu0 %vm518_vm0, %v435_v51  ;;  %v5289_v51 = vld [vmem:[%s5071_s29 + $0x130] sm:$0xff] }
  0x4b   : > { %3687 = vmatpush3.xpose.msk.msra.mxu1 %vm518_vm0, %v467_v52  ;;  %3614 = vmatprep.subr.msk.mxu0 %vm518_vm0, %v450_v53  ;;  %v422_v52 = vld [vmem:[%s4979_s18 + $0x58] sm:$0xff]  ;;  %v5298_v53 = vld [vmem:[%s5071_s29 + $0x28] sm:$0xff] }
  0x4c   : > { %3688 = vmatprep.subr.msk.mxu1 %vm518_vm0, %v482_v54  ;;  %v5302_v54 = vld [vmem:[%s5071_s29 + $0x1a8] sm:$0xff] }
  0x4e   : > { %3615 = vmatpush3.xpose.msk.msra.mxu0 %vm518_vm0, %v434_v55  ;;  %v5307_v55 = vld [vmem:[%s5071_s29 + $0xa0] sm:$0xff] }
  0x4f   : > { %3689 = vmatpush3.xpose.msk.msra.mxu1 %vm518_vm0, %v466_v56  ;;  %3616 = vmatprep.subr.msk.mxu0 %vm518_vm0, %v449_v57  ;;  %v5310_v56 = vld [vmem:[%s5071_s29 + $0x128] sm:$0xff]  ;;  %v423_v57 = vld [vmem:[%s4979_s18 + $0x60] sm:$0xff] }
  0x50   : > { %3690 = vmatprep.subr.msk.mxu1 %vm518_vm0, %v481_v58  ;;  %v5319_v58 = vld [vmem:[%s5071_s29 + $0x20] sm:$0xff] }
  0x52   : > { %3617 = vmatpush3.xpose.msk.msra.mxu0 %vm518_vm0, %v433_v59  ;;  %v5323_v59 = vld [vmem:[%s5071_s29 + $0x1a0] sm:$0xff] }
  0x53   : > { %3691 = vmatpush3.xpose.msk.msra.mxu1 %vm518_vm0, %v465_v60  ;;  %3618 = vmatprep.subr.msk.mxu0 %vm518_vm0, %v448_v61  ;;  %v5328_v60 = vld [vmem:[%s5071_s29 + $0x98] sm:$0xff]  ;;  %v5331_v61 = vld [vmem:[%s5071_s29 + $0x120] sm:$0xff] }
  0x54   : > { %3692 = vmatprep.subr.msk.mxu1 %vm518_vm0, %v480_v62  ;;  %v424_v62 = vld [vmem:[%s4979_s18 + $0x68] sm:$0xff] }
  0x56   : > { %3619 = vmatpush3.xpose.msk.msra.mxu0 %vm518_vm0, %v432_v63  ;;  %v5340_v63 = vld [vmem:[%s5071_s29 + $0x18] sm:$0xff] }
  0x57   : > { %3693 = vmatpush3.xpose.msk.msra.mxu1 %vm518_vm0, %v464_v0  ;;  %3736 = vmatprep.subr.mxu0 %v5080_v1  ;;  %v5344_v0 = vld [vmem:[%s5071_s29 + $0x198] sm:$0xff] }
  0x58   : > { %3774 = vmatprep.subr.mxu1 %v5083_v2 }
  0x59   : > { %3621 = vmatmul.mubr.msk.f32.vlgmr.msra.gmra.mxu0 %vm518_vm0, %v4988_v26 }
  0x5a   : > { %3695 = vmatmul.mubr.msk.f32.vlgmr.msra.gmra.mxu1 %vm518_vm0, %v4988_v26  ;;  %3737 = vmatpush3.xpose.msra.mxu0 %v5089_v3  ;;  %v5184_v26 = vld [vmem:[%s5071_s29 + $0x158] sm:$0xff] }
  0x5b   : > { %3622 = vmatprep.mubr.msk.f32.mxu0 %vm518_vm0, %v412_v4  ;;  %3696 = vmatprep.mubr.msk.f32.mxu1 %vm518_vm0, %v412_v4 }
  0x5c   : > { %3738 = vmatprep.subr.mxu0 %v5094_v5  ;;  %3775 = vmatpush3.xpose.msra.mxu1 %v5101_v6 }
  0x5d   : > { %3623 = vmatmul.mubr.msk.f32.gmra.mxu0 %vm518_vm0, %v412_v4  ;;  %3776 = vmatprep.subr.mxu1 %v5113_v9 }
  0x5e   : > { %3697 = vmatmul.mubr.msk.f32.gmra.mxu1 %vm518_vm0, %v412_v4  ;;  %3624 = vmatprep.mubr.msk.f32.mxu0 %vm518_vm0, %v413_v7  ;;  %v5349_v4 = vld [vmem:[%s5071_s29 + $0x90] sm:$0xff] }
  0x5f   : > { %3698 = vmatprep.mubr.msk.f32.mxu1 %vm518_vm0, %v413_v7  ;;  %3739 = vmatpush3.xpose.msra.mxu0 %v5109_v8 }
  0x60   : > { %3740 = vmatprep.subr.mxu0 %v5118_v10  ;;  %3777 = vmatpush3.xpose.msra.mxu1 %v5121_v11 }
  0x61   : > { %3625 = vmatmul.mubr.msk.f32.gmra.mxu0 %vm518_vm0, %v413_v7  ;;  %3778 = vmatprep.subr.mxu1 %v5134_v14 }
  0x62   : > { %3699 = vmatmul.mubr.msk.f32.gmra.mxu1 %vm518_vm0, %v413_v7  ;;  %3626 = vmatprep.mubr.msk.f32.mxu0 %vm518_vm0, %v414_v12  ;;  %v5352_v7 = vld [vmem:[%s5071_s29 + $0x118] sm:$0xff] }
  0x63   : > { %3700 = vmatprep.mubr.msk.f32.mxu1 %vm518_vm0, %v414_v12  ;;  %3741 = vmatpush3.xpose.msra.mxu0 %v5130_v13 }
  0x64   : > { %3742 = vmatprep.subr.mxu0 %v5139_v15  ;;  %3779 = vmatpush3.xpose.msra.mxu1 %v5142_v16 }
  0x65   : > { %3627 = vmatmul.mubr.msk.f32.gmra.mxu0 %vm518_vm0, %v414_v12  ;;  %3780 = vmatprep.subr.mxu1 %v5155_v19 }
  0x66   : > { %3701 = vmatmul.mubr.msk.f32.gmra.mxu1 %vm518_vm0, %v414_v12  ;;  %3628 = vmatprep.mubr.msk.f32.mxu0 %vm518_vm0, %v415_v17  ;;  %v425_v12 = vld [vmem:[%s4979_s18 + $0x70] sm:$0xff] }
  0x67   : > { %3702 = vmatprep.mubr.msk.f32.mxu1 %vm518_vm0, %v415_v17  ;;  %3743 = vmatpush3.xpose.msra.mxu0 %v5151_v18 }
  0x68   : > { %3744 = vmatprep.subr.mxu0 %v5160_v20  ;;  %3781 = vmatpush3.xpose.msra.mxu1 %v5163_v21 }
  0x69   : > { %3629 = vmatmul.mubr.msk.f32.gmra.mxu0 %vm518_vm0, %v415_v17  ;;  %3782 = vmatprep.subr.mxu1 %v5176_v24 }
  0x6a   : > { %3703 = vmatmul.mubr.msk.f32.gmra.mxu1 %vm518_vm0, %v415_v17  ;;  %3630 = vmatprep.mubr.msk.f32.mxu0 %vm518_vm0, %v416_v22  ;;  %v5362_v17 = vld [vmem:[%s5071_s29 + $0x10] sm:$0xff] }
  0x6b   : > { %3704 = vmatprep.mubr.msk.f32.mxu1 %vm518_vm0, %v416_v22  ;;  %3745 = vmatpush3.xpose.msra.mxu0 %v5172_v23 }
  0x6c   : > { %3746 = vmatprep.subr.mxu0 %v5181_v25  ;;  %3783 = vmatpush3.xpose.msra.mxu1 %v5184_v26 }
  0x6d   : > { %3631 = vmatmul.mubr.msk.f32.gmra.mxu0 %vm518_vm0, %v416_v22  ;;  %3784 = vmatprep.subr.mxu1 %v5197_v29 }
  0x6e   : > { %3705 = vmatmul.mubr.msk.f32.gmra.mxu1 %vm518_vm0, %v416_v22  ;;  %3632 = vmatprep.mubr.msk.f32.mxu0 %vm518_vm0, %v417_v27  ;;  %v5365_v22 = vld [vmem:[%s5071_s29 + $0x190] sm:$0xff] }
  0x6f   : > { %3706 = vmatprep.mubr.msk.f32.mxu1 %vm518_vm0, %v417_v27  ;;  %3747 = vmatpush3.xpose.msra.mxu0 %v5193_v28 }
  0x70   : > { %3748 = vmatprep.subr.mxu0 %v5202_v30  ;;  %3785 = vmatpush3.xpose.msra.mxu1 %v5205_v31 }
  0x71   : > { %3633 = vmatmul.mubr.msk.f32.gmra.mxu0 %vm518_vm0, %v417_v27  ;;  %3786 = vmatprep.subr.mxu1 %v5218_v34 }
  0x72   : > { %3707 = vmatmul.mubr.msk.f32.gmra.mxu1 %vm518_vm0, %v417_v27  ;;  %3634 = vmatprep.mubr.msk.f32.mxu0 %vm518_vm0, %v418_v32  ;;  %v5370_v27 = vld [vmem:[%s5071_s29 + $0x110] sm:$0xff] }
  0x73   : > { %3708 = vmatprep.mubr.msk.f32.mxu1 %vm518_vm0, %v418_v32  ;;  %3749 = vmatpush3.xpose.msra.mxu0 %v5214_v33  ;;  %6907 = vst [vmem:[#allocation4_spill] sm:$0xff] %v5370_v27 }
  0x74   : > { %3750 = vmatprep.subr.mxu0 %v5223_v35  ;;  %3787 = vmatpush3.xpose.msra.mxu1 %v5226_v36 }
  0x75   : > { %3635 = vmatmul.mubr.msk.f32.gmra.mxu0 %vm518_vm0, %v418_v32  ;;  %3788 = vmatprep.subr.mxu1 %v5239_v39 }
  0x76   : > { %3709 = vmatmul.mubr.msk.f32.gmra.mxu1 %vm518_vm0, %v418_v32  ;;  %3636 = vmatprep.mubr.msk.f32.mxu0 %vm518_vm0, %v419_v37  ;;  %v5373_v32 = vld [vmem:[%s5071_s29 + $0x88] sm:$0xff] }
  0x77   : > { %3710 = vmatprep.mubr.msk.f32.mxu1 %vm518_vm0, %v419_v37  ;;  %3751 = vmatpush3.xpose.msra.mxu0 %v5235_v38  ;;  %6908 = vst [vmem:[#allocation5_spill] sm:$0xff] %v5373_v32 }
  0x78   : > { %3752 = vmatprep.subr.mxu0 %v5244_v40  ;;  %3789 = vmatpush3.xpose.msra.mxu1 %v5247_v41 }
  0x79   : > { %3637 = vmatmul.mubr.msk.f32.gmra.mxu0 %vm518_vm0, %v419_v37  ;;  %3790 = vmatprep.subr.mxu1 %v5260_v44 }
  0x7a   : > { %3711 = vmatmul.mubr.msk.f32.gmra.mxu1 %vm518_vm0, %v419_v37  ;;  %3638 = vmatprep.mubr.msk.f32.mxu0 %vm518_vm0, %v420_v42  ;;  %v426_v37 = vld [vmem:[%s4979_s18 + $0x78] sm:$0xff] }
  0x7b   : > { %3712 = vmatprep.mubr.msk.f32.mxu1 %vm518_vm0, %v420_v42  ;;  %3753 = vmatpush3.xpose.msra.mxu0 %v5256_v43 }
  0x7c   : > { %3754 = vmatprep.subr.mxu0 %v5265_v45  ;;  %3791 = vmatpush3.xpose.msra.mxu1 %v5268_v46 }
  0x7d   : > { %3639 = vmatmul.mubr.msk.f32.gmra.mxu0 %vm518_vm0, %v420_v42  ;;  %3792 = vmatprep.subr.mxu1 %v5281_v49 }
  0x7e   : > { %3713 = vmatmul.mubr.msk.f32.gmra.mxu1 %vm518_vm0, %v420_v42  ;;  %3640 = vmatprep.mubr.msk.f32.mxu0 %vm518_vm0, %v421_v47  ;;  %v5383_v42 = vld [vmem:[%s5071_s29 + $0x8] sm:$0xff] }
  0x7f   : > { %3714 = vmatprep.mubr.msk.f32.mxu1 %vm518_vm0, %v421_v47  ;;  %3755 = vmatpush3.xpose.msra.mxu0 %v5277_v48  ;;  %6909 = vst [vmem:[#allocation6_spill] sm:$0xff] %v5383_v42 }
  0x80   : > { %3756 = vmatprep.subr.mxu0 %v5286_v50  ;;  %3793 = vmatpush3.xpose.msra.mxu1 %v5289_v51 }
  0x81   : > { %3641 = vmatmul.mubr.msk.f32.gmra.mxu0 %vm518_vm0, %v421_v47  ;;  %3794 = vmatprep.subr.mxu1 %v5302_v54 }
  0x82   : > { %3715 = vmatmul.mubr.msk.f32.gmra.mxu1 %vm518_vm0, %v421_v47  ;;  %3642 = vmatprep.mubr.msk.f32.mxu0 %vm518_vm0, %v422_v52  ;;  %v5386_v47 = vld [vmem:[%s5071_s29 + $0x188] sm:$0xff] }
  0x83   : > { %3716 = vmatprep.mubr.msk.f32.mxu1 %vm518_vm0, %v422_v52  ;;  %3757 = vmatpush3.xpose.msra.mxu0 %v5298_v53  ;;  %6910 = vst [vmem:[#allocation7_spill] sm:$0xff] %v5386_v47 }
  0x84   : > { %3758 = vmatprep.subr.mxu0 %v5307_v55  ;;  %3795 = vmatpush3.xpose.msra.mxu1 %v5310_v56 }
  0x85   : > { %3643 = vmatmul.mubr.msk.f32.gmra.mxu0 %vm518_vm0, %v422_v52  ;;  %3796 = vmatprep.subr.mxu1 %v5323_v59 }
  0x86   : > { %3717 = vmatmul.mubr.msk.f32.gmra.mxu1 %vm518_vm0, %v422_v52  ;;  %3644 = vmatprep.mubr.msk.f32.mxu0 %vm518_vm0, %v423_v57  ;;  %v5391_v52 = vld [vmem:[%s5071_s29 + $0x108] sm:$0xff] }
  0x87   : > { %3718 = vmatprep.mubr.msk.f32.mxu1 %vm518_vm0, %v423_v57  ;;  %3759 = vmatpush3.xpose.msra.mxu0 %v5319_v58  ;;  %6911 = vst [vmem:[#allocation8_spill] sm:$0xff] %v5391_v52 }
  0x88   : > { %3760 = vmatprep.subr.mxu0 %v5328_v60  ;;  %3797 = vmatpush3.xpose.msra.mxu1 %v5331_v61 }
  0x89   : > { %3645 = vmatmul.mubr.msk.f32.gmra.mxu0 %vm518_vm0, %v423_v57  ;;  %3798 = vmatprep.subr.mxu1 %v5344_v0 }
  0x8a   : > { %3719 = vmatmul.mubr.msk.f32.gmra.mxu1 %vm518_vm0, %v423_v57  ;;  %3646 = vmatprep.mubr.msk.f32.mxu0 %vm518_vm0, %v424_v62  ;;  %v5394_v57 = vld [vmem:[%s5071_s29 + $0x80] sm:$0xff] }
  0x8b   : > { %3720 = vmatprep.mubr.msk.f32.mxu1 %vm518_vm0, %v424_v62  ;;  %3761 = vmatpush3.xpose.msra.mxu0 %v5340_v63  ;;  %6912 = vst [vmem:[#allocation9_spill] sm:$0xff] %v5394_v57 }
  0x8c   : > { %3762 = vmatprep.subr.mxu0 %v5349_v4  ;;  %3799 = vmatpush3.xpose.msra.mxu1 %v5352_v7 }
  0x8d   : > { %3647 = vmatmul.mubr.msk.f32.gmra.mxu0 %vm518_vm0, %v424_v62  ;;  %3800 = vmatprep.subr.mxu1 %v5365_v22 }
  0x8e   : > { %3721 = vmatmul.mubr.msk.f32.gmra.mxu1 %vm518_vm0, %v424_v62  ;;  %3648 = vmatprep.mubr.msk.f32.mxu0 %vm518_vm0, %v425_v12  ;;  %v427_v62 = vld [vmem:[%s4979_s18 + $0x80] sm:$0xff] }
  0x8f   : > { %3722 = vmatprep.mubr.msk.f32.mxu1 %vm518_vm0, %v425_v12  ;;  %3763 = vmatpush3.xpose.msra.mxu0 %v5362_v17 }
  0x90   : > { %3801 = vmatpush3.xpose.msra.mxu1 %v5370_v27  ;;  %3764 = vmatprep.subr.mxu0 %v5373_v32  ;;  %v5404_v32 = vld [vmem:[%s5071_s29] sm:$0xff] }
  0x91   : > { %3649 = vmatmul.mubr.msk.f32.gmra.mxu0 %vm518_vm0, %v425_v12  ;;  %3802 = vmatprep.subr.mxu1 %v5386_v47  ;;  %6913 = vst [vmem:[#allocation10_spill] sm:$0xff] %v5404_v32  ;;  %v5412_v27 = vld [vmem:[%s5071_s29 + $0x100] sm:$0xff] }
  0x92   : > { %3723 = vmatmul.mubr.msk.f32.gmra.mxu1 %vm518_vm0, %v425_v12  ;;  %3650 = vmatprep.mubr.msk.f32.mxu0 %vm518_vm0, %v426_v37  ;;  %v5407_v12 = vld [vmem:[%s5071_s29 + $0x180] sm:$0xff]  ;;  %6915 = vst [vmem:[#allocation12_spill] sm:$0xff] %v5412_v27 }
  0x93   : > { %3724 = vmatprep.mubr.msk.f32.mxu1 %vm518_vm0, %v426_v37  ;;  %3765 = vmatpush3.xpose.msra.mxu0 %v5383_v42  ;;  %6914 = vst [vmem:[#allocation11_spill] sm:$0xff] %v5407_v12  ;;  %v428_v42 = vld [vmem:[%s4979_s18 + $0x88] sm:$0xff] }
  0x94   : > { %3803 = vmatpush3.xpose.msra.mxu1 %v5391_v52  ;;  %3766 = vmatprep.subr.mxu0 %v5394_v57  ;;  %v429_v57 = vld [vmem:[%s4979_s18 + $0x90] sm:$0xff] }
  0x95   : > { %3651 = vmatmul.mubr.msk.f32.gmra.mxu0 %vm518_vm0, %v426_v37  ;;  %3804 = vmatprep.subr.mxu1 %v5407_v12 }
  0x96   : > { %3725 = vmatmul.mubr.msk.f32.gmra.mxu1 %vm518_vm0, %v426_v37  ;;  %3652 = vmatprep.mubr.msk.f32.mxu0 %vm518_vm0, %v427_v62  ;;  %v498_v37 = vlaneseq }
  0x97   : > { %3726 = vmatprep.mubr.msk.f32.mxu1 %vm518_vm0, %v427_v62  ;;  %3767 = vmatpush3.xpose.msra.mxu0 %v5404_v32  ;;  %v6796_v32 = vmov 0  }
  0x98   : > { %3805 = vmatpush3.xpose.msra.mxu1 %v5412_v27  ;;  %3812 = vmatprep.subr.mxu0 %v5080_v1  ;;  %v5429_v27 = vshrl.u32 %v498_v37, 7  ;;  %v5452_v37 = vld [vmem:[%s5438_s9 + $0x10] sm:$0xff]  ;;  %v431_v1 = vld [vmem:[%s4979_s18 + $0xa0] sm:$0xff] }
  0x99   : > { %3653 = vmatmul.mubr.msk.f32.gmra.mxu0 %vm518_vm0, %v427_v62  ;;  %3850 = vmatprep.subr.mxu1 %v5083_v2  ;;  %6918 = vst [vmem:[#allocation15_spill] sm:$0xff] %v5452_v37  ;;  %v5455_v2 = vld [vmem:[%s5444_s12] sm:$0x1]  ;;  %vm1476_vm1 = vcmp.gt.s32.totalorder %v5452_v37, 0 }
  0x9a   : > { %3727 = vmatmul.mubr.msk.f32.gmra.mxu1 %vm518_vm0, %v427_v62  ;;  %3654 = vmatprep.mubr.msk.f32.mxu0 %vm518_vm0, %v428_v42  ;;  %6916 = vst [vmem:[#allocation13_spill] sm:$0xff] %v5429_v27  ;;  %v430_v62 = vld [vmem:[%s4979_s18 + $0x98] sm:$0xff]  ;;  %6919 = vst [vmem:[#allocation16_spill] sm:$0xff] %v5455_v2  ;;  %vm1477_vm2 = vcmp.gt.s32.totalorder %v5455_v2, 0  ;;  %vm1759_vm3 = vcmp.gt.s32.totalorder %v5455_v2, 1  ;;  %v5480_v2 = vld [vmem:[%s5438_s9] sm:$0xff]  ;;  %s404_s18 = sadd.s32 %s3413_s17, %s3412_s16 }
  0x9b   : > { %3728 = vmatprep.mubr.msk.f32.mxu1 %vm518_vm0, %v428_v42  ;;  %4316 = vset.pattern.permute.xlu1 %v6796_v32  ;;  %6920 = vst [vmem:[#allocation17_spill] sm:$0xff] %v5480_v2  ;;  %vm1474_vm4 = vcmp.gt.s32.totalorder %v5480_v2, 0  ;;  %vm1756_vm6 = vcmp.gt.s32.totalorder %v5480_v2, 1  ;;  %s405_s30 = scalar_lea.vmem %s6772_s5, %s404_s18 }
  0x9c   : > { %4315 = vset.pattern.permute.xlu0 %v6796_v32 }
  0x9d   : > { %3655 = vmatmul.mubr.msk.f32.gmra.mxu0 %vm518_vm0, %v428_v42 }
  0x9e   : > { %3729 = vmatmul.mubr.msk.f32.gmra.mxu1 %vm518_vm0, %v428_v42  ;;  %3656 = vmatprep.mubr.msk.f32.mxu0 %vm518_vm0, %v429_v57  ;;  %v5449_v42 = vsub.s32 0, %v5429_v27  ;;  %v6802_v27 = vmov -inf  }
  0x9f   : > { %3730 = vmatprep.mubr.msk.f32.mxu1 %vm518_vm0, %v429_v57  ;;  %v1478_v12 = vsel %vm1477_vm2, 0.0, %v6802_v27  ;;  %v1760_v52 = vsel %vm1759_vm3, 0.0, %v6802_v27  ;;  %v4845_v27 = vmov 0.0  }
  0xa0   : > { %6917 = vst [vmem:[#allocation14_spill] sm:$0xff] %v5449_v42  ;;  %v1498_v37 = vrot.slane %v1478_v12, %v5449_v42 }
  0xa1   : > { %3657 = vmatmul.mubr.msk.f32.gmra.mxu0 %vm518_vm0, %v429_v57 }
  0xa2   : > { %3731 = vmatmul.mubr.msk.f32.gmra.mxu1 %vm518_vm0, %v429_v57  ;;  %3658 = vmatprep.mubr.msk.f32.mxu0 %vm518_vm0, %v430_v62  ;;  %v1481_v57 = vsel %vm1476_vm1, 1, %v6796_v32  ;;  %v1780_v32 = vrot.slane %v1760_v52, %v5449_v42 }
  0xa3   : > { %3732 = vmatprep.mubr.msk.f32.mxu1 %vm518_vm0, %v430_v62  ;;  %1489 = vperm.xlu1 %4316, %v1481_v57   ;;  %v6921_v57 = vmov 0  }
  0xa4   : > { %v4317_v47 = vpack.i.bf16 %v1780_v32, %v1498_v37  ;;  %v1479_v12 = vsel %vm1474_vm4, 1, %v6921_v57 }
  0xa5   : > { %3659 = vmatmul.mubr.msk.f32.gmra.mxu0 %vm518_vm0, %v430_v62  ;;  %1483 = vperm.xlu0 %4315, %v1479_v12  }
  0xa6   : > { %3733 = vmatmul.mubr.msk.f32.gmra.mxu1 %vm518_vm0, %v430_v62  ;;  %3660 = vmatprep.mubr.msk.f32.mxu0 %vm518_vm0, %v431_v1  ;;  %v5487_v62 = vld [vmem:[%s5438_s9 + $0x8] sm:$0xff] }
  0xa7   : > { %3734 = vmatprep.mubr.msk.f32.mxu1 %vm518_vm0, %v431_v1  ;;  %6922 = vst [vmem:[#allocation18_spill] sm:$0xff] %v5487_v62  ;;  %4318 = vperm.xlu1 %4316, %v4317_v47   ;;  %vm1475_vm5 = vcmp.gt.s32.totalorder %v5487_v62, 0  ;;  %vm1757_vm7 = vcmp.gt.s32.totalorder %v5487_v62, 1 }
  0xa8   : > { %v1480_v52 = vsel %vm1475_vm5, 1, %v6921_v57 }
  0xa9   : > { %3661 = vmatmul.mubr.msk.f32.gmra.mxu0 %vm518_vm0, %v431_v1  ;;  %1486 = vperm.xlu0 %4315, %v1480_v52  }
  0xaa   : > { %3735 = vmatmul.mubr.msk.f32.gmra.mxu1 %vm518_vm0, %v431_v1  ;;  %3768 = vmatprep.mubr.f32.mxu0 %v4845_v27  ;;  %v6923_v1 = vld [vmem:[#allocation4_spill] sm:$0xff] }
  0xab   : > { %3806 = vmatprep.mubr.f32.mxu1 %v4845_v27 }
  0xad   : > { %3769 = vmatmul.mubr.f32.vlgmr.msra.gmra.mxu0 %v4845_v27 }
  0xae   : > { %3807 = vmatmul.mubr.f32.vlgmr.msra.gmra.mxu1 %v4845_v27  ;;  %3770 = vmatprep.mubr.f32.mxu0 %v4845_v27 }
  0xaf   : > { %3808 = vmatprep.mubr.f32.mxu1 %v4845_v27  ;;  %3813 = vmatpush3.xpose.msra.mxu0 %v5089_v3  ;;  %v6924_v3 = vld [vmem:[#allocation5_spill] sm:$0xff] }
  0xb0   : > { %3851 = vmatpush3.xpose.msra.mxu1 %v5101_v6  ;;  %3814 = vmatprep.subr.mxu0 %v5094_v5  ;;  %v6925_v5 = vld [vmem:[#allocation7_spill] sm:$0xff]  ;;  %v6926_v6 = vld [vmem:[#allocation6_spill] sm:$0xff] }
  0xb1   : > { %3771 = vmatmul.mubr.f32.gmra.mxu0 %v4845_v27  ;;  %3852 = vmatprep.subr.mxu1 %v5113_v9  ;;  %v6928_v9 = vld [vmem:[#allocation9_spill] sm:$0xff] }
  0xb2   : > { %3809 = vmatmul.mubr.f32.gmra.mxu1 %v4845_v27  ;;  %3772 = vmatprep.mubr.f32.mxu0 %v4845_v27 }
  0xb3   : > { %3810 = vmatprep.mubr.f32.mxu1 %v4845_v27  ;;  %3815 = vmatpush3.xpose.msra.mxu0 %v5109_v8  ;;  %v6927_v8 = vld [vmem:[#allocation8_spill] sm:$0xff] }
  0xb4   : > { %3853 = vmatpush3.xpose.msra.mxu1 %v5121_v11  ;;  %3816 = vmatprep.subr.mxu0 %v5118_v10  ;;  %v6929_v10 = vld [vmem:[#allocation11_spill] sm:$0xff]  ;;  %v6930_v11 = vld [vmem:[#allocation10_spill] sm:$0xff] }
  0xb5   : > { %3773 = vmatmul.mubr.f32.gmra.mxu0 %v4845_v27  ;;  %3854 = vmatprep.subr.mxu1 %v5134_v14  ;;  %v6932_v14 = vld [vmem:[#allocation2_spill] sm:$0xff] }
  0xb6   : > { %3811 = vmatmul.mubr.f32.gmra.mxu1 %v4845_v27 }
  0xb7   : > { %3817 = vmatpush3.xpose.msra.mxu0 %v5130_v13  ;;  %v6931_v13 = vld [vmem:[#allocation12_spill] sm:$0xff] }
  0xb8   : > { %3855 = vmatpush3.xpose.msra.mxu1 %v5142_v16  ;;  %3818 = vmatprep.subr.mxu0 %v5139_v15  ;;  %v6933_v15 = vld [vmem:[#allocation3_spill] sm:$0xff] }
  0xb9   : > { %3856 = vmatprep.subr.mxu1 %v5155_v19 }
  0xbb   : > { %3819 = vmatpush3.xpose.msra.mxu0 %v5151_v18 }
  0xbc   : > { %3857 = vmatpush3.xpose.msra.mxu1 %v5163_v21  ;;  %3820 = vmatprep.subr.mxu0 %v5160_v20 }
  0xbd   : > { %3858 = vmatprep.subr.mxu1 %v5176_v24 }
  0xbf   : > { %3821 = vmatpush3.xpose.msra.mxu0 %v5172_v23 }
  0xc0   : > { %3859 = vmatpush3.xpose.msra.mxu1 %v5184_v26  ;;  %3822 = vmatprep.subr.mxu0 %v5181_v25 }
  0xc1   : > { %3860 = vmatprep.subr.mxu1 %v5197_v29 }
  0xc3   : > { %3823 = vmatpush3.xpose.msra.mxu0 %v5193_v28 }
  0xc4   : > { %3861 = vmatpush3.xpose.msra.mxu1 %v5205_v31  ;;  %3824 = vmatprep.subr.mxu0 %v5202_v30 }
  0xc5   : > { %3862 = vmatprep.subr.mxu1 %v5218_v34 }
  0xc7   : > { %3825 = vmatpush3.xpose.msra.mxu0 %v5214_v33 }
  0xc8   : > { %3863 = vmatpush3.xpose.msra.mxu1 %v5226_v36  ;;  %3826 = vmatprep.subr.mxu0 %v5223_v35 }
  0xc9   : > { %3864 = vmatprep.subr.mxu1 %v5239_v39 }
  0xcb   : > { %3827 = vmatpush3.xpose.msra.mxu0 %v5235_v38 }
  0xcc   : > { %3865 = vmatpush3.xpose.msra.mxu1 %v5247_v41  ;;  %3828 = vmatprep.subr.mxu0 %v5244_v40 }
  0xcd   : > { %3866 = vmatprep.subr.mxu1 %v5260_v44 }
  0xcf   : > { %3829 = vmatpush3.xpose.msra.mxu0 %v5256_v43 }
  0xd0   : > { %3867 = vmatpush3.xpose.msra.mxu1 %v5268_v46  ;;  %3830 = vmatprep.subr.mxu0 %v5265_v45 }
  0xd1   : > { %3868 = vmatprep.subr.mxu1 %v5281_v49 }
  0xd3   : > { %3831 = vmatpush3.xpose.msra.mxu0 %v5277_v48 }
  0xd4   : > { %3869 = vmatpush3.xpose.msra.mxu1 %v5289_v51  ;;  %3832 = vmatprep.subr.mxu0 %v5286_v50 }
  0xd5   : > { %3870 = vmatprep.subr.mxu1 %v5302_v54 }
  0xd7   : > { %3833 = vmatpush3.xpose.msra.mxu0 %v5298_v53 }
  0xd8   : > { %3871 = vmatpush3.xpose.msra.mxu1 %v5310_v56  ;;  %3834 = vmatprep.subr.mxu0 %v5307_v55 }
  0xd9   : > { %3872 = vmatprep.subr.mxu1 %v5323_v59 }
  0xdb   : > { %3835 = vmatpush3.xpose.msra.mxu0 %v5319_v58 }
  0xdc   : > { %3873 = vmatpush3.xpose.msra.mxu1 %v5331_v61  ;;  %3836 = vmatprep.subr.mxu0 %v5328_v60 }
  0xdd   : > { %3874 = vmatprep.subr.mxu1 %v5344_v0 }
  0xdf   : > { %3837 = vmatpush3.xpose.msra.mxu0 %v5340_v63 }
  0xe0   : > { %3875 = vmatpush3.xpose.msra.mxu1 %v5352_v7  ;;  %3838 = vmatprep.subr.mxu0 %v5349_v4 }
  0xe1   : > { %3876 = vmatprep.subr.mxu1 %v5365_v22 }
  0xe3   : > { %3839 = vmatpush3.xpose.msra.mxu0 %v5362_v17 }
  0xe4   : > { %3877 = vmatpush3.xpose.msra.mxu1 %v6923_v1  ;;  %3840 = vmatprep.subr.mxu0 %v6924_v3 }
  0xe5   : > { %3878 = vmatprep.subr.mxu1 %v6925_v5 }
  0xe7   : > { %3841 = vmatpush3.xpose.msra.mxu0 %v6926_v6 }
  0xe8   : > { %3879 = vmatpush3.xpose.msra.mxu1 %v6927_v8  ;;  %3842 = vmatprep.subr.mxu0 %v6928_v9 }
  0xe9   : > { %3880 = vmatprep.subr.mxu1 %v6929_v10 }
  0xeb   : > { %3843 = vmatpush3.xpose.msra.mxu0 %v6930_v11 }
  0xec   : > { %3881 = vmatpush3.xpose.msra.mxu1 %v6931_v13  ;;  %3888 = vmatprep.subr.mxu0 %v6932_v14 }
  0xed   : > { %3926 = vmatprep.subr.mxu1 %v6933_v15 }
 0x119   : > { %v5555_v16 = vpop.f32.mrf.mxu0 }
 0x11a   : > { %v5557_v18 = vpop.f32.mrf.mxu1 }
 0x11b   : > { %v5559_v19 = vpop.f32.mrf.mxu0 }
 0x11c   : > { %v5561_v20 = vpop.f32.mrf.mxu1 }
 0x11d   : > { %v5563_v21 = vpop.f32.mrf.mxu0 }
 0x11e   : > { %v5565_v23 = vpop.f32.mrf.mxu1 }
 0x11f   : > { %v5567_v24 = vpop.f32.mrf.mxu0 }
 0x120   : > { %v5569_v25 = vpop.f32.mrf.mxu1 }
 0x121   : > { %v5571_v26 = vpop.f32.mrf.mxu0 }
 0x122   : > { %v5573_v28 = vpop.f32.mrf.mxu1 }
 0x123   : > { %v5575_v29 = vpop.f32.mrf.mxu0 }
 0x124   : > { %v5577_v30 = vpop.f32.mrf.mxu1 }
 0x125   : > { %v5579_v31 = vpop.f32.mrf.mxu0 }
 0x126   : > { %6934 = vst [vmem:[#allocation4_spill] sm:$0xff] %v5579_v31  ;;  %v5581_v33 = vpop.f32.mrf.mxu1 }
 0x127   : > { %6935 = vst [vmem:[#allocation5_spill] sm:$0xff] %v5581_v33  ;;  %v5583_v34 = vpop.f32.mrf.mxu0  ;;  %v6946_v33 = vld [vmem:[#allocation15_spill] sm:$0xff] }
 0x128   : > { %6936 = vst [vmem:[#allocation7_spill] sm:$0xff] %v5583_v34  ;;  %v5585_v35 = vpop.f32.mrf.mxu1  ;;  %vm1758_vm8 = vcmp.gt.s32.totalorder %v6946_v33, 1 }
 0x129   : > { %6937 = vst [vmem:[#allocation6_spill] sm:$0xff] %v5585_v35  ;;  %v5587_v27 = vpop.f32.mrf.mxu0  ;;  %v1762_v35 = vsel %vm1757_vm7, 1, %v6921_v57 }
 0x12a   : > { %6938 = vst [vmem:[#allocation8_spill] sm:$0xff] %v5587_v27  ;;  %v5589_v32 = vpop.f32.mrf.mxu1  ;;  %1768 = vperm.xlu1 %4316, %v1762_v35  }
 0x12b   : > { %6939 = vst [vmem:[#allocation2_spill] sm:$0xff] %v5589_v32  ;;  %v5591_v47 = vpop.f32.mrf.mxu0  ;;  %v1761_v32 = vsel %vm1756_vm6, 1, %v6921_v57 }
 0x12c   : > { %6940 = vst [vmem:[#allocation3_spill] sm:$0xff] %v5591_v47  ;;  %v5593_v37 = vpop.f32.mrf.mxu1  ;;  %1765 = vperm.xlu0 %4315, %v1761_v32  }
 0x12d   : > { %6941 = vst [vmem:[#allocation19_spill] sm:$0xff] %v5593_v37  ;;  %v5595_v12 = vpop.f32.mrf.mxu0 }
 0x12e   : > { %6942 = vst [vmem:[#allocation20_spill] sm:$0xff] %v5595_v12  ;;  %v5597_v52 = vpop.f32.mrf.mxu1 }
 0x12f   : > { %6943 = vst [vmem:[#allocation21_spill] sm:$0xff] %v5597_v52  ;;  %v5599_v14 = vpop.f32.mrf.mxu0  ;;  %v1763_v52 = vsel %vm1758_vm8, 1, %v6921_v57 }
 0x130   : > { %6944 = vst [vmem:[#allocation22_spill] sm:$0xff] %v5599_v14  ;;  %v5601_v15 = vpop.f32.mrf.mxu1  ;;  %1771 = vperm.xlu0 %4315, %v1763_v52  }
 0x131   : > { %6945 = vst [vmem:[#allocation23_spill] sm:$0xff] %v5601_v15  ;;  %v5608_v47 = vpop.f32.mrf.mxu0 }
 0x132   : > { %6947 = vst [vmem:[#allocation24_spill] sm:$0xff] %v5608_v47  ;;  %v5610_v37 = vpop.f32.mrf.mxu1 }
 0x133   : > { %6948 = vst [vmem:[#allocation25_spill] sm:$0xff] %v5610_v37  ;;  %v5613_v14 = vpop.f32.mrf.mxu0 }
 0x134   : > { %6949 = vst [vmem:[#allocation26_spill] sm:$0xff] %v5613_v14  ;;  %v5615_v15 = vpop.f32.mrf.mxu1 }
 0x135   : > { %6950 = vst [vmem:[#allocation27_spill] sm:$0xff] %v5615_v15  ;;  %v5617_v12 = vpop.f32.mrf.mxu0 }
 0x136   : > { %6951 = vst [vmem:[#allocation28_spill] sm:$0xff] %v5617_v12  ;;  %v5619_v27 = vpop.f32.mrf.mxu1 }
 0x137   : > { %6952 = vst [vmem:[#allocation29_spill] sm:$0xff] %v5619_v27  ;;  %v5621_v34 = vpop.f32.mrf.mxu0 }
 0x138   : > { %6953 = vst [vmem:[#allocation30_spill] sm:$0xff] %v5621_v34  ;;  %v5623_v31 = vpop.f32.mrf.mxu1 }
 0x139   : > { %6954 = vst [vmem:[#allocation31_spill] sm:$0xff] %v5623_v31  ;;  %v5625_v47 = vpop.f32.mrf.mxu0 }
 0x13a   : > { %6955 = vst [vmem:[#allocation32_spill] sm:$0xff] %v5625_v47  ;;  %v5627_v37 = vpop.f32.mrf.mxu1 }
 0x13b   : > { %6956 = vst [vmem:[#allocation33_spill] sm:$0xff] %v5627_v37  ;;  %v5629_v35 = vpop.f32.mrf.mxu0 }
 0x13c   : > { %6957 = vst [vmem:[#allocation34_spill] sm:$0xff] %v5629_v35  ;;  %v5631_v32 = vpop.f32.mrf.mxu1 }
 0x13d   : > { %6958 = vst [vmem:[#allocation35_spill] sm:$0xff] %v5631_v32  ;;  %v5633_v14 = vpop.f32.mrf.mxu0 }
 0x13e   : > { %6959 = vst [vmem:[#allocation36_spill] sm:$0xff] %v5633_v14  ;;  %v5635_v15 = vpop.f32.mrf.mxu1 }
 0x13f   : > { %6960 = vst [vmem:[#allocation37_spill] sm:$0xff] %v5635_v15  ;;  %v5637_v12 = vpop.f32.mrf.mxu0 }
 0x140   : > { %6961 = vst [vmem:[#allocation38_spill] sm:$0xff] %v5637_v12  ;;  %v5639_v27 = vpop.f32.mrf.mxu1 }
 0x141   : > { %6962 = vst [vmem:[#allocation39_spill] sm:$0xff] %v5639_v27  ;;  %v5641_v52 = vpop.f32.mrf.mxu0 }
 0x142   : > { %6963 = vst [vmem:[#allocation40_spill] sm:$0xff] %v5641_v52  ;;  %v5643_v34 = vpop.f32.mrf.mxu1 }
 0x143   : > { %6964 = vst [vmem:[#allocation41_spill] sm:$0xff] %v5643_v34  ;;  %v5645_v31 = vpop.f32.mrf.mxu0 }
 0x144   : > { %6965 = vst [vmem:[#allocation42_spill] sm:$0xff] %v5645_v31  ;;  %v5647_v47 = vpop.f32.mrf.mxu1 }
 0x145   : > { %6966 = vst [vmem:[#allocation43_spill] sm:$0xff] %v5647_v47  ;;  %v5649_v37 = vpop.f32.mrf.mxu0 }
 0x146   : > { %6967 = vst [vmem:[#allocation44_spill] sm:$0xff] %v5649_v37  ;;  %v5651_v35 = vpop.f32.mrf.mxu1 }
 0x147   : > { %6968 = vst [vmem:[#allocation45_spill] sm:$0xff] %v5651_v35  ;;  %v5653_v32 = vpop.f32.mrf.mxu0 }
 0x148   : > { %6969 = vst [vmem:[#allocation46_spill] sm:$0xff] %v5653_v32  ;;  %v5655_v14 = vpop.f32.mrf.mxu1 }
 0x149   : > { %6970 = vst [vmem:[#allocation47_spill] sm:$0xff] %v5655_v14  ;;  %v5657_v15 = vpop.f32.mrf.mxu0 }
 0x14a   : > { %6971 = vst [vmem:[#allocation48_spill] sm:$0xff] %v5657_v15  ;;  %v5659_v12 = vpop.f32.mrf.mxu1 }
 0x14b   : > { %6972 = vst [vmem:[#allocation49_spill] sm:$0xff] %v5659_v12  ;;  %v5661_v27 = vpop.f32.mrf.mxu0 }
 0x14c   : > { %6973 = vst [vmem:[#allocation50_spill] sm:$0xff] %v5661_v27  ;;  %v5663_v52 = vpop.f32.mrf.mxu1 }
 0x14d   : > { %6974 = vst [vmem:[#allocation51_spill] sm:$0xff] %v5663_v52  ;;  %v5665_v34 = vpop.f32.mrf.mxu0 }
 0x14e   : > { %6975 = vst [vmem:[#allocation52_spill] sm:$0xff] %v5665_v34  ;;  %v5667_v47 = vpop.f32.mrf.mxu1 }
 0x14f   : > { %6976 = vst [vmem:[#allocation53_spill] sm:$0xff] %v5667_v47  ;;  %v5669_v37 = vpop.f32.mrf.mxu0 }
 0x150   : > { %6977 = vst [vmem:[#allocation54_spill] sm:$0xff] %v5669_v37  ;;  %v5671_v35 = vpop.f32.mrf.mxu1 }
 0x151   : > { %6978 = vst [vmem:[#allocation55_spill] sm:$0xff] %v5671_v35  ;;  %v5673_v32 = vpop.f32.mrf.mxu0 }
 0x152   : > { %6979 = vst [vmem:[#allocation56_spill] sm:$0xff] %v5673_v32  ;;  %v5675_v14 = vpop.f32.mrf.mxu1 }
 0x153   : > { %6980 = vst [vmem:[#allocation57_spill] sm:$0xff] %v5675_v14  ;;  %v5677_v15 = vpop.f32.mrf.mxu0 }
 0x154   : > { %6981 = vst [vmem:[#allocation58_spill] sm:$0xff] %v5677_v15  ;;  %v5679_v12 = vpop.f32.mrf.mxu1 }
 0x155   : > { %6982 = vst [vmem:[#allocation59_spill] sm:$0xff] %v5679_v12  ;;  %v5681_v27 = vpop.f32.mrf.mxu0 }
 0x156   : > { %6983 = vst [vmem:[#allocation60_spill] sm:$0xff] %v5681_v27  ;;  %v5683_v52 = vpop.f32.mrf.mxu1 }
 0x157   : > { %6984 = vst [vmem:[#allocation61_spill] sm:$0xff] %v5683_v52  ;;  %v5685_v34 = vpop.f32.mrf.mxu0 }
 0x158   : > { %6985 = vst [vmem:[#allocation62_spill] sm:$0xff] %v5685_v34  ;;  %v5687_v47 = vpop.f32.mrf.mxu1 }
 0x159   : > { %6986 = vst [vmem:[#allocation63_spill] sm:$0xff] %v5687_v47  ;;  %v5689_v31 = vpop.f32.mrf.mxu0 }
 0x15a   : > { %6987 = vst [vmem:[#allocation64_spill] sm:$0xff] %v5689_v31  ;;  %v5691_v37 = vpop.f32.mrf.mxu1 }
 0x15b   : > { %6988 = vst [vmem:[#allocation65_spill] sm:$0xff] %v5691_v37  ;;  %v5693_v35 = vpop.f32.mrf.mxu0 }
 0x15c   : > { %6989 = vst [vmem:[#allocation66_spill] sm:$0xff] %v5693_v35  ;;  %v5695_v32 = vpop.f32.mrf.mxu1 }
 0x15d   : > { %6990 = vst [vmem:[#allocation67_spill] sm:$0xff] %v5695_v32  ;;  %v5699_v14 = vpop.f32.mrf.mxu0 }
 0x15e   : > { %6991 = vst [vmem:[#allocation68_spill] sm:$0xff] %v5699_v14  ;;  %v5701_v12 = vpop.f32.mrf.mxu1  ;;  %v496_v14 = vld [vmem:[%s405_s30] sm:$0xf] }
 0x15f   : > { %6992 = vst [vmem:[#allocation69_spill] sm:$0xff] %v5701_v12  ;;  %v5703_v52 = vpop.f32.mrf.mxu0 }
 0x160   : > { %6993 = vst [vmem:[#allocation70_spill] sm:$0xff] %v5703_v52  ;;  %v5705_v34 = vpop.f32.mrf.mxu1  ;;  %v7001_v52 = vld [vmem:[#allocation13_spill] sm:$0xff] }
 0x161   : > { %6994 = vst [vmem:[#allocation71_spill] sm:$0xff] %v5705_v34  ;;  %v5707_v47 = vpop.f32.mrf.mxu0  ;;  %v504_v27 = vsub.s32 1, %v7001_v52  ;;  %v512_v2 = vsub.s32 3, %v7001_v52 }
 0x162   : > { %6995 = vst [vmem:[#allocation72_spill] sm:$0xff] %v5707_v47  ;;  %v5709_v31 = vpop.f32.mrf.mxu1 }
 0x163   : > { %6996 = vst [vmem:[#allocation73_spill] sm:$0xff] %v5709_v31  ;;  %v5714_v37 = vpop.f32.mrf.mxu0  ;;  %v5728_v31 = vrot.slane %v496_v14, %v5449_v42 }
 0x164   : > { %6997 = vst [vmem:[#allocation74_spill] sm:$0xff] %v5714_v37  ;;  %v5716_v32 = vpop.f32.mrf.mxu1  ;;  %v5734_v37 = vrot.slane %v496_v14, %v504_v27 }
 0x165   : > { %6998 = vst [vmem:[#allocation75_spill] sm:$0xff] %v5716_v32  ;;  %v5718_v35 = vpop.f32.mrf.mxu0  ;;  %v847_v27 = vadd.f32 %v5563_v21, %v5728_v31  ;;  %v853_v9 = vadd.f32 %v5571_v26, %v5728_v31 }
 0x166   : > { %6999 = vst [vmem:[#allocation76_spill] sm:$0xff] %v5718_v35  ;;  %v5720_v12 = vpop.f32.mrf.mxu1 }
 0x167   : > { %7000 = vst [vmem:[#allocation77_spill] sm:$0xff] %v5720_v12  ;;  %v5723_v34 = vpop.f32.mrf.mxu0  ;;  %v841_v12 = vadd.f32 %v5555_v16, %v5728_v31  ;;  %v849_v16 = vadd.f32 %v5567_v24, %v5734_v37 }
 0x168   : > { %7002 = vst [vmem:[#allocation13_spill] sm:$0xff] %v5723_v34  ;;  %v5725_v47 = vpop.f32.mrf.mxu1 }
 0x169   : > { %7003 = vst [vmem:[#allocation78_spill] sm:$0xff] %v5725_v47  ;;  %v5730_v15 = vpop.f32.mrf.mxu0  ;;  %v843_v47 = vadd.f32 %v5559_v19, %v5734_v37 }
 0x16a   : > { %7004 = vst [vmem:[#allocation79_spill] sm:$0xff] %v5730_v15  ;;  %v5732_v33 = vpop.f32.mrf.mxu1 }
 0x16b   : > { %7005 = vst [vmem:[#allocation80_spill] sm:$0xff] %v5732_v33  ;;  %v5736_v32 = vpop.f32.mrf.mxu0 }
 0x16c   : > { %7006 = vst [vmem:[#allocation81_spill] sm:$0xff] %v5736_v32  ;;  %v5738_v35 = vpop.f32.mrf.mxu1 }
 0x16d   : > { %7007 = vst [vmem:[#allocation82_spill] sm:$0xff] %v5738_v35  ;;  %v1290_v57 = vpop.f32.mrf.mxu0  ;;  %v508_v35 = vsub.s32 2, %v7001_v52  ;;  %v855_v52 = vadd.f32 %v5575_v29, %v5734_v37 }
 0x16e   : > { %v1373_v34 = vpop.f32.mrf.mxu1  ;;  %v1390_v42 = vadd.f32 %v1290_v57, %v841_v12  ;;  %v5750_v57 = vrot.slane %v496_v14, %v512_v2 }
 0x16f   : > { %v1292_v15 = vpop.f32.mrf.mxu0 }
 0x170   : > { %v1375_v62 = vpop.f32.mrf.mxu1  ;;  %v3521_v33 = vmul.f32 -1.442695, %v1390_v42  ;;  %v1391_v32 = vadd.f32 %v1292_v15, %v843_v47  ;;  %v5754_v47 = vrot.slane %v496_v14, %v508_v35  ;;  %v1034_v2 = vadd.f32 %v5561_v20, %v5750_v57 }
 0x171   : > { %v1296_v13 = vpop.f32.mrf.mxu0  ;;  %v1040_v29 = vadd.f32 %v5569_v25, %v5750_v57 }
 0x172   : > { %4332 = vpow2.f32 %v3521_v33  ;;  %v3524_v11 = vmul.f32 -1.442695, %v1391_v32  ;;  %v1394_v10 = vadd.f32 %v1296_v13, %v847_v27  ;;  %v1379_v19 = vpop.f32.mrf.mxu1 }
 0x173   : > { %v1298_v12 = vpop.f32.mrf.mxu0 }
 0x174   : > { %4334 = vpow2.f32 %v3524_v11  ;;  %v3522_v21 = vmul.f32 -1.442695, %v1394_v10  ;;  %v1395_v42 = vadd.f32 %v1298_v12, %v849_v16  ;;  %v1381_v33 = vpop.f32.mrf.mxu1  ;;  %v1393_v11 = vadd.f32 %v1375_v62, %v1034_v2 }
 0x175   : > { %v1302_v15 = vpop.f32.mrf.mxu0  ;;  %v1032_v10 = vadd.f32 %v5557_v18, %v5754_v47  ;;  %v1397_v12 = vadd.f32 %v1381_v33, %v1040_v29  ;;  %v1046_v62 = vadd.f32 %v5577_v30, %v5750_v57 }
 0x176   : > { %4336 = vpow2.f32 %v3522_v21  ;;  %v3525_v24 = vmul.f32 -1.442695, %v1395_v42  ;;  %v1398_v13 = vadd.f32 %v1302_v15, %v853_v9  ;;  %v1385_v14 = vpop.f32.mrf.mxu1  ;;  %v1038_v9 = vadd.f32 %v5565_v23, %v5754_v47 }
 0x177   : > { %v1304_v32 = vpop.f32.mrf.mxu0  ;;  %v1392_v16 = vadd.f32 %v1373_v34, %v1032_v10  ;;  %v3527_v20 = vmul.f32 -1.442695, %v1393_v11  ;;  %v3528_v25 = vmul.f32 -1.442695, %v1397_v12 }
 0x178   : > { %4338 = vpow2.f32 %v3525_v24  ;;  %v3523_v27 = vmul.f32 -1.442695, %v1398_v13  ;;  %v1399_v26 = vadd.f32 %v1304_v32, %v855_v52  ;;  %v1387_v21 = vpop.f32.mrf.mxu1  ;;  %v1396_v15 = vadd.f32 %v1379_v19, %v1038_v9 }
 0x179   : > { %v1044_v24 = vadd.f32 %v5573_v28, %v5754_v47  ;;  %v1401_v34 = vadd.f32 %v1387_v21, %v1046_v62 }
 0x17a   : > { %4340 = vpow2.f32 %v3523_v27  ;;  %v3526_v35 = vmul.f32 -1.442695, %v1399_v26 }
 0x17b   : > { %v1400_v33 = vadd.f32 %v1385_v14, %v1044_v24  ;;  %v3529_v30 = vmul.f32 -1.442695, %v1401_v34 }
 0x17c   : > { %4342 = vpow2.f32 %v3526_v35 }
 0x17d   : > { %4344 = vtanh.f32 %v1392_v16 }
 0x17e   : > { %4346 = vpow2.f32 %v3527_v20 }
 0x17f   : > { %v4333_v42 = vpop.eup %4332 }
 0x180   : > { %v1411_v18 = vadd.f32 1.0, %v4333_v42 }
 0x181   : > { %v4335_v52 = vpop.eup %4334 }
 0x182   : > { %4348 = vrcp.f32 %v1411_v18  ;;  %v1429_v13 = vadd.f32 1.0, %v4335_v52 }
 0x183   : > { %v4337_v23 = vpop.eup %4336  ;;  %4350 = vtanh.f32 %v1396_v15 }
 0x184   : > { %4352 = vrcp.f32 %v1429_v13  ;;  %v1412_v2 = vadd.f32 1.0, %v4337_v23 }
 0x185   : > { %v4339_v32 = vpop.eup %4338  ;;  %4354 = vpow2.f32 %v3528_v25 }
 0x186   : > { %4356 = vrcp.f32 %v1412_v2  ;;  %v1430_v19 = vadd.f32 1.0, %v4339_v32 }
 0x187   : > { %v4341_v27 = vpop.eup %4340  ;;  %4358 = vtanh.f32 %v1400_v33 }
 0x188   : > { %4360 = vrcp.f32 %v1430_v19  ;;  %v1413_v26 = vadd.f32 1.0, %v4341_v27 }
 0x189   : > { %v4343_v28 = vpop.eup %4342  ;;  %4362 = vpow2.f32 %v3529_v30 }
 0x18a   : > { %4364 = vrcp.f32 %v1413_v26  ;;  %v1431_v11 = vadd.f32 1.0, %v4343_v28  ;;  %v4345_v10 = vpop.eup %4344 }
 0x18b   : > { %v4347_v35 = vpop.eup %4346 }
 0x18c   : > { %4366 = vrcp.f32 %v1431_v11  ;;  %v1450_v20 = vadd.f32 1.0, %v4347_v35 }
 0x18e   : > { %4368 = vrcp.f32 %v1450_v20 }
 0x18f   : > { %v4349_v29 = vpop.eup %4348 }
 0x190   : > { %v4351_v14 = vpop.eup %4350  ;;  %v1462_v16 = vmul.f32 %v4349_v29, %v4345_v10  ;;  %v5788_v29 = vld [vmem:[%s5071_s29 + $0x78] sm:$0xff] }
 0x191   : > { %v4353_v9 = vpop.eup %4352 }
 0x192   : > { %v4355_v12 = vpop.eup %4354  ;;  %v1459_v21 = vmul.f32 0.0, %v4353_v9  ;;  %v5800_v9 = vld [vmem:[%s5071_s29 + $0x1f0] sm:$0xff] }
 0x193   : > { %v4357_v42 = vpop.eup %4356  ;;  %v1451_v24 = vadd.f32 1.0, %v4355_v12 }
 0x194   : > { %v4359_v62 = vpop.eup %4358  ;;  %v5770_v15 = vadd.f32 %v1462_v16, %v1459_v21  ;;  %v1463_v18 = vmul.f32 %v4357_v42, %v4351_v14  ;;  %v5792_v14 = vld [vmem:[%s5071_s29 + $0x178] sm:$0xff]  ;;  %v5796_v16 = vld [vmem:[%s5071_s29 + $0xf0] sm:$0xff] }
 0x195   : > { %v4361_v52 = vpop.eup %4360  ;;  %v5810_v42 = vld [vmem:[%s5071_s29 + $0x70] sm:$0xff] }
 0x196   : > { %v4363_v25 = vpop.eup %4362  ;;  %4370 = vtanh.f32 %v5770_v15  ;;  %v1460_v34 = vmul.f32 0.0, %v4361_v52  ;;  %v5822_v52 = vld [vmem:[%s5071_s29 + $0x1e8] sm:$0xff] }
 0x197   : > { %v4365_v13 = vpop.eup %4364  ;;  %4372 = vrcp.f32 %v1451_v24  ;;  %v1452_v32 = vadd.f32 1.0, %v4363_v25  ;;  %v5830_v24 = vld [vmem:[%s5071_s29 + $0x68] sm:$0xff] }
 0x198   : > { %v5773_v23 = vadd.f32 %v1463_v18, %v1460_v34  ;;  %v1464_v33 = vmul.f32 %v4365_v13, %v4359_v62  ;;  %v5814_v62 = vld [vmem:[%s5071_s29 + $0x170] sm:$0xff]  ;;  %v5818_v18 = vld [vmem:[%s5071_s29 + $0xe8] sm:$0xff]  ;;  %v5838_v34 = vld [vmem:[%s5071_s29 + $0xe0] sm:$0xff] }
 0x199   : > { %v4367_v2 = vpop.eup %4366  ;;  %v5834_v25 = vld [vmem:[%s5071_s29 + $0x168] sm:$0xff]  ;;  %v5842_v13 = vld [vmem:[%s5071_s29 + $0x1e0] sm:$0xff] }
 0x19a   : > { %4374 = vtanh.f32 %v5773_v23  ;;  %v1461_v30 = vmul.f32 0.0, %v4367_v2  ;;  %v5850_v2 = vld [vmem:[%s5071_s29 + $0x160] sm:$0xff] }
 0x19b   : > { %4376 = vrcp.f32 %v1452_v32  ;;  %v4369_v27 = vpop.eup %4368  ;;  %v5854_v32 = vld [vmem:[%s5071_s29 + $0xd8] sm:$0xff] }
 0x19c   : > { %v5776_v19 = vadd.f32 %v1464_v33, %v1461_v30  ;;  %v5846_v33 = vld [vmem:[%s5071_s29 + $0x60] sm:$0xff]  ;;  %v5858_v30 = vld [vmem:[%s5071_s29 + $0x1d8] sm:$0xff] }
 0x19e   : > { %4378 = vtanh.f32 %v5776_v19 }
 0x1a3   : > { %v4371_v26 = vpop.eup %4370 }
 0x1a4   : > { %v5779_v28 = vmul.f32 %v4371_v26, %v4369_v27  ;;  %v4373_v11 = vpop.eup %4372  ;;  %v5862_v27 = vld [vmem:[%s5071_s29 + $0x58] sm:$0xff] }
 0x1a5   : > { %7008 = vst [vmem:[#allocation83_spill] sm:$0xff] %v5862_v27  ;;  %v5866_v26 = vld [vmem:[%s5071_s29 + $0x158] sm:$0xff] }
 0x1a6   : > { %3844 = vmatprep.mubr.f32.mxu0 %v5779_v28  ;;  %3882 = vmatprep.mubr.f32.mxu1 %v5779_v28  ;;  %7009 = vst [vmem:[#allocation84_spill] sm:$0xff] %v5866_v26 }
 0x1a7   : > { %v4375_v10 = vpop.eup %4374  ;;  %3845 = vmatmul.mubr.f32.vlgmr.msra.gmra.mxu0 %v5779_v28  ;;  %3883 = vmatmul.mubr.f32.vlgmr.msra.gmra.mxu1 %v5779_v28 }
 0x1a8   : > { %v5785_v35 = vmul.f32 %v4375_v10, %v4373_v11  ;;  %3889 = vmatpush3.xpose.msra.mxu0 %v5788_v29  ;;  %3927 = vmatpush3.xpose.msra.mxu1 %v5792_v14  ;;  %v4377_v20 = vpop.eup %4376  ;;  %v5870_v11 = vld [vmem:[%s5071_s29 + $0xd0] sm:$0xff] }
 0x1a9   : > { %3890 = vmatprep.subr.mxu0 %v5796_v16  ;;  %3928 = vmatprep.subr.mxu1 %v5800_v9  ;;  %7010 = vst [vmem:[#allocation85_spill] sm:$0xff] %v5870_v11  ;;  %v5874_v10 = vld [vmem:[%s5071_s29 + $0x1d0] sm:$0xff] }
 0x1aa   : > { %3846 = vmatprep.mubr.f32.mxu0 %v5785_v35  ;;  %3884 = vmatprep.mubr.f32.mxu1 %v5785_v35  ;;  %7011 = vst [vmem:[#allocation86_spill] sm:$0xff] %v5874_v10 }
 0x1ab   : > { %v4379_v12 = vpop.eup %4378  ;;  %3847 = vmatmul.mubr.f32.gmra.mxu0 %v5785_v35  ;;  %3885 = vmatmul.mubr.f32.gmra.mxu1 %v5785_v35 }
 0x1ac   : > { %v5807_v21 = vmul.f32 %v4379_v12, %v4377_v20  ;;  %3891 = vmatpush3.xpose.msra.mxu0 %v5810_v42  ;;  %3929 = vmatpush3.xpose.msra.mxu1 %v5814_v62  ;;  %v5878_v20 = vld [vmem:[%s5071_s29 + $0x50] sm:$0xff] }
 0x1ad   : > { %3892 = vmatprep.subr.mxu0 %v5818_v18  ;;  %3930 = vmatprep.subr.mxu1 %v5822_v52  ;;  %v5882_v12 = vld [vmem:[%s5071_s29 + $0x150] sm:$0xff] }
 0x1ae   : > { %3848 = vmatprep.mubr.f32.mxu0 %v5807_v21  ;;  %3886 = vmatprep.mubr.f32.mxu1 %v5807_v21 }
 0x1af   : > { %3849 = vmatmul.mubr.f32.gmra.mxu0 %v5807_v21  ;;  %3887 = vmatmul.mubr.f32.gmra.mxu1 %v5807_v21 }
 0x1b0   : > { %3893 = vmatpush3.xpose.msra.mxu0 %v5830_v24  ;;  %3931 = vmatpush3.xpose.msra.mxu1 %v5834_v25 }
 0x1b1   : > { %3894 = vmatprep.subr.mxu0 %v5838_v34  ;;  %3932 = vmatprep.subr.mxu1 %v5842_v13 }
 0x1b4   : > { %3895 = vmatpush3.xpose.msra.mxu0 %v5846_v33  ;;  %3933 = vmatpush3.xpose.msra.mxu1 %v5850_v2 }
 0x1b5   : > { %3896 = vmatprep.subr.mxu0 %v5854_v32  ;;  %3934 = vmatprep.subr.mxu1 %v5858_v30 }
 0x1b8   : > { %3897 = vmatpush3.xpose.msra.mxu0 %v5862_v27  ;;  %3935 = vmatpush3.xpose.msra.mxu1 %v5866_v26  ;;  %v5886_v27 = vld [vmem:[%s5071_s29 + $0xc8] sm:$0xff] }
 0x1b9   : > { %3898 = vmatprep.subr.mxu0 %v5870_v11  ;;  %3936 = vmatprep.subr.mxu1 %v5874_v10  ;;  %v5890_v26 = vld [vmem:[%s5071_s29 + $0x1c8] sm:$0xff]  ;;  %v5899_v10 = vld [vmem:[%s5071_s29 + $0xc0] sm:$0xff] }
 0x1ba   : > { %v5894_v11 = vld [vmem:[%s5071_s29 + $0x48] sm:$0xff] }
 0x1bc   : > { %3899 = vmatpush3.xpose.msra.mxu0 %v5878_v20  ;;  %3937 = vmatpush3.xpose.msra.mxu1 %v5882_v12 }
 0x1bd   : > { %3900 = vmatprep.subr.mxu0 %v5886_v27  ;;  %3938 = vmatprep.subr.mxu1 %v5890_v26 }
 0x1c0   : > { %3901 = vmatpush3.xpose.msra.mxu0 %v5894_v11  ;;  %3939 = vmatpush3.xpose.msra.mxu1 %v5226_v36  ;;  %v7012_v36 = vld [vmem:[#allocation9_spill] sm:$0xff] }
 0x1c1   : > { %3902 = vmatprep.subr.mxu0 %v5899_v10  ;;  %3940 = vmatprep.subr.mxu1 %v5239_v39  ;;  %v7014_v39 = vld [vmem:[#allocation10_spill] sm:$0xff] }
 0x1c4   : > { %3903 = vmatpush3.xpose.msra.mxu0 %v5235_v38  ;;  %3941 = vmatpush3.xpose.msra.mxu1 %v5247_v41  ;;  %v7013_v38 = vld [vmem:[#allocation11_spill] sm:$0xff]  ;;  %v5938_v41 = vld [vmem:[%s5071_s29 + $0xf8] sm:$0xff] }
 0x1c5   : > { %3904 = vmatprep.subr.mxu0 %v5244_v40  ;;  %3942 = vmatprep.subr.mxu1 %v5260_v44  ;;  %v7015_v40 = vld [vmem:[#allocation12_spill] sm:$0xff]  ;;  %7016 = vst [vmem:[#allocation9_spill] sm:$0xff] %v5938_v41  ;;  %v7018_v44 = vld [vmem:[#allocation18_spill] sm:$0xff] }
 0x1c6   : > { %vm2042_vm9 = vcmp.gt.s32.totalorder %v7018_v44, 2 }
 0x1c8   : > { %3905 = vmatpush3.xpose.msra.mxu0 %v5256_v43  ;;  %3943 = vmatpush3.xpose.msra.mxu1 %v5268_v46  ;;  %v5942_v43 = vld [vmem:[%s5071_s29 + $0x1f8] sm:$0xff] }
 0x1c9   : > { %3906 = vmatprep.subr.mxu0 %v5265_v45  ;;  %3944 = vmatprep.subr.mxu1 %v5281_v49  ;;  %7017 = vst [vmem:[#allocation11_spill] sm:$0xff] %v5942_v43  ;;  %v7019_v45 = vld [vmem:[#allocation16_spill] sm:$0xff]  ;;  %v7020_v46 = vld [vmem:[#allocation17_spill] sm:$0xff] }
 0x1ca   : > { %vm2044_vm10 = vcmp.gt.s32.totalorder %v7019_v45, 2  ;;  %vm2329_vm11 = vcmp.gt.s32.totalorder %v7019_v45, 3  ;;  %vm2041_vm12 = vcmp.gt.s32.totalorder %v7020_v46, 2 }
 0x1cc   : > { %3907 = vmatpush3.xpose.msra.mxu0 %v5277_v48  ;;  %3945 = vmatpush3.xpose.msra.mxu1 %v5289_v51  ;;  %v7021_v48 = vmov 0  }
 0x1cd   : > { %3908 = vmatprep.subr.mxu0 %v5286_v50  ;;  %3946 = vmatprep.subr.mxu1 %v5302_v54  ;;  %v2047_v49 = vsel %vm2042_vm9, 1, %v7021_v48  ;;  %v7022_v50 = vmov -inf   ;;  %v2046_v54 = vsel %vm2041_vm12, 1, %v7021_v48 }
 0x1ce   : > { %v2045_v51 = vsel %vm2044_vm10, 0.0, %v7022_v50  ;;  %2053 = vperm.xlu0 %4315, %v2047_v49   ;;  %2050 = vperm.xlu1 %4316, %v2046_v54  }
 0x1d0   : > { %3909 = vmatpush3.xpose.msra.mxu0 %v5298_v53  ;;  %3947 = vmatpush3.xpose.msra.mxu1 %v5310_v56  ;;  %v2330_v53 = vsel %vm2329_vm11, 0.0, %v7022_v50  ;;  %v6125_v50 = vld [vmem:[%s5071_s29 + $0x198] sm:$0xff] }
 0x1d1   : > { %3910 = vmatprep.subr.mxu0 %v5307_v55  ;;  %3948 = vmatprep.subr.mxu1 %v5323_v59  ;;  %v7023_v55 = vld [vmem:[#allocation14_spill] sm:$0xff]  ;;  %v7024_v59 = vld [vmem:[#allocation15_spill] sm:$0xff] }
 0x1d2   : > { %v2065_v56 = vrot.slane %v2045_v51, %v7023_v55  ;;  %vm2043_vm13 = vcmp.gt.s32.totalorder %v7024_v59, 2 }
 0x1d4   : > { %3911 = vmatpush3.xpose.msra.mxu0 %v5319_v58  ;;  %3949 = vmatpush3.xpose.msra.mxu1 %v5331_v61  ;;  %v2350_v58 = vrot.slane %v2330_v53, %v7023_v55  ;;  %v7029_v53 = vld [vmem:[#allocation20_spill] sm:$0xff]  ;;  %v6121_v55 = vld [vmem:[%s5071_s29 + $0x98] sm:$0xff] }
 0x1d5   : > { %3912 = vmatprep.subr.mxu0 %v5328_v60  ;;  %3950 = vmatprep.subr.mxu1 %v5344_v0  ;;  %v2048_v60 = vsel %vm2043_vm13, 1, %v7021_v48  ;;  %v871_v54 = vadd.f32 %v7029_v53, %v5728_v31 }
 0x1d6   : > { %v4322_v61 = vpack.i.bf16 %v2350_v58, %v2065_v56  ;;  %2056 = vperm.xlu1 %4316, %v2048_v60   ;;  %v7030_v60 = vld [vmem:[#allocation22_spill] sm:$0xff] }
 0x1d8   : > { %3913 = vmatpush3.xpose.msra.mxu0 %v5340_v63  ;;  %3951 = vmatpush3.xpose.msra.mxu1 %v5352_v7  ;;  %v7025_v63 = vld [vmem:[#allocation4_spill] sm:$0xff] }
 0x1d9   : > { %3914 = vmatprep.subr.mxu0 %v5349_v4  ;;  %3952 = vmatprep.subr.mxu1 %v5365_v22  ;;  %v859_v0 = vadd.f32 %v7025_v63, %v5728_v31 }
 0x1da   : > { %4323 = vperm.xlu0 %4315, %v4322_v61   ;;  %v873_v61 = vadd.f32 %v7030_v60, %v5734_v37 }
 0x1dc   : > { %3915 = vmatpush3.xpose.msra.mxu0 %v5362_v17  ;;  %3953 = vmatpush3.xpose.msra.mxu1 %v6923_v1  ;;  %v7026_v17 = vld [vmem:[#allocation7_spill] sm:$0xff] }
 0x1dd   : > { %3916 = vmatprep.subr.mxu0 %v6924_v3  ;;  %3954 = vmatprep.subr.mxu1 %v6925_v5  ;;  %v861_v22 = vadd.f32 %v7026_v17, %v5734_v37  ;;  %v7031_v17 = vld [vmem:[#allocation6_spill] sm:$0xff] }
 0x1e0   : > { %3917 = vmatpush3.xpose.msra.mxu0 %v6926_v6  ;;  %3955 = vmatpush3.xpose.msra.mxu1 %v6927_v8  ;;  %v7027_v6 = vld [vmem:[#allocation8_spill] sm:$0xff] }
 0x1e1   : > { %3918 = vmatprep.subr.mxu0 %v7012_v36  ;;  %3956 = vmatprep.subr.mxu1 %v7013_v38  ;;  %v865_v8 = vadd.f32 %v7027_v6, %v5728_v31 }
 0x1e4   : > { %3919 = vmatpush3.xpose.msra.mxu0 %v7014_v39  ;;  %3957 = vmatpush3.xpose.msra.mxu1 %v7015_v40  ;;  %v7028_v40 = vld [vmem:[#allocation3_spill] sm:$0xff] }
 0x1e5   : > { %3964 = vmatprep.subr.mxu0 %v5938_v41  ;;  %4002 = vmatprep.subr.mxu1 %v5942_v43  ;;  %v867_v44 = vadd.f32 %v7028_v40, %v5734_v37 }
 0x267   : > { %v1572_v4 = vpop.f32.mrf.mxu0  ;;  %v1655_v7 = vpop.f32.mrf.mxu1 }
 0x268   : > { %v1672_v1 = vadd.f32 %v1572_v4, %v859_v0 }
 0x269   : > { %v1574_v3 = vpop.f32.mrf.mxu0  ;;  %v1657_v5 = vpop.f32.mrf.mxu1 }
 0x26a   : > { %v3530_v36 = vmul.f32 -1.442695, %v1672_v1  ;;  %v1673_v38 = vadd.f32 %v1574_v3, %v861_v22  ;;  %v1052_v22 = vadd.f32 %v7031_v17, %v5750_v57  ;;  %v7036_v17 = vld [vmem:[#allocation21_spill] sm:$0xff] }
 0x26b   : > { %v1578_v39 = vpop.f32.mrf.mxu0  ;;  %v1661_v49 = vpop.f32.mrf.mxu1 }
 0x26c   : > { %4380 = vpow2.f32 %v3530_v36  ;;  %v3533_v45 = vmul.f32 -1.442695, %v1673_v38  ;;  %v1676_v46 = vadd.f32 %v1578_v39, %v865_v8  ;;  %v1675_v8 = vadd.f32 %v1657_v5, %v1052_v22  ;;  %v7032_v36 = vld [vmem:[#allocation5_spill] sm:$0xff]  ;;  %v7035_v5 = vld [vmem:[#allocation23_spill] sm:$0xff] }
 0x26d   : > { %v1580_v51 = vpop.f32.mrf.mxu0  ;;  %v1663_v0 = vpop.f32.mrf.mxu1  ;;  %v1050_v38 = vadd.f32 %v7032_v36, %v5754_v47  ;;  %v1064_v60 = vadd.f32 %v7035_v5, %v5750_v57  ;;  %v1062_v22 = vadd.f32 %v7036_v17, %v5754_v47 }
 0x26e   : > { %4382 = vpow2.f32 %v3533_v45  ;;  %v3531_v56 = vmul.f32 -1.442695, %v1676_v46  ;;  %v1677_v58 = vadd.f32 %v1580_v51, %v867_v44  ;;  %v7033_v44 = vld [vmem:[#allocation19_spill] sm:$0xff]  ;;  %v7034_v51 = vld [vmem:[#allocation2_spill] sm:$0xff] }
 0x26f   : > { %v1584_v59 = vpop.f32.mrf.mxu0  ;;  %v1667_v39 = vpop.f32.mrf.mxu1  ;;  %v1058_v45 = vadd.f32 %v7033_v44, %v5750_v57  ;;  %v1674_v46 = vadd.f32 %v1655_v7, %v1050_v38  ;;  %v1056_v53 = vadd.f32 %v7034_v51, %v5754_v47 }
 0x270   : > { %4384 = vpow2.f32 %v3531_v56  ;;  %v3534_v63 = vmul.f32 -1.442695, %v1677_v58  ;;  %v1680_v4 = vadd.f32 %v1584_v59, %v871_v54  ;;  %v3536_v54 = vmul.f32 -1.442695, %v1675_v8 }
 0x271   : > { %v1586_v1 = vpop.f32.mrf.mxu0  ;;  %v1679_v56 = vadd.f32 %v1663_v0, %v1058_v45  ;;  %v1669_v58 = vpop.f32.mrf.mxu1  ;;  %v1682_v0 = vadd.f32 %v1667_v39, %v1062_v22 }
 0x272   : > { %4386 = vpow2.f32 %v3534_v63  ;;  %v3532_v3 = vmul.f32 -1.442695, %v1680_v4  ;;  %v1681_v6 = vadd.f32 %v1586_v1, %v873_v61  ;;  %v1678_v61 = vadd.f32 %v1661_v49, %v1056_v53 }
 0x273   : > { %v3537_v7 = vmul.f32 -1.442695, %v1679_v56  ;;  %v1683_v1 = vadd.f32 %v1669_v58, %v1064_v60 }
 0x274   : > { %4388 = vpow2.f32 %v3532_v3  ;;  %v3535_v40 = vmul.f32 -1.442695, %v1681_v6 }
 0x275   : > { %v3538_v38 = vmul.f32 -1.442695, %v1683_v1 }
 0x276   : > { %4390 = vpow2.f32 %v3535_v40 }
 0x277   : > { %4392 = vtanh.f32 %v1674_v46 }
 0x278   : > { %4394 = vpow2.f32 %v3536_v54 }
 0x279   : > { %v4381_v59 = vpop.eup %4380 }
 0x27a   : > { %v1693_v63 = vadd.f32 1.0, %v4381_v59 }
 0x27b   : > { %v4383_v4 = vpop.eup %4382 }
 0x27c   : > { %4396 = vrcp.f32 %v1693_v63  ;;  %v1711_v3 = vadd.f32 1.0, %v4383_v4 }
 0x27d   : > { %v4385_v6 = vpop.eup %4384  ;;  %4398 = vtanh.f32 %v1678_v61 }
 0x27e   : > { %4400 = vrcp.f32 %v1711_v3  ;;  %v1694_v8 = vadd.f32 1.0, %v4385_v6  ;;  %v1484_v3 = vpop.permute.xlu0 %1483 }
 0x27f   : > { %v4387_v36 = vpop.eup %4386  ;;  %4402 = vpow2.f32 %v3537_v7  ;;  %vm1491_vm14 = vcmp.eq.s32.totalorder %v1484_v3, 1  ;;  %v6113_v3 = vld [vmem:[%s5071_s29 + $0x20] sm:$0xff] }
 0x280   : > { %4404 = vrcp.f32 %v1694_v8  ;;  %v1712_v49 = vadd.f32 1.0, %v4387_v36  ;;  %7057 = vst [vmem:[#allocation23_spill] sm:$0xff] %v6113_v3 }
 0x281   : > { %v4389_v40 = vpop.eup %4388  ;;  %4406 = vtanh.f32 %v1682_v0 }
 0x282   : > { %4408 = vrcp.f32 %v1712_v49  ;;  %v1695_v44 = vadd.f32 1.0, %v4389_v40 }
 0x283   : > { %v4391_v45 = vpop.eup %4390  ;;  %4410 = vpow2.f32 %v3538_v38 }
 0x284   : > { %4412 = vrcp.f32 %v1695_v44  ;;  %v1713_v46 = vadd.f32 1.0, %v4391_v45  ;;  %v4393_v51 = vpop.eup %4392  ;;  %v1487_v44 = vpop.permute.xlu0 %1486 }
 0x285   : > { %v4395_v53 = vpop.eup %4394  ;;  %vm1492_vm1 = vcmp.eq.s32.totalorder %v1487_v44, 1  ;;  %v6045_v44 = vld [vmem:[%s5071_s29 + $0x1c0] sm:$0xff] }
 0x286   : > { %4414 = vrcp.f32 %v1713_v46  ;;  %v1732_v59 = vadd.f32 1.0, %v4395_v53 }
 0x288   : > { %4416 = vrcp.f32 %v1732_v59 }
 0x289   : > { %v4397_v54 = vpop.eup %4396 }
 0x28a   : > { %v4399_v39 = vpop.eup %4398  ;;  %v1744_v56 = vmul.f32 %v4397_v54, %v4393_v51 }
 0x28b   : > { %v4401_v58 = vpop.eup %4400 }
 0x28c   : > { %v4403_v5 = vpop.eup %4402  ;;  %v1741_v60 = vmul.f32 %v4401_v58, %v5770_v15  ;;  %v1490_v15 = vpop.permute.xlu1 %1489 }
 0x28d   : > { %v4405_v61 = vpop.eup %4404  ;;  %v1733_v7 = vadd.f32 1.0, %v4403_v5  ;;  %vm1493_vm3 = vcmp.eq.s32.totalorder %v1490_v15, 1  ;;  %v7039_v15 = vld [vmem:[#allocation85_spill] sm:$0xff] }
 0x28e   : > { %v4407_v63 = vpop.eup %4406  ;;  %v5982_v4 = vadd.f32 %v1744_v56, %v1741_v60  ;;  %v1745_v17 = vmul.f32 %v4405_v61, %v4399_v39  ;;  %v6117_v61 = vld [vmem:[%s5071_s29 + $0x120] sm:$0xff] }
 0x28f   : > { %v4409_v22 = vpop.eup %4408  ;;  %7058 = vst [vmem:[#allocation21_spill] sm:$0xff] %v6117_v61 }
 0x290   : > { %v4411_v1 = vpop.eup %4410  ;;  %4418 = vtanh.f32 %v5982_v4  ;;  %v1742_v6 = vmul.f32 %v4409_v22, %v5773_v23  ;;  %v4319_v46 = vpop.permute.xlu1 %4318 }
 0x291   : > { %v4413_v0 = vpop.eup %4412  ;;  %4420 = vrcp.f32 %v1733_v7  ;;  %v1734_v49 = vadd.f32 1.0, %v4411_v1  ;;  %v1766_v23 = vpop.permute.xlu0 %1765  ;;  %v4321_v53 = vunpack.i.h.bf16 %v4319_v46  ;;  %v4320_v54 = vunpack.i.l.bf16 %v4319_v46  ;;  %v6049_v46 = vld [vmem:[%s5071_s29 + $0x40] sm:$0xff] }
 0x292   : > { %v5986_v8 = vadd.f32 %v1745_v17, %v1742_v6  ;;  %v1746_v36 = vmul.f32 %v4413_v0, %v4407_v63  ;;  %vm1773_vm15 = vcmp.eq.s32.totalorder %v1766_v23, 1  ;;  %7041 = vst [vmem:[#allocation10_spill] sm:$0xff] %v6049_v46  ;;  %v6053_v23 = vld [vmem:[%s5071_s29 + $0x140] sm:$0xff] }
 0x293   : > { %v4415_v38 = vpop.eup %4414  ;;  %v5994_v5 = vsel %vm1491_vm14, %v5779_v28, %v4320_v54  ;;  %v6005_v22 = vsel %vm1492_vm1, %v5785_v35, %v4320_v54  ;;  %v6016_v35 = vsel %vm1493_vm3, %v5807_v21, %v4320_v54  ;;  %v7037_v21 = vld [vmem:[#allocation83_spill] sm:$0xff]  ;;  %7042 = vst [vmem:[#allocation12_spill] sm:$0xff] %v6053_v23  ;;  %v6065_v54 = vld [vmem:[%s5071_s29 + $0x38] sm:$0xff] }
 0x294   : > { %4422 = vtanh.f32 %v5986_v8  ;;  %v1743_v40 = vmul.f32 %v4415_v38, %v5776_v19  ;;  %v1769_v58 = vpop.permute.xlu1 %1768  ;;  %v7038_v38 = vld [vmem:[#allocation84_spill] sm:$0xff]  ;;  %7045 = vst [vmem:[#allocation17_spill] sm:$0xff] %v6065_v54  ;;  %7059 = vst [vmem:[#allocation83_spill] sm:$0xff] %v6121_v55 }
 0x295   : > { %4424 = vrcp.f32 %v1734_v49  ;;  %v4417_v51 = vpop.eup %4416  ;;  %vm1774_vm2 = vcmp.eq.s32.totalorder %v1769_v58, 1  ;;  %v1772_v17 = vpop.permute.xlu0 %1771  ;;  %v7040_v49 = vld [vmem:[#allocation86_spill] sm:$0xff]  ;;  %v6077_v58 = vld [vmem:[%s5071_s29 + $0x1b0] sm:$0xff]  ;;  %7060 = vst [vmem:[#allocation84_spill] sm:$0xff] %v6125_v50 }
 0x296   : > { %v5990_v45 = vadd.f32 %v1746_v36, %v1743_v40  ;;  %vm1775_vm4 = vcmp.eq.s32.totalorder %v1772_v17, 1  ;;  %v6040_v40 = vld [vmem:[%s5071_s29 + $0x148] sm:$0xff]  ;;  %7048 = vst [vmem:[#allocation7_spill] sm:$0xff] %v6077_v58  ;;  %v6109_v36 = vld [vmem:[%s5071_s29 + $0x1a0] sm:$0xff] }
 0x297   : > { %v6093_v17 = vld [vmem:[%s5071_s29 + $0x1a8] sm:$0xff]  ;;  %7056 = vst [vmem:[#allocation2_spill] sm:$0xff] %v6109_v36 }
 0x298   : > { %4426 = vtanh.f32 %v5990_v45  ;;  %7052 = vst [vmem:[#allocation22_spill] sm:$0xff] %v6093_v17 }
 0x29d   : > { %v4419_v39 = vpop.eup %4418 }
 0x29e   : > { %v1753_v56 = vmul.f32 %v4419_v39, %v4417_v51  ;;  %v4421_v59 = vpop.eup %4420  ;;  %v6057_v51 = vld [vmem:[%s5071_s29 + $0xb8] sm:$0xff] }
 0x29f   : > { %7043 = vst [vmem:[#allocation18_spill] sm:$0xff] %v6057_v51  ;;  %v6069_v39 = vld [vmem:[%s5071_s29 + $0x138] sm:$0xff] }
 0x2a0   : > { %v5996_v19 = vsel %vm1773_vm15, %v1753_v56, %v4321_v53  ;;  %3920 = vmatprep.mubr.f32.mxu0 %v1753_v56  ;;  %3958 = vmatprep.mubr.f32.mxu1 %v1753_v56  ;;  %7046 = vst [vmem:[#allocation15_spill] sm:$0xff] %v6069_v39 }
 0x2a1   : > { %v4423_v60 = vpop.eup %4422  ;;  %3921 = vmatmul.mubr.f32.vlgmr.msra.gmra.mxu0 %v1753_v56  ;;  %3959 = vmatmul.mubr.f32.vlgmr.msra.gmra.mxu1 %v1753_v56  ;;  %v6073_v56 = vld [vmem:[%s5071_s29 + $0xb0] sm:$0xff] }
 0x2a2   : > { %v1754_v63 = vmul.f32 %v4423_v60, %v4421_v59  ;;  %3965 = vmatpush3.xpose.msra.mxu0 %v5788_v29  ;;  %4003 = vmatpush3.xpose.msra.mxu1 %v5792_v14  ;;  %v4425_v28 = vpop.eup %4424  ;;  %7047 = vst [vmem:[#allocation4_spill] sm:$0xff] %v6073_v56  ;;  %v6081_v59 = vld [vmem:[%s5071_s29 + $0x30] sm:$0xff] }
 0x2a3   : > { %3966 = vmatprep.subr.mxu0 %v5796_v16  ;;  %4004 = vmatprep.subr.mxu1 %v5800_v9  ;;  %7049 = vst [vmem:[#allocation8_spill] sm:$0xff] %v6081_v59  ;;  %v6085_v60 = vld [vmem:[%s5071_s29 + $0x130] sm:$0xff] }
 0x2a4   : > { %v6007_v7 = vsel %vm1774_vm2, %v1754_v63, %v4321_v53  ;;  %3922 = vmatprep.mubr.f32.mxu0 %v1754_v63  ;;  %3960 = vmatprep.mubr.f32.mxu1 %v1754_v63  ;;  %7050 = vst [vmem:[#allocation3_spill] sm:$0xff] %v6085_v60 }
 0x2a5   : > { %v4427_v1 = vpop.eup %4426  ;;  %3923 = vmatmul.mubr.f32.gmra.mxu0 %v1754_v63  ;;  %3961 = vmatmul.mubr.f32.gmra.mxu1 %v1754_v63  ;;  %v6089_v63 = vld [vmem:[%s5071_s29 + $0xa8] sm:$0xff] }
 0x2a6   : > { %v1755_v6 = vmul.f32 %v4427_v1, %v4425_v28  ;;  %3967 = vmatpush3.xpose.msra.mxu0 %v5810_v42  ;;  %4005 = vmatpush3.xpose.msra.mxu1 %v5814_v62  ;;  %7051 = vst [vmem:[#allocation20_spill] sm:$0xff] %v6089_v63  ;;  %v6097_v28 = vld [vmem:[%s5071_s29 + $0x28] sm:$0xff] }
 0x2a7   : > { %3968 = vmatprep.subr.mxu0 %v5818_v18  ;;  %4006 = vmatprep.subr.mxu1 %v5822_v52  ;;  %7053 = vst [vmem:[#allocation6_spill] sm:$0xff] %v6097_v28  ;;  %v6101_v1 = vld [vmem:[%s5071_s29 + $0x128] sm:$0xff] }
 0x2a8   : > { %v6018_v0 = vsel %vm1775_vm4, %v1755_v6, %v4321_v53  ;;  %3924 = vmatprep.mubr.f32.mxu0 %v1755_v6  ;;  %3962 = vmatprep.mubr.f32.mxu1 %v1755_v6  ;;  %v6061_v53 = vld [vmem:[%s5071_s29 + $0x1b8] sm:$0xff]  ;;  %7054 = vst [vmem:[#allocation5_spill] sm:$0xff] %v6101_v1 }
 0x2a9   : > { %3925 = vmatmul.mubr.f32.gmra.mxu0 %v1755_v6  ;;  %3963 = vmatmul.mubr.f32.gmra.mxu1 %v1755_v6  ;;  %7044 = vst [vmem:[#allocation16_spill] sm:$0xff] %v6061_v53  ;;  %v6105_v6 = vld [vmem:[%s5071_s29 + $0xa0] sm:$0xff] }
 0x2aa   : > { %3969 = vmatpush3.xpose.msra.mxu0 %v5830_v24  ;;  %4007 = vmatpush3.xpose.msra.mxu1 %v5834_v25  ;;  %7055 = vst [vmem:[#allocation19_spill] sm:$0xff] %v6105_v6 }
 0x2ab   : > { %3970 = vmatprep.subr.mxu0 %v5838_v34  ;;  %4008 = vmatprep.subr.mxu1 %v5842_v13 }
 0x2ae   : > { %3971 = vmatpush3.xpose.msra.mxu0 %v5846_v33  ;;  %4009 = vmatpush3.xpose.msra.mxu1 %v5850_v2 }
 0x2af   : > { %3972 = vmatprep.subr.mxu0 %v5854_v32  ;;  %4010 = vmatprep.subr.mxu1 %v5858_v30 }
 0x2b2   : > { %3973 = vmatpush3.xpose.msra.mxu0 %v7037_v21  ;;  %4011 = vmatpush3.xpose.msra.mxu1 %v7038_v38 }
 0x2b3   : > { %3974 = vmatprep.subr.mxu0 %v7039_v15  ;;  %4012 = vmatprep.subr.mxu1 %v7040_v49 }
 0x2b6   : > { %3975 = vmatpush3.xpose.msra.mxu0 %v5878_v20  ;;  %4013 = vmatpush3.xpose.msra.mxu1 %v5882_v12 }
 0x2b7   : > { %3976 = vmatprep.subr.mxu0 %v5886_v27  ;;  %4014 = vmatprep.subr.mxu1 %v5890_v26 }
 0x2ba   : > { %3977 = vmatpush3.xpose.msra.mxu0 %v5894_v11  ;;  %4015 = vmatpush3.xpose.msra.mxu1 %v6040_v40 }
 0x2bb   : > { %3978 = vmatprep.subr.mxu0 %v5899_v10  ;;  %4016 = vmatprep.subr.mxu1 %v6045_v44 }
 0x2be   : > { %3979 = vmatpush3.xpose.msra.mxu0 %v6049_v46  ;;  %4017 = vmatpush3.xpose.msra.mxu1 %v6053_v23 }
 0x2bf   : > { %3980 = vmatprep.subr.mxu0 %v6057_v51  ;;  %4018 = vmatprep.subr.mxu1 %v6061_v53  ;;  %v7082_v53 = vld [vmem:[#allocation32_spill] sm:$0xff] }
 0x2c2   : > { %3981 = vmatpush3.xpose.msra.mxu0 %v6065_v54  ;;  %4019 = vmatpush3.xpose.msra.mxu1 %v6069_v39 }
 0x2c3   : > { %3982 = vmatprep.subr.mxu0 %v6073_v56  ;;  %4020 = vmatprep.subr.mxu1 %v6077_v58 }
 0x2c6   : > { %3983 = vmatpush3.xpose.msra.mxu0 %v6081_v59  ;;  %4021 = vmatpush3.xpose.msra.mxu1 %v6085_v60  ;;  %v7080_v60 = vld [vmem:[#allocation28_spill] sm:$0xff] }
 0x2c7   : > { %3984 = vmatprep.subr.mxu0 %v6089_v63  ;;  %4022 = vmatprep.subr.mxu1 %v6093_v17  ;;  %v883_v59 = vadd.f32 %v7080_v60, %v5728_v31  ;;  %v7083_v60 = vld [vmem:[#allocation34_spill] sm:$0xff] }
 0x2ca   : > { %3985 = vmatpush3.xpose.msra.mxu0 %v6097_v28  ;;  %4023 = vmatpush3.xpose.msra.mxu1 %v6101_v1 }
 0x2cb   : > { %3986 = vmatprep.subr.mxu0 %v6105_v6  ;;  %4024 = vmatprep.subr.mxu1 %v6109_v36  ;;  %v6129_v36 = vld [vmem:[%s5071_s29 + $0x18] sm:$0xff]  ;;  %v6177_v6 = vld [vmem:[%s5071_s29] sm:$0xff] }
 0x2cc   : > { %7061 = vst [vmem:[#allocation85_spill] sm:$0xff] %v6129_v36  ;;  %7073 = vst [vmem:[#allocation97_spill] sm:$0xff] %v6177_v6 }
 0x2ce   : > { %3987 = vmatpush3.xpose.msra.mxu0 %v6113_v3  ;;  %4025 = vmatpush3.xpose.msra.mxu1 %v6117_v61  ;;  %v6133_v3 = vld [vmem:[%s5071_s29 + $0x118] sm:$0xff]  ;;  %v6137_v61 = vld [vmem:[%s5071_s29 + $0x90] sm:$0xff] }
 0x2cf   : > { %3988 = vmatprep.subr.mxu0 %v6121_v55  ;;  %4026 = vmatprep.subr.mxu1 %v6125_v50  ;;  %7062 = vst [vmem:[#allocation86_spill] sm:$0xff] %v6133_v3  ;;  %7063 = vst [vmem:[#allocation87_spill] sm:$0xff] %v6137_v61  ;;  %v6141_v55 = vld [vmem:[%s5071_s29 + $0x190] sm:$0xff] }
 0x2d0   : > { %7064 = vst [vmem:[#allocation88_spill] sm:$0xff] %v6141_v55  ;;  %v6145_v50 = vld [vmem:[%s5071_s29 + $0x10] sm:$0xff] }
 0x2d1   : > { %7065 = vst [vmem:[#allocation89_spill] sm:$0xff] %v6145_v50 }
 0x2d2   : > { %3989 = vmatpush3.xpose.msra.mxu0 %v6129_v36  ;;  %4027 = vmatpush3.xpose.msra.mxu1 %v6133_v3  ;;  %v6149_v36 = vld [vmem:[%s5071_s29 + $0x110] sm:$0xff]  ;;  %v6153_v3 = vld [vmem:[%s5071_s29 + $0x88] sm:$0xff] }
 0x2d3   : > { %3990 = vmatprep.subr.mxu0 %v6137_v61  ;;  %4028 = vmatprep.subr.mxu1 %v6141_v55  ;;  %7066 = vst [vmem:[#allocation90_spill] sm:$0xff] %v6149_v36  ;;  %7067 = vst [vmem:[#allocation91_spill] sm:$0xff] %v6153_v3  ;;  %v6157_v61 = vld [vmem:[%s5071_s29 + $0x188] sm:$0xff] }
 0x2d4   : > { %7068 = vst [vmem:[#allocation92_spill] sm:$0xff] %v6157_v61  ;;  %v6161_v55 = vld [vmem:[%s5071_s29 + $0x8] sm:$0xff] }
 0x2d5   : > { %7069 = vst [vmem:[#allocation93_spill] sm:$0xff] %v6161_v55 }
 0x2d6   : > { %3991 = vmatpush3.xpose.msra.mxu0 %v6145_v50  ;;  %4029 = vmatpush3.xpose.msra.mxu1 %v6149_v36  ;;  %v6165_v50 = vld [vmem:[%s5071_s29 + $0x108] sm:$0xff]  ;;  %v6169_v36 = vld [vmem:[%s5071_s29 + $0x80] sm:$0xff] }
 0x2d7   : > { %3992 = vmatprep.subr.mxu0 %v6153_v3  ;;  %4030 = vmatprep.subr.mxu1 %v6157_v61  ;;  %7070 = vst [vmem:[#allocation94_spill] sm:$0xff] %v6165_v50  ;;  %7071 = vst [vmem:[#allocation95_spill] sm:$0xff] %v6169_v36  ;;  %v6173_v3 = vld [vmem:[%s5071_s29 + $0x180] sm:$0xff] }
 0x2d8   : > { %7072 = vst [vmem:[#allocation96_spill] sm:$0xff] %v6173_v3  ;;  %v6181_v61 = vld [vmem:[%s5071_s29 + $0x100] sm:$0xff] }
 0x2d9   : > { %7074 = vst [vmem:[#allocation98_spill] sm:$0xff] %v6181_v61 }
 0x2da   : > { %3993 = vmatpush3.xpose.msra.mxu0 %v6161_v55  ;;  %4031 = vmatpush3.xpose.msra.mxu1 %v6165_v50  ;;  %v6187_v50 = vld [vmem:[%s5438_s9] sm:$0xff] }
 0x2db   : > { %3994 = vmatprep.subr.mxu0 %v6169_v36  ;;  %4032 = vmatprep.subr.mxu1 %v6173_v3  ;;  %7075 = vst [vmem:[#allocation99_spill] sm:$0xff] %v6187_v50  ;;  %vm2326_vm5 = vcmp.gt.s32.totalorder %v6187_v50, 3  ;;  %v6191_v36 = vld [vmem:[%s5438_s9 + $0x8] sm:$0xff]  ;;  %v6195_v3 = vld [vmem:[%s5438_s9 + $0x10] sm:$0xff] }
 0x2dc   : > { %7076 = vst [vmem:[#allocation100_spill] sm:$0xff] %v6191_v36  ;;  %vm2327_vm6 = vcmp.gt.s32.totalorder %v6191_v36, 3  ;;  %7077 = vst [vmem:[#allocation101_spill] sm:$0xff] %v6195_v3  ;;  %vm2328_vm7 = vcmp.gt.s32.totalorder %v6195_v3, 3  ;;  %v7079_v36 = vld [vmem:[#allocation26_spill] sm:$0xff] }
 0x2dd   : > { %v879_v28 = vadd.f32 %v7079_v36, %v5734_v37  ;;  %v889_v36 = vadd.f32 %v7082_v53, %v5728_v31  ;;  %v7085_v53 = vld [vmem:[#allocation25_spill] sm:$0xff] }
 0x2de   : > { %3995 = vmatpush3.xpose.msra.mxu0 %v6177_v6  ;;  %4033 = vmatpush3.xpose.msra.mxu1 %v6181_v61  ;;  %v2331_v6 = vsel %vm2326_vm5, 1, %v7021_v48  ;;  %v2332_v61 = vsel %vm2327_vm6, 1, %v7021_v48 }
 0x2df   : > { %4040 = vmatprep.subr.mxu0 %v5938_v41  ;;  %4078 = vmatprep.subr.mxu1 %v5942_v43  ;;  %v2333_v43 = vsel %vm2328_vm7, 1, %v7021_v48  ;;  %v7078_v41 = vld [vmem:[#allocation24_spill] sm:$0xff]  ;;  %v7081_v48 = vld [vmem:[#allocation30_spill] sm:$0xff] }
 0x2e0   : > { %2335 = vperm.xlu1 %4316, %v2331_v6   ;;  %2338 = vperm.xlu0 %4315, %v2332_v61   ;;  %v877_v50 = vadd.f32 %v7078_v41, %v5728_v31 }
 0x2e4   : > { %2341 = vperm.xlu1 %4316, %v2333_v43   ;;  %v885_v43 = vadd.f32 %v7081_v48, %v5734_v37  ;;  %v7084_v48 = vld [vmem:[#allocation27_spill] sm:$0xff] }
 0x361   : > { %v1857_v55 = vpop.f32.mrf.mxu0  ;;  %v1940_v1 = vpop.f32.mrf.mxu1 }
 0x362   : > { %v1957_v17 = vadd.f32 %v1857_v55, %v877_v50 }
 0x363   : > { %v1859_v63 = vpop.f32.mrf.mxu0  ;;  %v1942_v3 = vpop.f32.mrf.mxu1 }
 0x364   : > { %v3539_v58 = vmul.f32 -1.442695, %v1957_v17  ;;  %v1958_v6 = vadd.f32 %v1859_v63, %v879_v28  ;;  %v891_v17 = vadd.f32 %v7083_v60, %v5734_v37 }
 0x365   : > { %v1863_v61 = vpop.f32.mrf.mxu0  ;;  %v1946_v39 = vpop.f32.mrf.mxu1 }
 0x366   : > { %4428 = vpow2.f32 %v3539_v58  ;;  %v3542_v56 = vmul.f32 -1.442695, %v1958_v6  ;;  %v1961_v41 = vadd.f32 %v1863_v61, %v883_v59  ;;  %v1070_v58 = vadd.f32 %v7084_v48, %v5750_v57 }
 0x367   : > { %v1865_v54 = vpop.f32.mrf.mxu0  ;;  %v1948_v28 = vpop.f32.mrf.mxu1 }
 0x368   : > { %4430 = vpow2.f32 %v3542_v56  ;;  %v3540_v50 = vmul.f32 -1.442695, %v1961_v41  ;;  %v1962_v55 = vadd.f32 %v1865_v54, %v885_v43  ;;  %v1960_v46 = vadd.f32 %v1942_v3, %v1070_v58  ;;  %v7086_v41 = vld [vmem:[#allocation31_spill] sm:$0xff] }
 0x369   : > { %v1869_v51 = vpop.f32.mrf.mxu0  ;;  %v1068_v56 = vadd.f32 %v7085_v53, %v5754_v47  ;;  %v1952_v54 = vpop.f32.mrf.mxu1  ;;  %v7088_v3 = vld [vmem:[#allocation35_spill] sm:$0xff] }
 0x36a   : > { %4432 = vpow2.f32 %v3540_v50  ;;  %v3543_v63 = vmul.f32 -1.442695, %v1962_v55  ;;  %v1965_v23 = vadd.f32 %v1869_v51, %v889_v36  ;;  %v1076_v50 = vadd.f32 %v7086_v41, %v5750_v57  ;;  %v7087_v51 = vld [vmem:[#allocation29_spill] sm:$0xff] }
 0x36b   : > { %v1871_v59 = vpop.f32.mrf.mxu0  ;;  %v1959_v55 = vadd.f32 %v1940_v1, %v1068_v56  ;;  %v1074_v36 = vadd.f32 %v7087_v51, %v5754_v47  ;;  %v3545_v60 = vmul.f32 -1.442695, %v1960_v46 }
 0x36c   : > { %4434 = vpow2.f32 %v3543_v63  ;;  %v3541_v6 = vmul.f32 -1.442695, %v1965_v23  ;;  %v1966_v61 = vadd.f32 %v1871_v59, %v891_v17  ;;  %v1964_v48 = vadd.f32 %v1948_v28, %v1076_v50  ;;  %v1954_v63 = vpop.f32.mrf.mxu1 }
 0x36d   : > { %v1082_v17 = vadd.f32 %v7088_v3, %v5750_v57  ;;  %v1963_v58 = vadd.f32 %v1946_v39, %v1074_v36 }
 0x36e   : > { %4436 = vpow2.f32 %v3541_v6  ;;  %v3544_v43 = vmul.f32 -1.442695, %v1966_v61  ;;  %v7089_v61 = vld [vmem:[#allocation33_spill] sm:$0xff]  ;;  %v3546_v1 = vmul.f32 -1.442695, %v1964_v48 }
 0x36f   : > { %v1080_v53 = vadd.f32 %v7089_v61, %v5754_v47  ;;  %v1968_v56 = vadd.f32 %v1954_v63, %v1082_v17 }
 0x370   : > { %4438 = vpow2.f32 %v3544_v43 }
 0x371   : > { %4440 = vtanh.f32 %v1959_v55  ;;  %v1967_v46 = vadd.f32 %v1952_v54, %v1080_v53  ;;  %v3547_v51 = vmul.f32 -1.442695, %v1968_v56 }
 0x372   : > { %4442 = vpow2.f32 %v3545_v60 }
 0x373   : > { %v4429_v23 = vpop.eup %4428 }
 0x374   : > { %v1978_v59 = vadd.f32 1.0, %v4429_v23 }
 0x375   : > { %v4431_v6 = vpop.eup %4430 }
 0x376   : > { %4444 = vrcp.f32 %v1978_v59  ;;  %v1996_v43 = vadd.f32 1.0, %v4431_v6 }
 0x377   : > { %v4433_v41 = vpop.eup %4432  ;;  %4446 = vtanh.f32 %v1963_v58 }
 0x378   : > { %4448 = vrcp.f32 %v1996_v43  ;;  %v1979_v28 = vadd.f32 1.0, %v4433_v41 }
 0x379   : > { %v4435_v50 = vpop.eup %4434  ;;  %4450 = vpow2.f32 %v3546_v1 }
 0x37a   : > { %4452 = vrcp.f32 %v1979_v28  ;;  %v1997_v39 = vadd.f32 1.0, %v4435_v50 }
 0x37b   : > { %v4437_v55 = vpop.eup %4436  ;;  %4454 = vtanh.f32 %v1967_v46 }
 0x37c   : > { %4456 = vrcp.f32 %v1997_v39  ;;  %v1980_v36 = vadd.f32 1.0, %v4437_v55 }
 0x37d   : > { %v4439_v23 = vpop.eup %4438  ;;  %4458 = vpow2.f32 %v3547_v51 }
 0x37e   : > { %4460 = vrcp.f32 %v1980_v36  ;;  %v1998_v60 = vadd.f32 1.0, %v4439_v23  ;;  %v4441_v48 = vpop.eup %4440  ;;  %v2054_v23 = vpop.permute.xlu0 %2053 }
 0x37f   : > { %v4443_v63 = vpop.eup %4442  ;;  %vm2059_vm9 = vcmp.eq.s32.totalorder %v2054_v23, 1  ;;  %v7124_v23 = vld [vmem:[#allocation96_spill] sm:$0xff] }
 0x380   : > { %4462 = vrcp.f32 %v1998_v60  ;;  %v2017_v59 = vadd.f32 1.0, %v4443_v63 }
 0x382   : > { %4464 = vrcp.f32 %v2017_v59  ;;  %v6237_v63 = vpop.permute.xlu0 %4323 }
 0x383   : > { %v4445_v3 = vpop.eup %4444 }
 0x384   : > { %v4447_v54 = vpop.eup %4446  ;;  %v2029_v17 = vmul.f32 %v4445_v3, %v4441_v48 }
 0x385   : > { %v4449_v58 = vpop.eup %4448 }
 0x386   : > { %v4451_v6 = vpop.eup %4450  ;;  %v2026_v61 = vmul.f32 %v4449_v58, %v5982_v4 }
 0x387   : > { %v4453_v53 = vpop.eup %4452  ;;  %v2018_v46 = vadd.f32 1.0, %v4451_v6 }
 0x388   : > { %v4455_v1 = vpop.eup %4454  ;;  %v6226_v56 = vadd.f32 %v2029_v17, %v2026_v61  ;;  %v2030_v43 = vmul.f32 %v4453_v53, %v4447_v54  ;;  %v4325_v54 = vunpack.i.l.bf16 %v6237_v63 }
 0x389   : > { %v4457_v41 = vpop.eup %4456 }
 0x38a   : > { %v4459_v28 = vpop.eup %4458  ;;  %4466 = vtanh.f32 %v6226_v56  ;;  %v2027_v50 = vmul.f32 %v4457_v41, %v5986_v8  ;;  %v2051_v8 = vpop.permute.xlu1 %2050 }
 0x38b   : > { %v4461_v51 = vpop.eup %4460  ;;  %4468 = vrcp.f32 %v2018_v46  ;;  %v2019_v4 = vadd.f32 1.0, %v4459_v28  ;;  %vm2058_vm8 = vcmp.eq.s32.totalorder %v2051_v8, 1  ;;  %v7126_v8 = vld [vmem:[#allocation98_spill] sm:$0xff] }
 0x38c   : > { %v6230_v39 = vadd.f32 %v2030_v43, %v2027_v50  ;;  %v2031_v55 = vmul.f32 %v4461_v51, %v4455_v1  ;;  %v7119_v50 = vld [vmem:[#allocation91_spill] sm:$0xff]  ;;  %v7120_v51 = vld [vmem:[#allocation92_spill] sm:$0xff] }
 0x38d   : > { %v4463_v36 = vpop.eup %4462 }
 0x38e   : > { %4470 = vtanh.f32 %v6230_v39  ;;  %v2028_v60 = vmul.f32 %v4463_v36, %v5990_v45  ;;  %v7090_v45 = vmax.f32 %v5994_v5, %v5996_v19  ;;  %v2057_v43 = vpop.permute.xlu1 %2056  ;;  %v7091_v5 = vmax.f32 %v6005_v22, %v6007_v7  ;;  %v7111_v22 = vld [vmem:[#allocation83_spill] sm:$0xff]  ;;  %v7112_v7 = vld [vmem:[#allocation84_spill] sm:$0xff]  ;;  %v7122_v36 = vld [vmem:[#allocation94_spill] sm:$0xff] }
 0x38f   : > { %4472 = vrcp.f32 %v2019_v4  ;;  %v4465_v3 = vpop.eup %4464  ;;  %vm2060_vm10 = vcmp.eq.s32.totalorder %v2057_v43, 1  ;;  %v7123_v4 = vld [vmem:[#allocation95_spill] sm:$0xff] }
 0x390   : > { %v6234_v48 = vadd.f32 %v2031_v55, %v2028_v60  ;;  %v7121_v55 = vld [vmem:[#allocation93_spill] sm:$0xff] }
 0x391   : > { %v7125_v60 = vld [vmem:[#allocation97_spill] sm:$0xff] }
 0x392   : > { %4474 = vtanh.f32 %v6234_v48 }
 0x397   : > { %v4467_v17 = vpop.eup %4466 }
 0x398   : > { %v2038_v58 = vmul.f32 %v4467_v17, %v4465_v3  ;;  %v4469_v59 = vpop.eup %4468  ;;  %v7127_v3 = vld [vmem:[#allocation9_spill] sm:$0xff]  ;;  %v7129_v17 = vld [vmem:[#allocation100_spill] sm:$0xff] }
 0x399   : > { %vm2612_vm11 = vcmp.gt.s32.totalorder %v7129_v17, 4  ;;  %v7137_v17 = vld [vmem:[#allocation38_spill] sm:$0xff] }
 0x39a   : > { %v2070_v6 = vsel %vm2058_vm8, %v2038_v58, %v4325_v54  ;;  %3996 = vmatprep.mubr.f32.mxu0 %v2038_v58  ;;  %4034 = vmatprep.mubr.f32.mxu1 %v2038_v58 }
 0x39b   : > { %v4471_v61 = vpop.eup %4470  ;;  %v6243_v53 = vmax.f32 %v7090_v45, %v2070_v6  ;;  %3997 = vmatmul.mubr.f32.vlgmr.msra.gmra.mxu0 %v2038_v58  ;;  %4035 = vmatmul.mubr.f32.vlgmr.msra.gmra.mxu1 %v2038_v58  ;;  %v6321_v58 = vld [vmem:[%s5444_s12] sm:$0x1]  ;;  %v7132_v6 = vmov 0   ;;  %v7133_v45 = vmov -inf  }
 0x39c   : > { %v2039_v1 = vmul.f32 %v4471_v61, %v4469_v59  ;;  %4041 = vmatpush3.xpose.msra.mxu0 %v5788_v29  ;;  %4079 = vmatpush3.xpose.msra.mxu1 %v5792_v14  ;;  %v4473_v41 = vpop.eup %4472  ;;  %7130 = vst [vmem:[#allocation24_spill] sm:$0xff] %v6321_v58  ;;  %vm2614_vm12 = vcmp.gt.s32.totalorder %v6321_v58, 4  ;;  %vm2899_vm13 = vcmp.gt.s32.totalorder %v6321_v58, 5  ;;  %v7131_v59 = vld [vmem:[#allocation99_spill] sm:$0xff]  ;;  %v2617_v61 = vsel %vm2612_vm11, 1, %v7132_v6 }
 0x39d   : > { %4042 = vmatprep.subr.mxu0 %v5796_v16  ;;  %4080 = vmatprep.subr.mxu1 %v5800_v9  ;;  %v7092_v16 = vmax.f32 %v6016_v35, %v6018_v0  ;;  %v7113_v35 = vld [vmem:[#allocation85_spill] sm:$0xff]  ;;  %v7114_v0 = vld [vmem:[#allocation86_spill] sm:$0xff]  ;;  %vm2611_vm14 = vcmp.gt.s32.totalorder %v7131_v59, 4  ;;  %v2900_v43 = vsel %vm2899_vm13, 0.0, %v7133_v45 }
 0x39e   : > { %v2071_v46 = vsel %vm2059_vm9, %v2039_v1, %v4325_v54  ;;  %3998 = vmatprep.mubr.f32.mxu0 %v2039_v1  ;;  %4036 = vmatprep.mubr.f32.mxu1 %v2039_v1 }
 0x39f   : > { %v4475_v28 = vpop.eup %4474  ;;  %3999 = vmatmul.mubr.f32.gmra.mxu0 %v2039_v1  ;;  %4037 = vmatmul.mubr.f32.gmra.mxu1 %v2039_v1  ;;  %v6252_v19 = vmax.f32 %v7091_v5, %v2071_v46  ;;  %v2615_v1 = vsel %vm2614_vm12, 0.0, %v7133_v45  ;;  %v7134_v46 = vld [vmem:[#allocation14_spill] sm:$0xff] }
 0x3a0   : > { %v2040_v29 = vmul.f32 %v4475_v28, %v4473_v41  ;;  %4043 = vmatpush3.xpose.msra.mxu0 %v5810_v42  ;;  %4081 = vmatpush3.xpose.msra.mxu1 %v5814_v62  ;;  %v7093_v42 = vld [vmem:[#allocation10_spill] sm:$0xff]  ;;  %v7094_v62 = vld [vmem:[#allocation12_spill] sm:$0xff]  ;;  %v2616_v41 = vsel %vm2611_vm14, 1, %v7132_v6  ;;  %v2635_v28 = vrot.slane %v2615_v1, %v7134_v46  ;;  %v2920_v5 = vrot.slane %v2900_v43, %v7134_v46 }
 0x3a1   : > { %4044 = vmatprep.subr.mxu0 %v5818_v18  ;;  %4082 = vmatprep.subr.mxu1 %v5822_v52  ;;  %v7095_v18 = vld [vmem:[#allocation18_spill] sm:$0xff]  ;;  %v7096_v52 = vld [vmem:[#allocation16_spill] sm:$0xff] }
 0x3a2   : > { %v2072_v14 = vsel %vm2060_vm10, %v2040_v29, %v4325_v54  ;;  %4000 = vmatprep.mubr.f32.mxu0 %v2040_v29  ;;  %4038 = vmatprep.mubr.f32.mxu1 %v2040_v29  ;;  %v7128_v54 = vld [vmem:[#allocation11_spill] sm:$0xff]  ;;  %v7138_v43 = vld [vmem:[#allocation40_spill] sm:$0xff] }
 0x3a3   : > { %v6261_v9 = vmax.f32 %v7092_v16, %v2072_v14  ;;  %4001 = vmatmul.mubr.f32.gmra.mxu0 %v2040_v29  ;;  %4039 = vmatmul.mubr.f32.gmra.mxu1 %v2040_v29  ;;  %v7135_v29 = vld [vmem:[#allocation101_spill] sm:$0xff]  ;;  %v4327_v16 = vpack.i.bf16 %v2920_v5, %v2635_v28  ;;  %v7139_v28 = vld [vmem:[#allocation42_spill] sm:$0xff] }
 0x3a4   : > { %4045 = vmatpush3.xpose.msra.mxu0 %v5830_v24  ;;  %4083 = vmatpush3.xpose.msra.mxu1 %v5834_v25  ;;  %v7097_v24 = vld [vmem:[#allocation17_spill] sm:$0xff]  ;;  %v7098_v25 = vld [vmem:[#allocation15_spill] sm:$0xff]  ;;  %vm2613_vm15 = vcmp.gt.s32.totalorder %v7135_v29, 4  ;;  %v903_v5 = vadd.f32 %v7139_v28, %v5734_v37 }
 0x3a5   : > { %4046 = vmatprep.subr.mxu0 %v5838_v34  ;;  %4084 = vmatprep.subr.mxu1 %v5842_v13  ;;  %v7099_v34 = vld [vmem:[#allocation4_spill] sm:$0xff]  ;;  %v7100_v13 = vld [vmem:[#allocation7_spill] sm:$0xff]  ;;  %v2618_v14 = vsel %vm2613_vm15, 1, %v7132_v6 }
 0x3a6   : > { %2623 = vperm.xlu1 %4316, %v2617_v61   ;;  %2620 = vperm.xlu0 %4315, %v2616_v41   ;;  %v897_v61 = vadd.f32 %v7137_v17, %v5734_v37  ;;  %v901_v41 = vadd.f32 %v7138_v43, %v5728_v31  ;;  %v7141_v43 = vld [vmem:[#allocation46_spill] sm:$0xff] }
 0x3a8   : > { %4047 = vmatpush3.xpose.msra.mxu0 %v5846_v33  ;;  %4085 = vmatpush3.xpose.msra.mxu1 %v5850_v2  ;;  %v7101_v33 = vld [vmem:[#allocation8_spill] sm:$0xff]  ;;  %v7102_v2 = vld [vmem:[#allocation3_spill] sm:$0xff] }
 0x3a9   : > { %4048 = vmatprep.subr.mxu0 %v5854_v32  ;;  %4086 = vmatprep.subr.mxu1 %v5858_v30  ;;  %v7103_v32 = vld [vmem:[#allocation20_spill] sm:$0xff]  ;;  %v7104_v30 = vld [vmem:[#allocation22_spill] sm:$0xff] }
 0x3aa   : > { %4328 = vperm.xlu1 %4316, %v4327_v16   ;;  %2626 = vperm.xlu0 %4315, %v2618_v14  }
 0x3ac   : > { %4049 = vmatpush3.xpose.msra.mxu0 %v7037_v21  ;;  %4087 = vmatpush3.xpose.msra.mxu1 %v7038_v38  ;;  %v7115_v21 = vld [vmem:[#allocation87_spill] sm:$0xff]  ;;  %v7116_v38 = vld [vmem:[#allocation88_spill] sm:$0xff] }
 0x3ad   : > { %4050 = vmatprep.subr.mxu0 %v7039_v15  ;;  %4088 = vmatprep.subr.mxu1 %v7040_v49  ;;  %v7117_v15 = vld [vmem:[#allocation89_spill] sm:$0xff]  ;;  %v7118_v49 = vld [vmem:[#allocation90_spill] sm:$0xff] }
 0x3b0   : > { %4051 = vmatpush3.xpose.msra.mxu0 %v5878_v20  ;;  %4089 = vmatpush3.xpose.msra.mxu1 %v5882_v12  ;;  %v7109_v20 = vld [vmem:[#allocation23_spill] sm:$0xff]  ;;  %v7110_v12 = vld [vmem:[#allocation21_spill] sm:$0xff] }
 0x3b1   : > { %4052 = vmatprep.subr.mxu0 %v5886_v27  ;;  %4090 = vmatprep.subr.mxu1 %v5890_v26  ;;  %v7105_v27 = vld [vmem:[#allocation6_spill] sm:$0xff]  ;;  %v7106_v26 = vld [vmem:[#allocation5_spill] sm:$0xff] }
 0x3b4   : > { %4053 = vmatpush3.xpose.msra.mxu0 %v5894_v11  ;;  %4091 = vmatpush3.xpose.msra.mxu1 %v6040_v40  ;;  %v7107_v11 = vld [vmem:[#allocation19_spill] sm:$0xff] }
 0x3b5   : > { %4054 = vmatprep.subr.mxu0 %v5899_v10  ;;  %4092 = vmatprep.subr.mxu1 %v6045_v44  ;;  %v7108_v10 = vld [vmem:[#allocation2_spill] sm:$0xff] }
 0x3b8   : > { %4055 = vmatpush3.xpose.msra.mxu0 %v7093_v42  ;;  %4093 = vmatpush3.xpose.msra.mxu1 %v7094_v62 }
 0x3b9   : > { %4056 = vmatprep.subr.mxu0 %v7095_v18  ;;  %4094 = vmatprep.subr.mxu1 %v7096_v52 }
 0x3bc   : > { %4057 = vmatpush3.xpose.msra.mxu0 %v7097_v24  ;;  %4095 = vmatpush3.xpose.msra.mxu1 %v7098_v25 }
 0x3bd   : > { %4058 = vmatprep.subr.mxu0 %v7099_v34  ;;  %4096 = vmatprep.subr.mxu1 %v7100_v13 }
 0x3c0   : > { %4059 = vmatpush3.xpose.msra.mxu0 %v7101_v33  ;;  %4097 = vmatpush3.xpose.msra.mxu1 %v7102_v2 }
 0x3c1   : > { %4060 = vmatprep.subr.mxu0 %v7103_v32  ;;  %4098 = vmatprep.subr.mxu1 %v7104_v30 }
 0x3c4   : > { %4061 = vmatpush3.xpose.msra.mxu0 %v7105_v27  ;;  %4099 = vmatpush3.xpose.msra.mxu1 %v7106_v26 }
 0x3c5   : > { %4062 = vmatprep.subr.mxu0 %v7107_v11  ;;  %4100 = vmatprep.subr.mxu1 %v7108_v10 }
 0x3c8   : > { %4063 = vmatpush3.xpose.msra.mxu0 %v7109_v20  ;;  %4101 = vmatpush3.xpose.msra.mxu1 %v7110_v12 }
 0x3c9   : > { %4064 = vmatprep.subr.mxu0 %v7111_v22  ;;  %4102 = vmatprep.subr.mxu1 %v7112_v7 }
 0x3cc   : > { %4065 = vmatpush3.xpose.msra.mxu0 %v7113_v35  ;;  %4103 = vmatpush3.xpose.msra.mxu1 %v7114_v0 }
 0x3cd   : > { %4066 = vmatprep.subr.mxu0 %v7115_v21  ;;  %4104 = vmatprep.subr.mxu1 %v7116_v38 }
 0x3d0   : > { %4067 = vmatpush3.xpose.msra.mxu0 %v7117_v15  ;;  %4105 = vmatpush3.xpose.msra.mxu1 %v7118_v49 }
 0x3d1   : > { %4068 = vmatprep.subr.mxu0 %v7119_v50  ;;  %4106 = vmatprep.subr.mxu1 %v7120_v51 }
 0x3d4   : > { %4069 = vmatpush3.xpose.msra.mxu0 %v7121_v55  ;;  %4107 = vmatpush3.xpose.msra.mxu1 %v7122_v36 }
 0x3d5   : > { %4070 = vmatprep.subr.mxu0 %v7123_v4  ;;  %4108 = vmatprep.subr.mxu1 %v7124_v23  ;;  %v7140_v23 = vld [vmem:[#allocation44_spill] sm:$0xff] }
 0x3d6   : > { %v907_v17 = vadd.f32 %v7140_v23, %v5728_v31  ;;  %v7143_v23 = vld [vmem:[#allocation37_spill] sm:$0xff] }
 0x3d8   : > { %4071 = vmatpush3.xpose.msra.mxu0 %v7125_v60  ;;  %4109 = vmatpush3.xpose.msra.mxu1 %v7126_v8 }
 0x3d9   : > { %4116 = vmatprep.subr.mxu0 %v7127_v3  ;;  %4154 = vmatprep.subr.mxu1 %v7128_v54  ;;  %v7136_v3 = vld [vmem:[#allocation36_spill] sm:$0xff] }
 0x3da   : > { %v895_v54 = vadd.f32 %v7136_v3, %v5728_v31 }
 0x45b   : > { %v2142_v58 = vpop.f32.mrf.mxu0  ;;  %v2225_v45 = vpop.f32.mrf.mxu1 }
 0x45c   : > { %v2242_v59 = vadd.f32 %v2142_v58, %v895_v54 }
 0x45d   : > { %v2144_v1 = vpop.f32.mrf.mxu0  ;;  %v2227_v8 = vpop.f32.mrf.mxu1 }
 0x45e   : > { %v3548_v46 = vmul.f32 -1.442695, %v2242_v59  ;;  %v2243_v29 = vadd.f32 %v2144_v1, %v897_v61  ;;  %v909_v59 = vadd.f32 %v7141_v43, %v5734_v37 }
 0x45f   : > { %v2148_v6 = vpop.f32.mrf.mxu0  ;;  %v2231_v3 = vpop.f32.mrf.mxu1 }
 0x460   : > { %4476 = vpow2.f32 %v3548_v46  ;;  %v3551_v14 = vmul.f32 -1.442695, %v2243_v29  ;;  %v2246_v16 = vadd.f32 %v2148_v6, %v901_v41  ;;  %v7142_v46 = vld [vmem:[#allocation39_spill] sm:$0xff] }
 0x461   : > { %v2150_v60 = vpop.f32.mrf.mxu0  ;;  %v2233_v1 = vpop.f32.mrf.mxu1  ;;  %v1088_v29 = vadd.f32 %v7142_v46, %v5750_v57 }
 0x462   : > { %4478 = vpow2.f32 %v3551_v14  ;;  %v3549_v58 = vmul.f32 -1.442695, %v2246_v16  ;;  %v2247_v54 = vadd.f32 %v2150_v60, %v903_v5  ;;  %v1086_v14 = vadd.f32 %v7143_v23, %v5754_v47  ;;  %v7144_v16 = vld [vmem:[#allocation43_spill] sm:$0xff] }
 0x463   : > { %v2154_v4 = vpop.f32.mrf.mxu0  ;;  %v2245_v55 = vadd.f32 %v2227_v8, %v1088_v29  ;;  %v2237_v60 = vpop.f32.mrf.mxu1  ;;  %v7146_v8 = vld [vmem:[#allocation47_spill] sm:$0xff] }
 0x464   : > { %4480 = vpow2.f32 %v3549_v58  ;;  %v3552_v61 = vmul.f32 -1.442695, %v2247_v54  ;;  %v2250_v36 = vadd.f32 %v2154_v4, %v907_v17  ;;  %v1094_v58 = vadd.f32 %v7144_v16, %v5750_v57  ;;  %v7145_v4 = vld [vmem:[#allocation41_spill] sm:$0xff] }
 0x465   : > { %v2156_v6 = vpop.f32.mrf.mxu0  ;;  %v2244_v54 = vadd.f32 %v2225_v45, %v1086_v14  ;;  %v1092_v17 = vadd.f32 %v7145_v4, %v5754_v47  ;;  %v3554_v43 = vmul.f32 -1.442695, %v2245_v55 }
 0x466   : > { %4482 = vpow2.f32 %v3552_v61  ;;  %v3550_v41 = vmul.f32 -1.442695, %v2250_v36  ;;  %v2251_v28 = vadd.f32 %v2156_v6, %v909_v59  ;;  %v2249_v46 = vadd.f32 %v2233_v1, %v1094_v58  ;;  %v2239_v61 = vpop.f32.mrf.mxu1 }
 0x467   : > { %v1100_v59 = vadd.f32 %v7146_v8, %v5750_v57  ;;  %v2248_v29 = vadd.f32 %v2231_v3, %v1092_v17 }
 0x468   : > { %4484 = vpow2.f32 %v3550_v41  ;;  %v3553_v5 = vmul.f32 -1.442695, %v2251_v28  ;;  %v7147_v28 = vld [vmem:[#allocation45_spill] sm:$0xff]  ;;  %v3555_v45 = vmul.f32 -1.442695, %v2249_v46 }
 0x469   : > { %v1098_v23 = vadd.f32 %v7147_v28, %v5754_v47  ;;  %v2253_v14 = vadd.f32 %v2239_v61, %v1100_v59 }
 0x46a   : > { %4486 = vpow2.f32 %v3553_v5 }
 0x46b   : > { %4488 = vtanh.f32 %v2244_v54  ;;  %v2252_v55 = vadd.f32 %v2237_v60, %v1098_v23  ;;  %v3556_v4 = vmul.f32 -1.442695, %v2253_v14 }
 0x46c   : > { %4490 = vpow2.f32 %v3554_v43 }
 0x46d   : > { %v4477_v36 = vpop.eup %4476 }
 0x46e   : > { %v2263_v6 = vadd.f32 1.0, %v4477_v36 }
 0x46f   : > { %v4479_v41 = vpop.eup %4478 }
 0x470   : > { %4492 = vrcp.f32 %v2263_v6  ;;  %v2281_v5 = vadd.f32 1.0, %v4479_v41 }
 0x471   : > { %v4481_v16 = vpop.eup %4480  ;;  %4494 = vtanh.f32 %v2248_v29 }
 0x472   : > { %4496 = vrcp.f32 %v2281_v5  ;;  %v2264_v1 = vadd.f32 1.0, %v4481_v16 }
 0x473   : > { %v4483_v58 = vpop.eup %4482  ;;  %4498 = vpow2.f32 %v3555_v45 }
 0x474   : > { %4500 = vrcp.f32 %v2264_v1  ;;  %v2282_v3 = vadd.f32 1.0, %v4483_v58 }
 0x475   : > { %v4485_v54 = vpop.eup %4484  ;;  %4502 = vtanh.f32 %v2252_v55 }
 0x476   : > { %4504 = vrcp.f32 %v2282_v3  ;;  %v2265_v17 = vadd.f32 1.0, %v4485_v54 }
 0x477   : > { %v4487_v36 = vpop.eup %4486  ;;  %4506 = vpow2.f32 %v3556_v4 }
 0x478   : > { %4508 = vrcp.f32 %v2265_v17  ;;  %v2283_v43 = vadd.f32 1.0, %v4487_v36  ;;  %v4489_v46 = vpop.eup %4488 }
 0x479   : > { %v4491_v61 = vpop.eup %4490 }
 0x47a   : > { %4510 = vrcp.f32 %v2283_v43  ;;  %v2302_v6 = vadd.f32 1.0, %v4491_v61 }
 0x47c   : > { %4512 = vrcp.f32 %v2302_v6 }
 0x47d   : > { %v4493_v8 = vpop.eup %4492 }
 0x47e   : > { %v4495_v60 = vpop.eup %4494  ;;  %v2314_v59 = vmul.f32 %v4493_v8, %v4489_v46  ;;  %v2336_v46 = vpop.permute.xlu1 %2335 }
 0x47f   : > { %v4497_v29 = vpop.eup %4496  ;;  %vm2343_vm1 = vcmp.eq.s32.totalorder %v2336_v46, 1  ;;  %v6408_v46 = vld [vmem:[%s5071_s29 + $0x1e8] sm:$0xff] }
 0x480   : > { %v4499_v41 = vpop.eup %4498  ;;  %v2311_v28 = vmul.f32 %v4497_v29, %v6226_v56 }
 0x481   : > { %v4501_v23 = vpop.eup %4500  ;;  %v2303_v55 = vadd.f32 1.0, %v4499_v41  ;;  %v6464_v41 = vld [vmem:[%s5071_s29 + $0x50] sm:$0xff] }
 0x482   : > { %v4503_v45 = vpop.eup %4502  ;;  %v6359_v14 = vadd.f32 %v2314_v59, %v2311_v28  ;;  %v2315_v5 = vmul.f32 %v4501_v23, %v4495_v60  ;;  %v2339_v59 = vpop.permute.xlu0 %2338  ;;  %v6376_v23 = vld [vmem:[%s5071_s29 + $0x78] sm:$0xff] }
 0x483   : > { %v4505_v16 = vpop.eup %4504  ;;  %vm2344_vm2 = vcmp.eq.s32.totalorder %v2339_v59, 1  ;;  %v2342_v28 = vpop.permute.xlu1 %2341  ;;  %v6420_v59 = vld [vmem:[%s5071_s29 + $0x168] sm:$0xff] }
 0x484   : > { %v4507_v1 = vpop.eup %4506  ;;  %4514 = vtanh.f32 %v6359_v14  ;;  %v2312_v58 = vmul.f32 %v4505_v16, %v6230_v39  ;;  %v4326_v39 = vunpack.i.h.bf16 %v6237_v63  ;;  %v6388_v16 = vld [vmem:[%s5071_s29 + $0x1f0] sm:$0xff]  ;;  %vm2345_vm3 = vcmp.eq.s32.totalorder %v2342_v28, 1  ;;  %v6440_v28 = vld [vmem:[%s5071_s29 + $0xd8] sm:$0xff] }
 0x485   : > { %v4509_v4 = vpop.eup %4508  ;;  %4516 = vrcp.f32 %v2303_v55  ;;  %v2304_v56 = vadd.f32 1.0, %v4507_v1 }
 0x486   : > { %v6363_v3 = vadd.f32 %v2315_v5, %v2312_v58  ;;  %v2316_v54 = vmul.f32 %v4509_v4, %v4503_v45  ;;  %v6380_v45 = vld [vmem:[%s5071_s29 + $0x178] sm:$0xff]  ;;  %v6384_v5 = vld [vmem:[%s5071_s29 + $0xf0] sm:$0xff] }
 0x487   : > { %v4511_v17 = vpop.eup %4510  ;;  %v6460_v4 = vld [vmem:[%s5071_s29 + $0x1d0] sm:$0xff] }
 0x488   : > { %4518 = vtanh.f32 %v6363_v3  ;;  %v2313_v36 = vmul.f32 %v4511_v17, %v6234_v48  ;;  %v6396_v17 = vld [vmem:[%s5071_s29 + $0x70] sm:$0xff]  ;;  %7152 = vst [vmem:[#allocation34_spill] sm:$0xff] %v6460_v4 }
 0x489   : > { %4520 = vrcp.f32 %v2304_v56  ;;  %v4513_v61 = vpop.eup %4512  ;;  %v6400_v56 = vld [vmem:[%s5071_s29 + $0x170] sm:$0xff] }
 0x48a   : > { %v6367_v43 = vadd.f32 %v2316_v54, %v2313_v36  ;;  %v6404_v36 = vld [vmem:[%s5071_s29 + $0xe8] sm:$0xff] }
 0x48c   : > { %4522 = vtanh.f32 %v6367_v43 }
 0x491   : > { %v4515_v8 = vpop.eup %4514 }
 0x492   : > { %v2323_v60 = vmul.f32 %v4515_v8, %v4513_v61  ;;  %v4517_v29 = vpop.eup %4516  ;;  %v6456_v8 = vld [vmem:[%s5071_s29 + $0xd0] sm:$0xff] }
 0x493   : > { %7151 = vst [vmem:[#allocation32_spill] sm:$0xff] %v6456_v8 }
 0x494   : > { %v6371_v6 = vsel %vm2343_vm1, %v2323_v60, %v4326_v39  ;;  %4072 = vmatprep.mubr.f32.mxu0 %v2323_v60  ;;  %4110 = vmatprep.mubr.f32.mxu1 %v2323_v60 }
 0x495   : > { %v4519_v48 = vpop.eup %4518  ;;  %4073 = vmatmul.mubr.f32.vlgmr.msra.gmra.mxu0 %v2323_v60  ;;  %4111 = vmatmul.mubr.f32.vlgmr.msra.gmra.mxu1 %v2323_v60  ;;  %v6416_v60 = vld [vmem:[%s5071_s29 + $0x68] sm:$0xff] }
 0x496   : > { %v2324_v63 = vmul.f32 %v4519_v48, %v4517_v29  ;;  %4117 = vmatpush3.xpose.msra.mxu0 %v6376_v23  ;;  %4155 = vmatpush3.xpose.msra.mxu1 %v6380_v45  ;;  %v4521_v55 = vpop.eup %4520  ;;  %v6428_v29 = vld [vmem:[%s5071_s29 + $0x1e0] sm:$0xff] }
 0x497   : > { %4118 = vmatprep.subr.mxu0 %v6384_v5  ;;  %4156 = vmatprep.subr.mxu1 %v6388_v16  ;;  %v6432_v48 = vld [vmem:[%s5071_s29 + $0x60] sm:$0xff] }
 0x498   : > { %v6391_v1 = vsel %vm2344_vm2, %v2324_v63, %v4326_v39  ;;  %4074 = vmatprep.mubr.f32.mxu0 %v2324_v63  ;;  %4112 = vmatprep.mubr.f32.mxu1 %v2324_v63 }
 0x499   : > { %v4523_v58 = vpop.eup %4522  ;;  %4075 = vmatmul.mubr.f32.gmra.mxu0 %v2324_v63  ;;  %4113 = vmatmul.mubr.f32.gmra.mxu1 %v2324_v63  ;;  %v6436_v63 = vld [vmem:[%s5071_s29 + $0x160] sm:$0xff] }
 0x49a   : > { %v2325_v54 = vmul.f32 %v4523_v58, %v4521_v55  ;;  %4119 = vmatpush3.xpose.msra.mxu0 %v6396_v17  ;;  %4157 = vmatpush3.xpose.msra.mxu1 %v6400_v56  ;;  %v6444_v55 = vld [vmem:[%s5071_s29 + $0x1d8] sm:$0xff] }
 0x49b   : > { %4120 = vmatprep.subr.mxu0 %v6404_v36  ;;  %4158 = vmatprep.subr.mxu1 %v6408_v46  ;;  %7148 = vst [vmem:[#allocation26_spill] sm:$0xff] %v6444_v55  ;;  %v6448_v58 = vld [vmem:[%s5071_s29 + $0x58] sm:$0xff] }
 0x49c   : > { %v6411_v61 = vsel %vm2345_vm3, %v2325_v54, %v4326_v39  ;;  %4076 = vmatprep.mubr.f32.mxu0 %v2325_v54  ;;  %4114 = vmatprep.mubr.f32.mxu1 %v2325_v54  ;;  %v6424_v39 = vld [vmem:[%s5071_s29 + $0xe0] sm:$0xff]  ;;  %7149 = vst [vmem:[#allocation28_spill] sm:$0xff] %v6448_v58 }
 0x49d   : > { %4077 = vmatmul.mubr.f32.gmra.mxu0 %v2325_v54  ;;  %4115 = vmatmul.mubr.f32.gmra.mxu1 %v2325_v54  ;;  %v6452_v54 = vld [vmem:[%s5071_s29 + $0x158] sm:$0xff] }
 0x49e   : > { %4121 = vmatpush3.xpose.msra.mxu0 %v6416_v60  ;;  %4159 = vmatpush3.xpose.msra.mxu1 %v6420_v59  ;;  %7150 = vst [vmem:[#allocation30_spill] sm:$0xff] %v6452_v54 }
 0x49f   : > { %4122 = vmatprep.subr.mxu0 %v6424_v39  ;;  %4160 = vmatprep.subr.mxu1 %v6428_v29 }
 0x4a2   : > { %4123 = vmatpush3.xpose.msra.mxu0 %v6432_v48  ;;  %4161 = vmatpush3.xpose.msra.mxu1 %v6436_v63 }
 0x4a3   : > { %4124 = vmatprep.subr.mxu0 %v6440_v28  ;;  %4162 = vmatprep.subr.mxu1 %v6444_v55  ;;  %v6468_v55 = vld [vmem:[%s5071_s29 + $0x150] sm:$0xff] }
 0x4a6   : > { %4125 = vmatpush3.xpose.msra.mxu0 %v6448_v58  ;;  %4163 = vmatpush3.xpose.msra.mxu1 %v6452_v54  ;;  %v6472_v58 = vld [vmem:[%s5071_s29 + $0xc8] sm:$0xff] }
 0x4a7   : > { %4126 = vmatprep.subr.mxu0 %v6456_v8  ;;  %4164 = vmatprep.subr.mxu1 %v6460_v4  ;;  %v6476_v54 = vld [vmem:[%s5071_s29 + $0x1c8] sm:$0xff]  ;;  %v6485_v4 = vld [vmem:[%s5071_s29 + $0xc0] sm:$0xff] }
 0x4a8   : > { %v6480_v8 = vld [vmem:[%s5071_s29 + $0x48] sm:$0xff] }
 0x4aa   : > { %4127 = vmatpush3.xpose.msra.mxu0 %v6464_v41  ;;  %4165 = vmatpush3.xpose.msra.mxu1 %v6468_v55 }
 0x4ab   : > { %4128 = vmatprep.subr.mxu0 %v6472_v58  ;;  %4166 = vmatprep.subr.mxu1 %v6476_v54 }
 0x4ae   : > { %4129 = vmatpush3.xpose.msra.mxu0 %v6480_v8  ;;  %4167 = vmatpush3.xpose.msra.mxu1 %v6040_v40  ;;  %v7153_v40 = vld [vmem:[#allocation93_spill] sm:$0xff] }
 0x4af   : > { %4130 = vmatprep.subr.mxu0 %v6485_v4  ;;  %4168 = vmatprep.subr.mxu1 %v6045_v44  ;;  %v7154_v44 = vld [vmem:[#allocation94_spill] sm:$0xff] }
 0x4b2   : > { %4131 = vmatpush3.xpose.msra.mxu0 %v7093_v42  ;;  %4169 = vmatpush3.xpose.msra.mxu1 %v7094_v62  ;;  %v7155_v42 = vld [vmem:[#allocation95_spill] sm:$0xff]  ;;  %v7156_v62 = vld [vmem:[#allocation96_spill] sm:$0xff] }
 0x4b3   : > { %4132 = vmatprep.subr.mxu0 %v7095_v18  ;;  %4170 = vmatprep.subr.mxu1 %v7096_v52  ;;  %v7157_v18 = vld [vmem:[#allocation97_spill] sm:$0xff]  ;;  %v7158_v52 = vld [vmem:[#allocation98_spill] sm:$0xff] }
 0x4b6   : > { %4133 = vmatpush3.xpose.msra.mxu0 %v7097_v24  ;;  %4171 = vmatpush3.xpose.msra.mxu1 %v7098_v25  ;;  %v4762_v24 = vld [vmem:[%s5071_s29 + $0xf8] sm:$0xff] }
 0x4b7   : > { %4134 = vmatprep.subr.mxu0 %v7099_v34  ;;  %4172 = vmatprep.subr.mxu1 %v7100_v13  ;;  %v4763_v25 = vld [vmem:[%s5071_s29 + $0x1f8] sm:$0xff]  ;;  %v7159_v34 = vld [vmem:[#allocation99_spill] sm:$0xff]  ;;  %v7160_v13 = vld [vmem:[#allocation100_spill] sm:$0xff] }
 0x4b8   : > { %vm2896_vm4 = vcmp.gt.s32.totalorder %v7159_v34, 5  ;;  %vm2897_vm5 = vcmp.gt.s32.totalorder %v7160_v13, 5 }
 0x4ba   : > { %4135 = vmatpush3.xpose.msra.mxu0 %v7101_v33  ;;  %4173 = vmatpush3.xpose.msra.mxu1 %v7102_v2  ;;  %v7161_v33 = vld [vmem:[#allocation101_spill] sm:$0xff]  ;;  %v7162_v2 = vmov 0  }
 0x4bb   : > { %4136 = vmatprep.subr.mxu0 %v7103_v32  ;;  %4174 = vmatprep.subr.mxu1 %v7104_v30  ;;  %vm2898_vm6 = vcmp.gt.s32.totalorder %v7161_v33, 5  ;;  %v2901_v32 = vsel %vm2896_vm4, 1, %v7162_v2  ;;  %v2902_v30 = vsel %vm2897_vm5, 1, %v7162_v2  ;;  %v7168_v33 = vld [vmem:[#allocation58_spill] sm:$0xff] }
 0x4bc   : > { %2905 = vperm.xlu0 %4315, %v2901_v32   ;;  %2908 = vperm.xlu1 %4316, %v2902_v30   ;;  %v927_v32 = vadd.f32 %v7168_v33, %v5734_v37 }
 0x4be   : > { %4137 = vmatpush3.xpose.msra.mxu0 %v7105_v27  ;;  %4175 = vmatpush3.xpose.msra.mxu1 %v7106_v26  ;;  %v2903_v27 = vsel %vm2898_vm6, 1, %v7162_v2  ;;  %v7163_v26 = vld [vmem:[#allocation48_spill] sm:$0xff] }
 0x4bf   : > { %4138 = vmatprep.subr.mxu0 %v7107_v11  ;;  %4176 = vmatprep.subr.mxu1 %v7108_v10  ;;  %v913_v11 = vadd.f32 %v7163_v26, %v5728_v31 }
 0x4c0   : > { %2911 = vperm.xlu0 %4315, %v2903_v27  }
 0x4c2   : > { %4139 = vmatpush3.xpose.msra.mxu0 %v7109_v20  ;;  %4177 = vmatpush3.xpose.msra.mxu1 %v7110_v12  ;;  %v7164_v12 = vld [vmem:[#allocation50_spill] sm:$0xff] }
 0x4c3   : > { %4140 = vmatprep.subr.mxu0 %v7111_v22  ;;  %4178 = vmatprep.subr.mxu1 %v7112_v7  ;;  %v915_v22 = vadd.f32 %v7164_v12, %v5734_v37 }
 0x4c6   : > { %4141 = vmatpush3.xpose.msra.mxu0 %v7113_v35  ;;  %4179 = vmatpush3.xpose.msra.mxu1 %v7114_v0 }
 0x4c7   : > { %4142 = vmatprep.subr.mxu0 %v7115_v21  ;;  %4180 = vmatprep.subr.mxu1 %v7116_v38  ;;  %v7165_v21 = vld [vmem:[#allocation52_spill] sm:$0xff] }
 0x4c8   : > { %v919_v38 = vadd.f32 %v7165_v21, %v5728_v31  ;;  %v7170_v21 = vld [vmem:[#allocation49_spill] sm:$0xff] }
 0x4ca   : > { %4143 = vmatpush3.xpose.msra.mxu0 %v7117_v15  ;;  %4181 = vmatpush3.xpose.msra.mxu1 %v7118_v49 }
 0x4cb   : > { %4144 = vmatprep.subr.mxu0 %v7119_v50  ;;  %4182 = vmatprep.subr.mxu1 %v7120_v51  ;;  %v7166_v51 = vld [vmem:[#allocation54_spill] sm:$0xff] }
 0x4ce   : > { %4145 = vmatpush3.xpose.msra.mxu0 %v7153_v40  ;;  %4183 = vmatpush3.xpose.msra.mxu1 %v7154_v44  ;;  %v921_v40 = vadd.f32 %v7166_v51, %v5734_v37 }
 0x4cf   : > { %4146 = vmatprep.subr.mxu0 %v7155_v42  ;;  %4184 = vmatprep.subr.mxu1 %v7156_v62 }
 0x4d2   : > { %4147 = vmatpush3.xpose.msra.mxu0 %v7157_v18  ;;  %4185 = vmatpush3.xpose.msra.mxu1 %v7158_v52  ;;  %v7167_v52 = vld [vmem:[#allocation56_spill] sm:$0xff] }
 0x4d3   : > { %4192 = vmatprep.subr.mxu0 %v4762_v24  ;;  %4230 = vmatprep.subr.mxu1 %v4763_v25  ;;  %v925_v24 = vadd.f32 %v7167_v52, %v5728_v31 }
 0x555   : > { %v2427_v10 = vpop.f32.mrf.mxu0  ;;  %v2510_v20 = vpop.f32.mrf.mxu1 }
 0x556   : > { %v2527_v7 = vadd.f32 %v2427_v10, %v913_v11  ;;  %v7169_v11 = vld [vmem:[#allocation51_spill] sm:$0xff] }
 0x557   : > { %v2429_v35 = vpop.f32.mrf.mxu0  ;;  %v2512_v0 = vpop.f32.mrf.mxu1  ;;  %v1106_v10 = vadd.f32 %v7169_v11, %v5750_v57 }
 0x558   : > { %v3557_v15 = vmul.f32 -1.442695, %v2527_v7  ;;  %v2528_v49 = vadd.f32 %v2429_v35, %v915_v22 }
 0x559   : > { %v2433_v50 = vpop.f32.mrf.mxu0  ;;  %v2516_v62 = vpop.f32.mrf.mxu1  ;;  %v2530_v35 = vadd.f32 %v2512_v0, %v1106_v10  ;;  %v7173_v0 = vld [vmem:[#allocation59_spill] sm:$0xff] }
 0x55a   : > { %4524 = vpow2.f32 %v3557_v15  ;;  %v3560_v44 = vmul.f32 -1.442695, %v2528_v49  ;;  %v2531_v42 = vadd.f32 %v2433_v50, %v919_v38  ;;  %v1104_v38 = vadd.f32 %v7170_v21, %v5754_v47  ;;  %v7171_v50 = vld [vmem:[#allocation55_spill] sm:$0xff] }
 0x55b   : > { %v2435_v18 = vpop.f32.mrf.mxu0  ;;  %v2518_v27 = vpop.f32.mrf.mxu1  ;;  %v1112_v51 = vadd.f32 %v7171_v50, %v5750_v57 }
 0x55c   : > { %4526 = vpow2.f32 %v3560_v44  ;;  %v3558_v25 = vmul.f32 -1.442695, %v2531_v42  ;;  %v2532_v34 = vadd.f32 %v2435_v18, %v921_v40  ;;  %v2529_v40 = vadd.f32 %v2510_v20, %v1104_v38  ;;  %v7172_v44 = vld [vmem:[#allocation53_spill] sm:$0xff] }
 0x55d   : > { %v2439_v13 = vpop.f32.mrf.mxu0  ;;  %v2522_v15 = vpop.f32.mrf.mxu1  ;;  %v1110_v42 = vadd.f32 %v7172_v44, %v5754_v47  ;;  %v3563_v18 = vmul.f32 -1.442695, %v2530_v35  ;;  %v2534_v52 = vadd.f32 %v2518_v27, %v1112_v51 }
 0x55e   : > { %4528 = vpow2.f32 %v3558_v25  ;;  %v3561_v30 = vmul.f32 -1.442695, %v2532_v34  ;;  %v2535_v26 = vadd.f32 %v2439_v13, %v925_v24  ;;  %v1118_v34 = vadd.f32 %v7173_v0, %v5750_v57 }
 0x55f   : > { %v2441_v12 = vpop.f32.mrf.mxu0  ;;  %v2524_v24 = vpop.f32.mrf.mxu1  ;;  %v2533_v13 = vadd.f32 %v2516_v62, %v1110_v42  ;;  %v3564_v20 = vmul.f32 -1.442695, %v2534_v52 }
 0x560   : > { %4530 = vpow2.f32 %v3561_v30  ;;  %v3559_v22 = vmul.f32 -1.442695, %v2535_v26  ;;  %v2536_v7 = vadd.f32 %v2441_v12, %v927_v32  ;;  %v7174_v30 = vld [vmem:[#allocation57_spill] sm:$0xff]  ;;  %v2538_v11 = vadd.f32 %v2524_v24, %v1118_v34 }
 0x561   : > { %v1116_v26 = vadd.f32 %v7174_v30, %v5754_v47 }
 0x562   : > { %4532 = vpow2.f32 %v3559_v22  ;;  %v3562_v49 = vmul.f32 -1.442695, %v2536_v7  ;;  %v3565_v35 = vmul.f32 -1.442695, %v2538_v11 }
 0x563   : > { %v2537_v27 = vadd.f32 %v2522_v15, %v1116_v26 }
 0x564   : > { %4534 = vpow2.f32 %v3562_v49 }
 0x565   : > { %4536 = vtanh.f32 %v2529_v40 }
 0x566   : > { %4538 = vpow2.f32 %v3563_v18 }
 0x567   : > { %v4525_v25 = vpop.eup %4524 }
 0x568   : > { %v2548_v33 = vadd.f32 1.0, %v4525_v25 }
 0x569   : > { %v4527_v32 = vpop.eup %4526 }
 0x56a   : > { %4540 = vrcp.f32 %v2548_v33  ;;  %v2566_v10 = vadd.f32 1.0, %v4527_v32 }
 0x56b   : > { %v4529_v12 = vpop.eup %4528  ;;  %4542 = vtanh.f32 %v2533_v13 }
 0x56c   : > { %4544 = vrcp.f32 %v2566_v10  ;;  %v2549_v22 = vadd.f32 1.0, %v4529_v12 }
 0x56d   : > { %v4531_v7 = vpop.eup %4530  ;;  %4546 = vpow2.f32 %v3564_v20 }
 0x56e   : > { %4548 = vrcp.f32 %v2549_v22  ;;  %v2567_v62 = vadd.f32 1.0, %v4531_v7  ;;  %v2624_v22 = vpop.permute.xlu1 %2623 }
 0x56f   : > { %v4533_v21 = vpop.eup %4532  ;;  %4550 = vtanh.f32 %v2537_v27  ;;  %vm2629_vm8 = vcmp.eq.s32.totalorder %v2624_v22, 1  ;;  %v4791_v22 = vld [vmem:[%s5071_s29 + $0x110] sm:$0xff] }
 0x570   : > { %4552 = vrcp.f32 %v2567_v62  ;;  %v2550_v38 = vadd.f32 1.0, %v4533_v21 }
 0x571   : > { %v4535_v49 = vpop.eup %4534  ;;  %4554 = vpow2.f32 %v3565_v35 }
 0x572   : > { %4556 = vrcp.f32 %v2550_v38  ;;  %v2568_v50 = vadd.f32 1.0, %v4535_v49  ;;  %v4537_v51 = vpop.eup %4536  ;;  %v6567_v62 = vpop.permute.xlu1 %4328 }
 0x573   : > { %v4539_v40 = vpop.eup %4538  ;;  %v4330_v38 = vunpack.i.l.bf16 %v6567_v62 }
 0x574   : > { %4558 = vrcp.f32 %v2568_v50  ;;  %v2587_v52 = vadd.f32 1.0, %v4539_v40 }
 0x576   : > { %4560 = vrcp.f32 %v2587_v52 }
 0x577   : > { %v4541_v44 = vpop.eup %4540 }
 0x578   : > { %v4543_v15 = vpop.eup %4542  ;;  %v2599_v42 = vmul.f32 %v4541_v44, %v4537_v51 }
 0x579   : > { %v4545_v18 = vpop.eup %4544 }
 0x57a   : > { %v4547_v24 = vpop.eup %4546  ;;  %v2596_v25 = vmul.f32 %v4545_v18, %v6359_v14 }
 0x57b   : > { %v4549_v0 = vpop.eup %4548  ;;  %v2588_v30 = vadd.f32 1.0, %v4547_v24 }
 0x57c   : > { %v4551_v34 = vpop.eup %4550  ;;  %v6556_v13 = vadd.f32 %v2599_v42, %v2596_v25  ;;  %v2600_v33 = vmul.f32 %v4549_v0, %v4543_v15  ;;  %v4780_v0 = vld [vmem:[%s5071_s29 + $0xa0] sm:$0xff] }
 0x57d   : > { %v4553_v32 = vpop.eup %4552 }
 0x57e   : > { %v4555_v26 = vpop.eup %4554  ;;  %4562 = vtanh.f32 %v6556_v13  ;;  %v2597_v20 = vmul.f32 %v4553_v32, %v6363_v3  ;;  %v2621_v3 = vpop.permute.xlu0 %2620  ;;  %v4783_v32 = vld [vmem:[%s5071_s29 + $0x120] sm:$0xff] }
 0x57f   : > { %v4557_v11 = vpop.eup %4556  ;;  %4564 = vrcp.f32 %v2588_v30  ;;  %v2589_v14 = vadd.f32 1.0, %v4555_v26  ;;  %vm2628_vm7 = vcmp.eq.s32.totalorder %v2621_v3, 1  ;;  %v4784_v30 = vld [vmem:[%s5071_s29 + $0x98] sm:$0xff]  ;;  %v4793_v3 = vld [vmem:[%s5071_s29 + $0x188] sm:$0xff] }
 0x580   : > { %v6560_v10 = vadd.f32 %v2600_v33, %v2597_v20  ;;  %v2601_v12 = vmul.f32 %v4557_v11, %v4551_v34  ;;  %v4781_v34 = vld [vmem:[%s5071_s29 + $0x1a0] sm:$0xff]  ;;  %v4785_v26 = vld [vmem:[%s5071_s29 + $0x198] sm:$0xff] }
 0x581   : > { %v4559_v27 = vpop.eup %4558  ;;  %v4782_v33 = vld [vmem:[%s5071_s29 + $0x20] sm:$0xff]  ;;  %v4786_v20 = vld [vmem:[%s5071_s29 + $0x18] sm:$0xff] }
 0x582   : > { %4566 = vtanh.f32 %v6560_v10  ;;  %v2598_v7 = vmul.f32 %v4559_v27, %v6367_v43  ;;  %v7175_v43 = vmax.f32 %v6243_v53, %v6371_v6  ;;  %v2627_v18 = vpop.permute.xlu0 %2626  ;;  %v7176_v53 = vmax.f32 %v6252_v19, %v6391_v1  ;;  %v7178_v19 = vld [vmem:[#allocation26_spill] sm:$0xff]  ;;  %v4787_v11 = vld [vmem:[%s5071_s29 + $0x118] sm:$0xff]  ;;  %v4789_v27 = vld [vmem:[%s5071_s29 + $0x190] sm:$0xff] }
 0x583   : > { %4568 = vrcp.f32 %v2589_v14  ;;  %v4561_v21 = vpop.eup %4560  ;;  %vm2630_vm9 = vcmp.eq.s32.totalorder %v2627_v18, 1  ;;  %v7180_v1 = vld [vmem:[#allocation30_spill] sm:$0xff]  ;;  %v4790_v14 = vld [vmem:[%s5071_s29 + $0x10] sm:$0xff] }
 0x584   : > { %v6564_v35 = vadd.f32 %v2601_v12, %v2598_v7  ;;  %v4788_v12 = vld [vmem:[%s5071_s29 + $0x90] sm:$0xff]  ;;  %v4792_v7 = vld [vmem:[%s5071_s29 + $0x88] sm:$0xff] }
 0x585   : > { %v4802_v18 = vld [vmem:[%s5438_s9 + $0x10] sm:$0xff] }
 0x586   : > { %4570 = vtanh.f32 %v6564_v35  ;;  %vm3183_vm13 = vcmp.gt.s32.totalorder %v4802_v18, 6 }
 0x58b   : > { %v4563_v49 = vpop.eup %4562 }
 0x58c   : > { %v2608_v50 = vmul.f32 %v4563_v49, %v4561_v21  ;;  %v4565_v51 = vpop.eup %4564  ;;  %v4794_v21 = vld [vmem:[%s5071_s29 + $0x8] sm:$0xff]  ;;  %v4796_v49 = vld [vmem:[%s5071_s29 + $0x80] sm:$0xff] }
 0x58e   : > { %v2640_v40 = vsel %vm2628_vm7, %v2608_v50, %v4330_v38  ;;  %4148 = vmatprep.mubr.f32.mxu0 %v2608_v50  ;;  %4186 = vmatprep.mubr.f32.mxu1 %v2608_v50 }
 0x58f   : > { %v4567_v44 = vpop.eup %4566  ;;  %v6573_v15 = vmax.f32 %v7175_v43, %v2640_v40  ;;  %4149 = vmatmul.mubr.f32.vlgmr.msra.gmra.mxu0 %v2608_v50  ;;  %4187 = vmatmul.mubr.f32.vlgmr.msra.gmra.mxu1 %v2608_v50  ;;  %v4797_v50 = vld [vmem:[%s5071_s29 + $0x180] sm:$0xff] }
 0x590   : > { %v2609_v42 = vmul.f32 %v4567_v44, %v4565_v51  ;;  %4193 = vmatpush3.xpose.msra.mxu0 %v6376_v23  ;;  %4231 = vmatpush3.xpose.msra.mxu1 %v6380_v45  ;;  %v4569_v52 = vpop.eup %4568  ;;  %v4798_v51 = vld [vmem:[%s5071_s29] sm:$0xff]  ;;  %v4800_v44 = vld [vmem:[%s5438_s9 + $0x8] sm:$0xff] }
 0x591   : > { %4194 = vmatprep.subr.mxu0 %v6384_v5  ;;  %4232 = vmatprep.subr.mxu1 %v6388_v16  ;;  %v7177_v5 = vmax.f32 %v6261_v9, %v6411_v61  ;;  %v7179_v9 = vld [vmem:[#allocation28_spill] sm:$0xff]  ;;  %v4767_v61 = vld [vmem:[%s5071_s29 + $0x140] sm:$0xff]  ;;  %vm3182_vm10 = vcmp.gt.s32.totalorder %v4800_v44, 6 }
 0x592   : > { %v2641_v24 = vsel %vm2629_vm8, %v2609_v42, %v4330_v38  ;;  %4150 = vmatprep.mubr.f32.mxu0 %v2609_v42  ;;  %4188 = vmatprep.mubr.f32.mxu1 %v2609_v42  ;;  %v4799_v40 = vld [vmem:[%s5071_s29 + $0x100] sm:$0xff] }
 0x593   : > { %v4571_v25 = vpop.eup %4570  ;;  %4151 = vmatmul.mubr.f32.gmra.mxu0 %v2609_v42  ;;  %4189 = vmatmul.mubr.f32.gmra.mxu1 %v2609_v42  ;;  %v6582_v6 = vmax.f32 %v7176_v53, %v2641_v24  ;;  %v4801_v43 = vld [vmem:[%s5438_s9] sm:$0xff]  ;;  %v7183_v42 = vld [vmem:[#allocation24_spill] sm:$0xff] }
 0x594   : > { %v2610_v23 = vmul.f32 %v4571_v25, %v4569_v52  ;;  %4195 = vmatpush3.xpose.msra.mxu0 %v6396_v17  ;;  %4233 = vmatpush3.xpose.msra.mxu1 %v6400_v56  ;;  %v7181_v17 = vld [vmem:[#allocation32_spill] sm:$0xff]  ;;  %v7182_v56 = vld [vmem:[#allocation34_spill] sm:$0xff]  ;;  %vm3181_vm11 = vcmp.gt.s32.totalorder %v4801_v43, 6  ;;  %vm3184_vm12 = vcmp.gt.s32.totalorder %v7183_v42, 6  ;;  %v3187_v52 = vsel %vm3182_vm10, 1, %v7162_v2  ;;  %v7195_v43 = vld [vmem:[#allocation65_spill] sm:$0xff] }
 0x595   : > { %4196 = vmatprep.subr.mxu0 %v6404_v36  ;;  %4234 = vmatprep.subr.mxu1 %v6408_v46  ;;  %v4764_v36 = vld [vmem:[%s5071_s29 + $0x148] sm:$0xff]  ;;  %v4765_v46 = vld [vmem:[%s5071_s29 + $0x1c0] sm:$0xff]  ;;  %v3186_v24 = vsel %vm3181_vm11, 1, %v7162_v2  ;;  %v7184_v25 = vmov -inf   ;;  %v1128_v42 = vadd.f32 %v7195_v43, %v5754_v47  ;;  %v2909_v43 = vpop.permute.xlu1 %2908 }
 0x596   : > { %v2642_v45 = vsel %vm2630_vm9, %v2610_v23, %v4330_v38  ;;  %4152 = vmatprep.mubr.f32.mxu0 %v2610_v23  ;;  %4190 = vmatprep.mubr.f32.mxu1 %v2610_v23  ;;  %v4795_v38 = vld [vmem:[%s5071_s29 + $0x108] sm:$0xff]  ;;  %v3185_v53 = vsel %vm3184_vm12, 0.0, %v7184_v25  ;;  %vm2914_vm15 = vcmp.eq.s32.totalorder %v2909_v43, 1 }
 0x597   : > { %v6591_v16 = vmax.f32 %v7177_v5, %v2642_v45  ;;  %4153 = vmatmul.mubr.f32.gmra.mxu0 %v2610_v23  ;;  %4191 = vmatmul.mubr.f32.gmra.mxu1 %v2610_v23  ;;  %v7185_v23 = vld [vmem:[#allocation14_spill] sm:$0xff]  ;;  %v3188_v5 = vsel %vm3183_vm13, 1, %v7162_v2 }
 0x598   : > { %4197 = vmatpush3.xpose.msra.mxu0 %v6416_v60  ;;  %4235 = vmatpush3.xpose.msra.mxu1 %v6420_v59  ;;  %v4768_v60 = vld [vmem:[%s5071_s29 + $0xb8] sm:$0xff]  ;;  %v3205_v45 = vrot.slane %v3185_v53, %v7185_v23  ;;  %v7189_v2 = vld [vmem:[#allocation66_spill] sm:$0xff]  ;;  %v7196_v53 = vld [vmem:[#allocation71_spill] sm:$0xff] }
 0x599   : > { %4198 = vmatprep.subr.mxu0 %v6424_v39  ;;  %4236 = vmatprep.subr.mxu1 %v6428_v29  ;;  %v4769_v59 = vld [vmem:[%s5071_s29 + $0x1b8] sm:$0xff]  ;;  %v4773_v29 = vld [vmem:[%s5071_s29 + $0x1b0] sm:$0xff]  ;;  %v1136_v23 = vadd.f32 %v7196_v53, %v5750_v57 }
 0x59a   : > { %v4771_v39 = vld [vmem:[%s5071_s29 + $0x138] sm:$0xff]  ;;  %3193 = vperm.xlu0 %4315, %v3187_v52   ;;  %3190 = vperm.xlu1 %4316, %v3186_v24  }
 0x59c   : > { %4199 = vmatpush3.xpose.msra.mxu0 %v6432_v48  ;;  %4237 = vmatpush3.xpose.msra.mxu1 %v6436_v63  ;;  %v4774_v48 = vld [vmem:[%s5071_s29 + $0x30] sm:$0xff] }
 0x59d   : > { %4200 = vmatprep.subr.mxu0 %v6440_v28  ;;  %4238 = vmatprep.subr.mxu1 %v7178_v19  ;;  %v4775_v63 = vld [vmem:[%s5071_s29 + $0x130] sm:$0xff]  ;;  %v4776_v28 = vld [vmem:[%s5071_s29 + $0xa8] sm:$0xff] }
 0x59e   : > { %3207 = vperm.xlu0 %4315, %v3205_v45   ;;  %3196 = vperm.xlu1 %4316, %v3188_v5   ;;  %v7186_v19 = vld [vmem:[#allocation60_spill] sm:$0xff] }
 0x5a0   : > { %4201 = vmatpush3.xpose.msra.mxu0 %v7179_v9  ;;  %4239 = vmatpush3.xpose.msra.mxu1 %v7180_v1  ;;  %v931_v9 = vadd.f32 %v7186_v19, %v5728_v31 }
 0x5a1   : > { %4202 = vmatprep.subr.mxu0 %v7181_v17  ;;  %4240 = vmatprep.subr.mxu1 %v7182_v56  ;;  %v7187_v56 = vld [vmem:[#allocation62_spill] sm:$0xff] }
 0x5a4   : > { %4203 = vmatpush3.xpose.msra.mxu0 %v6464_v41  ;;  %4241 = vmatpush3.xpose.msra.mxu1 %v6468_v55  ;;  %v4766_v41 = vld [vmem:[%s5071_s29 + $0x40] sm:$0xff]  ;;  %v4777_v55 = vld [vmem:[%s5071_s29 + $0x1a8] sm:$0xff] }
 0x5a5   : > { %4204 = vmatprep.subr.mxu0 %v6472_v58  ;;  %4242 = vmatprep.subr.mxu1 %v6476_v54  ;;  %v4778_v58 = vld [vmem:[%s5071_s29 + $0x28] sm:$0xff] }
 0x5a6   : > { %v4779_v54 = vld [vmem:[%s5071_s29 + $0x128] sm:$0xff] }
 0x5a8   : > { %4205 = vmatpush3.xpose.msra.mxu0 %v6480_v8  ;;  %4243 = vmatpush3.xpose.msra.mxu1 %v4764_v36  ;;  %v4770_v8 = vld [vmem:[%s5071_s29 + $0x38] sm:$0xff]  ;;  %v933_v36 = vadd.f32 %v7187_v56, %v5734_v37 }
 0x5a9   : > { %4206 = vmatprep.subr.mxu0 %v6485_v4  ;;  %4244 = vmatprep.subr.mxu1 %v4765_v46  ;;  %v4772_v4 = vld [vmem:[%s5071_s29 + $0xb0] sm:$0xff] }
 0x5ac   : > { %4207 = vmatpush3.xpose.msra.mxu0 %v4766_v41  ;;  %4245 = vmatpush3.xpose.msra.mxu1 %v4767_v61 }
 0x5ad   : > { %4208 = vmatprep.subr.mxu0 %v4768_v60  ;;  %4246 = vmatprep.subr.mxu1 %v4769_v59  ;;  %v7188_v60 = vld [vmem:[#allocation64_spill] sm:$0xff] }
 0x5ae   : > { %v937_v59 = vadd.f32 %v7188_v60, %v5728_v31 }
 0x5b0   : > { %4209 = vmatpush3.xpose.msra.mxu0 %v4770_v8  ;;  %4247 = vmatpush3.xpose.msra.mxu1 %v4771_v39 }
 0x5b1   : > { %4210 = vmatprep.subr.mxu0 %v4772_v4  ;;  %4248 = vmatprep.subr.mxu1 %v4773_v29  ;;  %v939_v29 = vadd.f32 %v7189_v2, %v5734_v37 }
 0x5b4   : > { %4211 = vmatpush3.xpose.msra.mxu0 %v4774_v48  ;;  %4249 = vmatpush3.xpose.msra.mxu1 %v4775_v63 }
 0x5b5   : > { %4212 = vmatprep.subr.mxu0 %v4776_v28  ;;  %4250 = vmatprep.subr.mxu1 %v4777_v55 }
 0x5b8   : > { %4213 = vmatpush3.xpose.msra.mxu0 %v4778_v58  ;;  %4251 = vmatpush3.xpose.msra.mxu1 %v4779_v54  ;;  %v7190_v58 = vld [vmem:[#allocation68_spill] sm:$0xff] }
 0x5b9   : > { %4214 = vmatprep.subr.mxu0 %v4780_v0  ;;  %4252 = vmatprep.subr.mxu1 %v4781_v34  ;;  %v943_v54 = vadd.f32 %v7190_v58, %v5728_v31 }
 0x5bc   : > { %4215 = vmatpush3.xpose.msra.mxu0 %v4782_v33  ;;  %4253 = vmatpush3.xpose.msra.mxu1 %v4783_v32  ;;  %v7191_v32 = vld [vmem:[#allocation70_spill] sm:$0xff] }
 0x5bd   : > { %4216 = vmatprep.subr.mxu0 %v4784_v30  ;;  %4254 = vmatprep.subr.mxu1 %v4785_v26  ;;  %v945_v30 = vadd.f32 %v7191_v32, %v5734_v37 }
 0x5c0   : > { %4217 = vmatpush3.xpose.msra.mxu0 %v4786_v20  ;;  %4255 = vmatpush3.xpose.msra.mxu1 %v4787_v11 }
 0x5c1   : > { %4218 = vmatprep.subr.mxu0 %v4788_v12  ;;  %4256 = vmatprep.subr.mxu1 %v4789_v27  ;;  %v7192_v12 = vld [vmem:[#allocation63_spill] sm:$0xff] }
 0x5c2   : > { %v1124_v27 = vadd.f32 %v7192_v12, %v5750_v57 }
 0x5c4   : > { %4219 = vmatpush3.xpose.msra.mxu0 %v4790_v14  ;;  %4257 = vmatpush3.xpose.msra.mxu1 %v4791_v22 }
 0x5c5   : > { %4220 = vmatprep.subr.mxu0 %v4792_v7  ;;  %4258 = vmatprep.subr.mxu1 %v4793_v3 }
 0x5c8   : > { %4221 = vmatpush3.xpose.msra.mxu0 %v4794_v21  ;;  %4259 = vmatpush3.xpose.msra.mxu1 %v4795_v38  ;;  %v7193_v21 = vld [vmem:[#allocation61_spill] sm:$0xff] }
 0x5c9   : > { %4222 = vmatprep.subr.mxu0 %v4796_v49  ;;  %4260 = vmatprep.subr.mxu1 %v4797_v50  ;;  %v1122_v38 = vadd.f32 %v7193_v21, %v5754_v47 }
 0x5cc   : > { %4223 = vmatpush3.xpose.msra.mxu0 %v4798_v51  ;;  %4261 = vmatpush3.xpose.msra.mxu1 %v4799_v40  ;;  %v7194_v51 = vld [vmem:[#allocation67_spill] sm:$0xff] }
 0x5cd   : > { %v1130_v40 = vadd.f32 %v7194_v51, %v5750_v57 }
 0x64f   : > { %v2712_v1 = vpop.f32.mrf.mxu0  ;;  %v2795_v17 = vpop.f32.mrf.mxu1 }
 0x650   : > { %v2812_v46 = vadd.f32 %v2712_v1, %v931_v9  ;;  %v2814_v44 = vadd.f32 %v2795_v17, %v1122_v38  ;;  %v7197_v9 = vld [vmem:[#allocation69_spill] sm:$0xff] }
 0x651   : > { %v2714_v41 = vpop.f32.mrf.mxu0  ;;  %v2797_v61 = vpop.f32.mrf.mxu1  ;;  %v1134_v1 = vadd.f32 %v7197_v9, %v5754_v47 }
 0x652   : > { %v3566_v8 = vmul.f32 -1.442695, %v2812_v46  ;;  %v2813_v39 = vadd.f32 %v2714_v41, %v933_v36  ;;  %v2815_v3 = vadd.f32 %v2797_v61, %v1124_v27 }
 0x653   : > { %v2718_v4 = vpop.f32.mrf.mxu0  ;;  %v2801_v28 = vpop.f32.mrf.mxu1 }
 0x654   : > { %4572 = vpow2.f32 %v3566_v8  ;;  %v3569_v48 = vmul.f32 -1.442695, %v2813_v39  ;;  %v2816_v63 = vadd.f32 %v2718_v4, %v937_v59  ;;  %v3572_v18 = vmul.f32 -1.442695, %v2815_v3 }
 0x655   : > { %v2720_v55 = vpop.f32.mrf.mxu0  ;;  %v2803_v20 = vpop.f32.mrf.mxu1  ;;  %v2818_v45 = vadd.f32 %v2801_v28, %v1128_v42 }
 0x656   : > { %4574 = vpow2.f32 %v3569_v48  ;;  %v3567_v0 = vmul.f32 -1.442695, %v2816_v63  ;;  %v2817_v34 = vadd.f32 %v2720_v55, %v939_v29  ;;  %v2819_v52 = vadd.f32 %v2803_v20, %v1130_v40 }
 0x657   : > { %v2724_v33 = vpop.f32.mrf.mxu0  ;;  %v2807_v49 = vpop.f32.mrf.mxu1 }
 0x658   : > { %4576 = vpow2.f32 %v3567_v0  ;;  %v3570_v26 = vmul.f32 -1.442695, %v2817_v34  ;;  %v2820_v11 = vadd.f32 %v2724_v33, %v943_v54  ;;  %v3573_v17 = vmul.f32 -1.442695, %v2819_v52 }
 0x659   : > { %v2726_v14 = vpop.f32.mrf.mxu0  ;;  %v2809_v24 = vpop.f32.mrf.mxu1  ;;  %v2822_v41 = vadd.f32 %v2807_v49, %v1134_v1  ;;  %v7198_v1 = vld [vmem:[#allocation72_spill] sm:$0xff] }
 0x65a   : > { %4578 = vpow2.f32 %v3570_v26  ;;  %v3568_v22 = vmul.f32 -1.442695, %v2820_v11  ;;  %v2821_v7 = vadd.f32 %v2726_v14, %v945_v30  ;;  %v2823_v56 = vadd.f32 %v2809_v24, %v1136_v23 }
 0x65c   : > { %4580 = vpow2.f32 %v3568_v22  ;;  %v3571_v50 = vmul.f32 -1.442695, %v2821_v7  ;;  %v3574_v59 = vmul.f32 -1.442695, %v2823_v56 }
 0x65e   : > { %4582 = vpow2.f32 %v3571_v50  ;;  %v2906_v50 = vpop.permute.xlu0 %2905 }
 0x65f   : > { %4584 = vtanh.f32 %v2814_v44  ;;  %vm2913_vm14 = vcmp.eq.s32.totalorder %v2906_v50, 1 }
 0x660   : > { %4586 = vpow2.f32 %v3572_v18 }
 0x661   : > { %v4573_v25 = vpop.eup %4572 }
 0x662   : > { %v2833_v5 = vadd.f32 1.0, %v4573_v25  ;;  %v2912_v25 = vpop.permute.xlu0 %2911 }
 0x663   : > { %v4575_v19 = vpop.eup %4574  ;;  %vm2915_vm1 = vcmp.eq.s32.totalorder %v2912_v25, 1 }
 0x664   : > { %4588 = vrcp.f32 %v2833_v5  ;;  %v2851_v36 = vadd.f32 1.0, %v4575_v19 }
 0x665   : > { %v4577_v46 = vpop.eup %4576  ;;  %4590 = vtanh.f32 %v2818_v45 }
 0x666   : > { %4592 = vrcp.f32 %v2851_v36  ;;  %v2834_v61 = vadd.f32 1.0, %v4577_v46  ;;  %v7199_v46 = vld [vmem:[#allocation74_spill] sm:$0xff] }
 0x667   : > { %v4579_v60 = vpop.eup %4578  ;;  %4594 = vpow2.f32 %v3573_v17  ;;  %v949_v17 = vadd.f32 %v7198_v1, %v5728_v31 }
 0x668   : > { %4596 = vrcp.f32 %v2834_v61  ;;  %v2852_v8 = vadd.f32 1.0, %v4579_v60 }
 0x669   : > { %v4581_v39 = vpop.eup %4580  ;;  %4598 = vtanh.f32 %v2822_v41  ;;  %v951_v41 = vadd.f32 %v7199_v46, %v5734_v37 }
 0x66a   : > { %4600 = vrcp.f32 %v2852_v8  ;;  %v2835_v4 = vadd.f32 1.0, %v4581_v39  ;;  %v7200_v8 = vld [vmem:[#allocation76_spill] sm:$0xff] }
 0x66b   : > { %v4583_v2 = vpop.eup %4582  ;;  %4602 = vpow2.f32 %v3574_v59  ;;  %v955_v39 = vadd.f32 %v7200_v8, %v5728_v31 }
 0x66c   : > { %4604 = vrcp.f32 %v2835_v4  ;;  %v2853_v29 = vadd.f32 1.0, %v4583_v2  ;;  %v4585_v48 = vpop.eup %4584 }
 0x66d   : > { %v4587_v63 = vpop.eup %4586 }
 0x66e   : > { %4606 = vrcp.f32 %v2853_v29  ;;  %v2872_v0 = vadd.f32 1.0, %v4587_v63 }
 0x670   : > { %4608 = vrcp.f32 %v2872_v0  ;;  %v7202_v0 = vld [vmem:[#allocation79_spill] sm:$0xff] }
 0x671   : > { %v4589_v28 = vpop.eup %4588 }
 0x672   : > { %v4591_v55 = vpop.eup %4590  ;;  %v2884_v58 = vmul.f32 %v4589_v28, %v4585_v48  ;;  %v7201_v48 = vld [vmem:[#allocation13_spill] sm:$0xff] }
 0x673   : > { %v4593_v54 = vpop.eup %4592  ;;  %v957_v63 = vadd.f32 %v7201_v48, %v5734_v37 }
 0x674   : > { %v4595_v34 = vpop.eup %4594  ;;  %v2881_v33 = vmul.f32 %v4593_v54, %v6556_v13 }
 0x675   : > { %v4597_v32 = vpop.eup %4596  ;;  %v2873_v12 = vadd.f32 1.0, %v4595_v34  ;;  %v961_v34 = vadd.f32 %v7202_v0, %v5728_v31  ;;  %v7205_v31 = vld [vmem:[#allocation73_spill] sm:$0xff] }
 0x676   : > { %v4599_v30 = vpop.eup %4598  ;;  %v6681_v26 = vadd.f32 %v2884_v58, %v2881_v33  ;;  %v2885_v20 = vmul.f32 %v4597_v32, %v4591_v55 }
 0x677   : > { %v4601_v11 = vpop.eup %4600 }
 0x678   : > { %v4603_v27 = vpop.eup %4602  ;;  %4610 = vtanh.f32 %v6681_v26  ;;  %v2882_v14 = vmul.f32 %v4601_v11, %v6560_v10  ;;  %v4331_v10 = vunpack.i.h.bf16 %v6567_v62 }
 0x679   : > { %v4605_v22 = vpop.eup %4604  ;;  %4612 = vrcp.f32 %v2873_v12  ;;  %v2874_v13 = vadd.f32 1.0, %v4603_v27 }
 0x67a   : > { %v6685_v7 = vadd.f32 %v2885_v20, %v2882_v14  ;;  %v2886_v3 = vmul.f32 %v4605_v22, %v4599_v30  ;;  %v7203_v20 = vld [vmem:[#allocation81_spill] sm:$0xff]  ;;  %v7204_v22 = vld [vmem:[#allocation75_spill] sm:$0xff] }
 0x67b   : > { %v4607_v21 = vpop.eup %4606  ;;  %v963_v11 = vadd.f32 %v7203_v20, %v5734_v37  ;;  %v7206_v37 = vld [vmem:[#allocation78_spill] sm:$0xff] }
 0x67c   : > { %4614 = vtanh.f32 %v6685_v7  ;;  %v2883_v38 = vmul.f32 %v4607_v21, %v6564_v35 }
 0x67d   : > { %4616 = vrcp.f32 %v2874_v13  ;;  %v4609_v51 = vpop.eup %4608 }
 0x67e   : > { %v6689_v49 = vadd.f32 %v2886_v3, %v2883_v38  ;;  %v1142_v3 = vadd.f32 %v7204_v22, %v5750_v57 }
 0x680   : > { %4618 = vtanh.f32 %v6689_v49 }
 0x685   : > { %v4611_v40 = vpop.eup %4610 }
 0x686   : > { %v2893_v44 = vmul.f32 %v4611_v40, %v4609_v51  ;;  %v4613_v42 = vpop.eup %4612  ;;  %v1140_v51 = vadd.f32 %v7205_v31, %v5754_v47 }
 0x688   : > { %v6693_v18 = vsel %vm2913_vm14, %v2893_v44, %v4331_v10  ;;  %4224 = vmatprep.mubr.f32.mxu0 %v2893_v44  ;;  %4262 = vmatprep.mubr.f32.mxu1 %v2893_v44 }
 0x689   : > { %v4615_v52 = vpop.eup %4614  ;;  %v2928_v35 = vmax.f32 %v6573_v15, %v6693_v18  ;;  %4225 = vmatmul.mubr.f32.vlgmr.msra.gmra.mxu0 %v2893_v44  ;;  %4263 = vmatmul.mubr.f32.vlgmr.msra.gmra.mxu1 %v2893_v44  ;;  %v1148_v44 = vadd.f32 %v7206_v37, %v5750_v57  ;;  %v3194_v37 = vpop.permute.xlu0 %3193 }
 0x68a   : > { %v2894_v24 = vmul.f32 %v4615_v52, %v4613_v42  ;;  %v4617_v53 = vpop.eup %4616  ;;  %v7207_v42 = vld [vmem:[#allocation77_spill] sm:$0xff]  ;;  %vm3199_vm3 = vcmp.eq.s32.totalorder %v3194_v37, 1 }
 0x68b   : > { %v1146_v52 = vadd.f32 %v7207_v42, %v5754_v47  ;;  %v3191_v42 = vpop.permute.xlu1 %3190 }
 0x68c   : > { %v6697_v62 = vsel %vm2914_vm15, %v2894_v24, %v4331_v10  ;;  %4226 = vmatprep.mubr.f32.mxu0 %v2894_v24  ;;  %4264 = vmatprep.mubr.f32.mxu1 %v2894_v24  ;;  %vm3198_vm2 = vcmp.eq.s32.totalorder %v3191_v42, 1 }
 0x68d   : > { %v4619_v23 = vpop.eup %4618  ;;  %v2929_v45 = vmax.f32 %v6582_v6, %v6697_v62  ;;  %4227 = vmatmul.mubr.f32.gmra.mxu0 %v2894_v24  ;;  %4265 = vmatmul.mubr.f32.gmra.mxu1 %v2894_v24 }
 0x68e   : > { %v2895_v5 = vmul.f32 %v4619_v23, %v4617_v53 }
 0x690   : > { %v6701_v19 = vsel %vm2915_vm1, %v2895_v5, %v4331_v10  ;;  %4228 = vmatprep.mubr.f32.mxu0 %v2895_v5  ;;  %4266 = vmatprep.mubr.f32.mxu1 %v2895_v5 }
 0x691   : > { %v2930_v9 = vmax.f32 %v6591_v16, %v6701_v19  ;;  %4229 = vmatmul.mubr.f32.gmra.mxu0 %v2895_v5  ;;  %4267 = vmatmul.mubr.f32.gmra.mxu1 %v2895_v5  ;;  %v7208_v5 = vld [vmem:[#allocation82_spill] sm:$0xff] }
 0x692   : > { %v1154_v1 = vadd.f32 %v7208_v5, %v5750_v57 }
 0x749   : > { %v2997_v56 = vpop.f32.mrf.mxu0  ;;  %v3080_v36 = vpop.f32.mrf.mxu1 }
 0x74a   : > { %v3097_v61 = vadd.f32 %v2997_v56, %v949_v17  ;;  %v3099_v43 = vadd.f32 %v3080_v36, %v1140_v51 }
 0x74b   : > { %v2999_v60 = vpop.f32.mrf.mxu0  ;;  %v3082_v59 = vpop.f32.mrf.mxu1 }
 0x74c   : > { %v3575_v4 = vmul.f32 -1.442695, %v3097_v61  ;;  %v3098_v2 = vadd.f32 %v2999_v60, %v951_v41  ;;  %v3100_v50 = vadd.f32 %v3082_v59, %v1142_v3  ;;  %v7209_v41 = vld [vmem:[#allocation80_spill] sm:$0xff] }
 0x74d   : > { %v3003_v29 = vpop.f32.mrf.mxu0  ;;  %v3086_v58 = vpop.f32.mrf.mxu1  ;;  %v1152_v61 = vadd.f32 %v7209_v41, %v5754_v47 }
 0x74e   : > { %4620 = vpow2.f32 %v3575_v4  ;;  %v3578_v28 = vmul.f32 -1.442695, %v3098_v2  ;;  %v3101_v55 = vadd.f32 %v3003_v29, %v955_v39  ;;  %v3581_v24 = vmul.f32 -1.442695, %v3100_v50 }
 0x74f   : > { %v3005_v54 = vpop.f32.mrf.mxu0  ;;  %v3088_v27 = vpop.f32.mrf.mxu1  ;;  %v3103_v17 = vadd.f32 %v3086_v58, %v1146_v52 }
 0x750   : > { %4622 = vpow2.f32 %v3578_v28  ;;  %v3576_v33 = vmul.f32 -1.442695, %v3101_v55  ;;  %v3102_v32 = vadd.f32 %v3005_v54, %v957_v63  ;;  %v3104_v25 = vadd.f32 %v3088_v27, %v1148_v44 }
 0x751   : > { %v3009_v30 = vpop.f32.mrf.mxu0  ;;  %v3092_v10 = vpop.f32.mrf.mxu1 }
 0x752   : > { %4624 = vpow2.f32 %v3576_v33  ;;  %v3579_v12 = vmul.f32 -1.442695, %v3102_v32  ;;  %v3105_v14 = vadd.f32 %v3009_v30, %v961_v34  ;;  %v3582_v36 = vmul.f32 -1.442695, %v3104_v25 }
 0x753   : > { %v3011_v21 = vpop.f32.mrf.mxu0  ;;  %v3094_v53 = vpop.f32.mrf.mxu1  ;;  %v3107_v39 = vadd.f32 %v3092_v10, %v1152_v61 }
 0x754   : > { %4626 = vpow2.f32 %v3579_v12  ;;  %v3577_v13 = vmul.f32 -1.442695, %v3105_v14  ;;  %v3106_v38 = vadd.f32 %v3011_v21, %v963_v11  ;;  %v3108_v60 = vadd.f32 %v3094_v53, %v1154_v1 }
 0x756   : > { %4628 = vpow2.f32 %v3577_v13  ;;  %v3580_v40 = vmul.f32 -1.442695, %v3106_v38  ;;  %v3583_v57 = vmul.f32 -1.442695, %v3108_v60 }
 0x758   : > { %4630 = vpow2.f32 %v3580_v40 }
 0x759   : > { %4632 = vtanh.f32 %v3099_v43 }
 0x75a   : > { %4634 = vpow2.f32 %v3581_v24 }
 0x75b   : > { %v4621_v23 = vpop.eup %4620 }
 0x75c   : > { %v3118_v56 = vadd.f32 1.0, %v4621_v23 }
 0x75d   : > { %v4623_v46 = vpop.eup %4622 }
 0x75e   : > { %4636 = vrcp.f32 %v3118_v56  ;;  %v3136_v59 = vadd.f32 1.0, %v4623_v46 }
 0x75f   : > { %v4625_v8 = vpop.eup %4624  ;;  %4638 = vtanh.f32 %v3103_v17  ;;  %v3197_v17 = vpop.permute.xlu1 %3196 }
 0x760   : > { %4640 = vrcp.f32 %v3136_v59  ;;  %v3119_v4 = vadd.f32 1.0, %v4625_v8  ;;  %vm3200_vm4 = vcmp.eq.s32.totalorder %v3197_v17, 1 }
 0x761   : > { %v4627_v2 = vpop.eup %4626  ;;  %4642 = vpow2.f32 %v3582_v36 }
 0x762   : > { %4644 = vrcp.f32 %v3119_v4  ;;  %v3137_v29 = vadd.f32 1.0, %v4627_v2 }
 0x763   : > { %v4629_v48 = vpop.eup %4628  ;;  %4646 = vtanh.f32 %v3107_v39 }
 0x764   : > { %4648 = vrcp.f32 %v3137_v29  ;;  %v3120_v63 = vadd.f32 1.0, %v4629_v48 }
 0x765   : > { %v4631_v47 = vpop.eup %4630  ;;  %4650 = vpow2.f32 %v3583_v57 }
 0x766   : > { %4652 = vrcp.f32 %v3120_v63  ;;  %v3138_v28 = vadd.f32 1.0, %v4631_v47  ;;  %v4633_v55 = vpop.eup %4632 }
 0x767   : > { %v4635_v58 = vpop.eup %4634 }
 0x768   : > { %4654 = vrcp.f32 %v3138_v28  ;;  %v3157_v32 = vadd.f32 1.0, %v4635_v58 }
 0x76a   : > { %4656 = vrcp.f32 %v3157_v32 }
 0x76b   : > { %v4637_v54 = vpop.eup %4636 }
 0x76c   : > { %v4639_v0 = vpop.eup %4638  ;;  %v3169_v34 = vmul.f32 %v4637_v54, %v4633_v55 }
 0x76d   : > { %v4641_v33 = vpop.eup %4640 }
 0x76e   : > { %v4643_v30 = vpop.eup %4642  ;;  %v3166_v20 = vmul.f32 %v4641_v33, %v6681_v26 }
 0x76f   : > { %v4645_v11 = vpop.eup %4644  ;;  %v3158_v3 = vadd.f32 1.0, %v4643_v30 }
 0x770   : > { %v4647_v12 = vpop.eup %4646  ;;  %v3170_v27 = vmul.f32 %v4645_v11, %v4639_v0  ;;  %v3172_v14 = vadd.f32 %v3169_v34, %v3166_v20 }
 0x771   : > { %v4649_v22 = vpop.eup %4648 }
 0x772   : > { %v4651_v21 = vpop.eup %4650  ;;  %v3167_v13 = vmul.f32 %v4649_v22, %v6685_v7  ;;  %4658 = vtanh.f32 %v3172_v14  ;;  %v3208_v7 = vpop.permute.xlu0 %3207 }
 0x773   : > { %v4653_v38 = vpop.eup %4652  ;;  %4660 = vrcp.f32 %v3158_v3  ;;  %v3159_v10 = vadd.f32 1.0, %v4651_v21 }
 0x774   : > { %v3171_v50 = vmul.f32 %v4653_v38, %v4647_v12  ;;  %v3173_v31 = vadd.f32 %v3170_v27, %v3167_v13 }
 0x775   : > { %v4655_v51 = vpop.eup %4654 }
 0x776   : > { %v3168_v40 = vmul.f32 %v4655_v51, %v6689_v49  ;;  %4662 = vtanh.f32 %v3173_v31 }
 0x777   : > { %4664 = vrcp.f32 %v3159_v10  ;;  %v4657_v44 = vpop.eup %4656 }
 0x778   : > { %v3174_v26 = vadd.f32 %v3171_v50, %v3168_v40 }
 0x77a   : > { %4666 = vtanh.f32 %v3174_v26 }
 0x77f   : > { %v4659_v43 = vpop.eup %4658 }
 0x780   : > { %v3178_v52 = vmul.f32 %v4659_v43, %v4657_v44  ;;  %v4661_v24 = vpop.eup %4660 }
 0x782   : > { %v3210_v25 = vsel %vm3198_vm2, %v3178_v52, %v3208_v7 }
 0x783   : > { %v4663_v53 = vpop.eup %4662  ;;  %v3213_v23 = vmax.f32 %v2928_v35, %v3210_v25 }
 0x784   : > { %v3179_v5 = vmul.f32 %v4663_v53, %v4661_v24  ;;  %v4665_v49 = vpop.eup %4664 }
 0x786   : > { %v3211_v1 = vsel %vm3199_vm3, %v3179_v5, %v3208_v7 }
 0x787   : > { %v4667_v56 = vpop.eup %4666  ;;  %v3214_v46 = vmax.f32 %v2929_v45, %v3211_v1  ;;  %3219 = sbr.rel (%p3584_p7) target bundleno = 1934 (0x78e), region = 48 }
 0x788   : > { %v3180_v41 = vmul.f32 %v4667_v56, %v4665_v49 }
 0x78a   : > { %v3212_v61 = vsel %vm3200_vm4, %v3180_v41, %v3208_v7 }
 0x78b   : > { %v3215_v36 = vmax.f32 %v2930_v9, %v3212_v61 }
 0x78c   : > { %3220 = vst.msk [vmem:[%s5470_s15] sm:$0xff] %vm518_vm0, %v3213_v23  ;;  %3221 = vst.msk [vmem:[%s5470_s15 + $0x8] sm:$0xff] %vm518_vm0, %v3214_v46 }
 0x78d   : > { %3222 = vst.msk [vmem:[%s5470_s15 + $0x10] sm:$0xff] %vm518_vm0, %v3215_v36 }
 0x78e PF: > { %p3585_p8 = scmp.ne.s32.totalorder %s4825_s21, 1 }
 0x78f   : > { %s4846_s22 = smov (!%p3585_p8), 16  }
 0x790   : > { %3226 = sbr.rel (%p3585_p8) target bundleno = 2061 (0x80d), region = 52 }
 0x795   : > { %3230 = vrot.lane.b32.xlu0 %v3213_v23, %s4846_s22  ;;  %3234 = vrot.lane.b32.xlu1 %v3215_v36, %s4846_s22  ;;  %vm3239_vm5 = vcmask 261248  }
 0x799   : > { %3232 = vrot.lane.b32.xlu0 %v3214_v46, %s4846_s22 }
 0x807   : > { %v3231_v15 = vpop.permute.xlu0 %3230  ;;  %v3235_v6 = vpop.permute.xlu1 %3234 }
 0x808   : > { %3240 = vst.msk [vmem:[%s5470_s15] sm:$0xff] %vm3239_vm5, %v3231_v15  ;;  %3242 = vst.msk [vmem:[%s5470_s15 + $0x10] sm:$0xff] %vm3239_vm5, %v3235_v6 }
 0x80b   : > { %v3233_v16 = vpop.permute.xlu0 %3232 }
 0x80c   : > { %3241 = vst.msk [vmem:[%s5470_s15 + $0x8] sm:$0xff] %vm3239_vm5, %v3233_v16 }
 0x80d PF: > { %s16_s25 = sadd.s32 1, %s4841_s25   ;;  %s7210_s21 = smov %s4833_s23 }
 0x80e   : > { %p13_p9 = scmp.ge.s32.totalorder %s16_s25, 6   ;;  %s7211_s22 = smov %s4837_s24 }
 0x80f   : > { %s7212_s23 = smov %s7215_s26  ;;  %s7213_s24 = smov %s7219_s27 }
 0x810   :  { %15 = sbr.rel (!%p13_p9) target bundleno = 3 (0x3), region = 97 }

// kernel: nsrf_forward.3
= control target key start
LH: loop header
LB: loop body
LE: loop exit
PB: predicated region body
PF: predicated region fallthrough
CT: control target
= control target key end

     0   :  { %s10170_s0 = inlined_call_operand.vmem [shape: f32[24,32], index: 0, kind: input, shape index: {}]   ;;  %s10171_s1 = inlined_call_operand.vmem [shape: f32[3,8,3,32], index: 1, kind: input, shape index: {}]   ;;  %s10172_s2 = inlined_call_operand.vmem [shape: f32[3,8,3], index: 2, kind: input, shape index: {}]   ;;  %s10173_s3 = inlined_call_operand.vmem [shape: f32[512,32], index: 3, kind: input, shape index: {}]   ;;  %s10174_s4 = inlined_call_operand.vmem [shape: f32[512,128], index: 4, kind: input, shape index: {}]   ;;  %s10175_s5 = inlined_call_operand.vmem [shape: f32[1,512], index: 5, kind: input, shape index: {}]   ;;  %s10176_s6 = inlined_call_operand.vmem [shape: f32[32,32], index: 6, kind: input, shape index: {}]   ;;  %s10177_s7 = inlined_call_operand.vmem [shape: f32[32,128], index: 7, kind: input, shape index: {}]   ;;  %s10178_s8 = inlined_call_operand.vmem [shape: f32[1,32], index: 8, kind: input, shape index: {}]   ;;  %s10179_s9 = inlined_call_operand.vmem [shape: f32[80,16], index: 9, kind: input, shape index: {}]   ;;  %s10180_s10 = inlined_call_operand.vmem [shape: s32[5,16,1], index: 10, kind: input, shape index: {}]   ;;  %s10181_s11 = inlined_call_operand.vmem [shape: s32[16,1], index: 11, kind: input, shape index: {}]   ;;  %s10182_s12 = inlined_call_operand.vmem [shape: f32[512,16], index: 12, kind: input, shape index: {}]   ;;  %s10183_s13 = inlined_call_operand.vmem [shape: f32[512,128], index: 13, kind: input, shape index: {}]   ;;  %s10184_s14 = inlined_call_operand.vmem [shape: f32[1,512], index: 14, kind: input, shape index: {}]   ;;  %s10185_s15 = inlined_call_operand.vmem [shape: f32[50,128], index: 15, kind: input, shape index: {}]   ;;  %s10186_s16 = inlined_call_operand.vmem [shape: f32[1,50], index: 16, kind: input, shape index: {}]   ;;  %s10187_s17 = inlined_call_operand.hbm [shape: f32[1,1], index: 17, kind: output, shape index: {0}]   ;;  %s10188_s18 = inlined_call_operand.hbm [shape: f32[1,1], index: 18, kind: output, shape index: {1}]  }
   0x1   :  { %10302 = sst [smem:[#allocation103_spill]] %s10170_s0 }
   0x2   :  { %10303 = sst [smem:[#allocation104_spill]] %s10171_s1 }
   0x3   :  { %10304 = sst [smem:[#allocation105_spill]] %s10172_s2 }
   0x4   :  { %24 = vsyncpa [#allocation5], 0  ;;  %v94_v0 = vld [vmem:[%s10173_s3 + $0xf8] sm:$0xff]  ;;  %vm149_vm0 = vcmask 261120   ;;  %v93_v4 = vld [vmem:[%s10173_s3 + $0xf0] sm:$0xff]  ;;  %s10305_s22 = sld [smem:[#allocation103_spill]] }
   0x5   :  { %v126_v1 = vld [vmem:[%s10173_s3 + $0x1f8] sm:$0xff]  ;;  %5229 = vmatprep.subr.msk.mxu0 %vm149_vm0, %v94_v0  ;;  %v125_v5 = vld [vmem:[%s10173_s3 + $0x1f0] sm:$0xff]  ;;  %v92_v8 = vld [vmem:[%s10173_s3 + $0xe8] sm:$0xff]  ;;  %vm712_vm1 = vcmask 130048  }
   0x6   :  { %v78_v2 = vld [vmem:[%s10173_s3 + $0x78] sm:$0xff]  ;;  %5267 = vmatprep.subr.msk.mxu1 %vm149_vm0, %v126_v1  ;;  %v77_v6 = vld [vmem:[%s10173_s3 + $0x70] sm:$0xff]  ;;  %v124_v9 = vld [vmem:[%s10173_s3 + $0x1e8] sm:$0xff] }
   0x7   :  { %v110_v3 = vld [vmem:[%s10173_s3 + $0x178] sm:$0xff]  ;;  %5230 = vmatpush3.xpose.msk.msra.mxu0 %vm149_vm0, %v78_v2  ;;  %v109_v7 = vld [vmem:[%s10173_s3 + $0x170] sm:$0xff]  ;;  %v76_v10 = vld [vmem:[%s10173_s3 + $0x68] sm:$0xff] }
   0x8   :  { %5268 = vmatpush3.xpose.msk.msra.mxu1 %vm149_vm0, %v110_v3  ;;  %5231 = vmatprep.subr.msk.mxu0 %vm149_vm0, %v93_v4  ;;  %v108_v11 = vld [vmem:[%s10173_s3 + $0x168] sm:$0xff]  ;;  %v91_v12 = vld [vmem:[%s10173_s3 + $0xe0] sm:$0xff]  ;;  %v90_v16 = vld [vmem:[%s10173_s3 + $0xd8] sm:$0xff] }
   0x9   :  { %5269 = vmatprep.subr.msk.mxu1 %vm149_vm0, %v125_v5  ;;  %v123_v13 = vld [vmem:[%s10173_s3 + $0x1e0] sm:$0xff]  ;;  %v122_v17 = vld [vmem:[%s10173_s3 + $0x1d8] sm:$0xff]  ;;  %v89_v20 = vld [vmem:[%s10173_s3 + $0xd0] sm:$0xff] }
   0xa   :  { %v75_v14 = vld [vmem:[%s10173_s3 + $0x60] sm:$0xff]  ;;  %v74_v18 = vld [vmem:[%s10173_s3 + $0x58] sm:$0xff]  ;;  %v121_v21 = vld [vmem:[%s10173_s3 + $0x1d0] sm:$0xff] }
   0xb   :  { %5232 = vmatpush3.xpose.msk.msra.mxu0 %vm149_vm0, %v77_v6  ;;  %v107_v15 = vld [vmem:[%s10173_s3 + $0x160] sm:$0xff]  ;;  %v106_v19 = vld [vmem:[%s10173_s3 + $0x158] sm:$0xff]  ;;  %v73_v22 = vld [vmem:[%s10173_s3 + $0x50] sm:$0xff] }
   0xc   :  { %5270 = vmatpush3.xpose.msk.msra.mxu1 %vm149_vm0, %v109_v7  ;;  %5233 = vmatprep.subr.msk.mxu0 %vm149_vm0, %v92_v8  ;;  %v105_v23 = vld [vmem:[%s10173_s3 + $0x150] sm:$0xff]  ;;  %v88_v24 = vld [vmem:[%s10173_s3 + $0xc8] sm:$0xff]  ;;  %v6813_v26 = vld [vmem:[%s10305_s22] sm:$0xff] }
   0xd   :  { %5271 = vmatprep.subr.msk.mxu1 %vm149_vm0, %v124_v9  ;;  %v120_v25 = vld [vmem:[%s10173_s3 + $0x1c8] sm:$0xff]  ;;  %v87_v29 = vld [vmem:[%s10173_s3 + $0xc0] sm:$0xff]  ;;  %5299 = vmatprep.mubr.msk.f32.mxu1 %vm149_vm0, %v6813_v26  ;;  %v86_v33 = vld [vmem:[%s10173_s3 + $0xb8] sm:$0xff] }
   0xe   :  { %v72_v27 = vld [vmem:[%s10173_s3 + $0x48] sm:$0xff]  ;;  %v119_v30 = vld [vmem:[%s10173_s3 + $0x1c0] sm:$0xff]  ;;  %5261 = vmatprep.mubr.msk.f32.mxu0 %vm149_vm0, %v6813_v26  ;;  %v118_v34 = vld [vmem:[%s10173_s3 + $0x1b8] sm:$0xff] }
   0xf   :  { %5234 = vmatpush3.xpose.msk.msra.mxu0 %vm149_vm0, %v76_v10  ;;  %v104_v28 = vld [vmem:[%s10173_s3 + $0x148] sm:$0xff]  ;;  %v71_v31 = vld [vmem:[%s10173_s3 + $0x40] sm:$0xff]  ;;  %v70_v35 = vld [vmem:[%s10173_s3 + $0x38] sm:$0xff] }
  0x10   :  { %5272 = vmatpush3.xpose.msk.msra.mxu1 %vm149_vm0, %v108_v11  ;;  %5235 = vmatprep.subr.msk.mxu0 %vm149_vm0, %v91_v12  ;;  %v103_v32 = vld [vmem:[%s10173_s3 + $0x140] sm:$0xff]  ;;  %v102_v36 = vld [vmem:[%s10173_s3 + $0x138] sm:$0xff]  ;;  %v85_v37 = vld [vmem:[%s10173_s3 + $0xb0] sm:$0xff] }
  0x11   :  { %5273 = vmatprep.subr.msk.mxu1 %vm149_vm0, %v123_v13  ;;  %v117_v38 = vld [vmem:[%s10173_s3 + $0x1b0] sm:$0xff]  ;;  %v84_v41 = vld [vmem:[%s10173_s3 + $0xa8] sm:$0xff]  ;;  %v83_v45 = vld [vmem:[%s10173_s3 + $0xa0] sm:$0xff] }
  0x12   :  { %v69_v39 = vld [vmem:[%s10173_s3 + $0x30] sm:$0xff]  ;;  %v116_v42 = vld [vmem:[%s10173_s3 + $0x1a8] sm:$0xff]  ;;  %v115_v46 = vld [vmem:[%s10173_s3 + $0x1a0] sm:$0xff] }
  0x13   :  { %5236 = vmatpush3.xpose.msk.msra.mxu0 %vm149_vm0, %v75_v14  ;;  %v101_v40 = vld [vmem:[%s10173_s3 + $0x130] sm:$0xff]  ;;  %v68_v43 = vld [vmem:[%s10173_s3 + $0x28] sm:$0xff]  ;;  %v67_v47 = vld [vmem:[%s10173_s3 + $0x20] sm:$0xff] }
  0x14   :  { %5274 = vmatpush3.xpose.msk.msra.mxu1 %vm149_vm0, %v107_v15  ;;  %5237 = vmatprep.subr.msk.mxu0 %vm149_vm0, %v90_v16  ;;  %v100_v44 = vld [vmem:[%s10173_s3 + $0x128] sm:$0xff]  ;;  %v99_v48 = vld [vmem:[%s10173_s3 + $0x120] sm:$0xff]  ;;  %v82_v49 = vld [vmem:[%s10173_s3 + $0x98] sm:$0xff] }
  0x15   :  { %5275 = vmatprep.subr.msk.mxu1 %vm149_vm0, %v122_v17  ;;  %v114_v50 = vld [vmem:[%s10173_s3 + $0x198] sm:$0xff]  ;;  %v81_v53 = vld [vmem:[%s10173_s3 + $0x90] sm:$0xff]  ;;  %v80_v57 = vld [vmem:[%s10173_s3 + $0x88] sm:$0xff] }
  0x16   :  { %v66_v51 = vld [vmem:[%s10173_s3 + $0x18] sm:$0xff]  ;;  %v113_v54 = vld [vmem:[%s10173_s3 + $0x190] sm:$0xff]  ;;  %v112_v58 = vld [vmem:[%s10173_s3 + $0x188] sm:$0xff] }
  0x17   :  { %5238 = vmatpush3.xpose.msk.msra.mxu0 %vm149_vm0, %v74_v18  ;;  %v98_v52 = vld [vmem:[%s10173_s3 + $0x118] sm:$0xff]  ;;  %v65_v55 = vld [vmem:[%s10173_s3 + $0x10] sm:$0xff]  ;;  %v64_v59 = vld [vmem:[%s10173_s3 + $0x8] sm:$0xff] }
  0x18   :  { %5276 = vmatpush3.xpose.msk.msra.mxu1 %vm149_vm0, %v106_v19  ;;  %5239 = vmatprep.subr.msk.mxu0 %vm149_vm0, %v89_v20  ;;  %v97_v56 = vld [vmem:[%s10173_s3 + $0x110] sm:$0xff]  ;;  %v96_v60 = vld [vmem:[%s10173_s3 + $0x108] sm:$0xff]  ;;  %v79_v61 = vld [vmem:[%s10173_s3 + $0x80] sm:$0xff] }
  0x19   :  { %5277 = vmatprep.subr.msk.mxu1 %vm149_vm0, %v121_v21  ;;  %v111_v62 = vld [vmem:[%s10173_s3 + $0x180] sm:$0xff]  ;;  %v657_v1 = vld [vmem:[%s10182_s12 + $0xf8] sm:$0xff] }
  0x1a   :  { %v63_v63 = vld [vmem:[%s10173_s3] sm:$0xff] }
  0x1b   :  { %5240 = vmatpush3.xpose.msk.msra.mxu0 %vm149_vm0, %v73_v22  ;;  %v95_v0 = vld [vmem:[%s10173_s3 + $0x100] sm:$0xff] }
  0x1c   :  { %5278 = vmatpush3.xpose.msk.msra.mxu1 %vm149_vm0, %v105_v23  ;;  %5241 = vmatprep.subr.msk.mxu0 %vm149_vm0, %v88_v24 }
  0x1d   :  { %5279 = vmatprep.subr.msk.mxu1 %vm149_vm0, %v120_v25 }
  0x1f   :  { %5242 = vmatpush3.xpose.msk.msra.mxu0 %vm149_vm0, %v72_v27 }
  0x20   :  { %5280 = vmatpush3.xpose.msk.msra.mxu1 %vm149_vm0, %v104_v28  ;;  %5243 = vmatprep.subr.msk.mxu0 %vm149_vm0, %v87_v29 }
  0x21   :  { %5281 = vmatprep.subr.msk.mxu1 %vm149_vm0, %v119_v30 }
  0x23   :  { %5244 = vmatpush3.xpose.msk.msra.mxu0 %vm149_vm0, %v71_v31 }
  0x24   :  { %5282 = vmatpush3.xpose.msk.msra.mxu1 %vm149_vm0, %v103_v32  ;;  %5245 = vmatprep.subr.msk.mxu0 %vm149_vm0, %v86_v33 }
  0x25   :  { %5283 = vmatprep.subr.msk.mxu1 %vm149_vm0, %v118_v34 }
  0x27   :  { %5246 = vmatpush3.xpose.msk.msra.mxu0 %vm149_vm0, %v70_v35 }
  0x28   :  { %5284 = vmatpush3.xpose.msk.msra.mxu1 %vm149_vm0, %v102_v36  ;;  %5247 = vmatprep.subr.msk.mxu0 %vm149_vm0, %v85_v37 }
  0x29   :  { %5285 = vmatprep.subr.msk.mxu1 %vm149_vm0, %v117_v38 }
  0x2b   :  { %5248 = vmatpush3.xpose.msk.msra.mxu0 %vm149_vm0, %v69_v39 }
  0x2c   :  { %5286 = vmatpush3.xpose.msk.msra.mxu1 %vm149_vm0, %v101_v40  ;;  %5249 = vmatprep.subr.msk.mxu0 %vm149_vm0, %v84_v41 }
  0x2d   :  { %5287 = vmatprep.subr.msk.mxu1 %vm149_vm0, %v116_v42 }
  0x2f   :  { %5250 = vmatpush3.xpose.msk.msra.mxu0 %vm149_vm0, %v68_v43 }
  0x30   :  { %5288 = vmatpush3.xpose.msk.msra.mxu1 %vm149_vm0, %v100_v44  ;;  %5251 = vmatprep.subr.msk.mxu0 %vm149_vm0, %v83_v45 }
  0x31   :  { %5289 = vmatprep.subr.msk.mxu1 %vm149_vm0, %v115_v46 }
  0x33   :  { %5252 = vmatpush3.xpose.msk.msra.mxu0 %vm149_vm0, %v67_v47 }
  0x34   :  { %5290 = vmatpush3.xpose.msk.msra.mxu1 %vm149_vm0, %v99_v48  ;;  %5253 = vmatprep.subr.msk.mxu0 %vm149_vm0, %v82_v49 }
  0x35   :  { %5291 = vmatprep.subr.msk.mxu1 %vm149_vm0, %v114_v50 }
  0x37   :  { %5254 = vmatpush3.xpose.msk.msra.mxu0 %vm149_vm0, %v66_v51 }
  0x38   :  { %5292 = vmatpush3.xpose.msk.msra.mxu1 %vm149_vm0, %v98_v52  ;;  %5255 = vmatprep.subr.msk.mxu0 %vm149_vm0, %v81_v53 }
  0x39   :  { %5293 = vmatprep.subr.msk.mxu1 %vm149_vm0, %v113_v54 }
  0x3b   :  { %5256 = vmatpush3.xpose.msk.msra.mxu0 %vm149_vm0, %v65_v55 }
  0x3c   :  { %5294 = vmatpush3.xpose.msk.msra.mxu1 %vm149_vm0, %v97_v56  ;;  %5257 = vmatprep.subr.msk.mxu0 %vm149_vm0, %v80_v57 }
  0x3d   :  { %5295 = vmatprep.subr.msk.mxu1 %vm149_vm0, %v112_v58 }
  0x3f   :  { %5258 = vmatpush3.xpose.msk.msra.mxu0 %vm149_vm0, %v64_v59 }
  0x40   :  { %5296 = vmatpush3.xpose.msk.msra.mxu1 %vm149_vm0, %v96_v60  ;;  %5259 = vmatprep.subr.msk.mxu0 %vm149_vm0, %v79_v61 }
  0x41   :  { %5297 = vmatprep.subr.msk.mxu1 %vm149_vm0, %v111_v62 }
  0x42   :  { %25 = vsyncpa [#allocation7], 0  ;;  %v10193_v2 = vmov 0.0   ;;  %v516_v3 = vld [vmem:[%s10176_s6 + $0x18] sm:$0xff]  ;;  %v656_v5 = vld [vmem:[%s10182_s12 + $0xf0] sm:$0xff]  ;;  %vm6610_vm2 = vmmov 0  }
  0x43   :  { %5260 = vmatpush3.xpose.msk.msra.mxu0 %vm149_vm0, %v63_v63  ;;  %v641_v4 = vld [vmem:[%s10182_s12 + $0x78] sm:$0xff]  ;;  %v61_v6 = vld [vmem:[%s10305_s22 + $0x8] sm:$0xff]  ;;  %v515_v7 = vld [vmem:[%s10176_s6 + $0x10] sm:$0xff]  ;;  %s10307_s19 = sld [smem:[#allocation105_spill]]  ;;  %vm1509_vm3 = vcmask 256000   ;;  %vm1802_vm5 = vcmask 1041409  }
  0x44   :  { %5298 = vmatpush3.xpose.msk.msra.mxu1 %vm149_vm0, %v95_v0  ;;  %5972 = vmatprep.subr.mxu0 %v10193_v2  ;;  %v640_v8 = vld [vmem:[%s10182_s12 + $0x70] sm:$0xff]  ;;  %v655_v9 = vld [vmem:[%s10182_s12 + $0xe8] sm:$0xff]  ;;  %v654_v13 = vld [vmem:[%s10182_s12 + $0xe0] sm:$0xff]  ;;  %vm1804_vm6 = vcmask 1042434   ;;  %vm1806_vm7 = vcmask 1043459   ;;  %vm1808_vm8 = vcmask 1044484  }
  0x45   :  { %5312 = vmatprep.subr.msk.mxu1 %vm712_vm1, %v657_v1  ;;  %v62_v10 = vld [vmem:[%s10305_s22 + $0x10] sm:$0xff]  ;;  %v514_v11 = vld [vmem:[%s10176_s6 + $0x8] sm:$0xff]  ;;  %v7036_v14 = vld [vmem:[%s10179_s9] sm:$0xff]  ;;  %vm1810_vm9 = vcmask 1045509   ;;  %vm1812_vm10 = vcmask 1046534   ;;  %vm1814_vm11 = vcmask 1047559  }
  0x46   :  { %5262 = vmatmul.mubr.msk.f32.vlgmr.msra.gmra.mxu0 %vm149_vm0, %v6813_v26  ;;  %v639_v12 = vld [vmem:[%s10182_s12 + $0x68] sm:$0xff]  ;;  %v513_v15 = vld [vmem:[%s10176_s6] sm:$0xff]  ;;  %v653_v17 = vld [vmem:[%s10182_s12 + $0xd8] sm:$0xff]  ;;  %s10372_s6 = sld [smem:[#allocation104_spill]]  ;;  %vm1817_vm12 = vcmask 23552   ;;  %vm3374_vm13 = vcmask 408576  }
  0x47   :  { %5300 = vmatmul.mubr.msk.f32.vlgmr.msra.gmra.mxu1 %vm149_vm0, %v6813_v26  ;;  %5973 = vmatpush3.xpose.msk.msra.mxu0 %vm149_vm0, %v516_v3  ;;  %v638_v16 = vld [vmem:[%s10182_s12 + $0x60] sm:$0xff]  ;;  %v689_v18 = vld [vmem:[%s10182_s12 + $0x1f8] sm:$0xff]  ;;  %v652_v21 = vld [vmem:[%s10182_s12 + $0xd0] sm:$0xff]  ;;  %s6613_s0 = smov [#allocation4]  }
  0x48   :  { %5313 = vmatpush3.xpose.msk.msra.mxu1 %vm712_vm1, %v641_v4  ;;  %5974 = vmatprep.subr.mxu0 %v10193_v2  ;;  %v637_v19 = vld [vmem:[%s10182_s12 + $0x58] sm:$0xff]  ;;  %v688_v22 = vld [vmem:[%s10182_s12 + $0x1f0] sm:$0xff]  ;;  %v651_v25 = vld [vmem:[%s10182_s12 + $0xc8] sm:$0xff] }
  0x49   :  { %5314 = vmatprep.subr.msk.mxu1 %vm712_vm1, %v656_v5  ;;  %5263 = vmatprep.mubr.msk.f32.mxu0 %vm149_vm0, %v61_v6  ;;  %v673_v20 = vld [vmem:[%s10182_s12 + $0x178] sm:$0xff]  ;;  %v636_v23 = vld [vmem:[%s10182_s12 + $0x50] sm:$0xff]  ;;  %v635_v27 = vld [vmem:[%s10182_s12 + $0x48] sm:$0xff] }
  0x4a   :  { %5301 = vmatprep.mubr.msk.f32.mxu1 %vm149_vm0, %v61_v6  ;;  %5264 = vmatmul.mubr.msk.f32.gmra.mxu0 %vm149_vm0, %v61_v6  ;;  %v672_v24 = vld [vmem:[%s10182_s12 + $0x170] sm:$0xff]  ;;  %v671_v28 = vld [vmem:[%s10182_s12 + $0x168] sm:$0xff]  ;;  %v650_v29 = vld [vmem:[%s10182_s12 + $0xc0] sm:$0xff] }
  0x4b   :  { %5302 = vmatmul.mubr.msk.f32.gmra.mxu1 %vm149_vm0, %v61_v6  ;;  %5975 = vmatpush3.xpose.msk.msra.mxu0 %vm149_vm0, %v515_v7  ;;  %v686_v30 = vld [vmem:[%s10182_s12 + $0x1e0] sm:$0xff]  ;;  %v649_v33 = vld [vmem:[%s10182_s12 + $0xb8] sm:$0xff]  ;;  %v648_v37 = vld [vmem:[%s10182_s12 + $0xb0] sm:$0xff] }
  0x4c   :  { %5315 = vmatpush3.xpose.msk.msra.mxu1 %vm712_vm1, %v640_v8  ;;  %5976 = vmatprep.subr.mxu0 %v10193_v2  ;;  %v634_v31 = vld [vmem:[%s10182_s12 + $0x40] sm:$0xff]  ;;  %v685_v34 = vld [vmem:[%s10182_s12 + $0x1d8] sm:$0xff]  ;;  %v684_v38 = vld [vmem:[%s10182_s12 + $0x1d0] sm:$0xff] }
  0x4d   :  { %5316 = vmatprep.subr.msk.mxu1 %vm712_vm1, %v655_v9  ;;  %5265 = vmatprep.mubr.msk.f32.mxu0 %vm149_vm0, %v62_v10  ;;  %v670_v32 = vld [vmem:[%s10182_s12 + $0x160] sm:$0xff]  ;;  %v633_v35 = vld [vmem:[%s10182_s12 + $0x38] sm:$0xff]  ;;  %v632_v39 = vld [vmem:[%s10182_s12 + $0x30] sm:$0xff] }
  0x4e   :  { %5303 = vmatprep.mubr.msk.f32.mxu1 %vm149_vm0, %v62_v10  ;;  %5266 = vmatmul.mubr.msk.f32.gmra.mxu0 %vm149_vm0, %v62_v10  ;;  %v669_v36 = vld [vmem:[%s10182_s12 + $0x158] sm:$0xff]  ;;  %v668_v40 = vld [vmem:[%s10182_s12 + $0x150] sm:$0xff]  ;;  %v647_v41 = vld [vmem:[%s10182_s12 + $0xa8] sm:$0xff] }
  0x4f   :  { %5304 = vmatmul.mubr.msk.f32.gmra.mxu1 %vm149_vm0, %v62_v10  ;;  %5977 = vmatpush3.xpose.msk.msra.mxu0 %vm149_vm0, %v514_v11  ;;  %v683_v42 = vld [vmem:[%s10182_s12 + $0x1c8] sm:$0xff]  ;;  %v646_v45 = vld [vmem:[%s10182_s12 + $0xa0] sm:$0xff]  ;;  %v645_v49 = vld [vmem:[%s10182_s12 + $0x98] sm:$0xff] }
  0x50   :  { %5317 = vmatpush3.xpose.msk.msra.mxu1 %vm712_vm1, %v639_v12  ;;  %5978 = vmatprep.subr.mxu0 %v10193_v2  ;;  %v631_v43 = vld [vmem:[%s10182_s12 + $0x28] sm:$0xff]  ;;  %v682_v46 = vld [vmem:[%s10182_s12 + $0x1c0] sm:$0xff]  ;;  %v681_v50 = vld [vmem:[%s10182_s12 + $0x1b8] sm:$0xff] }
  0x51   :  { %5318 = vmatprep.subr.msk.mxu1 %vm712_vm1, %v654_v13  ;;  %5980 = vmatprep.mubr.msk.f32.mxu0 %vm6610_vm2, %v10193_v2  ;;  %v667_v44 = vld [vmem:[%s10182_s12 + $0x148] sm:$0xff]  ;;  %v630_v47 = vld [vmem:[%s10182_s12 + $0x20] sm:$0xff]  ;;  %v629_v51 = vld [vmem:[%s10182_s12 + $0x18] sm:$0xff] }
  0x52   :  { %5344 = vmatprep.mubr.msk.f32.mxu1 %vm712_vm1, %v7036_v14  ;;  %v666_v48 = vld [vmem:[%s10182_s12 + $0x140] sm:$0xff]  ;;  %v665_v52 = vld [vmem:[%s10182_s12 + $0x138] sm:$0xff]  ;;  %v644_v53 = vld [vmem:[%s10182_s12 + $0x90] sm:$0xff] }
  0x53   :  { %5979 = vmatpush3.xpose.msk.msra.mxu0 %vm149_vm0, %v513_v15  ;;  %v680_v54 = vld [vmem:[%s10182_s12 + $0x1b0] sm:$0xff]  ;;  %v643_v57 = vld [vmem:[%s10182_s12 + $0x88] sm:$0xff]  ;;  %v642_v61 = vld [vmem:[%s10182_s12 + $0x80] sm:$0xff] }
  0x54   :  { %5319 = vmatpush3.xpose.msk.msra.mxu1 %vm712_vm1, %v638_v16  ;;  %5364 = vmatprep.subr.msk.mxu0 %vm712_vm1, %v689_v18  ;;  %v628_v55 = vld [vmem:[%s10182_s12 + $0x10] sm:$0xff]  ;;  %v679_v58 = vld [vmem:[%s10182_s12 + $0x1a8] sm:$0xff]  ;;  %v678_v62 = vld [vmem:[%s10182_s12 + $0x1a0] sm:$0xff] }
  0x55   :  { %5320 = vmatprep.subr.msk.mxu1 %vm712_vm1, %v653_v17  ;;  %v664_v56 = vld [vmem:[%s10182_s12 + $0x130] sm:$0xff]  ;;  %v627_v59 = vld [vmem:[%s10182_s12 + $0x8] sm:$0xff]  ;;  %v626_v63 = vld [vmem:[%s10182_s12] sm:$0xff] }
  0x56   :  { %5981 = vmatmul.mubr.msk.f32.vlgmr.msra.gmra.mxu0 %vm149_vm0, %v6813_v26  ;;  %v687_v26 = vld [vmem:[%s10182_s12 + $0x1e8] sm:$0xff]  ;;  %v662_v0 = vld [vmem:[%s10182_s12 + $0x120] sm:$0xff]  ;;  %v677_v1 = vld [vmem:[%s10182_s12 + $0x198] sm:$0xff] }
  0x57   :  { %5365 = vmatpush3.xpose.msk.msra.mxu0 %vm712_vm1, %v673_v20  ;;  %5983 = vmatprep.mubr.msk.f32.mxu0 %vm6610_vm2, %v10193_v2  ;;  %v663_v60 = vld [vmem:[%s10182_s12 + $0x128] sm:$0xff]  ;;  %v661_v3 = vld [vmem:[%s10182_s12 + $0x118] sm:$0xff]  ;;  %v660_v7 = vld [vmem:[%s10182_s12 + $0x110] sm:$0xff]  ;;  %v10192_v20 = vlaneseq }
  0x58   :  { %5321 = vmatpush3.xpose.msk.msra.mxu1 %vm712_vm1, %v637_v19  ;;  %5366 = vmatprep.subr.msk.mxu0 %vm712_vm1, %v688_v22  ;;  %v7267_v4 = vld [vmem:[%s10177_s7 + $0x18] sm:$0xff]  ;;  %v617_v5 = vld [vmem:[%s10179_s9 + $0x8] sm:$0xff]  ;;  %v618_v8 = vld [vmem:[%s10179_s9 + $0x10] sm:$0xff] }
  0x59   :  { %5322 = vmatprep.subr.msk.mxu1 %vm712_vm1, %v652_v21  ;;  %v675_v9 = vld [vmem:[%s10182_s12 + $0x188] sm:$0xff]  ;;  %v7306_v12 = vld [vmem:[%s10179_s9 + $0x18] sm:$0xff]  ;;  %v674_v13 = vld [vmem:[%s10182_s12 + $0x180] sm:$0xff] }
  0x5a   :  { %5984 = vmatmul.mubr.msk.f32.gmra.mxu0 %vm149_vm0, %v61_v6  ;;  %v676_v6 = vld [vmem:[%s10182_s12 + $0x190] sm:$0xff]  ;;  %v659_v11 = vld [vmem:[%s10182_s12 + $0x108] sm:$0xff]  ;;  %v658_v16 = vld [vmem:[%s10182_s12 + $0x100] sm:$0xff] }
  0x5b   :  { %5367 = vmatpush3.xpose.msk.msra.mxu0 %vm712_vm1, %v672_v24  ;;  %5986 = vmatprep.mubr.msk.f32.mxu0 %vm6610_vm2, %v10193_v2  ;;  %v7316_v15 = vld [vmem:[%s10177_s7 + $0x8] sm:$0xff]  ;;  %v7329_v17 = vld [vmem:[%s10179_s9 + $0x20] sm:$0xff]  ;;  %v7335_v18 = vld [vmem:[%s10174_s4 + $0xf8] sm:$0xff] }
  0x5c   :  { %5323 = vmatpush3.xpose.msk.msra.mxu1 %vm712_vm1, %v636_v23  ;;  %5368 = vmatprep.subr.msk.mxu0 %vm712_vm1, %v687_v26  ;;  %v7341_v19 = vld [vmem:[%s10177_s7] sm:$0xff]  ;;  %v7348_v21 = vld [vmem:[%s10174_s4 + $0x1f8] sm:$0xff]  ;;  %v7362_v23 = vld [vmem:[%s10179_s9 + $0x28] sm:$0xff] }
  0x5d   :  { %5324 = vmatprep.subr.msk.mxu1 %vm712_vm1, %v651_v25  ;;  %v7357_v22 = vld [vmem:[%s10174_s4 + $0x78] sm:$0xff]  ;;  %v7368_v24 = vld [vmem:[%s10174_s4 + $0xf0] sm:$0xff]  ;;  %v7372_v25 = vshrl.u32 %v10192_v20, 7  ;;  %v7752_v20 = vld [vmem:[%s10174_s4 + $0x80] sm:$0xff] }
  0x5e   :  { %5987 = vmatmul.mubr.msk.f32.gmra.mxu0 %vm149_vm0, %v62_v10  ;;  %v7294_v10 = vld [vmem:[%s10177_s7 + $0x10] sm:$0xff]  ;;  %10321 = vst [vmem:[#allocation24_spill] sm:$0xff] %v7752_v20 }
  0x5f   :  { %5369 = vmatpush3.xpose.msk.msra.mxu0 %vm712_vm1, %v671_v28  ;;  %5396 = vmatprep.mubr.msk.f32.mxu0 %vm712_vm1, %v7036_v14  ;;  %v7382_v26 = vsub.s32 1, %v7372_v25  ;;  %v7393_v28 = vld [vmem:[%s10179_s9 + $0x30] sm:$0xff]  ;;  %vm1327_vm4 = vcmp.lt.s32.totalorder %v7372_v25, 2 }
  0x60   :  { %5325 = vmatpush3.xpose.msk.msra.mxu1 %vm712_vm1, %v635_v27  ;;  %5370 = vmatprep.subr.msk.mxu0 %vm712_vm1, %v686_v30  ;;  %v7388_v27 = vld [vmem:[%s10174_s4 + $0x70] sm:$0xff] }
  0x61   :  { %5326 = vmatprep.subr.msk.mxu1 %vm712_vm1, %v650_v29  ;;  %10306 = vst [vmem:[#allocation10_spill] sm:$0xff] %v7382_v26  ;;  %v7404_v29 = vld [vmem:[%s10174_s4 + $0xe8] sm:$0xff] }
  0x63   :  { %5371 = vmatpush3.xpose.msk.msra.mxu0 %vm712_vm1, %v670_v32  ;;  %v7421_v32 = vld [vmem:[%s10174_s4 + $0x68] sm:$0xff] }
  0x64   :  { %5327 = vmatpush3.xpose.msk.msra.mxu1 %vm712_vm1, %v634_v31  ;;  %5372 = vmatprep.subr.msk.mxu0 %vm712_vm1, %v685_v34  ;;  %v7415_v31 = vsub.s32 2, %v7372_v25  ;;  %v7432_v34 = vld [vmem:[%s10174_s4 + $0xe0] sm:$0xff] }
  0x65   :  { %5328 = vmatprep.subr.msk.mxu1 %vm712_vm1, %v649_v33  ;;  %v7426_v33 = vld [vmem:[%s10179_s9 + $0x38] sm:$0xff] }
  0x66   :  { %10308 = vst [vmem:[#allocation11_spill] sm:$0xff] %v7415_v31 }
  0x67   :  { %5373 = vmatpush3.xpose.msk.msra.mxu0 %vm712_vm1, %v669_v36  ;;  %v7443_v36 = vsub.s32 3, %v7372_v25 }
  0x68   :  { %5329 = vmatpush3.xpose.msk.msra.mxu1 %vm712_vm1, %v633_v35  ;;  %5374 = vmatprep.subr.msk.mxu0 %vm712_vm1, %v684_v38  ;;  %v624_v38 = vld [vmem:[%s10179_s9 + $0x40] sm:$0xff] }
  0x69   :  { %5330 = vmatprep.subr.msk.mxu1 %vm712_vm1, %v648_v37  ;;  %10309 = vst [vmem:[#allocation12_spill] sm:$0xff] %v7443_v36  ;;  %v7449_v37 = vld [vmem:[%s10174_s4 + $0x60] sm:$0xff] }
  0x6b   :  { %5375 = vmatpush3.xpose.msk.msra.mxu0 %vm712_vm1, %v668_v40 }
  0x6c   :  { %5331 = vmatpush3.xpose.msk.msra.mxu1 %vm712_vm1, %v632_v39  ;;  %5376 = vmatprep.subr.msk.mxu0 %vm712_vm1, %v683_v42  ;;  %v7459_v39 = vld [vmem:[%s10174_s4 + $0xd8] sm:$0xff] }
  0x6d   :  { %5332 = vmatprep.subr.msk.mxu1 %vm712_vm1, %v647_v41  ;;  %v7464_v41 = vsub.s32 5, %v7372_v25  ;;  %v7476_v42 = vld [vmem:[%s10174_s4 + $0x58] sm:$0xff] }
  0x6f   :  { %5377 = vmatpush3.xpose.msk.msra.mxu0 %vm712_vm1, %v667_v44  ;;  %10310 = vst [vmem:[#allocation13_spill] sm:$0xff] %v7464_v41  ;;  %v7486_v44 = vld [vmem:[%s10174_s4 + $0xd0] sm:$0xff] }
  0x70   :  { %5333 = vmatpush3.xpose.msk.msra.mxu1 %vm712_vm1, %v631_v43  ;;  %5378 = vmatprep.subr.msk.mxu0 %vm712_vm1, %v682_v46  ;;  %v625_v43 = vld [vmem:[%s10179_s9 + $0x48] sm:$0xff]  ;;  %v7491_v46 = vsub.s32 7, %v7372_v25 }
  0x71   :  { %5334 = vmatprep.subr.msk.mxu1 %vm712_vm1, %v646_v45 }
  0x72   :  { %10311 = vst [vmem:[#allocation14_spill] sm:$0xff] %v7491_v46 }
  0x73   :  { %5379 = vmatpush3.xpose.msk.msra.mxu0 %vm712_vm1, %v666_v48  ;;  %v7509_v48 = vld [vmem:[%s10174_s4 + $0xc8] sm:$0xff] }
  0x74   :  { %5335 = vmatpush3.xpose.msk.msra.mxu1 %vm712_vm1, %v630_v47  ;;  %5380 = vmatprep.subr.msk.mxu0 %vm712_vm1, %v681_v50  ;;  %v7502_v47 = vld [vmem:[%s10174_s4 + $0x50] sm:$0xff]  ;;  %v7523_v50 = vld [vmem:[%s10174_s4 + $0x178] sm:$0xff] }
  0x75   :  { %5336 = vmatprep.subr.msk.mxu1 %vm712_vm1, %v645_v49 }
  0x77   :  { %5381 = vmatpush3.xpose.msk.msra.mxu0 %vm712_vm1, %v665_v52  ;;  %v7535_v52 = vld [vmem:[%s10174_s4 + $0x1f0] sm:$0xff] }
  0x78   :  { %5337 = vmatpush3.xpose.msk.msra.mxu1 %vm712_vm1, %v629_v51  ;;  %5382 = vmatprep.subr.msk.mxu0 %vm712_vm1, %v680_v54  ;;  %v7528_v51 = vld [vmem:[%s10174_s4 + $0x48] sm:$0xff]  ;;  %v7552_v54 = vld [vmem:[%s10174_s4 + $0x170] sm:$0xff] }
  0x79   :  { %5338 = vmatprep.subr.msk.mxu1 %vm712_vm1, %v644_v53  ;;  %v7540_v53 = vld [vmem:[%s10174_s4 + $0xc0] sm:$0xff] }
  0x7b   :  { %5383 = vmatpush3.xpose.msk.msra.mxu0 %vm712_vm1, %v664_v56  ;;  %v7562_v56 = vld [vmem:[%s10174_s4 + $0x1e8] sm:$0xff] }
  0x7c   :  { %5339 = vmatpush3.xpose.msk.msra.mxu1 %vm712_vm1, %v628_v55  ;;  %5384 = vmatprep.subr.msk.mxu0 %vm712_vm1, %v679_v58  ;;  %v7557_v55 = vld [vmem:[%s10174_s4 + $0x40] sm:$0xff]  ;;  %v7581_v58 = vld [vmem:[%s10174_s4 + $0x168] sm:$0xff] }
  0x7d   :  { %5340 = vmatprep.subr.msk.mxu1 %vm712_vm1, %v643_v57  ;;  %v7567_v57 = vld [vmem:[%s10174_s4 + $0xb8] sm:$0xff] }
  0x7f   :  { %5385 = vmatpush3.xpose.msk.msra.mxu0 %vm712_vm1, %v663_v60  ;;  %v7591_v60 = vld [vmem:[%s10174_s4 + $0x1e0] sm:$0xff] }
  0x80   :  { %5341 = vmatpush3.xpose.msk.msra.mxu1 %vm712_vm1, %v627_v59  ;;  %5386 = vmatprep.subr.msk.mxu0 %vm712_vm1, %v678_v62  ;;  %v7586_v59 = vld [vmem:[%s10174_s4 + $0x38] sm:$0xff]  ;;  %v7607_v62 = vld [vmem:[%s10174_s4 + $0x160] sm:$0xff] }
  0x81   :  { %5342 = vmatprep.subr.msk.mxu1 %vm712_vm1, %v642_v61  ;;  %v7596_v61 = vld [vmem:[%s10174_s4 + $0xb0] sm:$0xff] }
  0x83   :  { %5387 = vmatpush3.xpose.msk.msra.mxu0 %vm712_vm1, %v662_v0  ;;  %v7617_v0 = vld [vmem:[%s10174_s4 + $0x1d8] sm:$0xff] }
  0x84   :  { %5343 = vmatpush3.xpose.msk.msra.mxu1 %vm712_vm1, %v626_v63  ;;  %5388 = vmatprep.subr.msk.mxu0 %vm712_vm1, %v677_v1  ;;  %v7612_v63 = vld [vmem:[%s10174_s4 + $0x30] sm:$0xff]  ;;  %v7622_v1 = vld [vmem:[%s10174_s4 + $0xa8] sm:$0xff] }
  0x85   :  { %5989 = vmatprep.subr.mxu1 %v10193_v2 }
  0x87   :  { %5345 = vmatmul.mubr.msk.f32.vlgmr.msra.gmra.mxu1 %vm712_vm1, %v7036_v14  ;;  %5389 = vmatpush3.xpose.msk.msra.mxu0 %vm712_vm1, %v661_v3  ;;  %v7633_v3 = vld [vmem:[%s10174_s4 + $0x158] sm:$0xff] }
  0x88   :  { %5990 = vmatpush3.xpose.msra.mxu1 %v7267_v4  ;;  %5346 = vmatprep.mubr.msk.f32.mxu1 %vm712_vm1, %v617_v5 }
  0x89   :  { %5390 = vmatprep.subr.msk.mxu0 %vm712_vm1, %v676_v6  ;;  %5991 = vmatprep.subr.mxu1 %v10193_v2  ;;  %v7643_v6 = vld [vmem:[%s10174_s4 + $0x1d0] sm:$0xff] }
  0x8b   :  { %5347 = vmatmul.mubr.msk.f32.gmra.mxu1 %vm712_vm1, %v617_v5  ;;  %5391 = vmatpush3.xpose.msk.msra.mxu0 %vm712_vm1, %v660_v7  ;;  %v7648_v7 = vld [vmem:[%s10174_s4 + $0xa0] sm:$0xff] }
  0x8c   :  { %5348 = vmatprep.mubr.msk.f32.mxu1 %vm712_vm1, %v618_v8  ;;  %5392 = vmatprep.subr.msk.mxu0 %vm712_vm1, %v675_v9  ;;  %10313 = vst [vmem:[#allocation16_spill] sm:$0xff] %v7648_v7  ;;  %v7663_v9 = vld [vmem:[%s10174_s4 + $0x20] sm:$0xff] }
  0x8d   :  { %5992 = vmatpush3.xpose.msra.mxu1 %v7294_v10  ;;  %10314 = vst [vmem:[#allocation17_spill] sm:$0xff] %v7663_v9 }
  0x8e   :  { %5993 = vmatprep.subr.mxu1 %v10193_v2 }
  0x8f   :  { %5349 = vmatmul.mubr.msk.f32.gmra.mxu1 %vm712_vm1, %v618_v8  ;;  %5393 = vmatpush3.xpose.msk.msra.mxu0 %vm712_vm1, %v659_v11  ;;  %v7668_v11 = vld [vmem:[%s10174_s4 + $0x1c8] sm:$0xff] }
  0x90   :  { %5350 = vmatprep.mubr.msk.f32.mxu1 %vm712_vm1, %v7306_v12  ;;  %5394 = vmatprep.subr.msk.mxu0 %vm712_vm1, %v674_v13  ;;  %v7682_v13 = vld [vmem:[%s10174_s4 + $0x148] sm:$0xff] }
  0x91   :  { %5994 = vmatpush3.xpose.msra.mxu1 %v7316_v15 }
  0x92   :  { %5995 = vmatprep.subr.mxu1 %v10193_v2 }
  0x93   :  { %5351 = vmatmul.mubr.msk.f32.gmra.mxu1 %vm712_vm1, %v7306_v12  ;;  %5395 = vmatpush3.xpose.msk.msra.mxu0 %vm712_vm1, %v658_v16  ;;  %v7687_v16 = vld [vmem:[%s10174_s4 + $0x18] sm:$0xff] }
  0x94   :  { %5352 = vmatprep.mubr.msk.f32.mxu1 %vm712_vm1, %v7329_v17  ;;  %5421 = vmatprep.subr.mxu0 %v7335_v18  ;;  %10316 = vst [vmem:[#allocation19_spill] sm:$0xff] %v7687_v16 }
  0x95   :  { %5996 = vmatpush3.xpose.msra.mxu1 %v7341_v19 }
  0x96   :  { %5455 = vmatprep.subr.mxu1 %v7348_v21  ;;  %5397 = vmatmul.mubr.msk.f32.vlgmr.msra.gmra.mxu0 %vm712_vm1, %v7036_v14  ;;  %v7399_v14 = vld [vmem:[%s10307_s19] sm:$0xff] }
  0x97   :  { %5353 = vmatmul.mubr.msk.f32.gmra.mxu1 %vm712_vm1, %v7329_v17  ;;  %5422 = vmatpush3.xpose.msra.mxu0 %v7357_v22  ;;  %v1553_v30 = vrot.slane %v7399_v14, %v7382_v26  ;;  %v1560_v35 = vrot.slane %v7399_v14, %v7415_v31  ;;  %v1567_v40 = vrot.slane %v7399_v14, %v7443_v36 }
  0x98   :  { %5354 = vmatprep.mubr.msk.f32.mxu1 %vm712_vm1, %v7362_v23  ;;  %5423 = vmatprep.subr.mxu0 %v7368_v24  ;;  %v1581_v45 = vrot.slane %v7399_v14, %v7464_v41  ;;  %v1595_v49 = vrot.slane %v7399_v14, %v7491_v46 }
  0x99   :  { %5398 = vmatprep.mubr.msk.f32.mxu0 %vm712_vm1, %v617_v5  ;;  %1555 = vbcast.lane.b32.xlu1 %v1553_v30, 256  ;;  %v7711_v30 = vld [vmem:[%s10174_s4 + $0x10] sm:$0xff] }
  0x9a   :  { %5399 = vmatmul.mubr.msk.f32.gmra.mxu0 %vm712_vm1, %v617_v5  ;;  %v7638_v5 = vld [vmem:[%s10174_s4 + $0x28] sm:$0xff]  ;;  %10318 = vst [vmem:[#allocation21_spill] sm:$0xff] %v7711_v30 }
  0x9b   :  { %5355 = vmatmul.mubr.msk.f32.gmra.mxu1 %vm712_vm1, %v7362_v23  ;;  %5424 = vmatpush3.xpose.msra.mxu0 %v7388_v27  ;;  %10312 = vst [vmem:[#allocation15_spill] sm:$0xff] %v7638_v5 }
  0x9c   :  { %5356 = vmatprep.mubr.msk.f32.mxu1 %vm712_vm1, %v7393_v28  ;;  %5425 = vmatprep.subr.mxu0 %v7404_v29 }
  0x9d   :  { %5400 = vmatprep.mubr.msk.f32.mxu0 %vm712_vm1, %v618_v8  ;;  %1562 = vbcast.lane.b32.xlu1 %v1560_v35, 256  ;;  %v7721_v35 = vld [vmem:[%s10174_s4 + $0x1b8] sm:$0xff] }
  0x9e   :  { %5401 = vmatmul.mubr.msk.f32.gmra.mxu0 %vm712_vm1, %v618_v8  ;;  %v7658_v8 = vld [vmem:[%s10174_s4 + $0x150] sm:$0xff] }
  0x9f   :  { %5357 = vmatmul.mubr.msk.f32.gmra.mxu1 %vm712_vm1, %v7393_v28  ;;  %5426 = vmatpush3.xpose.msra.mxu0 %v7421_v32 }
  0xa0   :  { %5358 = vmatprep.mubr.msk.f32.mxu1 %vm712_vm1, %v7426_v33  ;;  %5427 = vmatprep.subr.mxu0 %v7432_v34 }
  0xa1   :  { %5402 = vmatprep.mubr.msk.f32.mxu0 %vm712_vm1, %v7306_v12  ;;  %1569 = vbcast.lane.b32.xlu1 %v1567_v40, 256 }
  0xa2   :  { %5403 = vmatmul.mubr.msk.f32.gmra.mxu0 %vm712_vm1, %v7306_v12  ;;  %v7673_v12 = vld [vmem:[%s10174_s4 + $0x98] sm:$0xff] }
  0xa3   :  { %5359 = vmatmul.mubr.msk.f32.gmra.mxu1 %vm712_vm1, %v7426_v33  ;;  %5428 = vmatpush3.xpose.msra.mxu0 %v7449_v37  ;;  %10315 = vst [vmem:[#allocation18_spill] sm:$0xff] %v7673_v12 }
  0xa4   :  { %5360 = vmatprep.mubr.msk.f32.mxu1 %vm712_vm1, %v624_v38  ;;  %5429 = vmatprep.subr.mxu0 %v7459_v39 }
  0xa5   :  { %5404 = vmatprep.mubr.msk.f32.mxu0 %vm712_vm1, %v7329_v17  ;;  %1583 = vbcast.lane.b32.xlu1 %v1581_v45, 256  ;;  %v7742_v45 = vld [vmem:[%s10174_s4 + $0x8] sm:$0xff] }
  0xa6   :  { %5405 = vmatmul.mubr.msk.f32.gmra.mxu0 %vm712_vm1, %v7329_v17  ;;  %v7692_v17 = vld [vmem:[%s10174_s4 + $0x1c0] sm:$0xff]  ;;  %10320 = vst [vmem:[#allocation23_spill] sm:$0xff] %v7742_v45 }
  0xa7   :  { %5361 = vmatmul.mubr.msk.f32.gmra.mxu1 %vm712_vm1, %v624_v38  ;;  %5430 = vmatpush3.xpose.msra.mxu0 %v7476_v42 }
  0xa8   :  { %5362 = vmatprep.mubr.msk.f32.mxu1 %vm712_vm1, %v625_v43  ;;  %5431 = vmatprep.subr.mxu0 %v7486_v44 }
  0xa9   :  { %5406 = vmatprep.mubr.msk.f32.mxu0 %vm712_vm1, %v7362_v23  ;;  %1597 = vbcast.lane.b32.xlu1 %v1595_v49, 256  ;;  %v7747_v49 = vld [vmem:[%s10174_s4 + $0x1b0] sm:$0xff] }
  0xaa   :  { %5407 = vmatmul.mubr.msk.f32.gmra.mxu0 %vm712_vm1, %v7362_v23  ;;  %v7697_v23 = vld [vmem:[%s10174_s4 + $0x90] sm:$0xff] }
  0xab   :  { %5363 = vmatmul.mubr.msk.f32.gmra.mxu1 %vm712_vm1, %v625_v43  ;;  %5432 = vmatpush3.xpose.msra.mxu0 %v7502_v47  ;;  %10317 = vst [vmem:[#allocation20_spill] sm:$0xff] %v7697_v23 }
  0xac   :  { %5997 = vmatprep.mubr.msk.f32.mxu1 %vm6610_vm2, %v10193_v2  ;;  %5433 = vmatprep.subr.mxu0 %v7509_v48 }
  0xad   :  { %5408 = vmatprep.mubr.msk.f32.mxu0 %vm712_vm1, %v7393_v28 }
  0xae   :  { %5409 = vmatmul.mubr.msk.f32.gmra.mxu0 %vm712_vm1, %v7393_v28  ;;  %v7706_v28 = vld [vmem:[%s10174_s4 + $0x140] sm:$0xff] }
  0xaf   :  { %5998 = vmatmul.mubr.f32.vlgmr.msra.gmra.mxu1 %v10193_v2  ;;  %5434 = vmatpush3.xpose.msra.mxu0 %v7528_v51 }
  0xb0   :  { %5456 = vmatpush3.xpose.msra.mxu1 %v7523_v50  ;;  %5435 = vmatprep.subr.mxu0 %v7540_v53 }
  0xb1   :  { %5457 = vmatprep.subr.mxu1 %v7535_v52  ;;  %5410 = vmatprep.mubr.msk.f32.mxu0 %vm712_vm1, %v7426_v33 }
  0xb2   :  { %5487 = vmatprep.mubr.f32.mxu1 %v10193_v2  ;;  %5411 = vmatmul.mubr.msk.f32.gmra.mxu0 %vm712_vm1, %v7426_v33  ;;  %v7716_v33 = vld [vmem:[%s10307_s19 + $0x8] sm:$0xff] }
  0xb3   :  { %5436 = vmatpush3.xpose.msra.mxu0 %v7557_v55  ;;  %5412 = vmatprep.mubr.msk.f32.mxu0 %vm712_vm1, %v624_v38  ;;  %v2226_v40 = vrot.slane %v7716_v33, %v7382_v26 }
  0xb4   :  { %5458 = vmatpush3.xpose.msra.mxu1 %v7552_v54  ;;  %5437 = vmatprep.subr.mxu0 %v7567_v57 }
  0xb5   :  { %5459 = vmatprep.subr.mxu1 %v7562_v56  ;;  %2228 = vbcast.lane.b32.xlu1 %v2226_v40, 256  ;;  %v7771_v40 = vld [vmem:[%s10174_s4] sm:$0xff] }
  0xb6   :  { %5413 = vmatmul.mubr.msk.f32.gmra.mxu0 %vm712_vm1, %v624_v38  ;;  %v7726_v38 = vld [vmem:[%s10174_s4 + $0x88] sm:$0xff]  ;;  %10323 = vst [vmem:[#allocation26_spill] sm:$0xff] %v7771_v40 }
  0xb7   :  { %5438 = vmatpush3.xpose.msra.mxu0 %v7586_v59  ;;  %5414 = vmatprep.mubr.msk.f32.mxu0 %vm712_vm1, %v625_v43  ;;  %10319 = vst [vmem:[#allocation22_spill] sm:$0xff] %v7726_v38 }
  0xb8   :  { %5460 = vmatpush3.xpose.msra.mxu1 %v7581_v58  ;;  %5439 = vmatprep.subr.mxu0 %v7596_v61 }
  0xb9   :  { %5461 = vmatprep.subr.mxu1 %v7591_v60 }
  0xba   :  { %5415 = vmatmul.mubr.msk.f32.gmra.mxu0 %vm712_vm1, %v625_v43  ;;  %v7737_v43 = vld [vmem:[%s10174_s4 + $0x138] sm:$0xff] }
  0xbb   :  { %5440 = vmatpush3.xpose.msra.mxu0 %v7612_v63  ;;  %5453 = vmatprep.mubr.f32.mxu0 %v10193_v2  ;;  %v2233_v2 = vrot.slane %v7716_v33, %v7415_v31 }
  0xbc   :  { %5462 = vmatpush3.xpose.msra.mxu1 %v7607_v62  ;;  %5441 = vmatprep.subr.mxu0 %v7622_v1 }
  0xbd   :  { %5463 = vmatprep.subr.mxu1 %v7617_v0  ;;  %2235 = vbcast.lane.b32.xlu1 %v2233_v2, 256 }
  0xbf   :  { %5442 = vmatpush3.xpose.msra.mxu0 %v7638_v5  ;;  %v7813_v5 = vld [vmem:[%s10174_s4 + $0x120] sm:$0xff] }
  0xc0   :  { %5464 = vmatpush3.xpose.msra.mxu1 %v7633_v3  ;;  %5443 = vmatprep.subr.mxu0 %v7648_v7  ;;  %v7805_v7 = vsub.s32 6, %v7372_v25 }
  0xc1   :  { %5465 = vmatprep.subr.mxu1 %v7643_v6 }
  0xc2   :  { %10326 = vst [vmem:[#allocation28_spill] sm:$0xff] %v7805_v7 }
  0xc3   :  { %5444 = vmatpush3.xpose.msra.mxu0 %v7663_v9  ;;  %v10325_v9 = vmov 0.0  }
  0xc4   :  { %5466 = vmatpush3.xpose.msra.mxu1 %v7658_v8  ;;  %5445 = vmatprep.subr.mxu0 %v7673_v12  ;;  %v7791_v12 = vld [vmem:[%s10174_s4 + $0x128] sm:$0xff] }
  0xc5   :  { %5467 = vmatprep.subr.mxu1 %v7668_v11 }
  0xc7   :  { %5446 = vmatpush3.xpose.msra.mxu0 %v7687_v16  ;;  %v7783_v16 = vsub.s32 4, %v7372_v25 }
  0xc8   :  { %5468 = vmatpush3.xpose.msra.mxu1 %v7682_v13  ;;  %5447 = vmatprep.subr.mxu0 %v7697_v23 }
  0xc9   :  { %5469 = vmatprep.subr.mxu1 %v7692_v17  ;;  %10324 = vst [vmem:[#allocation27_spill] sm:$0xff] %v7783_v16  ;;  %v1574_v2 = vrot.slane %v7399_v14, %v7783_v16 }
  0xcb   :  { %5448 = vmatpush3.xpose.msra.mxu0 %v7711_v30  ;;  %v7766_v30 = vld [vmem:[%s10174_s4 + $0x130] sm:$0xff] }
  0xcc   :  { %5470 = vmatpush3.xpose.msra.mxu1 %v7706_v28  ;;  %5449 = vmatprep.subr.mxu0 %v7726_v38  ;;  %v7757_v38 = vsub.s32 0, %v7372_v25 }
  0xcd   :  { %5471 = vmatprep.subr.mxu1 %v7721_v35 }
  0xce   :  { %10322 = vst [vmem:[#allocation25_spill] sm:$0xff] %v7757_v38  ;;  %v1546_v23 = vrot.slane %v7399_v14, %v7757_v38 }
  0xcf   :  { %5450 = vmatpush3.xpose.msra.mxu0 %v7742_v45  ;;  %v7778_v45 = vld [vmem:[%s10174_s4 + $0x1a8] sm:$0xff] }
  0xd0   :  { %5472 = vmatpush3.xpose.msra.mxu1 %v7737_v43  ;;  %5451 = vmatprep.subr.mxu0 %v7752_v20  ;;  %v2240_v20 = vrot.slane %v7716_v33, %v7443_v36 }
  0xd1   :  { %5473 = vmatprep.subr.mxu1 %v7747_v49  ;;  %1548 = vbcast.lane.b32.xlu0 %v1546_v23, 256  ;;  %v7799_v23 = vld [vmem:[%s10174_s4 + $0x1a0] sm:$0xff] }
  0xd2   :  { %2242 = vbcast.lane.b32.xlu1 %v2240_v20, 256  ;;  %v1588_v20 = vrot.slane %v7399_v14, %v7805_v7  ;;  %v7833_v14 = vld [vmem:[%s10174_s4 + $0x118] sm:$0xff] }
  0xd3   :  { %5452 = vmatpush3.xpose.msra.mxu0 %v7771_v40  ;;  %v2254_v40 = vrot.slane %v7716_v33, %v7464_v41  ;;  %v7851_v41 = vld [vmem:[%s10174_s4 + $0x110] sm:$0xff] }
  0xd4   :  { %5474 = vmatpush3.xpose.msra.mxu1 %v7766_v30  ;;  %6000 = vmatprep.subr.mxu0 %v10325_v9 }
  0xd5   :  { %5475 = vmatprep.subr.mxu1 %v7778_v45  ;;  %1576 = vbcast.lane.b32.xlu0 %v1574_v2, 256  ;;  %v7821_v2 = vld [vmem:[%s10174_s4 + $0x198] sm:$0xff] }
  0xd6   :  { %5454 = vmatmul.mubr.f32.vlgmr.msra.gmra.mxu0 %v10325_v9  ;;  %2256 = vbcast.lane.b32.xlu1 %v2254_v40, 256  ;;  %v2219_v40 = vrot.slane %v7716_v33, %v7757_v38 }
  0xd7   :  { %6001 = vmatpush3.xpose.msra.mxu0 %v7267_v4  ;;  %v2268_v4 = vrot.slane %v7716_v33, %v7491_v46  ;;  %6008 = vmatprep.mubr.msk.f32.mxu0 %vm6610_vm2, %v10325_v9  ;;  %v6611_v46 = vmov 0  }
  0xd8   :  { %5476 = vmatpush3.xpose.msra.mxu1 %v7791_v12  ;;  %6002 = vmatprep.subr.mxu0 %v10325_v9 }
  0xd9   :  { %5477 = vmatprep.subr.mxu1 %v7799_v23  ;;  %1590 = vbcast.lane.b32.xlu0 %v1588_v20, 256  ;;  %v7841_v20 = vld [vmem:[%s10174_s4 + $0x190] sm:$0xff] }
  0xda   :  { %2270 = vbcast.lane.b32.xlu1 %v2268_v4, 256  ;;  %6139 = vset.pattern.permute.xlu0 %v6611_v46  ;;  %v2247_v4 = vrot.slane %v7716_v33, %v7783_v16  ;;  %v2261_v16 = vrot.slane %v7716_v33, %v7805_v7  ;;  %v3401_v33 = vld [vmem:[%s10180_s10] sm:$0xff] }
  0xdb   :  { %6003 = vmatpush3.xpose.msra.mxu0 %v7294_v10  ;;  %6140 = vset.pattern.permute.xlu1 %v6611_v46  ;;  %v3402_v10 = vld [vmem:[%s10180_s10 + $0x8] sm:$0xff]  ;;  %v5187_v46 = vld [vmem:[%s10180_s10 + $0x10] sm:$0xff] }
  0xdc   :  { %5478 = vmatpush3.xpose.msra.mxu1 %v7813_v5  ;;  %6004 = vmatprep.subr.mxu0 %v10325_v9 }
  0xdd   :  { %5479 = vmatprep.subr.mxu1 %v7821_v2  ;;  %2221 = vbcast.lane.b32.xlu0 %v2219_v40, 256  ;;  %v7859_v40 = vld [vmem:[%s10174_s4 + $0x188] sm:$0xff] }
  0xde   :  { %3407 = vperm.xlu1 %6140, %v3402_v10   ;;  %v7878_v10 = vld [vmem:[%s10174_s4 + $0x180] sm:$0xff] }
  0xdf   :  { %6005 = vmatpush3.xpose.msra.mxu0 %v7316_v15  ;;  %v7870_v15 = vld [vmem:[%s10174_s4 + $0x108] sm:$0xff] }
  0xe0   :  { %5480 = vmatpush3.xpose.msra.mxu1 %v7833_v14  ;;  %6006 = vmatprep.subr.mxu0 %v10325_v9 }
  0xe1   :  { %5481 = vmatprep.subr.mxu1 %v7841_v20  ;;  %2249 = vbcast.lane.b32.xlu0 %v2247_v4, 256  ;;  %v5188_v4 = vld [vmem:[%s10180_s10 + $0x18] sm:$0xff] }
  0xe2   :  { %3777 = vperm.xlu1 %6140, %v5187_v46  }
  0xe3   :  { %6007 = vmatpush3.xpose.msra.mxu0 %v7341_v19  ;;  %v7889_v19 = vld [vmem:[%s10174_s4 + $0x100] sm:$0xff] }
  0xe4   :  { %5482 = vmatpush3.xpose.msra.mxu1 %v7851_v41  ;;  %5494 = vmatprep.subr.mxu0 %v7335_v18  ;;  %v127_v18 = vld [vmem:[%s10175_s5] sm:$0xf] }
  0xe5   :  { %5483 = vmatprep.subr.mxu1 %v7859_v40  ;;  %2263 = vbcast.lane.b32.xlu0 %v2261_v16, 256 }
  0xe6   :  { %3780 = vperm.xlu1 %6140, %v5188_v4  }
  0xe8   :  { %5484 = vmatpush3.xpose.msra.mxu1 %v7870_v15 }
  0xe9   :  { %5485 = vmatprep.subr.mxu1 %v7878_v10  ;;  %3404 = vperm.xlu0 %6139, %v3401_v33  }
  0xec   :  { %5486 = vmatpush3.xpose.msra.mxu1 %v7889_v19 }
  0xed   :  { %5528 = vmatprep.subr.mxu1 %v7348_v21 }
  0xef   :  { %5488 = vmatmul.mubr.f32.vlgmr.msra.gmra.mxu1 %v10325_v9 }
  0xf0   :  { %5529 = vmatpush3.xpose.msra.mxu1 %v7523_v50 }
  0xf1   :  { %5530 = vmatprep.subr.mxu1 %v7535_v52 }
  0xf4   :  { %5531 = vmatpush3.xpose.msra.mxu1 %v7552_v54 }
  0xf5   :  { %5532 = vmatprep.subr.mxu1 %v7562_v56  ;;  %v7923_v56 = vrot.slane %v127_v18, %v7415_v31 }
  0xf8   :  { %5533 = vmatpush3.xpose.msra.mxu1 %v7581_v58  ;;  %v7926_v58 = vrot.slane %v127_v18, %v7757_v38 }
  0xf9   :  { %5534 = vmatprep.subr.mxu1 %v7591_v60 }
  0xfc   :  { %5535 = vmatpush3.xpose.msra.mxu1 %v7607_v62 }
  0xfd   :  { %5536 = vmatprep.subr.mxu1 %v7617_v0  ;;  %v7929_v0 = vrot.slane %v127_v18, %v7443_v36 }
 0x100   :  { %5537 = vmatpush3.xpose.msra.mxu1 %v7633_v3  ;;  %v7932_v3 = vrot.slane %v127_v18, %v7382_v26 }
 0x101   :  { %5538 = vmatprep.subr.mxu1 %v7643_v6 }
 0x104   :  { %5539 = vmatpush3.xpose.msra.mxu1 %v7658_v8 }
 0x105   :  { %5540 = vmatprep.subr.mxu1 %v7668_v11 }
 0x106   :  { %v7914_v50 = vpop.f32.mrf.mxu0 }
 0x107   :  { %v7912_v21 = vpop.f32.mrf.mxu1 }
 0x108   :  { %5541 = vmatpush3.xpose.msra.mxu1 %v7682_v13  ;;  %v7919_v54 = vpop.f32.mrf.mxu0 }
 0x109   :  { %v7917_v52 = vpop.f32.mrf.mxu1  ;;  %5542 = vmatprep.subr.mxu1 %v7692_v17 }
 0x10a   :  { %v423_v60 = vpop.f32.mrf.mxu0 }
 0x10b   :  { %v504_v62 = vpop.f32.mrf.mxu1  ;;  %v7935_v6 = vadd.f32 %v423_v60, %v7926_v58  ;;  %v7959_v60 = vld [vmem:[%s10178_s8] ss:$0 sm:$0xff] }
 0x10c   :  { %v7938_v8 = vadd.f32 %v504_v62, %v7923_v56  ;;  %5543 = vmatpush3.xpose.msra.mxu1 %v7706_v28  ;;  %v425_v11 = vpop.f32.mrf.mxu0 }
 0x10d   :  { %v506_v13 = vpop.f32.mrf.mxu1  ;;  %5544 = vmatprep.subr.mxu1 %v7721_v35  ;;  %v7943_v16 = vadd.f32 %v425_v11, %v7932_v3 }
 0x10e   :  { %v7946_v17 = vadd.f32 %v506_v13, %v7929_v0  ;;  %v429_v46 = vpop.f32.mrf.mxu0 }
 0x10f   :  { %v510_v4 = vpop.f32.mrf.mxu1 }
 0x110   :  { %5545 = vmatpush3.xpose.msra.mxu1 %v7737_v43  ;;  %v430_v33 = vpop.f32.mrf.mxu0 }
 0x111   :  { %v511_v18 = vpop.f32.mrf.mxu1  ;;  %5546 = vmatprep.subr.mxu1 %v7747_v49 }
 0x112   :  { %v1284_v18 = vld [vmem:[%s10183_s13 + $0xf8] sm:$0xff] }
 0x114   :  { %5547 = vmatpush3.xpose.msra.mxu1 %v7766_v30 }
 0x115   :  { %5548 = vmatprep.subr.mxu1 %v7778_v45 }
 0x116   :  { %v7952_v28 = vpop.f32.mrf.mxu0 }
 0x118   :  { %5549 = vmatpush3.xpose.msra.mxu1 %v7791_v12  ;;  %v5982_v35 = vpop.f32.mrf.mxu0 }
 0x119   :  { %5550 = vmatprep.subr.mxu1 %v7799_v23 }
 0x11a   :  { %v607_v43 = vpop.f32.mrf.mxu0 }
 0x11b   :  { %v7962_v62 = vadd.f32 %v7959_v60, %v607_v43 }
 0x11c   :  { %5551 = vmatpush3.xpose.msra.mxu1 %v7813_v5  ;;  %v5985_v30 = vpop.f32.mrf.mxu0 }
 0x11d   :  { %5552 = vmatprep.subr.mxu1 %v7821_v2  ;;  %v690_v2 = vld [vmem:[%s10184_s14] sm:$0xf] }
 0x11e   :  { %v612_v45 = vpop.f32.mrf.mxu0 }
 0x11f   :  { %v7967_v12 = vadd.f32 %v7959_v60, %v612_v45 }
 0x120   :  { %5553 = vmatpush3.xpose.msra.mxu1 %v7833_v14  ;;  %v5988_v49 = vpop.f32.mrf.mxu0 }
 0x121   :  { %10327 = vst [vmem:[#allocation29_spill] sm:$0xff] %v7967_v12  ;;  %5554 = vmatprep.subr.mxu1 %v7841_v20 }
 0x124   :  { %5555 = vmatpush3.xpose.msra.mxu1 %v7851_v41  ;;  %v7988_v41 = vrot.slane %v690_v2, %v7757_v38 }
 0x125   :  { %5556 = vmatprep.subr.mxu1 %v7859_v40 }
 0x126   :  { %10332 = vst [vmem:[#allocation34_spill] sm:$0xff] %v7988_v41 }
 0x128   :  { %5557 = vmatpush3.xpose.msra.mxu1 %v7870_v15  ;;  %v7991_v15 = vrot.slane %v690_v2, %v7382_v26 }
 0x129   :  { %5558 = vmatprep.subr.mxu1 %v7878_v10 }
 0x12a   :  { %10333 = vst [vmem:[#allocation35_spill] sm:$0xff] %v7991_v15 }
 0x12c   :  { %5559 = vmatpush3.xpose.msra.mxu1 %v7889_v19 }
 0x12d   :  { %5567 = vmatprep.subr.mxu1 %v1284_v18  ;;  %v8026_v18 = vrot.slane %v690_v2, %v7415_v31 }
 0x12f   :  { %10345 = vst [vmem:[#allocation47_spill] sm:$0xff] %v8026_v18 }
 0x147   :  { %v7976_v5 = vpop.f32.mrf.mxu1 }
 0x148   :  { %10328 = vst [vmem:[#allocation30_spill] sm:$0xff] %v7976_v5 }
 0x149   :  { %v7978_v23 = vpop.f32.mrf.mxu1 }
 0x14a   :  { %10329 = vst [vmem:[#allocation31_spill] sm:$0xff] %v7978_v23 }
 0x14b   :  { %v7983_v14 = vpop.f32.mrf.mxu1 }
 0x14c   :  { %10330 = vst [vmem:[#allocation32_spill] sm:$0xff] %v7983_v14 }
 0x14d   :  { %v7985_v20 = vpop.f32.mrf.mxu1 }
 0x14e   :  { %10331 = vst [vmem:[#allocation33_spill] sm:$0xff] %v7985_v20 }
 0x14f   :  { %v1013_v40 = vpop.f32.mrf.mxu1 }
 0x150   :  { %v7994_v10 = vadd.f32 %v1013_v40, %v7988_v41 }
 0x151   :  { %v1015_v19 = vpop.f32.mrf.mxu1 }
 0x152   :  { %10334 = vst [vmem:[#allocation36_spill] sm:$0xff] %v7994_v10  ;;  %v7997_v11 = vadd.f32 %v1015_v19, %v7991_v15 }
 0x153   :  { %v1019_v13 = vpop.f32.mrf.mxu1 }
 0x154   :  { %10335 = vst [vmem:[#allocation37_spill] sm:$0xff] %v7997_v11  ;;  %v8000_v46 = vadd.f32 %v1019_v13, %v7988_v41 }
 0x155   :  { %v1021_v4 = vpop.f32.mrf.mxu1 }
 0x156   :  { %10336 = vst [vmem:[#allocation38_spill] sm:$0xff] %v8000_v46  ;;  %v8003_v33 = vadd.f32 %v1021_v4, %v7991_v15  ;;  %v8008_v43 = vpop.f32.mrf.mxu0 }
 0x157   :  { %v1025_v35 = vpop.f32.mrf.mxu1  ;;  %10338 = vst [vmem:[#allocation40_spill] sm:$0xff] %v8008_v43 }
 0x158   :  { %10337 = vst [vmem:[#allocation39_spill] sm:$0xff] %v8003_v33  ;;  %v8011_v30 = vadd.f32 %v1025_v35, %v7988_v41  ;;  %v8013_v49 = vpop.f32.mrf.mxu0 }
 0x159   :  { %v1027_v45 = vpop.f32.mrf.mxu1  ;;  %10340 = vst [vmem:[#allocation42_spill] sm:$0xff] %v8013_v49 }
 0x15a   :  { %10339 = vst [vmem:[#allocation41_spill] sm:$0xff] %v8011_v30  ;;  %v8016_v40 = vadd.f32 %v1027_v45, %v7991_v15  ;;  %v8018_v13 = vpop.f32.mrf.mxu0  ;;  %v8032_v45 = vrot.slane %v690_v2, %v7443_v36 }
 0x15b   :  { %v1031_v19 = vpop.f32.mrf.mxu1  ;;  %10342 = vst [vmem:[#allocation44_spill] sm:$0xff] %v8018_v13 }
 0x15c   :  { %10341 = vst [vmem:[#allocation43_spill] sm:$0xff] %v8016_v40  ;;  %v8021_v4 = vadd.f32 %v1031_v19, %v7988_v41  ;;  %v8023_v46 = vpop.f32.mrf.mxu0  ;;  %10347 = vst [vmem:[#allocation49_spill] sm:$0xff] %v8032_v45 }
 0x15d   :  { %v1033_v33 = vpop.f32.mrf.mxu1  ;;  %10344 = vst [vmem:[#allocation46_spill] sm:$0xff] %v8023_v46 }
 0x15e   :  { %10343 = vst [vmem:[#allocation45_spill] sm:$0xff] %v8021_v4  ;;  %v8029_v35 = vadd.f32 %v1033_v33, %v7991_v15  ;;  %v1138_v10 = vpop.f32.mrf.mxu0 }
 0x15f   :  { %v1037_v30 = vpop.f32.mrf.mxu1  ;;  %v8038_v19 = vadd.f32 %v1138_v10, %v8026_v18 }
 0x160   :  { %10346 = vst [vmem:[#allocation48_spill] sm:$0xff] %v8029_v35  ;;  %v8035_v40 = vadd.f32 %v1037_v30, %v7988_v41  ;;  %v1140_v11 = vpop.f32.mrf.mxu0 }
 0x161   :  { %10349 = vst [vmem:[#allocation51_spill] sm:$0xff] %v8038_v19  ;;  %v1039_v4 = vpop.f32.mrf.mxu1  ;;  %v8044_v13 = vadd.f32 %v1140_v11, %v8032_v45 }
 0x162   :  { %10348 = vst [vmem:[#allocation50_spill] sm:$0xff] %v8035_v40  ;;  %v8041_v46 = vadd.f32 %v1039_v4, %v7991_v15  ;;  %v1144_v35 = vpop.f32.mrf.mxu0 }
 0x163   :  { %10351 = vst [vmem:[#allocation53_spill] sm:$0xff] %v8044_v13  ;;  %v1043_v33 = vpop.f32.mrf.mxu1  ;;  %v8050_v2 = vadd.f32 %v1144_v35, %v8026_v18 }
 0x164   :  { %10350 = vst [vmem:[#allocation52_spill] sm:$0xff] %v8041_v46  ;;  %v8047_v49 = vadd.f32 %v1043_v33, %v7988_v41  ;;  %v1146_v40 = vpop.f32.mrf.mxu0 }
 0x165   :  { %10353 = vst [vmem:[#allocation55_spill] sm:$0xff] %v8050_v2  ;;  %v1045_v30 = vpop.f32.mrf.mxu1  ;;  %v8056_v19 = vadd.f32 %v1146_v40, %v8032_v45 }
 0x166   :  { %10352 = vst [vmem:[#allocation54_spill] sm:$0xff] %v8047_v49  ;;  %v8053_v10 = vadd.f32 %v1045_v30, %v7991_v15  ;;  %v1150_v46 = vpop.f32.mrf.mxu0 }
 0x167   :  { %10355 = vst [vmem:[#allocation57_spill] sm:$0xff] %v8056_v19  ;;  %v1049_v4 = vpop.f32.mrf.mxu1  ;;  %v8062_v13 = vadd.f32 %v1150_v46, %v8026_v18  ;;  %v603_v46 = vadd.f32 %v7959_v60, %v7952_v28  ;;  %v6612_v28 = vmov 1966171168  }
 0x168   :  { %10354 = vst [vmem:[#allocation56_spill] sm:$0xff] %v8053_v10  ;;  %v8059_v11 = vadd.f32 %v1049_v4, %v7988_v41  ;;  %v1152_v49 = vpop.f32.mrf.mxu0  ;;  %v1414_v60 = vunpack.c.l.s4 %v6612_v28 }
 0x169   :  { %10357 = vst [vmem:[#allocation59_spill] sm:$0xff] %v8062_v13  ;;  %v1051_v33 = vpop.f32.mrf.mxu1  ;;  %v8068_v2 = vadd.f32 %v1152_v49, %v8032_v45 }
 0x16a   :  { %10356 = vst [vmem:[#allocation58_spill] sm:$0xff] %v8059_v11  ;;  %v8065_v35 = vadd.f32 %v1051_v33, %v7991_v15  ;;  %v1156_v10 = vpop.f32.mrf.mxu0 }
 0x16b   :  { %10359 = vst [vmem:[#allocation61_spill] sm:$0xff] %v8068_v2  ;;  %v1055_v30 = vpop.f32.mrf.mxu1  ;;  %v8074_v19 = vadd.f32 %v1156_v10, %v8026_v18 }
 0x16c   :  { %10358 = vst [vmem:[#allocation60_spill] sm:$0xff] %v8065_v35  ;;  %v8071_v40 = vadd.f32 %v1055_v30, %v7988_v41  ;;  %v1158_v11 = vpop.f32.mrf.mxu0 }
 0x16d   :  { %10361 = vst [vmem:[#allocation63_spill] sm:$0xff] %v8074_v19  ;;  %v1057_v4 = vpop.f32.mrf.mxu1  ;;  %v8082_v33 = vadd.f32 %v1158_v11, %v8032_v45 }
 0x16e   :  { %10360 = vst [vmem:[#allocation62_spill] sm:$0xff] %v8071_v40  ;;  %v8079_v13 = vadd.f32 %v1057_v4, %v7991_v15  ;;  %v1162_v35 = vpop.f32.mrf.mxu0 }
 0x16f   :  { %10363 = vst [vmem:[#allocation65_spill] sm:$0xff] %v8082_v33  ;;  %v1396_v49 = vpop.f32.mrf.mxu1  ;;  %v8085_v30 = vadd.f32 %v1162_v35, %v8026_v18 }
 0x170   :  { %10362 = vst [vmem:[#allocation64_spill] sm:$0xff] %v8079_v13  ;;  %v1400_v2 = vadd.f32 %v1396_v49, %v603_v46  ;;  %v1164_v10 = vpop.f32.mrf.mxu0  ;;  %v1415_v49 = vunpack.c.0.s8 %v1414_v60 }
 0x171   :  { %10364 = vst [vmem:[#allocation66_spill] sm:$0xff] %v8085_v30  ;;  %v5999_v40 = vpop.f32.mrf.mxu1  ;;  %v8088_v19 = vadd.f32 %v1164_v10, %v8032_v45 }
 0x172   :  { %6141 = vtanh.f32 %v1400_v2  ;;  %v1168_v43 = vpop.f32.mrf.mxu0 }
 0x173   :  { %10365 = vst [vmem:[#allocation67_spill] sm:$0xff] %v8088_v19  ;;  %v8091_v4 = vadd.f32 %v1168_v43, %v8026_v18  ;;  %v8103_v19 = vsub.s32 %v1415_v49, %v7372_v25  ;;  %v1402_v49 = vld [vmem:[%s10372_s6] sm:$0x7] }
 0x174   :  { %v1170_v11 = vpop.f32.mrf.mxu0 }
 0x175   :  { %10366 = vst [vmem:[#allocation68_spill] sm:$0xff] %v8091_v4  ;;  %v8094_v13 = vadd.f32 %v1170_v11, %v8032_v45 }
 0x176   :  { %v1174_v46 = vpop.f32.mrf.mxu0 }
 0x177   :  { %10367 = vst [vmem:[#allocation69_spill] sm:$0xff] %v8094_v13  ;;  %v8097_v35 = vadd.f32 %v1174_v46, %v8026_v18 }
 0x178   :  { %v1176_v40 = vpop.f32.mrf.mxu0 }
 0x179   :  { %10368 = vst [vmem:[#allocation70_spill] sm:$0xff] %v8097_v35  ;;  %v8100_v2 = vadd.f32 %v1176_v40, %v8032_v45 }
 0x17a   :  { %v1180_v10 = vpop.f32.mrf.mxu0 }
 0x17b   :  { %10369 = vst [vmem:[#allocation71_spill] sm:$0xff] %v8100_v2  ;;  %v8106_v43 = vadd.f32 %v1180_v10, %v8026_v18 }
 0x17c   :  { %v1182_v28 = vpop.f32.mrf.mxu0 }
 0x17d   :  { %10370 = vst [vmem:[#allocation72_spill] sm:$0xff] %v8106_v43  ;;  %v8109_v11 = vadd.f32 %v1182_v28, %v8032_v45 }
 0x17f   :  { %10371 = vst [vmem:[#allocation73_spill] sm:$0xff] %v8109_v11  ;;  %v6142_v13 = vpop.eup %6141 }
 0x180   :  { %v1419_v60 = vrot.slane %v6142_v13, %v8103_v19  ;;  %v1412_v46 = vcombine.high %v6142_v13, %v6142_v13  ;;  %v1404_v13 = vld [vmem:[%s10372_s6 + $0x8] sm:$0x7] }
 0x182   :  { %v1435_v35 = vrot.slane %v1419_v60, %v8103_v19  ;;  %v1427_v4 = vcombine.high %v1419_v60, %v1419_v60  ;;  %v1426_v40 = vrot.slane %v1412_v46, %v8103_v19  ;;  %v1403_v60 = vld [vmem:[%s10372_s6 + $0x4] sm:$0x7] }
 0x184   :  { %v1464_v10 = vrot.slane %v1435_v35, %v7757_v38  ;;  %v1457_v43 = vcombine.high %v1435_v35, %v1435_v35  ;;  %v1449_v2 = vrot.slane %v1427_v4, %v8103_v19  ;;  %v1442_v28 = vrot.slane %v1426_v40, %v8103_v19  ;;  %v1405_v4 = vld [vmem:[%s10372_s6 + $0xc] sm:$0x7] }
 0x185   :  { %v1428_v46 = vcombine.high %v1426_v40, %v1426_v40 }
 0x186   :  { %v1501_v11 = vmul.f32 %v1464_v10, %v1402_v49  ;;  %v1472_v30 = vrot.slane %v1457_v43, %v7757_v38  ;;  %v1468_v33 = vrot.slane %v1449_v2, %v7757_v38  ;;  %v1459_v35 = vcombine.high %v1449_v2, %v1449_v2  ;;  %v1406_v2 = vld [vmem:[%s10372_s6 + $0x10] sm:$0x7] }
 0x187   :  { %v1480_v45 = vrot.slane %v1442_v28, %v7757_v38  ;;  %v1456_v18 = vrot.slane %v1428_v46, %v8103_v19  ;;  %v1458_v20 = vcombine.high %v1442_v28, %v1442_v28  ;;  %v1408_v28 = vld [vmem:[%s10372_s6 + $0x18] sm:$0x7] }
 0x188   :  { %v1510_v14 = vsel %vm1509_vm3, %v1501_v11, 0.0  ;;  %v1503_v5 = vmul.f32 %v1472_v30, %v1404_v13  ;;  %v1502_v41 = vmul.f32 %v1468_v33, %v1403_v60  ;;  %v1476_v40 = vrot.slane %v1459_v35, %v7757_v38  ;;  %v1407_v11 = vld [vmem:[%s10372_s6 + $0x14] sm:$0x7]  ;;  %v1409_v60 = vld [vmem:[%s10372_s6 + $0x1c] sm:$0x7] }
 0x189   :  { %1511 = vadd.xlane.f32.xlu0 %v1510_v14  ;;  %v1484_v10 = vrot.slane %v1456_v18, %v7757_v38  ;;  %v1460_v23 = vcombine.high %v1456_v18, %v1456_v18  ;;  %v1505_v30 = vmul.f32 %v1480_v45, %v1406_v2  ;;  %v1488_v14 = vrot.slane %v1458_v20, %v7757_v38 }
 0x18a   :  { %v1516_v43 = vsel %vm1509_vm3, %v1503_v5, 0.0  ;;  %v1504_v49 = vmul.f32 %v1476_v40, %v1405_v4  ;;  %v1513_v33 = vsel %vm1509_vm3, %v1502_v41, 0.0  ;;  %v418_v4 = vadd.f32 %v7914_v50, %v7926_v58 }
 0x18b   :  { %1517 = vadd.xlane.f32.xlu1 %v1516_v43  ;;  %v1506_v13 = vmul.f32 %v1484_v10, %v1407_v11  ;;  %v1492_v18 = vrot.slane %v1460_v23, %v7757_v38  ;;  %v1522_v41 = vsel %vm1509_vm3, %v1505_v30, 0.0  ;;  %v1507_v45 = vmul.f32 %v1488_v14, %v1408_v28 }
 0x18c   :  { %v1519_v5 = vsel %vm1509_vm3, %v1504_v49, 0.0  ;;  %v420_v2 = vadd.f32 %v7919_v54, %v7932_v3  ;;  %v499_v50 = vadd.f32 %v7912_v21, %v7923_v56 }
 0x18d   :  { %1514 = vadd.xlane.f32.xlu0 %v1513_v33  ;;  %v1525_v20 = vsel %vm1509_vm3, %v1506_v13, 0.0  ;;  %v1508_v46 = vmul.f32 %v1492_v18, %v1409_v60  ;;  %v1528_v35 = vsel %vm1509_vm3, %v1507_v45, 0.0  ;;  %v501_v13 = vadd.f32 %v7917_v52, %v7929_v0  ;;  %v8168_v52 = vpop.permute.xlu1 %1555 }
 0x18f   :  { %1520 = vadd.xlane.f32.xlu1 %v1519_v5  ;;  %v1531_v23 = vsel %vm1509_vm3, %v1508_v46, 0.0 }
 0x191   :  { %1523 = vadd.xlane.f32.xlu0 %v1522_v41  ;;  %v8170_v0 = vpop.permute.xlu1 %1562 }
 0x193   :  { %1526 = vadd.xlane.f32.xlu1 %v1525_v20 }
 0x195   :  { %1529 = vadd.xlane.f32.xlu0 %v1528_v35 }
 0x196   :  { %v1896_v40 = vpop.f32.mrf.mxu0 }
 0x197   :  { %1532 = vadd.xlane.f32.xlu1 %v1531_v23  ;;  %v1972_v43 = vadd.f32 %v1896_v40, %v418_v4  ;;  %v8172_v40 = vpop.permute.xlu1 %1569 }
 0x198   :  { %v1898_v49 = vpop.f32.mrf.mxu0 }
 0x199   :  { %v5146_v10 = vmul.f32 -1.442695, %v1972_v43  ;;  %v1973_v11 = vadd.f32 %v1898_v49, %v420_v2  ;;  %v8181_v49 = vld [vmem:[%s10183_s13 + $0x78] sm:$0xff] }
 0x19b   :  { %v5147_v33 = vmul.f32 -1.442695, %v1973_v11  ;;  %6143 = vpow2.f32 %v5146_v10  ;;  %v8188_v10 = vld [vmem:[%s10183_s13 + $0xf0] sm:$0xff]  ;;  %v8192_v11 = vpop.permute.xlu1 %1583 }
 0x19d   :  { %6145 = vpow2.f32 %v5147_v33  ;;  %v8206_v33 = vld [vmem:[%s10183_s13 + $0xe8] sm:$0xff] }
 0x1a8   :  { %v6144_v30 = vpop.eup %6143 }
 0x1a9   :  { %v1979_v5 = vadd.f32 1.0, %v6144_v30  ;;  %v8216_v30 = vpop.permute.xlu1 %1597 }
 0x1aa   :  { %v6146_v14 = vpop.eup %6145 }
 0x1ab   :  { %v1985_v28 = vadd.f32 1.0, %v6146_v14 }
 0x1ad   :  { %6147 = vrcp.f32 %v1985_v28  ;;  %v8239_v14 = vpop.permute.xlu1 %2228  ;;  %v1263_v28 = vld [vmem:[%s10183_s13 + $0x50] sm:$0xff] }
 0x1ae   :  { %6149 = vrcp.f32 %v1979_v5 }
 0x1af   :  { %v1967_v58 = vpop.f32.mrf.mxu1 }
 0x1b0   :  { %v1974_v54 = vadd.f32 %v1967_v58, %v499_v50 }
 0x1b1   :  { %v1969_v3 = vpop.f32.mrf.mxu1  ;;  %v8262_v5 = vpop.permute.xlu1 %2235 }
 0x1b2   :  { %6151 = vtanh.f32 %v1974_v54  ;;  %v1975_v18 = vadd.f32 %v1969_v3, %v501_v13 }
 0x1b4   :  { %v5148_v60 = vmul.f32 -1.442695, %v1975_v18 }
 0x1b5   :  { %v8279_v58 = vpop.permute.xlu1 %2242 }
 0x1b6   :  { %6153 = vpow2.f32 %v5148_v60  ;;  %v10374_v60 = vld [vmem:[#allocation15_spill] sm:$0xff] }
 0x1b9   :  { %v8294_v54 = vpop.permute.xlu1 %2256 }
 0x1ba   :  { %v6148_v41 = vpop.eup %6147 }
 0x1bb   :  { %v6150_v45 = vpop.eup %6149  ;;  %v1995_v46 = vmul.f32 0.0, %v6148_v41  ;;  %v10376_v41 = vld [vmem:[#allocation16_spill] sm:$0xff] }
 0x1bd   :  { %v8311_v18 = vpop.permute.xlu1 %2270 }
 0x1be   :  { %10373 = vst [vmem:[#allocation74_spill] sm:$0xff] %v8311_v18 }
 0x1bf   :  { %v6152_v20 = vpop.eup %6151 }
 0x1c0   :  { %v1996_v35 = vmul.f32 %v6152_v20, %v6150_v45 }
 0x1c1   :  { %v8331_v20 = vpop.permute.xlu1 %3407 }
 0x1c2   :  { %v8165_v4 = vadd.f32 %v1996_v35, %v1995_v46  ;;  %10378 = vst [vmem:[#allocation75_spill] sm:$0xff] %v8331_v20  ;;  %v10379_v46 = vld [vmem:[#allocation17_spill] sm:$0xff] }
 0x1c3   :  { %v6154_v21 = vpop.eup %6153  ;;  %v8337_v35 = vld [vmem:[%s10183_s13 + $0x98] sm:$0xff] }
 0x1c4   :  { %v1992_v56 = vadd.f32 1.0, %v6154_v21  ;;  %6155 = vtanh.f32 %v8165_v4  ;;  %10380 = vst [vmem:[#allocation17_spill] sm:$0xff] %v8337_v35  ;;  %v10381_v21 = vld [vmem:[#allocation18_spill] sm:$0xff] }
 0x1c6   :  { %6157 = vrcp.f32 %v1992_v56  ;;  %v8345_v56 = vld [vmem:[%s10183_s13 + $0x18] sm:$0xff] }
 0x1c7   :  { %10382 = vst [vmem:[#allocation18_spill] sm:$0xff] %v8345_v56 }
 0x1d1   :  { %v6156_v23 = vpop.eup %6155 }
 0x1d3   :  { %v6158_v2 = vpop.eup %6157 }
 0x1d4   :  { %v8174_v43 = vmul.f32 %v6158_v2, %v6156_v23  ;;  %v10384_v2 = vld [vmem:[#allocation19_spill] sm:$0xff] }
 0x1d6   :  { %6009 = vmatmul.mubr.f32.vlgmr.msra.gmra.mxu0 %v8174_v43  ;;  %5560 = vmatprep.mubr.f32.mxu1 %v8174_v43 }
 0x1d7   :  { %5495 = vmatpush3.xpose.msra.mxu0 %v7357_v22  ;;  %5526 = vmatprep.mubr.f32.mxu0 %v8174_v43  ;;  %v8200_v22 = vld [vmem:[%s10183_s13 + $0x70] sm:$0xff] }
 0x1d8   :  { %5561 = vmatmul.mubr.f32.vlgmr.msra.gmra.mxu1 %v8174_v43  ;;  %5496 = vmatprep.subr.mxu0 %v7368_v24  ;;  %v8214_v24 = vld [vmem:[%s10183_s13 + $0x68] sm:$0xff] }
 0x1d9   :  { %5568 = vmatpush3.xpose.msra.mxu1 %v8181_v49  ;;  %5599 = vmatprep.mubr.f32.mxu1 %v8174_v43 }
 0x1da   :  { %5569 = vmatprep.subr.mxu1 %v8188_v10 }
 0x1db   :  { %5497 = vmatpush3.xpose.msra.mxu0 %v7388_v27  ;;  %v8222_v27 = vld [vmem:[%s10183_s13 + $0xe0] sm:$0xff] }
 0x1dc   :  { %5498 = vmatprep.subr.mxu0 %v7404_v29  ;;  %v8230_v29 = vld [vmem:[%s10183_s13 + $0x60] sm:$0xff] }
 0x1dd   :  { %5570 = vmatpush3.xpose.msra.mxu1 %v8200_v22 }
 0x1de   :  { %5571 = vmatprep.subr.mxu1 %v8206_v33 }
 0x1df   :  { %5499 = vmatpush3.xpose.msra.mxu0 %v7421_v32  ;;  %v8236_v32 = vld [vmem:[%s10183_s13 + $0xd8] sm:$0xff] }
 0x1e0   :  { %5500 = vmatprep.subr.mxu0 %v7432_v34  ;;  %v8246_v34 = vld [vmem:[%s10183_s13 + $0x58] sm:$0xff] }
 0x1e1   :  { %5572 = vmatpush3.xpose.msra.mxu1 %v8214_v24 }
 0x1e2   :  { %5573 = vmatprep.subr.mxu1 %v8222_v27 }
 0x1e3   :  { %5501 = vmatpush3.xpose.msra.mxu0 %v7449_v37  ;;  %v8252_v37 = vld [vmem:[%s10183_s13 + $0xd0] sm:$0xff] }
 0x1e4   :  { %5502 = vmatprep.subr.mxu0 %v7459_v39  ;;  %v8255_v39 = vpop.permute.xlu0 %1548 }
 0x1e5   :  { %5574 = vmatpush3.xpose.msra.mxu1 %v8230_v29 }
 0x1e6   :  { %5575 = vmatprep.subr.mxu1 %v8236_v32 }
 0x1e7   :  { %5503 = vmatpush3.xpose.msra.mxu0 %v7476_v42  ;;  %v1278_v42 = vld [vmem:[%s10183_s13 + $0xc8] sm:$0xff] }
 0x1e8   :  { %5504 = vmatprep.subr.mxu0 %v7486_v44  ;;  %v1262_v44 = vld [vmem:[%s10183_s13 + $0x48] sm:$0xff]  ;;  %v8272_v50 = vpop.permute.xlu0 %1576 }
 0x1e9   :  { %5576 = vmatpush3.xpose.msra.mxu1 %v8246_v34 }
 0x1ea   :  { %5577 = vmatprep.subr.mxu1 %v8252_v37 }
 0x1eb   :  { %5505 = vmatpush3.xpose.msra.mxu0 %v7502_v47  ;;  %v1277_v47 = vld [vmem:[%s10183_s13 + $0xc0] sm:$0xff] }
 0x1ec   :  { %5506 = vmatprep.subr.mxu0 %v7509_v48  ;;  %v1261_v48 = vld [vmem:[%s10183_s13 + $0x40] sm:$0xff]  ;;  %v8289_v13 = vpop.permute.xlu0 %1590 }
 0x1ed   :  { %5578 = vmatpush3.xpose.msra.mxu1 %v1263_v28  ;;  %v8353_v28 = vld [vmem:[%s10183_s13 + $0x90] sm:$0xff] }
 0x1ee   :  { %5579 = vmatprep.subr.mxu1 %v1278_v42  ;;  %10385 = vst [vmem:[#allocation19_spill] sm:$0xff] %v8353_v28  ;;  %v10386_v42 = vld [vmem:[#allocation20_spill] sm:$0xff] }
 0x1ef   :  { %5507 = vmatpush3.xpose.msra.mxu0 %v7528_v51  ;;  %v1276_v51 = vld [vmem:[%s10183_s13 + $0xb8] sm:$0xff] }
 0x1f0   :  { %5508 = vmatprep.subr.mxu0 %v7540_v53  ;;  %v1260_v53 = vld [vmem:[%s10183_s13 + $0x38] sm:$0xff]  ;;  %v8304_v3 = vpop.permute.xlu0 %2221 }
 0x1f1   :  { %5580 = vmatpush3.xpose.msra.mxu1 %v1262_v44  ;;  %v8356_v44 = vpop.permute.xlu1 %3777 }
 0x1f2   :  { %5581 = vmatprep.subr.mxu1 %v1277_v47  ;;  %10387 = vst [vmem:[#allocation20_spill] sm:$0xff] %v8356_v44  ;;  %v8363_v47 = vld [vmem:[%s10183_s13 + $0x10] sm:$0xff] }
 0x1f3   :  { %5509 = vmatpush3.xpose.msra.mxu0 %v7557_v55  ;;  %v1275_v55 = vld [vmem:[%s10183_s13 + $0xb0] sm:$0xff]  ;;  %10388 = vst [vmem:[#allocation77_spill] sm:$0xff] %v8363_v47 }
 0x1f4   :  { %5510 = vmatprep.subr.mxu0 %v7567_v57  ;;  %v1259_v57 = vld [vmem:[%s10183_s13 + $0x30] sm:$0xff]  ;;  %v8323_v45 = vpop.permute.xlu0 %2249 }
 0x1f5   :  { %5582 = vmatpush3.xpose.msra.mxu1 %v1261_v48  ;;  %v10389_v48 = vld [vmem:[#allocation21_spill] sm:$0xff] }
 0x1f6   :  { %5583 = vmatprep.subr.mxu1 %v1276_v51  ;;  %v8369_v51 = vld [vmem:[%s10183_s13 + $0x88] sm:$0xff] }
 0x1f7   :  { %5511 = vmatpush3.xpose.msra.mxu0 %v7586_v59  ;;  %v1274_v59 = vld [vmem:[%s10183_s13 + $0xa8] sm:$0xff]  ;;  %10390 = vst [vmem:[#allocation21_spill] sm:$0xff] %v8369_v51 }
 0x1f8   :  { %5512 = vmatprep.subr.mxu0 %v7596_v61  ;;  %v1258_v61 = vld [vmem:[%s10183_s13 + $0x28] sm:$0xff]  ;;  %v8347_v23 = vpop.permute.xlu0 %2263 }
 0x1f9   :  { %5584 = vmatpush3.xpose.msra.mxu1 %v1260_v53  ;;  %10383 = vst [vmem:[#allocation76_spill] sm:$0xff] %v8347_v23  ;;  %v10391_v53 = vld [vmem:[#allocation22_spill] sm:$0xff] }
 0x1fa   :  { %5585 = vmatprep.subr.mxu1 %v1275_v55 }
 0x1fb   :  { %5513 = vmatpush3.xpose.msra.mxu0 %v7612_v63  ;;  %v8320_v63 = vld [vmem:[%s10183_s13 + $0xa0] sm:$0xff] }
 0x1fc   :  { %5514 = vmatprep.subr.mxu0 %v7622_v1  ;;  %10375 = vst [vmem:[#allocation15_spill] sm:$0xff] %v8320_v63  ;;  %v8329_v1 = vld [vmem:[%s10183_s13 + $0x20] sm:$0xff]  ;;  %v8372_v55 = vpop.permute.xlu0 %3404 }
 0x1fd   :  { %5586 = vmatpush3.xpose.msra.mxu1 %v1259_v57  ;;  %10377 = vst [vmem:[#allocation16_spill] sm:$0xff] %v8329_v1  ;;  %10392 = vst [vmem:[#allocation22_spill] sm:$0xff] %v8372_v55  ;;  %v8379_v57 = vld [vmem:[%s10183_s13 + $0x8] sm:$0xff] }
 0x1fe   :  { %5587 = vmatprep.subr.mxu1 %v1274_v59  ;;  %10393 = vst [vmem:[#allocation78_spill] sm:$0xff] %v8379_v57  ;;  %v8381_v59 = vpop.permute.xlu1 %3780 }
 0x1ff   :  { %5515 = vmatpush3.xpose.msra.mxu0 %v10374_v60  ;;  %10394 = vst [vmem:[#allocation79_spill] sm:$0xff] %v8381_v59  ;;  %v8387_v60 = vld [vmem:[%s10183_s13 + $0x80] sm:$0xff] }
 0x200   :  { %5516 = vmatprep.subr.mxu0 %v10376_v41  ;;  %v10397_v41 = vld [vmem:[#allocation24_spill] sm:$0xff] }
 0x201   :  { %5588 = vmatpush3.xpose.msra.mxu1 %v1258_v61  ;;  %v10395_v61 = vld [vmem:[#allocation23_spill] sm:$0xff] }
 0x202   :  { %5589 = vmatprep.subr.mxu1 %v8320_v63  ;;  %10396 = vst [vmem:[#allocation23_spill] sm:$0xff] %v8387_v60 }
 0x203   :  { %5517 = vmatpush3.xpose.msra.mxu0 %v10379_v46 }
 0x204   :  { %5518 = vmatprep.subr.mxu0 %v10381_v21  ;;  %v8397_v21 = vld [vmem:[%s10183_s13] sm:$0xff] }
 0x205   :  { %5590 = vmatpush3.xpose.msra.mxu1 %v8329_v1  ;;  %10398 = vst [vmem:[#allocation24_spill] sm:$0xff] %v8397_v21 }
 0x206   :  { %5591 = vmatprep.subr.mxu1 %v8337_v35 }
 0x207   :  { %5519 = vmatpush3.xpose.msra.mxu0 %v10384_v2  ;;  %v10399_v2 = vld [vmem:[#allocation26_spill] sm:$0xff] }
 0x208   :  { %5520 = vmatprep.subr.mxu0 %v10386_v42 }
 0x209   :  { %5592 = vmatpush3.xpose.msra.mxu1 %v8345_v56 }
 0x20a   :  { %5593 = vmatprep.subr.mxu1 %v8353_v28 }
 0x20b   :  { %5521 = vmatpush3.xpose.msra.mxu0 %v10389_v48 }
 0x20c   :  { %5522 = vmatprep.subr.mxu0 %v10391_v53 }
 0x20d   :  { %5594 = vmatpush3.xpose.msra.mxu1 %v8363_v47 }
 0x20e   :  { %5595 = vmatprep.subr.mxu1 %v8369_v51  ;;  %v6479_v51 = vld [vmem:[%s10177_s7 + $0x8] sm:$0xff] }
 0x20f   :  { %5523 = vmatpush3.xpose.msra.mxu0 %v10395_v61 }
 0x210   :  { %5524 = vmatprep.subr.mxu0 %v10397_v41 }
 0x211   :  { %5596 = vmatpush3.xpose.msra.mxu1 %v8379_v57 }
 0x212   :  { %5597 = vmatprep.subr.mxu1 %v8387_v60  ;;  %v8392_v46 = vpop.xlane.xlu0 %1511 }
 0x213   :  { %5525 = vmatpush3.xpose.msra.mxu0 %v10399_v2  ;;  %v1623_v42 = vand.u32 2147483647, %v8392_v46  ;;  %v6477_v2 = vld [vmem:[%s10177_s7 + $0x18] sm:$0xff] }
 0x214   :  { %v8401_v48 = vpop.xlane.xlu1 %1517  ;;  %6011 = vmatprep.subr.mxu0 %v10325_v9 }
 0x215   :  { %v1631_v53 = vsub.f32 0.0, %v1623_v42  ;;  %5598 = vmatpush3.xpose.msra.mxu1 %v8397_v21  ;;  %v1625_v61 = vand.u32 2147483647, %v8401_v48 }
 0x216   :  { %5527 = vmatmul.mubr.f32.vlgmr.msra.gmra.mxu0 %v8174_v43  ;;  %v8407_v41 = vpop.xlane.xlu0 %1514 }
 0x217   :  { %v1639_v18 = vmul.f32 1.442695, %v1631_v53  ;;  %6012 = vmatpush3.xpose.msra.mxu0 %v6477_v2  ;;  %6019 = vmatprep.mubr.msk.f32.mxu0 %vm6610_vm2, %v10325_v9  ;;  %v1633_v23 = vsub.f32 0.0, %v1625_v61  ;;  %v1624_v42 = vand.u32 2147483647, %v8407_v41  ;;  %v6478_v61 = vld [vmem:[%s10177_s7 + $0x10] sm:$0xff] }
 0x218   :  { %5600 = vmatmul.mubr.f32.vlgmr.msra.gmra.mxu1 %v8174_v43  ;;  %v8416_v59 = vpop.xlane.xlu1 %1520  ;;  %6013 = vmatprep.subr.mxu0 %v10325_v9 }
 0x219   :  { %6159 = vpow2.f32 %v1639_v18  ;;  %v1643_v44 = vmul.f32 1.442695, %v1633_v23  ;;  %v1632_v53 = vsub.f32 0.0, %v1624_v42  ;;  %v1626_v55 = vand.u32 2147483647, %v8416_v59 }
 0x21a   :  { %v8420_v20 = vpop.xlane.xlu0 %1523 }
 0x21b   :  { %v1627_v2 = vand.u32 2147483647, %v8420_v20  ;;  %6014 = vmatpush3.xpose.msra.mxu0 %v6478_v61  ;;  %6161 = vpow2.f32 %v1643_v44  ;;  %v1641_v15 = vmul.f32 1.442695, %v1632_v53  ;;  %v1634_v12 = vsub.f32 0.0, %v1626_v55  ;;  %v6480_v61 = vld [vmem:[%s10177_s7] sm:$0xff] }
 0x21c   :  { %v8426_v21 = vpop.xlane.xlu1 %1526  ;;  %6015 = vmatprep.subr.mxu0 %v10325_v9 }
 0x21d   :  { %v1635_v18 = vsub.f32 0.0, %v1627_v2  ;;  %6163 = vpow2.f32 %v1641_v15  ;;  %v1645_v23 = vmul.f32 1.442695, %v1634_v12  ;;  %v1628_v42 = vand.u32 2147483647, %v8426_v21 }
 0x21e   :  { %v8430_v60 = vpop.xlane.xlu0 %1529 }
 0x21f   :  { %v1647_v57 = vmul.f32 1.442695, %v1635_v18  ;;  %6016 = vmatpush3.xpose.msra.mxu0 %v6479_v51  ;;  %6165 = vpow2.f32 %v1645_v23  ;;  %v1636_v44 = vsub.f32 0.0, %v1628_v42  ;;  %v1629_v55 = vand.u32 2147483647, %v8430_v60 }
 0x220   :  { %v8436_v53 = vpop.xlane.xlu1 %1532  ;;  %6017 = vmatprep.subr.mxu0 %v10325_v9 }
 0x221   :  { %6167 = vpow2.f32 %v1647_v57  ;;  %v1649_v12 = vmul.f32 1.442695, %v1636_v44  ;;  %v1637_v15 = vsub.f32 0.0, %v1629_v55  ;;  %v1630_v2 = vand.u32 2147483647, %v8436_v53 }
 0x223   :  { %6018 = vmatpush3.xpose.msra.mxu0 %v6480_v61  ;;  %6169 = vpow2.f32 %v1649_v12  ;;  %v1651_v51 = vmul.f32 1.442695, %v1637_v15  ;;  %v1638_v18 = vsub.f32 0.0, %v1630_v2  ;;  %v1534_v61 = vmax.f32 %v8392_v46, 0.0 }
 0x225   :  { %6171 = vpow2.f32 %v1651_v51  ;;  %v1653_v42 = vmul.f32 1.442695, %v1638_v18  ;;  %v8448_v51 = vsel %vm1327_vm4, 1.0, %v10325_v9 }
 0x226   :  { %v6160_v23 = vpop.eup %6159 }
 0x227   :  { %v1655_v47 = vadd.f32 1.0, %v6160_v23  ;;  %6173 = vpow2.f32 %v1653_v42  ;;  %v8452_v23 = vrot.slane %v8448_v51, %v7757_v38  ;;  %v1535_v42 = vmax.f32 %v8407_v41, 0.0 }
 0x228   :  { %v6162_v28 = vpop.eup %6161 }
 0x229   :  { %6175 = vlog2.f32 %v1655_v47  ;;  %v1657_v57 = vadd.f32 1.0, %v6162_v28  ;;  %v1607_v28 = vmul.f32 %v8255_v39, %v8392_v46  ;;  %10400 = vst [vmem:[#allocation26_spill] sm:$0xff] %v8452_v23  ;;  %v1608_v39 = vmul.f32 %v8168_v52, %v8407_v41 }
 0x22a   :  { %v6164_v44 = vpop.eup %6163 }
 0x22b   :  { %6177 = vlog2.f32 %v1657_v57  ;;  %v1656_v55 = vadd.f32 1.0, %v6164_v44  ;;  %v1536_v44 = vmax.f32 %v8401_v48, 0.0  ;;  %v1616_v52 = vsub.f32 %v1535_v42, %v1608_v39 }
 0x22c   :  { %v6166_v56 = vpop.eup %6165 }
 0x22d   :  { %6179 = vlog2.f32 %v1656_v55  ;;  %v1658_v1 = vadd.f32 1.0, %v6166_v56  ;;  %v1609_v55 = vmul.f32 %v8170_v0, %v8401_v48  ;;  %v1538_v48 = vmax.f32 %v8420_v20, 0.0 }
 0x22e   :  { %v6168_v35 = vpop.eup %6167 }
 0x22f   :  { %v1659_v63 = vadd.f32 1.0, %v6168_v35  ;;  %6181 = vlog2.f32 %v1658_v1  ;;  %v1615_v35 = vsub.f32 %v1534_v61, %v1607_v28  ;;  %v8466_v28 = vrot.slane %v8448_v51, %v7382_v26 }
 0x230   :  { %v6170_v12 = vpop.eup %6169 }
 0x231   :  { %6183 = vlog2.f32 %v1659_v63  ;;  %v1660_v15 = vadd.f32 1.0, %v6170_v12  ;;  %v1537_v12 = vmax.f32 %v8416_v59, 0.0  ;;  %10401 = vst [vmem:[#allocation80_spill] sm:$0xff] %v8466_v28 }
 0x232   :  { %v6172_v2 = vpop.eup %6171 }
 0x233   :  { %6185 = vlog2.f32 %v1660_v15  ;;  %v1661_v47 = vadd.f32 1.0, %v6172_v2  ;;  %v1610_v15 = vmul.f32 %v8172_v40, %v8416_v59  ;;  %v1611_v40 = vmul.f32 %v8272_v50, %v8420_v20 }
 0x234   :  { %v6174_v18 = vpop.eup %6173  ;;  %v1539_v59 = vmax.f32 %v8426_v21, 0.0 }
 0x235   :  { %6187 = vlog2.f32 %v1661_v47  ;;  %v1662_v1 = vadd.f32 1.0, %v6174_v18  ;;  %v8470_v47 = vrot.slane %v8448_v51, %v7443_v36 }
 0x236   :  { %v6176_v56 = vpop.eup %6175 }
 0x237   :  { %v1664_v63 = vmul.f32 0.6931472, %v6176_v56  ;;  %6189 = vlog2.f32 %v1662_v1  ;;  %10402 = vst [vmem:[#allocation81_spill] sm:$0xff] %v8470_v47  ;;  %v1612_v56 = vmul.f32 %v8192_v11, %v8426_v21  ;;  %v1619_v21 = vsub.f32 %v1538_v48, %v1611_v40 }
 0x238   :  { %v6178_v46 = vpop.eup %6177 }
 0x239   :  { %v1679_v57 = vadd.f32 %v1664_v63, %v1615_v35  ;;  %v1668_v18 = vmul.f32 0.6931472, %v6178_v46  ;;  %v1617_v35 = vsub.f32 %v1536_v44, %v1609_v55  ;;  %v1618_v63 = vsub.f32 %v1537_v12, %v1610_v15 }
 0x23a   :  { %v6180_v2 = vpop.eup %6179  ;;  %v8480_v46 = vrot.slane %v8448_v51, %v7415_v31  ;;  %v1540_v44 = vmax.f32 %v8430_v60, 0.0  ;;  %v1613_v55 = vmul.f32 %v8289_v13, %v8430_v60  ;;  %v1541_v12 = vmax.f32 %v8436_v53, 0.0 }
 0x23b   :  { %v1728_v61 = vmul.f32 %v8452_v23, %v1679_v57  ;;  %v1666_v41 = vmul.f32 0.6931472, %v6180_v2  ;;  %v10404_v57 = vld [vmem:[#allocation13_spill] sm:$0xff]  ;;  %v1681_v9 = vadd.f32 %v1668_v18, %v1617_v35  ;;  %v1614_v15 = vmul.f32 %v8216_v30, %v8436_v53  ;;  %v10406_v18 = vld [vmem:[#allocation27_spill] sm:$0xff] }
 0x23c   :  { %v6182_v0 = vpop.eup %6181  ;;  %10403 = vst [vmem:[#allocation82_spill] sm:$0xff] %v8480_v46  ;;  %v8484_v2 = vrot.slane %v8448_v51, %v10404_v57  ;;  %v1621_v30 = vsub.f32 %v1540_v44, %v1613_v55 }
 0x23d   :  { %1745 = vperm.xlu0 %6139, %v1728_v61   ;;  %v1680_v42 = vadd.f32 %v1666_v41, %v1616_v52  ;;  %v1670_v39 = vmul.f32 0.6931472, %v6182_v0  ;;  %v1620_v61 = vsub.f32 %v1539_v59, %v1612_v56  ;;  %v1730_v48 = vmul.f32 %v8480_v46, %v1681_v9  ;;  %v10408_v56 = vld [vmem:[#allocation14_spill] sm:$0xff] }
 0x23e   :  { %v6184_v1 = vpop.eup %6183  ;;  %10405 = vst [vmem:[#allocation83_spill] sm:$0xff] %v8484_v2  ;;  %v8501_v35 = vrot.slane %v8448_v51, %v10408_v56  ;;  %v1622_v53 = vsub.f32 %v1541_v12, %v1614_v15  ;;  %v8756_v56 = vld [vmem:[%s10183_s13 + $0x118] sm:$0xff] }
 0x23f   :  { %v1729_v50 = vmul.f32 %v8466_v28, %v1680_v42  ;;  %v1682_v20 = vadd.f32 %v1670_v39, %v1618_v63  ;;  %v1672_v36 = vmul.f32 0.6931472, %v6184_v1  ;;  %v8496_v1 = vrot.slane %v8448_v51, %v10406_v18  ;;  %10422 = vst [vmem:[#allocation97_spill] sm:$0xff] %v8756_v56 }
 0x240   :  { %v6186_v11 = vpop.eup %6185  ;;  %10409 = vst [vmem:[#allocation85_spill] sm:$0xff] %v8501_v35 }
 0x241   :  { %1748 = vperm.xlu1 %6140, %v1729_v50   ;;  %v1731_v52 = vmul.f32 %v8470_v47, %v1682_v20  ;;  %v1674_v41 = vmul.f32 0.6931472, %v6186_v11  ;;  %10407 = vst [vmem:[#allocation84_spill] sm:$0xff] %v8496_v1  ;;  %v1683_v59 = vadd.f32 %v1672_v36, %v1619_v21  ;;  %v8507_v36 = vrot.slane %v8448_v51, %v7805_v7  ;;  %v8514_v21 = vld [vmem:[%s10183_s13 + $0x1f8] sm:$0xff] }
 0x242   :  { %v6188_v0 = vpop.eup %6187  ;;  %5603 = vmatprep.subr.mxu0 %v8514_v21 }
 0x243   :  { %1754 = vperm.xlu0 %6139, %v1731_v52   ;;  %v1684_v40 = vadd.f32 %v1674_v41, %v1620_v61  ;;  %v1676_v13 = vmul.f32 0.6931472, %v6188_v0  ;;  %v1732_v39 = vmul.f32 %v8496_v1, %v1683_v59  ;;  %10410 = vst [vmem:[#allocation86_spill] sm:$0xff] %v8507_v36 }
 0x244   :  { %v6190_v60 = vpop.eup %6189 }
 0x245   :  { %1751 = vperm.xlu1 %6140, %v1730_v48   ;;  %v1733_v63 = vmul.f32 %v8484_v2, %v1684_v40  ;;  %v1678_v42 = vmul.f32 0.6931472, %v6190_v60  ;;  %v1685_v20 = vadd.f32 %v1676_v13, %v1621_v30  ;;  %v5149_v48 = vld [vmem:[%s10372_s6 + $0x20] sm:$0x7]  ;;  %v5150_v60 = vld [vmem:[%s10372_s6 + $0x24] sm:$0x7] }
 0x247   :  { %1760 = vperm.xlu0 %6139, %v1733_v63   ;;  %v1686_v50 = vadd.f32 %v1678_v42, %v1622_v53  ;;  %v1734_v11 = vmul.f32 %v8507_v36, %v1685_v20  ;;  %v5152_v42 = vld [vmem:[%s10372_s6 + $0x2c] sm:$0x7] }
 0x249   :  { %1757 = vperm.xlu1 %6140, %v1732_v39   ;;  %v1735_v9 = vmul.f32 %v8501_v35, %v1686_v50  ;;  %v8744_v35 = vld [vmem:[%s10183_s13 + $0x198] sm:$0xff] }
 0x24a   :  { %10421 = vst [vmem:[#allocation96_spill] sm:$0xff] %v8744_v35 }
 0x24b   :  { %1766 = vperm.xlu0 %6139, %v1735_v9  }
 0x24d   :  { %1763 = vperm.xlu1 %6140, %v1734_v11  }
 0x296   :  { %v2068_v61 = vpop.f32.mrf.mxu0 }
 0x297   :  { %v2072_v44 = vadd.f32 %v2068_v61, %v7962_v62 }
 0x298   :  { %v6010_v55 = vpop.f32.mrf.mxu0 }
 0x299   :  { %6191 = vtanh.f32 %v2072_v44  ;;  %v5151_v44 = vld [vmem:[%s10372_s6 + $0x28] sm:$0x7]  ;;  %v5154_v55 = vld [vmem:[%s10372_s6 + $0x34] sm:$0x7] }
 0x2a6   :  { %v6192_v51 = vpop.eup %6191 }
 0x2a7   :  { %v2093_v12 = vrot.slane %v6192_v51, %v8103_v19  ;;  %v2086_v15 = vcombine.high %v6192_v51, %v6192_v51 }
 0x2a9   :  { %v2109_v52 = vrot.slane %v2093_v12, %v8103_v19  ;;  %v2101_v41 = vcombine.high %v2093_v12, %v2093_v12  ;;  %v2100_v0 = vrot.slane %v2086_v15, %v8103_v19 }
 0x2ab   :  { %v2138_v40 = vrot.slane %v2109_v52, %v7757_v38  ;;  %v2123_v59 = vrot.slane %v2101_v41, %v8103_v19  ;;  %v2131_v62 = vcombine.high %v2109_v52, %v2109_v52  ;;  %v2102_v13 = vcombine.high %v2100_v0, %v2100_v0 }
 0x2ac   :  { %v2116_v20 = vrot.slane %v2100_v0, %v8103_v19 }
 0x2ad   :  { %v2175_v30 = vmul.f32 %v5149_v48, %v2138_v40  ;;  %v2142_v53 = vrot.slane %v2123_v59, %v7757_v38  ;;  %v2133_v63 = vcombine.high %v2123_v59, %v2123_v59  ;;  %v2146_v39 = vrot.slane %v2131_v62, %v7757_v38  ;;  %v5153_v62 = vld [vmem:[%s10372_s6 + $0x30] sm:$0x7] }
 0x2ae   :  { %v2130_v50 = vrot.slane %v2102_v13, %v8103_v19  ;;  %v2154_v41 = vrot.slane %v2116_v20, %v7757_v38  ;;  %v2132_v0 = vcombine.high %v2116_v20, %v2116_v20  ;;  %v10411_v20 = vlaneseq }
 0x2af   :  { %v2183_v9 = vsel %vm1509_vm3, %v2175_v30, 0.0  ;;  %v2176_v11 = vmul.f32 %v5150_v60, %v2142_v53  ;;  %v2150_v61 = vrot.slane %v2133_v63, %v7757_v38  ;;  %v2177_v52 = vmul.f32 %v5151_v44, %v2146_v39  ;;  %v5156_v60 = vld [vmem:[%s10372_s6 + $0x3c] sm:$0x7] }
 0x2b0   :  { %2184 = vadd.xlane.f32.xlu0 %v2183_v9  ;;  %v2158_v51 = vrot.slane %v2130_v50, %v7757_v38  ;;  %v2134_v12 = vcombine.high %v2130_v50, %v2130_v50  ;;  %v2179_v30 = vmul.f32 %v5153_v62, %v2154_v41  ;;  %v2162_v39 = vrot.slane %v2132_v0, %v7757_v38  ;;  %v5155_v50 = vld [vmem:[%s10372_s6 + $0x38] sm:$0x7] }
 0x2b1   :  { %v2178_v15 = vmul.f32 %v5152_v42, %v2150_v61  ;;  %v2186_v48 = vsel %vm1509_vm3, %v2176_v11, 0.0  ;;  %v2189_v53 = vsel %vm1509_vm3, %v2177_v52, 0.0  ;;  %v8562_v9 = vand.u32 127, %v10411_v20 }
 0x2b2   :  { %v2180_v59 = vmul.f32 %v5154_v55, %v2158_v51  ;;  %v2166_v13 = vrot.slane %v2134_v12, %v7757_v38  ;;  %v2195_v61 = vsel %vm1509_vm3, %v2179_v30, 0.0  ;;  %v2181_v55 = vmul.f32 %v5155_v50, %v2162_v39 }
 0x2b3   :  { %v2192_v40 = vsel %vm1509_vm3, %v2178_v15, 0.0  ;;  %10412 = vst [vmem:[#allocation87_spill] sm:$0xff] %v8562_v9  ;;  %v8568_v51 = vsub.s32 %v8562_v9, %v7372_v25 }
 0x2b4   :  { %2187 = vadd.xlane.f32.xlu0 %v2186_v48  ;;  %2193 = vadd.xlane.f32.xlu1 %v2192_v40  ;;  %v2198_v63 = vsel %vm1509_vm3, %v2180_v59, 0.0  ;;  %v2182_v42 = vmul.f32 %v5156_v60, %v2166_v13  ;;  %v2201_v41 = vsel %vm1509_vm3, %v2181_v55, 0.0 }
 0x2b5   :  { %10413 = vst [vmem:[#allocation88_spill] sm:$0xff] %v8568_v51 }
 0x2b6   :  { %v2204_v44 = vsel %vm1509_vm3, %v2182_v42, 0.0 }
 0x2b8   :  { %2190 = vadd.xlane.f32.xlu0 %v2189_v53  ;;  %2199 = vadd.xlane.f32.xlu1 %v2198_v63  ;;  %v1746_v11 = vpop.permute.xlu0 %1745 }
 0x2b9   :  { %v1773_v0 = vrot.slane %v1746_v11, %v8568_v51 }
 0x2bc   :  { %2196 = vadd.xlane.f32.xlu0 %v2195_v61  ;;  %2205 = vadd.xlane.f32.xlu1 %v2204_v44  ;;  %v1749_v12 = vpop.permute.xlu1 %1748 }
 0x2bd   :  { %v1777_v15 = vrot.slane %v1749_v12, %v8568_v51 }
 0x2be   :  { %v1755_v52 = vpop.permute.xlu0 %1754 }
 0x2bf   :  { %v1803_v59 = vsel %vm1802_vm5, %v1777_v15, %v1773_v0  ;;  %v1785_v13 = vrot.slane %v1755_v52, %v8568_v51 }
 0x2c0   :  { %2202 = vadd.xlane.f32.xlu0 %v2201_v41  ;;  %v1752_v48 = vpop.permute.xlu1 %1751 }
 0x2c1   :  { %v1781_v40 = vrot.slane %v1752_v48, %v8568_v51 }
 0x2c2   :  { %v1761_v62 = vpop.permute.xlu0 %1760 }
 0x2c3   :  { %v1805_v25 = vsel %vm1804_vm6, %v1781_v40, %v1803_v59  ;;  %v1793_v39 = vrot.slane %v1761_v62, %v8568_v51  ;;  %v2589_v40 = vpop.f32.mrf.mxu1 }
 0x2c4   :  { %v1758_v60 = vpop.permute.xlu1 %1757  ;;  %v1807_v53 = vsel %vm1806_vm7, %v1785_v13, %v1805_v25  ;;  %v2596_v13 = vadd.f32 %v2589_v40, %v7938_v8  ;;  %v8640_v40 = vld [vmem:[%s10183_s13 + $0x160] sm:$0xff] }
 0x2c5   :  { %v1789_v30 = vrot.slane %v1758_v60, %v8568_v51  ;;  %v2591_v62 = vpop.f32.mrf.mxu1 }
 0x2c6   :  { %v1767_v42 = vpop.permute.xlu0 %1766  ;;  %v2597_v25 = vadd.f32 %v2591_v62, %v7946_v17  ;;  %v8652_v62 = vld [vmem:[%s10183_s13 + $0x158] sm:$0xff] }
 0x2c7   :  { %v1809_v63 = vsel %vm1808_vm8, %v1789_v30, %v1807_v53  ;;  %v1801_v11 = vrot.slane %v1767_v42, %v8568_v51 }
 0x2c8   :  { %v1764_v50 = vpop.permute.xlu1 %1763  ;;  %v1811_v61 = vsel %vm1810_vm9, %v1793_v39, %v1809_v63  ;;  %v5160_v60 = vmul.f32 -1.442695, %v2597_v25  ;;  %v8657_v25 = vld [vmem:[%s10183_s13 + $0x1d0] sm:$0xff] }
 0x2c9   :  { %v1797_v20 = vrot.slane %v1764_v50, %v8568_v51 }
 0x2cb   :  { %v1813_v44 = vsel %vm1812_vm10, %v1797_v20, %v1811_v61 }
 0x2cc   :  { %v1815_v55 = vsel %vm1814_vm11, %v1801_v11, %v1813_v44 }
 0x2cd   :  { %v1818_v12 = vsel %vm1817_vm12, %v1815_v55, 0.0 }
 0x2ce   :  { %1819 = vadd.xlane.f32.xlu1 %v1818_v12  ;;  %v8600_v12 = vld [vmem:[%s10183_s13 + $0x178] sm:$0xff] }
 0x2d6   :  { %v2518_v15 = vpop.f32.mrf.mxu0 }
 0x2d7   :  { %v2594_v52 = vadd.f32 %v2518_v15, %v7935_v6  ;;  %v8605_v15 = vld [vmem:[%s10183_s13 + $0x1f0] sm:$0xff] }
 0x2d8   :  { %v2520_v41 = vpop.f32.mrf.mxu0 }
 0x2d9   :  { %v5158_v0 = vmul.f32 -1.442695, %v2594_v52  ;;  %v2595_v48 = vadd.f32 %v2520_v41, %v7943_v16  ;;  %v8616_v52 = vld [vmem:[%s10183_s13 + $0x170] sm:$0xff]  ;;  %v8621_v41 = vld [vmem:[%s10183_s13 + $0x1e8] sm:$0xff] }
 0x2db   :  { %6193 = vpow2.f32 %v5158_v0  ;;  %v5159_v59 = vmul.f32 -1.442695, %v2595_v48  ;;  %v8628_v0 = vld [vmem:[%s10183_s13 + $0x168] sm:$0xff]  ;;  %v8633_v48 = vld [vmem:[%s10183_s13 + $0x1e0] sm:$0xff] }
 0x2dd   :  { %6195 = vpow2.f32 %v5159_v59  ;;  %v8645_v59 = vld [vmem:[%s10183_s13 + $0x1d8] sm:$0xff] }
 0x2de   :  { %6197 = vtanh.f32 %v2596_v13  ;;  %v8664_v13 = vld [vmem:[%s10183_s13 + $0x150] sm:$0xff] }
 0x2df   :  { %6199 = vpow2.f32 %v5160_v60  ;;  %v8669_v60 = vld [vmem:[%s10183_s13 + $0x1c8] sm:$0xff] }
 0x2e8   :  { %v6194_v30 = vpop.eup %6193 }
 0x2e9   :  { %v2601_v53 = vadd.f32 1.0, %v6194_v30  ;;  %v8676_v30 = vld [vmem:[%s10183_s13 + $0x148] sm:$0xff] }
 0x2ea   :  { %v6196_v63 = vpop.eup %6195 }
 0x2eb   :  { %6201 = vrcp.f32 %v2601_v53  ;;  %v2607_v6 = vadd.f32 1.0, %v6196_v63  ;;  %v6198_v42 = vpop.eup %6197  ;;  %v8681_v53 = vld [vmem:[%s10183_s13 + $0x1c0] sm:$0xff] }
 0x2ec   :  { %v6200_v16 = vpop.eup %6199  ;;  %v8688_v63 = vld [vmem:[%s10183_s13 + $0x140] sm:$0xff] }
 0x2ed   :  { %6203 = vrcp.f32 %v2607_v6  ;;  %v2614_v11 = vadd.f32 1.0, %v6200_v16  ;;  %v8693_v6 = vld [vmem:[%s10183_s13 + $0x1b8] sm:$0xff]  ;;  %v8705_v16 = vld [vmem:[%s10183_s13 + $0x1b0] sm:$0xff] }
 0x2ee   :  { %10415 = vst [vmem:[#allocation90_spill] sm:$0xff] %v8705_v16 }
 0x2ef   :  { %6205 = vrcp.f32 %v2614_v11  ;;  %v8729_v11 = vld [vmem:[%s10183_s13 + $0x1a0] sm:$0xff] }
 0x2f0   :  { %10419 = vst [vmem:[#allocation94_spill] sm:$0xff] %v8729_v11 }
 0x2f8   :  { %v6202_v39 = vpop.eup %6201 }
 0x2f9   :  { %v2618_v50 = vmul.f32 %v6202_v39, %v6198_v42  ;;  %v8700_v42 = vld [vmem:[%s10183_s13 + $0x138] sm:$0xff]  ;;  %v8712_v39 = vld [vmem:[%s10183_s13 + $0x130] sm:$0xff] }
 0x2fa   :  { %v6204_v20 = vpop.eup %6203  ;;  %10414 = vst [vmem:[#allocation89_spill] sm:$0xff] %v8700_v42  ;;  %10416 = vst [vmem:[#allocation91_spill] sm:$0xff] %v8712_v39 }
 0x2fb   :  { %v2617_v61 = vmul.f32 %v6204_v20, %v8165_v4  ;;  %v8724_v20 = vld [vmem:[%s10183_s13 + $0x128] sm:$0xff] }
 0x2fc   :  { %v6206_v8 = vpop.eup %6205  ;;  %10418 = vst [vmem:[#allocation93_spill] sm:$0xff] %v8724_v20 }
 0x2fd   :  { %v8592_v17 = vadd.f32 %v2618_v50, %v2617_v61  ;;  %v8717_v50 = vld [vmem:[%s10183_s13 + $0x1a8] sm:$0xff] }
 0x2fe   :  { %10417 = vst [vmem:[#allocation92_spill] sm:$0xff] %v8717_v50 }
 0x2ff   :  { %6207 = vtanh.f32 %v8592_v17 }
 0x30c   :  { %v6208_v44 = vpop.eup %6207 }
 0x30d   :  { %v8595_v55 = vmul.f32 %v6208_v44, %v6206_v8  ;;  %v8739_v44 = vld [vmem:[%s10183_s13 + $0x120] sm:$0xff] }
 0x30e   :  { %10420 = vst [vmem:[#allocation95_spill] sm:$0xff] %v8739_v44 }
 0x30f   :  { %6020 = vmatmul.mubr.f32.vlgmr.msra.gmra.mxu0 %v8595_v55  ;;  %5601 = vmatprep.mubr.f32.mxu1 %v8595_v55 }
 0x310   :  { %5604 = vmatpush3.xpose.msra.mxu0 %v8600_v12  ;;  %5602 = vmatmul.mubr.f32.gmra.mxu1 %v8595_v55 }
 0x311   :  { %5635 = vmatprep.mubr.f32.mxu0 %v8174_v43  ;;  %5605 = vmatprep.subr.mxu0 %v8605_v15 }
 0x314   :  { %5606 = vmatpush3.xpose.msra.mxu0 %v8616_v52 }
 0x315   :  { %5607 = vmatprep.subr.mxu0 %v8621_v41 }
 0x318   :  { %5608 = vmatpush3.xpose.msra.mxu0 %v8628_v0 }
 0x319   :  { %5609 = vmatprep.subr.mxu0 %v8633_v48 }
 0x31c   :  { %5610 = vmatpush3.xpose.msra.mxu0 %v8640_v40 }
 0x31d   :  { %5611 = vmatprep.subr.mxu0 %v8645_v59 }
 0x320   :  { %5612 = vmatpush3.xpose.msra.mxu0 %v8652_v62 }
 0x321   :  { %5613 = vmatprep.subr.mxu0 %v8657_v25 }
 0x324   :  { %5614 = vmatpush3.xpose.msra.mxu0 %v8664_v13 }
 0x325   :  { %5615 = vmatprep.subr.mxu0 %v8669_v60 }
 0x328   :  { %5616 = vmatpush3.xpose.msra.mxu0 %v8676_v30 }
 0x329   :  { %5617 = vmatprep.subr.mxu0 %v8681_v53 }
 0x32c   :  { %5618 = vmatpush3.xpose.msra.mxu0 %v8688_v63 }
 0x32d   :  { %5619 = vmatprep.subr.mxu0 %v8693_v6 }
 0x330   :  { %5620 = vmatpush3.xpose.msra.mxu0 %v8700_v42 }
 0x331   :  { %5621 = vmatprep.subr.mxu0 %v8705_v16 }
 0x334   :  { %5622 = vmatpush3.xpose.msra.mxu0 %v8712_v39 }
 0x335   :  { %5623 = vmatprep.subr.mxu0 %v8717_v50  ;;  %v8774_v50 = vld [vmem:[%s10183_s13 + $0x110] sm:$0xff] }
 0x338   :  { %5624 = vmatpush3.xpose.msra.mxu0 %v8724_v20 }
 0x339   :  { %v8732_v61 = vpop.xlane.xlu0 %2184  ;;  %5625 = vmatprep.subr.mxu0 %v8729_v11 }
 0x33a   :  { %v2296_v8 = vand.u32 2147483647, %v8732_v61 }
 0x33c   :  { %v2304_v36 = vsub.f32 0.0, %v2296_v8  ;;  %5626 = vmatpush3.xpose.msra.mxu0 %v8739_v44  ;;  %v8762_v8 = vld [vmem:[%s10183_s13 + $0x190] sm:$0xff] }
 0x33d   :  { %v8747_v9 = vpop.xlane.xlu0 %2187  ;;  %v8749_v7 = vpop.xlane.xlu1 %2193  ;;  %5627 = vmatprep.subr.mxu0 %v8744_v35  ;;  %10423 = vst [vmem:[#allocation98_spill] sm:$0xff] %v8762_v8 }
 0x33e   :  { %v2312_v18 = vmul.f32 1.442695, %v2304_v36  ;;  %v2297_v31 = vand.u32 2147483647, %v8747_v9  ;;  %v2299_v57 = vand.u32 2147483647, %v8749_v7 }
 0x340   :  { %6209 = vpow2.f32 %v2312_v18  ;;  %v2305_v26 = vsub.f32 0.0, %v2297_v31  ;;  %v2307_v44 = vsub.f32 0.0, %v2299_v57  ;;  %5628 = vmatpush3.xpose.msra.mxu0 %v8756_v56  ;;  %v8780_v57 = vld [vmem:[%s10183_s13 + $0x188] sm:$0xff] }
 0x341   :  { %v8765_v36 = vpop.xlane.xlu0 %2190  ;;  %v8767_v35 = vpop.xlane.xlu1 %2199  ;;  %5629 = vmatprep.subr.mxu0 %v8762_v8 }
 0x342   :  { %v2314_v11 = vmul.f32 1.442695, %v2305_v26  ;;  %v2298_v20 = vand.u32 2147483647, %v8765_v36  ;;  %v2318_v39 = vmul.f32 1.442695, %v2307_v44 }
 0x343   :  { %v2301_v31 = vand.u32 2147483647, %v8767_v35  ;;  %v8790_v44 = vld [vmem:[%s10183_s13 + $0x108] sm:$0xff] }
 0x344   :  { %6211 = vpow2.f32 %v2314_v11  ;;  %v2306_v18 = vsub.f32 0.0, %v2298_v20  ;;  %5630 = vmatpush3.xpose.msra.mxu0 %v8774_v50 }
 0x345   :  { %6213 = vpow2.f32 %v2318_v39  ;;  %v2309_v26 = vsub.f32 0.0, %v2301_v31  ;;  %v8783_v8 = vpop.xlane.xlu0 %2196  ;;  %5631 = vmatprep.subr.mxu0 %v8780_v57  ;;  %v8795_v39 = vld [vmem:[%s10183_s13 + $0x180] sm:$0xff] }
 0x346   :  { %v2316_v56 = vmul.f32 1.442695, %v2306_v18  ;;  %v2300_v16 = vand.u32 2147483647, %v8783_v8  ;;  %10424 = vst [vmem:[#allocation99_spill] sm:$0xff] %v8795_v39  ;;  %v8802_v31 = vld [vmem:[%s10183_s13 + $0x100] sm:$0xff] }
 0x347   :  { %v2322_v42 = vmul.f32 1.442695, %v2309_v26  ;;  %10425 = vst [vmem:[#allocation100_spill] sm:$0xff] %v8802_v31 }
 0x348   :  { %6215 = vpow2.f32 %v2316_v56  ;;  %v2308_v20 = vsub.f32 0.0, %v2300_v16  ;;  %5632 = vmatpush3.xpose.msra.mxu0 %v8790_v44  ;;  %v8808_v56 = vld [vmem:[%s10183_s13 + $0xf8] sm:$0xff] }
 0x349   :  { %6217 = vpow2.f32 %v2322_v42  ;;  %5633 = vmatprep.subr.mxu0 %v8795_v39  ;;  %10426 = vst [vmem:[#allocation101_spill] sm:$0xff] %v8808_v56 }
 0x34a   :  { %v2320_v11 = vmul.f32 1.442695, %v2308_v20 }
 0x34c   :  { %6219 = vpow2.f32 %v2320_v11  ;;  %5634 = vmatpush3.xpose.msra.mxu0 %v8802_v31 }
 0x34d   :  { %v6210_v18 = vpop.eup %6209  ;;  %5648 = vmatprep.subr.mxu0 %v8808_v56 }
 0x34e   :  { %v2328_v26 = vadd.f32 1.0, %v6210_v18  ;;  %v8815_v18 = vpop.xlane.xlu1 %2205 }
 0x34f   :  { %5636 = vmatmul.mubr.f32.vlgmr.msra.gmra.mxu0 %v8174_v43  ;;  %10427 = vst [vmem:[#allocation102_spill] sm:$0xff] %v8815_v18 }
 0x350   :  { %6221 = vlog2.f32 %v2328_v26  ;;  %5637 = vmatprep.mubr.f32.mxu0 %v8595_v55  ;;  %5649 = vmatpush3.xpose.msra.mxu0 %v8181_v49 }
 0x351   :  { %v6212_v42 = vpop.eup %6211  ;;  %5650 = vmatprep.subr.mxu0 %v8188_v10  ;;  %v2207_v10 = vmax.f32 %v8732_v61, 0.0 }
 0x352   :  { %v6214_v16 = vpop.eup %6213  ;;  %v2329_v20 = vadd.f32 1.0, %v6212_v42 }
 0x353   :  { %v2331_v11 = vadd.f32 1.0, %v6214_v16  ;;  %5638 = vmatmul.mubr.f32.gmra.mxu0 %v8595_v55  ;;  %v2280_v55 = vmul.f32 %v8304_v3, %v8732_v61 }
 0x354   :  { %6223 = vlog2.f32 %v2329_v20  ;;  %5651 = vmatpush3.xpose.msra.mxu0 %v8200_v22  ;;  %v2281_v20 = vmul.f32 %v8239_v14, %v8747_v9 }
 0x355   :  { %v6216_v31 = vpop.eup %6215  ;;  %6225 = vlog2.f32 %v2331_v11  ;;  %5652 = vmatprep.subr.mxu0 %v8206_v33  ;;  %v2208_v33 = vmax.f32 %v8747_v9, 0.0 }
 0x356   :  { %v6218_v26 = vpop.eup %6217  ;;  %v2330_v43 = vadd.f32 1.0, %v6216_v31 }
 0x357   :  { %v2333_v56 = vadd.f32 1.0, %v6218_v26  ;;  %v1820_v49 = vpop.xlane.xlu1 %1819 }
 0x358   :  { %6227 = vlog2.f32 %v2330_v43  ;;  %v1821_v39 = vrot.slane %v1820_v49, 4  ;;  %5653 = vmatpush3.xpose.msra.mxu0 %v8214_v24  ;;  %v2288_v24 = vsub.f32 %v2207_v10, %v2280_v55  ;;  %v2289_v43 = vsub.f32 %v2208_v33, %v2281_v20 }
 0x359   :  { %v6220_v42 = vpop.eup %6219  ;;  %6229 = vlog2.f32 %v2333_v56  ;;  %5654 = vmatprep.subr.mxu0 %v8222_v27  ;;  %v2283_v10 = vmul.f32 %v8279_v58, %v8749_v7  ;;  %v2212_v33 = vmax.f32 %v8767_v35, 0.0  ;;  %v2285_v20 = vmul.f32 %v8294_v54, %v8767_v35  ;;  %v8868_v54 = vld [vmem:[%s10183_s13 + $0xc0] sm:$0xff] }
 0x35a   :  { %v2332_v16 = vadd.f32 1.0, %v6220_v42  ;;  %v1822_v22 = vadd.f32 %v1821_v39, %v1820_v49  ;;  %v2209_v39 = vmax.f32 %v8765_v36, 0.0  ;;  %v2282_v49 = vmul.f32 %v8262_v5, %v8765_v36 }
 0x35b   :  { %v2284_v5 = vmul.f32 %v8323_v45, %v8783_v8  ;;  %v2293_v35 = vsub.f32 %v2212_v33, %v2285_v20  ;;  %v10434_v33 = vld [vmem:[#allocation21_spill] sm:$0xff]  ;;  %v10435_v20 = vld [vmem:[#allocation78_spill] sm:$0xff] }
 0x35c   :  { %6231 = vlog2.f32 %v2332_v16  ;;  %v1823_v11 = vrot.slane %v1822_v22, 2  ;;  %5655 = vmatpush3.xpose.msra.mxu0 %v8230_v29  ;;  %v2211_v16 = vmax.f32 %v8783_v8, 0.0  ;;  %v2290_v36 = vsub.f32 %v2209_v39, %v2282_v49  ;;  %v8874_v49 = vld [vmem:[%s10183_s13 + $0x40] sm:$0xff] }
 0x35d   :  { %v6222_v31 = vpop.eup %6221  ;;  %5656 = vmatprep.subr.mxu0 %v8236_v32  ;;  %v2210_v32 = vmax.f32 %v8749_v7, 0.0 }
 0x35e   :  { %v2337_v26 = vmul.f32 0.6931472, %v6222_v31  ;;  %v1824_v3 = vadd.f32 %v1823_v11, %v1822_v22  ;;  %v8852_v31 = vld [vmem:[%s10183_s13 + $0xc8] sm:$0xff] }
 0x35f   :  { %v2291_v8 = vsub.f32 %v2210_v32, %v2283_v10  ;;  %v8888_v32 = vld [vmem:[%s10183_s13 + $0x38] sm:$0xff] }
 0x360   :  { %v2352_v61 = vadd.f32 %v2337_v26, %v2288_v24  ;;  %v1825_v27 = vrot.slane %v1824_v3, 1  ;;  %5657 = vmatpush3.xpose.msra.mxu0 %v8246_v34  ;;  %v2292_v26 = vsub.f32 %v2211_v16, %v2284_v5  ;;  %v8907_v16 = vld [vmem:[%s10183_s13 + $0xa8] sm:$0xff] }
 0x361   :  { %v6224_v56 = vpop.eup %6223  ;;  %5658 = vmatprep.subr.mxu0 %v8252_v37  ;;  %v8845_v37 = vld [vmem:[%s10183_s13 + $0x50] sm:$0xff]  ;;  %v8913_v5 = vld [vmem:[%s10183_s13 + $0x28] sm:$0xff] }
 0x362   :  { %v2360_v14 = vmul.f32 %v2352_v61, %v8452_v23  ;;  %v2339_v9 = vmul.f32 0.6931472, %v6224_v56  ;;  %v6226_v29 = vpop.eup %6225  ;;  %v1826_v42 = vadd.f32 %v1825_v27, %v1824_v3  ;;  %v8861_v3 = vld [vmem:[%s10183_s13 + $0x48] sm:$0xff] }
 0x363   :  { %v2343_v58 = vmul.f32 0.6931472, %v6226_v29 }
 0x364   :  { %2377 = vperm.xlu0 %6139, %v2360_v14   ;;  %v2353_v55 = vadd.f32 %v2339_v9, %v2289_v43  ;;  %6107 = vpush %v1826_v42  ;;  %5659 = vmatpush3.xpose.msra.mxu0 %v8845_v37  ;;  %v8882_v42 = vld [vmem:[%s10183_s13 + $0xb8] sm:$0xff] }
 0x365   :  { %v6228_v34 = vpop.eup %6227  ;;  %5660 = vmatprep.subr.mxu0 %v8852_v31  ;;  %v2355_v43 = vadd.f32 %v2343_v58, %v2291_v8  ;;  %v10431_v58 = vld [vmem:[#allocation18_spill] sm:$0xff]  ;;  %v10433_v8 = vld [vmem:[#allocation77_spill] sm:$0xff] }
 0x366   :  { %v2361_v22 = vmul.f32 %v2353_v55, %v8466_v28  ;;  %v2341_v7 = vmul.f32 0.6931472, %v6228_v34  ;;  %v6230_v45 = vpop.eup %6229  ;;  %v8895_v55 = vld [vmem:[%s10183_s13 + $0xb0] sm:$0xff] }
 0x367   :  { %v2347_v27 = vmul.f32 0.6931472, %v6230_v45  ;;  %v2363_v9 = vmul.f32 %v2355_v43, %v8470_v47  ;;  %v8901_v34 = vld [vmem:[%s10183_s13 + $0x30] sm:$0xff]  ;;  %v8951_v43 = vld [vmem:[%s10185_s15 + $0x18] sm:$0xff] }
 0x368   :  { %2380 = vperm.xlu1 %6140, %v2361_v22   ;;  %v2354_v11 = vadd.f32 %v2341_v7, %v2290_v36  ;;  %5661 = vmatpush3.xpose.msra.mxu0 %v8861_v3  ;;  %v10428_v36 = vld [vmem:[#allocation15_spill] sm:$0xff]  ;;  %v10429_v22 = vld [vmem:[#allocation16_spill] sm:$0xff]  ;;  %v10430_v7 = vld [vmem:[#allocation17_spill] sm:$0xff] }
 0x369   :  { %v6232_v24 = vpop.eup %6231  ;;  %5662 = vmatprep.subr.mxu0 %v8868_v54  ;;  %v2357_v29 = vadd.f32 %v2347_v27, %v2293_v35  ;;  %v10432_v45 = vld [vmem:[#allocation19_spill] sm:$0xff] }
 0x36a   :  { %v2362_v61 = vmul.f32 %v2354_v11, %v8480_v46  ;;  %v2345_v56 = vmul.f32 0.6931472, %v6232_v24  ;;  %v10436_v11 = vld [vmem:[#allocation23_spill] sm:$0xff]  ;;  %v10437_v24 = vld [vmem:[#allocation24_spill] sm:$0xff] }
 0x36b   :  { %v2365_v10 = vmul.f32 %v2357_v29, %v8484_v2  ;;  %v8957_v27 = vld [vmem:[%s10185_s15 + $0x10] sm:$0xff]  ;;  %v8964_v35 = vld [vmem:[%s10185_s15 + $0x8] sm:$0xff] }
 0x36c   :  { %2383 = vperm.xlu1 %6140, %v2362_v61   ;;  %v2356_v39 = vadd.f32 %v2345_v56, %v2292_v26  ;;  %5663 = vmatpush3.xpose.msra.mxu0 %v8874_v49  ;;  %v8929_v26 = vld [vmem:[%s10185_s15 + $0x30] sm:$0x3]  ;;  %v8937_v61 = vld [vmem:[%s10185_s15 + $0x28] sm:$0xff]  ;;  %v8944_v56 = vld [vmem:[%s10185_s15 + $0x20] sm:$0xff] }
 0x36d   :  { %5664 = vmatprep.subr.mxu0 %v8882_v42  ;;  %6022 = vmatprep.subr.mxu1 %v8929_v26 }
 0x36e   :  { %v2364_v14 = vmul.f32 %v2356_v39, %v8496_v1  ;;  %6023 = vmatpush3.xpose.msra.mxu1 %v8929_v26  ;;  %v8971_v39 = vld [vmem:[%s10185_s15] sm:$0xff] }
 0x36f   :  { %6024 = vmatprep.subr.mxu1 %v8937_v61 }
 0x370   :  { %2389 = vperm.xlu0 %6139, %v2364_v14   ;;  %2386 = vperm.xlu1 %6140, %v2363_v9   ;;  %v10438_v9 = vld [vmem:[#allocation29_spill] sm:$0xff] }
 0x371   :  { %5665 = vmatpush3.xpose.msra.mxu0 %v8888_v32 }
 0x372   :  { %5666 = vmatprep.subr.mxu0 %v8895_v55  ;;  %6025 = vmatpush3.xpose.msra.mxu1 %v8937_v61 }
 0x373   :  { %6026 = vmatprep.subr.mxu1 %v8944_v56 }
 0x374   :  { %2392 = vperm.xlu1 %6140, %v2365_v10  }
 0x375   :  { %5667 = vmatpush3.xpose.msra.mxu0 %v8901_v34 }
 0x376   :  { %5668 = vmatprep.subr.mxu0 %v8907_v16  ;;  %6027 = vmatpush3.xpose.msra.mxu1 %v8944_v56 }
 0x377   :  { %6028 = vmatprep.subr.mxu1 %v8951_v43 }
 0x379   :  { %5669 = vmatpush3.xpose.msra.mxu0 %v8913_v5 }
 0x37a   :  { %5670 = vmatprep.subr.mxu0 %v10428_v36  ;;  %6029 = vmatpush3.xpose.msra.mxu1 %v8951_v43  ;;  %v8978_v36 = vpop.xlane.xlu0 %2202 }
 0x37b   :  { %6030 = vmatprep.subr.mxu1 %v8957_v27  ;;  %10439 = vst [vmem:[#allocation15_spill] sm:$0xff] %v8978_v36 }
 0x37d   :  { %5671 = vmatpush3.xpose.msra.mxu0 %v10429_v22 }
 0x37e   :  { %5672 = vmatprep.subr.mxu0 %v10430_v7  ;;  %6031 = vmatpush3.xpose.msra.mxu1 %v8957_v27 }
 0x37f   :  { %6032 = vmatprep.subr.mxu1 %v8964_v35 }
 0x381   :  { %5673 = vmatpush3.xpose.msra.mxu0 %v10431_v58 }
 0x382   :  { %5674 = vmatprep.subr.mxu0 %v10432_v45  ;;  %6033 = vmatpush3.xpose.msra.mxu1 %v8964_v35 }
 0x383   :  { %6034 = vmatprep.subr.mxu1 %v8971_v39 }
 0x385   :  { %5675 = vmatpush3.xpose.msra.mxu0 %v10433_v8 }
 0x386   :  { %5676 = vmatprep.subr.mxu0 %v10434_v33  ;;  %6035 = vmatpush3.xpose.msra.mxu1 %v8971_v39 }
 0x387   :  { %5684 = vmatprep.subr.mxu1 %v8514_v21 }
 0x389   :  { %5677 = vmatpush3.xpose.msra.mxu0 %v10435_v20 }
 0x38a   :  { %5678 = vmatprep.subr.mxu0 %v10436_v11 }
 0x38d   :  { %5679 = vmatpush3.xpose.msra.mxu0 %v10437_v24 }
 0x38e   :  { %6039 = vmatprep.subr.mxu0 %v8929_v26 }
 0x3cf   :  { %v2690_v14 = vpop.f32.mrf.mxu0 }
 0x3d0   :  { %v2694_v29 = vadd.f32 %v2690_v14, %v10438_v9  ;;  %v5161_v14 = vld [vmem:[%s10372_s6 + $0x40] sm:$0x7] }
 0x3d1   :  { %v6021_v10 = vpop.f32.mrf.mxu0 }
 0x3d2   :  { %6233 = vtanh.f32 %v2694_v29 }
 0x3df   :  { %v6234_v22 = vpop.eup %6233  ;;  %v2378_v7 = vpop.permute.xlu0 %2377 }
 0x3e0   :  { %v2715_v58 = vrot.slane %v6234_v22, %v8103_v19  ;;  %v2708_v45 = vcombine.high %v6234_v22, %v6234_v22  ;;  %v2403_v21 = vrot.slane %v2378_v7, %v8568_v51  ;;  %v5163_v7 = vld [vmem:[%s10372_s6 + $0x48] sm:$0x7] }
 0x3e2   :  { %v2731_v33 = vrot.slane %v2715_v58, %v8103_v19  ;;  %v2723_v20 = vcombine.high %v2715_v58, %v2715_v58  ;;  %v2722_v11 = vrot.slane %v2708_v45, %v8103_v19  ;;  %v5162_v58 = vld [vmem:[%s10372_s6 + $0x44] sm:$0x7] }
 0x3e3   :  { %v2381_v8 = vpop.permute.xlu1 %2380 }
 0x3e4   :  { %v2407_v24 = vrot.slane %v2381_v8, %v8568_v51  ;;  %v2760_v9 = vrot.slane %v2731_v33, %v7757_v38  ;;  %v2745_v29 = vrot.slane %v2723_v20, %v8103_v19  ;;  %v2753_v10 = vcombine.high %v2731_v33, %v2731_v33 }
 0x3e5   :  { %v2724_v22 = vcombine.high %v2722_v11, %v2722_v11  ;;  %v2738_v45 = vrot.slane %v2722_v11, %v8103_v19 }
 0x3e6   :  { %v2432_v1 = vsel %vm1802_vm5, %v2407_v24, %v2403_v21  ;;  %v2797_v18 = vmul.f32 %v5161_v14, %v2760_v9  ;;  %v2764_v46 = vrot.slane %v2745_v29, %v7757_v38  ;;  %v2768_v20 = vrot.slane %v2753_v10, %v7757_v38  ;;  %v5166_v24 = vld [vmem:[%s10372_s6 + $0x54] sm:$0x7] }
 0x3e7   :  { %v2384_v8 = vpop.permute.xlu1 %2383  ;;  %v2752_v33 = vrot.slane %v2724_v22, %v8103_v19  ;;  %v2776_v23 = vrot.slane %v2738_v45, %v7757_v38  ;;  %v2755_v2 = vcombine.high %v2745_v29, %v2745_v29  ;;  %v5165_v19 = vld [vmem:[%s10372_s6 + $0x50] sm:$0x7] }
 0x3e8   :  { %v2411_v21 = vrot.slane %v2384_v8, %v8568_v51  ;;  %v2805_v47 = vsel %vm1509_vm3, %v2797_v18, 0.0  ;;  %v2798_v11 = vmul.f32 %v5162_v58, %v2764_v46  ;;  %v2799_v28 = vmul.f32 %v5163_v7, %v2768_v20  ;;  %v5168_v46 = vld [vmem:[%s10372_s6 + $0x5c] sm:$0x7] }
 0x3e9   :  { %v2780_v14 = vrot.slane %v2752_v33, %v7757_v38  ;;  %2806 = vadd.xlane.f32.xlu0 %v2805_v47  ;;  %v2756_v10 = vcombine.high %v2752_v33, %v2752_v33  ;;  %v2801_v58 = vmul.f32 %v5165_v19, %v2776_v23  ;;  %v2772_v7 = vrot.slane %v2755_v2, %v7757_v38  ;;  %v5167_v2 = vld [vmem:[%s10372_s6 + $0x58] sm:$0x7] }
 0x3ea   :  { %v2433_v9 = vsel %vm1804_vm6, %v2411_v21, %v2432_v1  ;;  %v2808_v22 = vsel %vm1509_vm3, %v2798_v11, 0.0  ;;  %v3149_v1 = vpop.f32.mrf.mxu1  ;;  %v2811_v47 = vsel %vm1509_vm3, %v2799_v28, 0.0  ;;  %v2754_v20 = vcombine.high %v2738_v45, %v2738_v45  ;;  %v5164_v21 = vld [vmem:[%s10372_s6 + $0x4c] sm:$0x7]  ;;  %s4961_s6 = sshll.u32 %s6613_s0, 4  ;;  %s4962_s6 = int_to_ptr.vmem [resolvable:$true] %s4961_s6 }
 0x3eb   :  { %v2387_v8 = vpop.permute.xlu1 %2386  ;;  %v2802_v36 = vmul.f32 %v5166_v24, %v2780_v14  ;;  %2809 = vadd.xlane.f32.xlu1 %v2808_v22  ;;  %v2788_v18 = vrot.slane %v2756_v10, %v7757_v38  ;;  %v2817_v10 = vsel %vm1509_vm3, %v2801_v58, 0.0  ;;  %v2800_v28 = vmul.f32 %v5164_v21, %v2772_v7  ;;  %v10441_v45 = vld [vmem:[#allocation35_spill] sm:$0xff]  ;;  %s6565_s3 = scalar_lea.vmem %s4962_s6, 16  ;;  %s6569_s1 = scalar_lea.vmem %s4962_s6, 32 }
 0x3ec   :  { %v2415_v29 = vrot.slane %v2387_v8, %v8568_v51  ;;  %v3151_v14 = vpop.f32.mrf.mxu1  ;;  %v2784_v23 = vrot.slane %v2754_v20, %v7757_v38  ;;  %v10445_v20 = vld [vmem:[#allocation32_spill] sm:$0xff]  ;;  %p6566_p0 = scmp.ne.s32.totalorder %s4962_s6, %s6565_s3  ;;  %p6570_p1 = scmp.lt.s32.totalorder %s4962_s6, %s4962_s6 }
 0x3ed   :  { %2812 = vadd.xlane.f32.xlu0 %v2811_v47  ;;  %v2820_v24 = vsel %vm1509_vm3, %v2802_v36, 0.0  ;;  %v2804_v11 = vmul.f32 %v5168_v46, %v2788_v18  ;;  %v10443_v36 = vld [vmem:[#allocation34_spill] sm:$0xff]  ;;  %v2814_v47 = vsel %vm1509_vm3, %v2800_v28, 0.0  ;;  %p6571_p2 = scmp.lt.s32.totalorder %s6569_s1, %s6565_s3 }
 0x3ee   :  { %v9021_v33 = vsel %vm1806_vm7, %v2415_v29, %v2433_v9  ;;  %v10442_v9 = vld [vmem:[#allocation31_spill] sm:$0xff]  ;;  %v3155_v22 = vpop.f32.mrf.mxu1  ;;  %v10444_v29 = vld [vmem:[#allocation30_spill] sm:$0xff]  ;;  %v2803_v58 = vmul.f32 %v5167_v2, %v2784_v23  ;;  %v1008_v21 = vadd.f32 %v10445_v20, %v10443_v36 }
 0x3ef   :  { %10440 = vst [vmem:[#allocation16_spill] sm:$0xff] %v9021_v33  ;;  %2821 = vadd.xlane.f32.xlu1 %v2820_v24  ;;  %v1004_v19 = vadd.f32 %v10442_v9, %v10441_v45  ;;  %v2826_v8 = vsel %vm1509_vm3, %v2804_v11, 0.0  ;;  %v1002_v46 = vadd.f32 %v10444_v29, %v10443_v36  ;;  %p6572_p3 = por %p6571_p2, %p6570_p1 }
 0x3f0   :  { %v3157_v24 = vpop.f32.mrf.mxu1  ;;  %v3241_v51 = vadd.f32 %v3155_v22, %v1008_v21  ;;  %v2823_v11 = vsel %vm1509_vm3, %v2803_v58, 0.0  ;;  %v10450_v58 = vld [vmem:[#allocation42_spill] sm:$0xff]  ;;  %v10451_v21 = vld [vmem:[#allocation44_spill] sm:$0xff] }
 0x3f1   :  { %2818 = vadd.xlane.f32.xlu0 %v2817_v10  ;;  %v3238_v18 = vadd.f32 %v3151_v14, %v1004_v19  ;;  %v3237_v7 = vadd.f32 %v3149_v1, %v1002_v46  ;;  %v10446_v10 = vld [vmem:[#allocation33_spill] sm:$0xff]  ;;  %v10448_v46 = vld [vmem:[#allocation40_spill] sm:$0xff]  ;;  %p6573_p4 = pnand %p6572_p3, %p6566_p0 }
 0x3f2   :  { %v1010_v9 = vadd.f32 %v10446_v10, %v10441_v45  ;;  %v5171_v14 = vmul.f32 -1.442695, %v3241_v51  ;;  %v10447_v45 = vld [vmem:[#allocation47_spill] sm:$0xff] }
 0x3f3   :  { %2827 = vadd.xlane.f32.xlu1 %v2826_v8  ;;  %v5172_v33 = vmul.f32 -1.442695, %v3238_v18  ;;  %v5170_v38 = vmul.f32 -1.442695, %v3237_v7  ;;  %v1127_v22 = vadd.f32 %v10448_v46, %v10447_v45 }
 0x3f4   :  { %v3242_v29 = vadd.f32 %v3157_v24, %v1010_v9  ;;  %v1133_v24 = vadd.f32 %v10451_v21, %v10447_v45 }
 0x3f5   :  { %2815 = vadd.xlane.f32.xlu0 %v2814_v47  ;;  %6235 = vpow2.f32 %v5172_v33  ;;  %v10449_v47 = vld [vmem:[#allocation49_spill] sm:$0xff] }
 0x3f6   :  { %6237 = vpow2.f32 %v5170_v38  ;;  %v5173_v28 = vmul.f32 -1.442695, %v3242_v29  ;;  %v1129_v7 = vadd.f32 %v10450_v58, %v10449_v47 }
 0x3f7   :  { %6239 = vpow2.f32 %v5171_v14 }
 0x3f8   :  { %6241 = vpow2.f32 %v5173_v28 }
 0x3f9   :  { %2824 = vadd.xlane.f32.xlu0 %v2823_v11  ;;  %v10452_v11 = vld [vmem:[#allocation46_spill] sm:$0xff] }
 0x3fa   :  { %v1135_v29 = vadd.f32 %v10452_v11, %v10449_v47 }
 0x402   :  { %v6236_v1 = vpop.eup %6235 }
 0x403   :  { %v6238_v23 = vpop.eup %6237  ;;  %v3263_v2 = vadd.f32 1.0, %v6236_v1 }
 0x404   :  { %v6240_v19 = vpop.eup %6239  ;;  %v3251_v8 = vadd.f32 1.0, %v6238_v23 }
 0x405   :  { %v6242_v36 = vpop.eup %6241  ;;  %6243 = vrcp.f32 %v3263_v2  ;;  %v3252_v33 = vadd.f32 1.0, %v6240_v19 }
 0x406   :  { %6245 = vrcp.f32 %v3251_v8  ;;  %v3264_v38 = vadd.f32 1.0, %v6242_v36 }
 0x40f   :  { %v3226_v18 = vpop.f32.mrf.mxu0 }
 0x410   :  { %v3239_v51 = vadd.f32 %v3226_v18, %v1127_v22 }
 0x411   :  { %v3228_v20 = vpop.f32.mrf.mxu0 }
 0x412   :  { %6247 = vtanh.f32 %v3239_v51  ;;  %v3240_v10 = vadd.f32 %v3228_v20, %v1129_v7  ;;  %v6244_v19 = vpop.eup %6243 }
 0x413   :  { %v3232_v9 = vpop.f32.mrf.mxu0  ;;  %6249 = vrcp.f32 %v3252_v33  ;;  %v6246_v8 = vpop.eup %6245  ;;  %v3283_v45 = vmul.f32 %v6244_v19, %v8165_v4  ;;  %v9184_v19 = vld [vmem:[%s10183_s13 + $0xa0] sm:$0xff] }
 0x414   :  { %v5174_v14 = vmul.f32 -1.442695, %v3240_v10  ;;  %v3243_v28 = vadd.f32 %v3232_v9, %v1133_v24  ;;  %6251 = vrcp.f32 %v3264_v38 }
 0x415   :  { %v3234_v1 = vpop.f32.mrf.mxu0 }
 0x416   :  { %6253 = vpow2.f32 %v5174_v14  ;;  %v3244_v23 = vadd.f32 %v3234_v1, %v1135_v29  ;;  %v9155_v1 = vld [vmem:[%s10183_s13 + $0xd8] sm:$0xff] }
 0x417   :  { %6255 = vtanh.f32 %v3243_v28  ;;  %v9149_v28 = vld [vmem:[%s10183_s13 + $0x60] sm:$0xff] }
 0x418   :  { %v5175_v2 = vmul.f32 -1.442695, %v3244_v23  ;;  %v9161_v23 = vld [vmem:[%s10183_s13 + $0x58] sm:$0xff] }
 0x41a   :  { %6257 = vpow2.f32 %v5175_v2  ;;  %v9167_v2 = vld [vmem:[%s10183_s13 + $0xd0] sm:$0xff] }
 0x41f   :  { %v6248_v36 = vpop.eup %6247 }
 0x420   :  { %v3285_v46 = vmul.f32 %v6248_v36, %v6246_v8  ;;  %v6250_v22 = vpop.eup %6249  ;;  %v9190_v8 = vld [vmem:[%s10183_s13 + $0x20] sm:$0xff]  ;;  %v9196_v36 = vld [vmem:[%s10183_s13 + $0x98] sm:$0xff] }
 0x421   :  { %v6252_v18 = vpop.eup %6251 }
 0x422   :  { %v9052_v58 = vadd.f32 %v3285_v46, %v3283_v45  ;;  %v3284_v51 = vmul.f32 %v6252_v18, %v8592_v17  ;;  %v9087_v17 = vld [vmem:[%s10183_s13 + $0x1f8] sm:$0xff]  ;;  %v9208_v46 = vld [vmem:[%s10183_s13 + $0x90] sm:$0xff]  ;;  %v9220_v18 = vld [vmem:[%s10183_s13 + $0x88] sm:$0xff] }
 0x423   :  { %v6254_v47 = vpop.eup %6253  ;;  %v9202_v45 = vld [vmem:[%s10183_s13 + $0x18] sm:$0xff]  ;;  %10466 = vst [vmem:[#allocation17_spill] sm:$0xff] %v9208_v46  ;;  %10468 = vst [vmem:[#allocation19_spill] sm:$0xff] %v9220_v18 }
 0x424   :  { %v6256_v7 = vpop.eup %6255  ;;  %v3277_v33 = vadd.f32 1.0, %v6254_v47  ;;  %6259 = vtanh.f32 %v9052_v58  ;;  %v9226_v47 = vld [vmem:[%s10183_s13 + $0x8] sm:$0xff] }
 0x425   :  { %v3286_v38 = vmul.f32 %v6256_v7, %v6250_v22  ;;  %v9214_v22 = vld [vmem:[%s10183_s13 + $0x10] sm:$0xff]  ;;  %10469 = vst [vmem:[#allocation77_spill] sm:$0xff] %v9226_v47  ;;  %v9232_v7 = vld [vmem:[%s10183_s13 + $0x80] sm:$0xff] }
 0x426   :  { %6261 = vrcp.f32 %v3277_v33  ;;  %10467 = vst [vmem:[#allocation18_spill] sm:$0xff] %v9214_v22  ;;  %10470 = vst [vmem:[#allocation21_spill] sm:$0xff] %v9232_v7  ;;  %v9238_v33 = vld [vmem:[%s10183_s13] sm:$0xff] }
 0x427   :  { %v6258_v20 = vpop.eup %6257  ;;  %v9056_v21 = vadd.f32 %v3286_v38, %v3284_v51  ;;  %10471 = vst [vmem:[#allocation78_spill] sm:$0xff] %v9238_v33  ;;  %v9245_v51 = vld [vmem:[%s10186_s16] ss:$0 sm:$0xff] }
 0x428   :  { %v3278_v24 = vadd.f32 1.0, %v6258_v20  ;;  %10472 = vst [vmem:[#allocation23_spill] sm:$0xff] %v9245_v51 }
 0x429   :  { %6263 = vtanh.f32 %v9056_v21 }
 0x42a   :  { %6265 = vrcp.f32 %v3278_v24 }
 0x431   :  { %v6260_v4 = vpop.eup %6259 }
 0x433   :  { %v6262_v10 = vpop.eup %6261 }
 0x434   :  { %v3291_v9 = vmul.f32 %v6262_v10, %v6260_v4 }
 0x436   :  { %v6264_v11 = vpop.eup %6263  ;;  %6036 = vmatprep.mubr.f32.mxu1 %v3291_v9  ;;  %5680 = vmatprep.mubr.f32.mxu0 %v3291_v9 }
 0x437   :  { %v6266_v29 = vpop.eup %6265  ;;  %5681 = vmatmul.mubr.f32.vlgmr.msra.gmra.mxu0 %v3291_v9 }
 0x438   :  { %v3292_v14 = vmul.f32 %v6266_v29, %v6264_v11  ;;  %6040 = vmatpush3.xpose.msra.mxu0 %v8929_v26 }
 0x439   :  { %6041 = vmatprep.subr.mxu0 %v8937_v61 }
 0x43a   :  { %6037 = vmatmul.mubr.f32.vlgmr.msra.gmra.mxu1 %v3292_v14  ;;  %5682 = vmatprep.mubr.f32.mxu0 %v3292_v14 }
 0x43b   :  { %5685 = vmatpush3.xpose.msra.mxu1 %v8600_v12  ;;  %5683 = vmatmul.mubr.f32.gmra.mxu0 %v3292_v14  ;;  %v10453_v12 = vld [vmem:[#allocation89_spill] sm:$0xff] }
 0x43c   :  { %5716 = vmatprep.mubr.f32.mxu1 %v3291_v9  ;;  %5686 = vmatprep.subr.mxu1 %v8605_v15  ;;  %v10454_v15 = vld [vmem:[#allocation90_spill] sm:$0xff] }
 0x43d   :  { %6042 = vmatpush3.xpose.msra.mxu0 %v8937_v61 }
 0x43e   :  { %6043 = vmatprep.subr.mxu0 %v8944_v56 }
 0x43f   :  { %5687 = vmatpush3.xpose.msra.mxu1 %v8616_v52  ;;  %v10455_v52 = vld [vmem:[#allocation91_spill] sm:$0xff] }
 0x440   :  { %5688 = vmatprep.subr.mxu1 %v8621_v41  ;;  %v10456_v41 = vld [vmem:[#allocation92_spill] sm:$0xff] }
 0x441   :  { %6044 = vmatpush3.xpose.msra.mxu0 %v8944_v56 }
 0x442   :  { %6045 = vmatprep.subr.mxu0 %v8951_v43 }
 0x443   :  { %5689 = vmatpush3.xpose.msra.mxu1 %v8628_v0  ;;  %v10457_v0 = vld [vmem:[#allocation93_spill] sm:$0xff] }
 0x444   :  { %5690 = vmatprep.subr.mxu1 %v8633_v48  ;;  %v10458_v48 = vld [vmem:[#allocation94_spill] sm:$0xff] }
 0x445   :  { %6046 = vmatpush3.xpose.msra.mxu0 %v8951_v43 }
 0x446   :  { %6047 = vmatprep.subr.mxu0 %v8957_v27 }
 0x447   :  { %5691 = vmatpush3.xpose.msra.mxu1 %v8640_v40  ;;  %v10459_v40 = vld [vmem:[#allocation95_spill] sm:$0xff] }
 0x448   :  { %5692 = vmatprep.subr.mxu1 %v8645_v59  ;;  %v10460_v59 = vld [vmem:[#allocation96_spill] sm:$0xff] }
 0x449   :  { %6048 = vmatpush3.xpose.msra.mxu0 %v8957_v27 }
 0x44a   :  { %6049 = vmatprep.subr.mxu0 %v8964_v35 }
 0x44b   :  { %5693 = vmatpush3.xpose.msra.mxu1 %v8652_v62  ;;  %v10461_v62 = vld [vmem:[#allocation97_spill] sm:$0xff] }
 0x44c   :  { %5694 = vmatprep.subr.mxu1 %v8657_v25  ;;  %v10462_v25 = vld [vmem:[#allocation98_spill] sm:$0xff] }
 0x44d   :  { %6050 = vmatpush3.xpose.msra.mxu0 %v8964_v35 }
 0x44e   :  { %6051 = vmatprep.subr.mxu0 %v8971_v39 }
 0x44f   :  { %5695 = vmatpush3.xpose.msra.mxu1 %v8664_v13  ;;  %v10463_v13 = vld [vmem:[#allocation99_spill] sm:$0xff] }
 0x450   :  { %5696 = vmatprep.subr.mxu1 %v8669_v60  ;;  %v10464_v60 = vld [vmem:[#allocation100_spill] sm:$0xff] }
 0x451   :  { %6052 = vmatpush3.xpose.msra.mxu0 %v8971_v39 }
 0x452   :  { %5765 = vmatprep.subr.mxu0 %v9087_v17 }
 0x453   :  { %5697 = vmatpush3.xpose.msra.mxu1 %v8676_v30  ;;  %v10465_v30 = vld [vmem:[#allocation101_spill] sm:$0xff] }
 0x454   :  { %5698 = vmatprep.subr.mxu1 %v8681_v53  ;;  %v9113_v53 = vld [vmem:[%s10183_s13 + $0x78] sm:$0xff] }
 0x457   :  { %5699 = vmatpush3.xpose.msra.mxu1 %v8688_v63  ;;  %v9119_v63 = vld [vmem:[%s10183_s13 + $0xf0] sm:$0xff] }
 0x458   :  { %5700 = vmatprep.subr.mxu1 %v8693_v6  ;;  %v9125_v6 = vld [vmem:[%s10183_s13 + $0x70] sm:$0xff] }
 0x45b   :  { %5701 = vmatpush3.xpose.msra.mxu1 %v10453_v12  ;;  %v10475_v12 = vld [vmem:[#allocation37_spill] sm:$0xff] }
 0x45c   :  { %5702 = vmatprep.subr.mxu1 %v10454_v15 }
 0x45f   :  { %5703 = vmatpush3.xpose.msra.mxu1 %v10455_v52  ;;  %v10476_v52 = vld [vmem:[#allocation36_spill] sm:$0xff] }
 0x460   :  { %5704 = vmatprep.subr.mxu1 %v10456_v41 }
 0x463   :  { %5705 = vmatpush3.xpose.msra.mxu1 %v10457_v0 }
 0x464   :  { %5706 = vmatprep.subr.mxu1 %v10458_v48 }
 0x467   :  { %5707 = vmatpush3.xpose.msra.mxu1 %v10459_v40  ;;  %v10477_v40 = vld [vmem:[#allocation38_spill] sm:$0xff] }
 0x468   :  { %5708 = vmatprep.subr.mxu1 %v10460_v59 }
 0x46b   :  { %5709 = vmatpush3.xpose.msra.mxu1 %v10461_v62 }
 0x46c   :  { %5710 = vmatprep.subr.mxu1 %v10462_v25  ;;  %v10478_v25 = vld [vmem:[#allocation39_spill] sm:$0xff] }
 0x46f   :  { %5711 = vmatpush3.xpose.msra.mxu1 %v8774_v50  ;;  %v9131_v50 = vld [vmem:[%s10183_s13 + $0xe8] sm:$0xff] }
 0x470   :  { %5712 = vmatprep.subr.mxu1 %v8780_v57  ;;  %v9137_v57 = vld [vmem:[%s10183_s13 + $0x68] sm:$0xff] }
 0x473   :  { %5713 = vmatpush3.xpose.msra.mxu1 %v8790_v44  ;;  %v9143_v44 = vld [vmem:[%s10183_s13 + $0xe0] sm:$0xff] }
 0x474   :  { %5714 = vmatprep.subr.mxu1 %v10463_v13 }
 0x477   :  { %5715 = vmatpush3.xpose.msra.mxu1 %v10464_v60 }
 0x478   :  { %5729 = vmatprep.subr.mxu1 %v10465_v30 }
 0x47a   :  { %5717 = vmatmul.mubr.f32.vlgmr.msra.gmra.mxu1 %v3291_v9 }
 0x47b   :  { %5718 = vmatprep.mubr.f32.mxu1 %v3292_v14  ;;  %5730 = vmatpush3.xpose.msra.mxu1 %v9113_v53 }
 0x47c   :  { %5731 = vmatprep.subr.mxu1 %v9119_v63 }
 0x47e   :  { %5719 = vmatmul.mubr.f32.gmra.mxu1 %v3292_v14 }
 0x47f   :  { %5732 = vmatpush3.xpose.msra.mxu1 %v9125_v6 }
 0x480   :  { %5733 = vmatprep.subr.mxu1 %v9131_v50 }
 0x483   :  { %5734 = vmatpush3.xpose.msra.mxu1 %v9137_v57 }
 0x484   :  { %5735 = vmatprep.subr.mxu1 %v9143_v44 }
 0x487   :  { %5736 = vmatpush3.xpose.msra.mxu1 %v9149_v28 }
 0x488   :  { %5737 = vmatprep.subr.mxu1 %v9155_v1 }
 0x48b   :  { %5738 = vmatpush3.xpose.msra.mxu1 %v9161_v23 }
 0x48c   :  { %5739 = vmatprep.subr.mxu1 %v9167_v2 }
 0x48f   :  { %5740 = vmatpush3.xpose.msra.mxu1 %v8845_v37 }
 0x490   :  { %5741 = vmatprep.subr.mxu1 %v8852_v31 }
 0x493   :  { %5742 = vmatpush3.xpose.msra.mxu1 %v8861_v3 }
 0x494   :  { %5743 = vmatprep.subr.mxu1 %v8868_v54 }
 0x497   :  { %5744 = vmatpush3.xpose.msra.mxu1 %v8874_v49 }
 0x498   :  { %5745 = vmatprep.subr.mxu1 %v8882_v42 }
 0x49b   :  { %5746 = vmatpush3.xpose.msra.mxu1 %v8888_v32 }
 0x49c   :  { %5747 = vmatprep.subr.mxu1 %v8895_v55 }
 0x49f   :  { %5748 = vmatpush3.xpose.msra.mxu1 %v8901_v34 }
 0x4a0   :  { %5749 = vmatprep.subr.mxu1 %v8907_v16 }
 0x4a3   :  { %5750 = vmatpush3.xpose.msra.mxu1 %v8913_v5 }
 0x4a4   :  { %5751 = vmatprep.subr.mxu1 %v9184_v19 }
 0x4a7   :  { %5752 = vmatpush3.xpose.msra.mxu1 %v9190_v8 }
 0x4a8   :  { %5753 = vmatprep.subr.mxu1 %v9196_v36 }
 0x4ab   :  { %5754 = vmatpush3.xpose.msra.mxu1 %v9202_v45 }
 0x4ac   :  { %5755 = vmatprep.subr.mxu1 %v9208_v46 }
 0x4af   :  { %5756 = vmatpush3.xpose.msra.mxu1 %v9214_v22 }
 0x4b0   :  { %5757 = vmatprep.subr.mxu1 %v9220_v18 }
 0x4b3   :  { %5758 = vmatpush3.xpose.msra.mxu1 %v9226_v47 }
 0x4b4   :  { %5759 = vmatprep.subr.mxu1 %v9232_v7 }
 0x4b7   :  { %5760 = vmatpush3.xpose.msra.mxu1 %v9238_v33 }
 0x4b8   :  { %6056 = vmatprep.subr.mxu1 %v8929_v26 }
 0x4f7   :  { %v3528_v11 = vpop.f32.mrf.mxu0 }
 0x4f8   :  { %v3616_v41 = vadd.f32 %v3528_v11, %v10476_v52  ;;  %v10479_v52 = vld [vmem:[#allocation51_spill] sm:$0xff] }
 0x4f9   :  { %v3530_v29 = vpop.f32.mrf.mxu0 }
 0x4fa   :  { %v6038_v38 = vpop.f32.mrf.mxu1  ;;  %v3617_v15 = vadd.f32 %v3530_v29, %v10475_v12  ;;  %v5181_v62 = vmul.f32 -1.442695, %v3616_v41 }
 0x4fb   :  { %v9248_v20 = vadd.f32 %v6038_v38, %v9245_v51  ;;  %v3534_v14 = vpop.f32.mrf.mxu0 }
 0x4fc   :  { %v3365_v24 = vpop.f32.mrf.mxu1  ;;  %v5183_v48 = vmul.f32 -1.442695, %v3617_v15  ;;  %v3620_v59 = vadd.f32 %v3534_v14, %v10477_v40 }
 0x4fd   :  { %10473 = vst [vmem:[#allocation24_spill] sm:$0xff] %v9248_v20  ;;  %v9251_v4 = vadd.f32 %v9245_v51, %v3365_v24  ;;  %v3378_v10 = vsel %vm3374_vm13, %v9248_v20, -inf  ;;  %v3536_v0 = vpop.f32.mrf.mxu0 }
 0x4fe   :  { %3379 = vmax.xlane.f32.xlu1 %v3378_v10  ;;  %v3621_v13 = vadd.f32 %v3536_v0, %v10478_v25  ;;  %6267 = vpow2.f32 %v5183_v48  ;;  %v5182_v60 = vmul.f32 -1.442695, %v3620_v59  ;;  %v10480_v48 = vld [vmem:[#allocation53_spill] sm:$0xff]  ;;  %v10481_v25 = vld [vmem:[#allocation55_spill] sm:$0xff] }
 0x4ff   :  { %10474 = vst [vmem:[#allocation29_spill] sm:$0xff] %v9251_v4  ;;  %v3375_v9 = vsel %vm3374_vm13, %v9251_v4, -inf  ;;  %6269 = vpow2.f32 %v5181_v62 }
 0x500   :  { %3376 = vmax.xlane.f32.xlu0 %v3375_v9  ;;  %v5184_v30 = vmul.f32 -1.442695, %v3621_v13  ;;  %6271 = vpow2.f32 %v5182_v60 }
 0x502   :  { %6273 = vpow2.f32 %v5184_v30  ;;  %v10482_v30 = vld [vmem:[#allocation57_spill] sm:$0xff] }
 0x50b   :  { %v6268_v38 = vpop.eup %6267 }
 0x50c   :  { %v6270_v24 = vpop.eup %6269  ;;  %v3642_v10 = vadd.f32 1.0, %v6268_v38 }
 0x50d   :  { %v6272_v9 = vpop.eup %6271  ;;  %v3630_v29 = vadd.f32 1.0, %v6270_v24 }
 0x50e   :  { %6275 = vrcp.f32 %v3642_v10  ;;  %v3631_v15 = vadd.f32 1.0, %v6272_v9 }
 0x50f   :  { %v6274_v12 = vpop.eup %6273  ;;  %6277 = vrcp.f32 %v3630_v29 }
 0x510   :  { %v3643_v41 = vadd.f32 1.0, %v6274_v12 }
 0x51b   :  { %v6276_v10 = vpop.eup %6275 }
 0x51c   :  { %v6278_v9 = vpop.eup %6277  ;;  %v3662_v12 = vmul.f32 %v6276_v10, %v9052_v58  ;;  %v9287_v10 = vld [vmem:[%s10183_s13 + $0x178] sm:$0xff] }
 0x53a   :  { %v3605_v11 = vpop.f32.mrf.mxu1 }
 0x53b   :  { %v3618_v14 = vadd.f32 %v3605_v11, %v10479_v52 }
 0x53c   :  { %v3607_v0 = vpop.f32.mrf.mxu1 }
 0x53d   :  { %6279 = vtanh.f32 %v3618_v14  ;;  %v3619_v40 = vadd.f32 %v3607_v0, %v10480_v48 }
 0x53e   :  { %v3611_v59 = vpop.f32.mrf.mxu1  ;;  %6281 = vrcp.f32 %v3631_v15 }
 0x53f   :  { %v5185_v62 = vmul.f32 -1.442695, %v3619_v40  ;;  %v3622_v13 = vadd.f32 %v3611_v59, %v10481_v25  ;;  %6283 = vrcp.f32 %v3643_v41 }
 0x540   :  { %v3613_v60 = vpop.f32.mrf.mxu1 }
 0x541   :  { %6285 = vpow2.f32 %v5185_v62  ;;  %v3623_v38 = vadd.f32 %v3613_v60, %v10482_v30 }
 0x542   :  { %6287 = vtanh.f32 %v3622_v13 }
 0x543   :  { %v5186_v24 = vmul.f32 -1.442695, %v3623_v38 }
 0x545   :  { %6289 = vpow2.f32 %v5186_v24 }
 0x54a   :  { %v6280_v29 = vpop.eup %6279 }
 0x54b   :  { %v3664_v11 = vmul.f32 %v6280_v29, %v6278_v9  ;;  %v6282_v52 = vpop.eup %6281  ;;  %v9295_v9 = vld [vmem:[%s10183_s13 + $0x1f0] sm:$0xff]  ;;  %v9299_v29 = vpop.permute.xlu0 %2389 }
 0x54c   :  { %v6284_v14 = vpop.eup %6283  ;;  %10483 = vst [vmem:[#allocation35_spill] sm:$0xff] %v9299_v29 }
 0x54d   :  { %v9266_v15 = vadd.f32 %v3664_v11, %v3662_v12  ;;  %v3663_v40 = vmul.f32 %v6284_v14, %v9056_v21  ;;  %v9305_v12 = vld [vmem:[%s10183_s13 + $0x170] sm:$0xff]  ;;  %v9311_v11 = vld [vmem:[%s10183_s13 + $0x1e8] sm:$0xff]  ;;  %v9327_v14 = vld [vmem:[%s10183_s13 + $0x1e0] sm:$0xff] }
 0x54e   :  { %v6286_v0 = vpop.eup %6285 }
 0x54f   :  { %v6288_v48 = vpop.eup %6287  ;;  %v3656_v41 = vadd.f32 1.0, %v6286_v0  ;;  %6291 = vtanh.f32 %v9266_v15  ;;  %v9338_v0 = vpop.permute.xlu1 %2392 }
 0x550   :  { %v3665_v59 = vmul.f32 %v6288_v48, %v6282_v52  ;;  %v9321_v52 = vld [vmem:[%s10183_s13 + $0x168] sm:$0xff]  ;;  %10485 = vst [vmem:[#allocation34_spill] sm:$0xff] %v9338_v0  ;;  %v9409_v0 = vld [vmem:[%s10183_s13 + $0x1b8] sm:$0xff] }
 0x551   :  { %6293 = vrcp.f32 %v3656_v41  ;;  %v9345_v41 = vld [vmem:[%s10183_s13 + $0x1d8] sm:$0xff] }
 0x552   :  { %v6290_v62 = vpop.eup %6289  ;;  %v9270_v25 = vadd.f32 %v3665_v59, %v3663_v40  ;;  %v9361_v59 = vld [vmem:[%s10183_s13 + $0x1d0] sm:$0xff] }
 0x553   :  { %v3657_v13 = vadd.f32 1.0, %v6290_v62  ;;  %v9356_v40 = vpop.xlane.xlu1 %2809  ;;  %v9371_v62 = vld [vmem:[%s10183_s13 + $0x150] sm:$0xff] }
 0x554   :  { %6295 = vtanh.f32 %v9270_v25  ;;  %10487 = vst [vmem:[#allocation32_spill] sm:$0xff] %v9356_v40 }
 0x555   :  { %6297 = vrcp.f32 %v3657_v13  ;;  %v9377_v13 = vld [vmem:[%s10183_s13 + $0x1c8] sm:$0xff] }
 0x55c   :  { %v6292_v58 = vpop.eup %6291 }
 0x55e   :  { %v6294_v60 = vpop.eup %6293 }
 0x55f   :  { %v9273_v30 = vmul.f32 %v6294_v60, %v6292_v58  ;;  %v9387_v58 = vld [vmem:[%s10183_s13 + $0x148] sm:$0xff] }
 0x561   :  { %v6296_v38 = vpop.eup %6295  ;;  %6053 = vmatprep.mubr.f32.mxu0 %v9273_v30  ;;  %5761 = vmatprep.mubr.f32.mxu1 %v9273_v30 }
 0x562   :  { %v6298_v24 = vpop.eup %6297  ;;  %5762 = vmatmul.mubr.f32.vlgmr.msra.gmra.mxu1 %v9273_v30 }
 0x563   :  { %v9278_v21 = vmul.f32 %v6298_v24, %v6296_v38  ;;  %6057 = vmatpush3.xpose.msra.mxu1 %v8929_v26  ;;  %v9395_v38 = vld [vmem:[%s10183_s13 + $0x1c0] sm:$0xff] }
 0x564   :  { %6058 = vmatprep.subr.mxu1 %v8937_v61 }
 0x565   :  { %6054 = vmatmul.mubr.f32.vlgmr.msra.gmra.mxu0 %v9278_v21  ;;  %5763 = vmatprep.mubr.f32.mxu1 %v9278_v21 }
 0x566   :  { %5766 = vmatpush3.xpose.msra.mxu0 %v9287_v10  ;;  %5764 = vmatmul.mubr.f32.gmra.mxu1 %v9278_v21 }
 0x567   :  { %5797 = vmatprep.mubr.f32.mxu0 %v9273_v30  ;;  %5767 = vmatprep.subr.mxu0 %v9295_v9 }
 0x568   :  { %6059 = vmatpush3.xpose.msra.mxu1 %v8937_v61  ;;  %v9315_v61 = vpop.xlane.xlu0 %2806 }
 0x569   :  { %6060 = vmatprep.subr.mxu1 %v8944_v56  ;;  %10484 = vst [vmem:[#allocation31_spill] sm:$0xff] %v9315_v61 }
 0x56a   :  { %5768 = vmatpush3.xpose.msra.mxu0 %v9305_v12 }
 0x56b   :  { %5769 = vmatprep.subr.mxu0 %v9311_v11 }
 0x56c   :  { %6061 = vmatpush3.xpose.msra.mxu1 %v8944_v56  ;;  %v9335_v56 = vld [vmem:[%s10183_s13 + $0x160] sm:$0xff]  ;;  %v9340_v48 = vpop.xlane.xlu0 %2812 }
 0x56d   :  { %6062 = vmatprep.subr.mxu1 %v8951_v43  ;;  %10486 = vst [vmem:[#allocation30_spill] sm:$0xff] %v9340_v48 }
 0x56e   :  { %5770 = vmatpush3.xpose.msra.mxu0 %v9321_v52 }
 0x56f   :  { %5771 = vmatprep.subr.mxu0 %v9327_v14 }
 0x570   :  { %6063 = vmatpush3.xpose.msra.mxu1 %v8951_v43  ;;  %v9353_v43 = vld [vmem:[%s10183_s13 + $0x158] sm:$0xff] }
 0x571   :  { %6064 = vmatprep.subr.mxu1 %v8957_v27 }
 0x572   :  { %5772 = vmatpush3.xpose.msra.mxu0 %v9335_v56 }
 0x573   :  { %5773 = vmatprep.subr.mxu0 %v9345_v41 }
 0x574   :  { %6065 = vmatpush3.xpose.msra.mxu1 %v8957_v27  ;;  %v9365_v27 = vpop.xlane.xlu0 %2818 }
 0x575   :  { %6066 = vmatprep.subr.mxu1 %v8964_v35  ;;  %10488 = vst [vmem:[#allocation33_spill] sm:$0xff] %v9365_v27  ;;  %v9417_v27 = vld [vmem:[%s10183_s13 + $0x138] sm:$0xff] }
 0x576   :  { %5774 = vmatpush3.xpose.msra.mxu0 %v9353_v43 }
 0x577   :  { %5775 = vmatprep.subr.mxu0 %v9361_v59 }
 0x578   :  { %6067 = vmatpush3.xpose.msra.mxu1 %v8964_v35  ;;  %v9381_v35 = vpop.xlane.xlu1 %2821  ;;  %v9390_v60 = vpop.xlane.xlu0 %2815 }
 0x579   :  { %6068 = vmatprep.subr.mxu1 %v8971_v39  ;;  %10489 = vst [vmem:[#allocation47_spill] sm:$0xff] %v9381_v35  ;;  %10490 = vst [vmem:[#allocation40_spill] sm:$0xff] %v9390_v60  ;;  %v9435_v60 = vld [vmem:[%s10183_s13 + $0x130] sm:$0xff] }
 0x57a   :  { %5776 = vmatpush3.xpose.msra.mxu0 %v9371_v62 }
 0x57b   :  { %5777 = vmatprep.subr.mxu0 %v9377_v13 }
 0x57c   :  { %6069 = vmatpush3.xpose.msra.mxu1 %v8971_v39  ;;  %v9401_v39 = vld [vmem:[%s10183_s13 + $0x140] sm:$0xff]  ;;  %v9404_v24 = vpop.xlane.xlu1 %2827  ;;  %v9412_v29 = vpop.xlane.xlu0 %2824 }
 0x57d   :  { %5846 = vmatprep.subr.mxu1 %v9087_v17  ;;  %10491 = vst [vmem:[#allocation49_spill] sm:$0xff] %v9404_v24  ;;  %10492 = vst [vmem:[#allocation42_spill] sm:$0xff] %v9412_v29  ;;  %v9425_v24 = vld [vmem:[%s10183_s13 + $0x1b0] sm:$0xff] }
 0x57e   :  { %5778 = vmatpush3.xpose.msra.mxu0 %v9387_v58  ;;  %10494 = vst [vmem:[#allocation46_spill] sm:$0xff] %v9425_v24 }
 0x57f   :  { %5779 = vmatprep.subr.mxu0 %v9395_v38 }
 0x582   :  { %5780 = vmatpush3.xpose.msra.mxu0 %v9401_v39 }
 0x583   :  { %5781 = vmatprep.subr.mxu0 %v9409_v0 }
 0x586   :  { %5782 = vmatpush3.xpose.msra.mxu0 %v9417_v27 }
 0x587   :  { %v9420_v48 = vpop.xlane.xlu1 %3379  ;;  %5783 = vmatprep.subr.mxu0 %v9425_v24  ;;  %v9443_v24 = vld [vmem:[%s10183_s13 + $0x1a8] sm:$0xff] }
 0x588   :  { %10493 = vst [vmem:[#allocation44_spill] sm:$0xff] %v9420_v48  ;;  %v3382_v61 = vsub.f32 %v9248_v20, %v9420_v48 }
 0x589   :  { %v9430_v29 = vpop.xlane.xlu0 %3376 }
 0x58a   :  { %10495 = vst [vmem:[#allocation89_spill] sm:$0xff] %v9430_v29  ;;  %v3385_v35 = vmul.f32 1.442695, %v3382_v61  ;;  %5784 = vmatpush3.xpose.msra.mxu0 %v9435_v60  ;;  %v3381_v40 = vsub.f32 %v9251_v4, %v9430_v29  ;;  %v9449_v61 = vld [vmem:[%s10183_s13 + $0x128] sm:$0xff]  ;;  %v9455_v4 = vld [vmem:[%s10183_s13 + $0x1a0] sm:$0xff]  ;;  %v9479_v29 = vld [vmem:[%s10183_s13 + $0x190] sm:$0xff] }
 0x58b   :  { %5785 = vmatprep.subr.mxu0 %v9443_v24  ;;  %10496 = vst [vmem:[#allocation90_spill] sm:$0xff] %v9449_v61  ;;  %10497 = vst [vmem:[#allocation91_spill] sm:$0xff] %v9455_v4 }
 0x58c   :  { %6299 = vpow2.f32 %v3385_v35  ;;  %v3383_v20 = vmul.f32 1.442695, %v3381_v40  ;;  %v9461_v35 = vld [vmem:[%s10183_s13 + $0x120] sm:$0xff]  ;;  %v9473_v40 = vld [vmem:[%s10183_s13 + $0x118] sm:$0xff]  ;;  %10501 = vst [vmem:[#allocation95_spill] sm:$0xff] %v9479_v29 }
 0x58d   :  { %10498 = vst [vmem:[#allocation92_spill] sm:$0xff] %v9461_v35  ;;  %10500 = vst [vmem:[#allocation94_spill] sm:$0xff] %v9473_v40 }
 0x58e   :  { %6301 = vpow2.f32 %v3383_v20  ;;  %5786 = vmatpush3.xpose.msra.mxu0 %v9449_v61  ;;  %v9467_v20 = vld [vmem:[%s10183_s13 + $0x198] sm:$0xff]  ;;  %v9499_v61 = vld [vmem:[%s10183_s13 + $0x108] sm:$0xff] }
 0x58f   :  { %5787 = vmatprep.subr.mxu0 %v9455_v4  ;;  %10499 = vst [vmem:[#allocation93_spill] sm:$0xff] %v9467_v20 }
 0x592   :  { %5788 = vmatpush3.xpose.msra.mxu0 %v9461_v35  ;;  %v9485_v35 = vld [vmem:[%s10183_s13 + $0x110] sm:$0xff] }
 0x593   :  { %5789 = vmatprep.subr.mxu0 %v9467_v20 }
 0x596   :  { %5790 = vmatpush3.xpose.msra.mxu0 %v9473_v40  ;;  %v9492_v40 = vld [vmem:[%s10183_s13 + $0x188] sm:$0xff] }
 0x597   :  { %5791 = vmatprep.subr.mxu0 %v9479_v29 }
 0x599   :  { %v6300_v48 = vpop.eup %6299 }
 0x59a   :  { %5792 = vmatpush3.xpose.msra.mxu0 %v9485_v35  ;;  %v3390_v20 = vsel %vm3374_vm13, %v6300_v48, 0.0  ;;  %v9505_v48 = vld [vmem:[%s10183_s13 + $0x180] sm:$0xff] }
 0x59b   :  { %v6302_v4 = vpop.eup %6301  ;;  %3391 = vadd.xlane.f32.xlu1 %v3390_v20  ;;  %5793 = vmatprep.subr.mxu0 %v9492_v40  ;;  %v9511_v20 = vld [vmem:[%s10183_s13 + $0x100] sm:$0xff] }
 0x59c   :  { %v3387_v29 = vsel %vm3374_vm13, %v6302_v4, 0.0  ;;  %v9517_v4 = vld [vmem:[%s10183_s13 + $0xf8] sm:$0xff] }
 0x59d   :  { %3388 = vadd.xlane.f32.xlu0 %v3387_v29 }
 0x59e   :  { %5794 = vmatpush3.xpose.msra.mxu0 %v9499_v61 }
 0x59f   :  { %5795 = vmatprep.subr.mxu0 %v9505_v48 }
 0x5a2   :  { %5796 = vmatpush3.xpose.msra.mxu0 %v9511_v20 }
 0x5a3   :  { %5810 = vmatprep.subr.mxu0 %v9517_v4 }
 0x5a5   :  { %5798 = vmatmul.mubr.f32.vlgmr.msra.gmra.mxu0 %v9273_v30 }
 0x5a6   :  { %5799 = vmatprep.mubr.f32.mxu0 %v9278_v21  ;;  %5811 = vmatpush3.xpose.msra.mxu0 %v9113_v53 }
 0x5a7   :  { %5812 = vmatprep.subr.mxu0 %v9119_v63 }
 0x5a9   :  { %5800 = vmatmul.mubr.f32.gmra.mxu0 %v9278_v21 }
 0x5aa   :  { %5813 = vmatpush3.xpose.msra.mxu0 %v9125_v6 }
 0x5ab   :  { %5814 = vmatprep.subr.mxu0 %v9131_v50 }
 0x5ae   :  { %5815 = vmatpush3.xpose.msra.mxu0 %v9137_v57 }
 0x5af   :  { %5816 = vmatprep.subr.mxu0 %v9143_v44 }
 0x5b2   :  { %5817 = vmatpush3.xpose.msra.mxu0 %v9149_v28 }
 0x5b3   :  { %5818 = vmatprep.subr.mxu0 %v9155_v1 }
 0x5b6   :  { %5819 = vmatpush3.xpose.msra.mxu0 %v9161_v23 }
 0x5b7   :  { %5820 = vmatprep.subr.mxu0 %v9167_v2 }
 0x5ba   :  { %5821 = vmatpush3.xpose.msra.mxu0 %v8845_v37 }
 0x5bb   :  { %5822 = vmatprep.subr.mxu0 %v8852_v31 }
 0x5be   :  { %5823 = vmatpush3.xpose.msra.mxu0 %v8861_v3 }
 0x5bf   :  { %5824 = vmatprep.subr.mxu0 %v8868_v54 }
 0x5c2   :  { %5825 = vmatpush3.xpose.msra.mxu0 %v8874_v49 }
 0x5c3   :  { %5826 = vmatprep.subr.mxu0 %v8882_v42 }
 0x5c6   :  { %5827 = vmatpush3.xpose.msra.mxu0 %v8888_v32 }
 0x5c7   :  { %5828 = vmatprep.subr.mxu0 %v8895_v55 }
 0x5ca   :  { %5829 = vmatpush3.xpose.msra.mxu0 %v8901_v34 }
 0x5cb   :  { %5830 = vmatprep.subr.mxu0 %v8907_v16  ;;  %v10504_v16 = vld [vmem:[#allocation43_spill] sm:$0xff] }
 0x5ce   :  { %5831 = vmatpush3.xpose.msra.mxu0 %v8913_v5 }
 0x5cf   :  { %5832 = vmatprep.subr.mxu0 %v9184_v19 }
 0x5d2   :  { %5833 = vmatpush3.xpose.msra.mxu0 %v9190_v8 }
 0x5d3   :  { %5834 = vmatprep.subr.mxu0 %v9196_v36 }
 0x5d6   :  { %5835 = vmatpush3.xpose.msra.mxu0 %v9202_v45 }
 0x5d7   :  { %5836 = vmatprep.subr.mxu0 %v9208_v46 }
 0x5da   :  { %5837 = vmatpush3.xpose.msra.mxu0 %v9214_v22 }
 0x5db   :  { %5838 = vmatprep.subr.mxu0 %v9220_v18 }
 0x5de   :  { %5839 = vmatpush3.xpose.msra.mxu0 %v9226_v47 }
 0x5df   :  { %5840 = vmatprep.subr.mxu0 %v9232_v7 }
 0x5e2   :  { %5841 = vmatpush3.xpose.msra.mxu0 %v9238_v33  ;;  %v10507_v33 = vld [vmem:[#allocation48_spill] sm:$0xff] }
 0x5e3   :  { %6073 = vmatprep.subr.mxu0 %v8929_v26  ;;  %v10505_v26 = vld [vmem:[#allocation41_spill] sm:$0xff] }
 0x622   :  { %v3900_v32 = vpop.f32.mrf.mxu1 }
 0x623   :  { %v3988_v30 = vadd.f32 %v3900_v32, %v10505_v26  ;;  %v10508_v26 = vld [vmem:[#allocation59_spill] sm:$0xff] }
 0x624   :  { %v3902_v55 = vpop.f32.mrf.mxu1 }
 0x625   :  { %v6055_v37 = vpop.f32.mrf.mxu0  ;;  %v3989_v5 = vadd.f32 %v3902_v55, %v10504_v16 }
 0x626   :  { %v9556_v31 = vadd.f32 %v6055_v37, %v9245_v51  ;;  %v3906_v34 = vpop.f32.mrf.mxu1  ;;  %v10506_v37 = vld [vmem:[#allocation45_spill] sm:$0xff] }
 0x627   :  { %v3738_v3 = vpop.f32.mrf.mxu0  ;;  %v5195_v29 = vmul.f32 -1.442695, %v3989_v5 }
 0x628   :  { %10502 = vst [vmem:[#allocation96_spill] sm:$0xff] %v9556_v31  ;;  %v9559_v54 = vadd.f32 %v9245_v51, %v3738_v3  ;;  %v3750_v49 = vsel %vm3374_vm13, %v9556_v31, -inf  ;;  %v3908_v21 = vpop.f32.mrf.mxu1  ;;  %v3992_v3 = vadd.f32 %v3906_v34, %v10506_v37  ;;  %v5193_v51 = vmul.f32 -1.442695, %v3988_v30 }
 0x629   :  { %3751 = vmax.xlane.f32.xlu0 %v3750_v49  ;;  %v3993_v7 = vadd.f32 %v3908_v21, %v10507_v33  ;;  %6303 = vpow2.f32 %v5195_v29  ;;  %v10509_v21 = vld [vmem:[#allocation61_spill] sm:$0xff]  ;;  %v10510_v29 = vld [vmem:[#allocation63_spill] sm:$0xff] }
 0x62a   :  { %10503 = vst [vmem:[#allocation97_spill] sm:$0xff] %v9559_v54  ;;  %v3747_v42 = vsel %vm3374_vm13, %v9559_v54, -inf  ;;  %v5194_v49 = vmul.f32 -1.442695, %v3992_v3  ;;  %6305 = vpow2.f32 %v5193_v51 }
 0x62b   :  { %v5196_v47 = vmul.f32 -1.442695, %v3993_v7 }
 0x62c   :  { %6307 = vpow2.f32 %v5194_v49 }
 0x62d   :  { %3748 = vmax.xlane.f32.xlu0 %v3747_v42  ;;  %6309 = vpow2.f32 %v5196_v47 }
 0x636   :  { %v6304_v42 = vpop.eup %6303 }
 0x637   :  { %v6306_v18 = vpop.eup %6305  ;;  %v4014_v22 = vadd.f32 1.0, %v6304_v42 }
 0x638   :  { %v4002_v55 = vadd.f32 1.0, %v6306_v18  ;;  %v10511_v18 = vld [vmem:[#allocation65_spill] sm:$0xff] }
 0x639   :  { %v6308_v46 = vpop.eup %6307  ;;  %6311 = vrcp.f32 %v4014_v22 }
 0x63a   :  { %v6310_v16 = vpop.eup %6309  ;;  %v4003_v5 = vadd.f32 1.0, %v6308_v46  ;;  %6313 = vrcp.f32 %v4002_v55 }
 0x63b   :  { %v4015_v30 = vadd.f32 1.0, %v6310_v16 }
 0x646   :  { %v6312_v22 = vpop.eup %6311 }
 0x647   :  { %v6314_v42 = vpop.eup %6313  ;;  %v4034_v16 = vmul.f32 %v6312_v22, %v9266_v15  ;;  %v9591_v22 = vld [vmem:[%s10185_s15 + $0x30] sm:$0x3] }
 0x665   :  { %v3977_v32 = vpop.f32.mrf.mxu0 }
 0x666   :  { %v3990_v34 = vadd.f32 %v3977_v32, %v10508_v26 }
 0x667   :  { %v3979_v33 = vpop.f32.mrf.mxu0 }
 0x668   :  { %6315 = vtanh.f32 %v3990_v34  ;;  %v3991_v51 = vadd.f32 %v3979_v33, %v10509_v21 }
 0x669   :  { %v3983_v7 = vpop.f32.mrf.mxu0  ;;  %6317 = vrcp.f32 %v4003_v5 }
 0x66a   :  { %v5197_v47 = vmul.f32 -1.442695, %v3991_v51  ;;  %v3994_v37 = vadd.f32 %v3983_v7, %v10510_v29  ;;  %6319 = vrcp.f32 %v4015_v30 }
 0x66b   :  { %v3985_v3 = vpop.f32.mrf.mxu0 }
 0x66c   :  { %6321 = vpow2.f32 %v5197_v47  ;;  %v3995_v49 = vadd.f32 %v3985_v3, %v10511_v18 }
 0x66d   :  { %6323 = vtanh.f32 %v3994_v37 }
 0x66e   :  { %v5198_v46 = vmul.f32 -1.442695, %v3995_v49 }
 0x670   :  { %6325 = vpow2.f32 %v5198_v46 }
 0x675   :  { %v6316_v55 = vpop.eup %6315 }
 0x676   :  { %v4036_v32 = vmul.f32 %v6316_v55, %v6314_v42  ;;  %v6318_v26 = vpop.eup %6317  ;;  %v9597_v42 = vld [vmem:[%s10185_s15 + $0x28] sm:$0xff]  ;;  %v9610_v55 = vld [vmem:[%s10185_s15 + $0x20] sm:$0xff] }
 0x677   :  { %v6320_v34 = vpop.eup %6319 }
 0x678   :  { %v9574_v5 = vadd.f32 %v4036_v32, %v4034_v16  ;;  %v4035_v51 = vmul.f32 %v6320_v34, %v9270_v25  ;;  %v9619_v16 = vld [vmem:[%s10185_s15 + $0x18] sm:$0xff]  ;;  %v9628_v32 = vld [vmem:[%s10185_s15 + $0x10] sm:$0xff]  ;;  %v9646_v34 = vld [vmem:[%s10185_s15] sm:$0xff] }
 0x679   :  { %v6322_v33 = vpop.eup %6321 }
 0x67a   :  { %v6324_v21 = vpop.eup %6323  ;;  %v4028_v30 = vadd.f32 1.0, %v6322_v33  ;;  %6327 = vtanh.f32 %v9574_v5  ;;  %v9656_v33 = vpop.xlane.xlu0 %3388 }
 0x67b   :  { %v4037_v7 = vmul.f32 %v6324_v21, %v6318_v26  ;;  %v9637_v26 = vld [vmem:[%s10185_s15 + $0x8] sm:$0xff] }
 0x67c   :  { %6329 = vrcp.f32 %v4028_v30  ;;  %v10512_v21 = vld [vmem:[#allocation46_spill] sm:$0xff] }
 0x67d   :  { %v6326_v47 = vpop.eup %6325  ;;  %v9578_v29 = vadd.f32 %v4037_v7, %v4035_v51 }
 0x67e   :  { %v4029_v37 = vadd.f32 1.0, %v6326_v47 }
 0x67f   :  { %6331 = vtanh.f32 %v9578_v29 }
 0x680   :  { %6333 = vrcp.f32 %v4029_v37 }
 0x687   :  { %v6328_v15 = vpop.eup %6327 }
 0x689   :  { %v6330_v3 = vpop.eup %6329 }
 0x68a   :  { %v9581_v18 = vmul.f32 %v6330_v3, %v6328_v15  ;;  %v10514_v15 = vld [vmem:[#allocation90_spill] sm:$0xff]  ;;  %v10515_v3 = vld [vmem:[#allocation91_spill] sm:$0xff] }
 0x68c   :  { %v6332_v49 = vpop.eup %6331  ;;  %6070 = vmatprep.mubr.f32.mxu1 %v9581_v18  ;;  %5842 = vmatprep.mubr.f32.mxu0 %v9581_v18 }
 0x68d   :  { %v6334_v46 = vpop.eup %6333  ;;  %5843 = vmatmul.mubr.f32.vlgmr.msra.gmra.mxu0 %v9581_v18 }
 0x68e   :  { %v9586_v25 = vmul.f32 %v6334_v46, %v6332_v49  ;;  %6074 = vmatpush3.xpose.msra.mxu0 %v9591_v22  ;;  %v10516_v49 = vld [vmem:[#allocation92_spill] sm:$0xff]  ;;  %v10517_v46 = vld [vmem:[#allocation93_spill] sm:$0xff] }
 0x68f   :  { %6075 = vmatprep.subr.mxu0 %v9597_v42 }
 0x690   :  { %6071 = vmatmul.mubr.f32.vlgmr.msra.gmra.mxu1 %v9586_v25  ;;  %5844 = vmatprep.mubr.f32.mxu0 %v9586_v25 }
 0x691   :  { %5847 = vmatpush3.xpose.msra.mxu1 %v9287_v10  ;;  %5845 = vmatmul.mubr.f32.gmra.mxu0 %v9586_v25 }
 0x692   :  { %5878 = vmatprep.mubr.f32.mxu1 %v9581_v18  ;;  %5848 = vmatprep.subr.mxu1 %v9295_v9 }
 0x693   :  { %6076 = vmatpush3.xpose.msra.mxu0 %v9597_v42 }
 0x694   :  { %6077 = vmatprep.subr.mxu0 %v9610_v55 }
 0x695   :  { %5849 = vmatpush3.xpose.msra.mxu1 %v9305_v12 }
 0x696   :  { %5850 = vmatprep.subr.mxu1 %v9311_v11 }
 0x697   :  { %6078 = vmatpush3.xpose.msra.mxu0 %v9610_v55 }
 0x698   :  { %6079 = vmatprep.subr.mxu0 %v9619_v16 }
 0x699   :  { %5851 = vmatpush3.xpose.msra.mxu1 %v9321_v52 }
 0x69a   :  { %5852 = vmatprep.subr.mxu1 %v9327_v14 }
 0x69b   :  { %6080 = vmatpush3.xpose.msra.mxu0 %v9619_v16 }
 0x69c   :  { %6081 = vmatprep.subr.mxu0 %v9628_v32 }
 0x69d   :  { %5853 = vmatpush3.xpose.msra.mxu1 %v9335_v56 }
 0x69e   :  { %5854 = vmatprep.subr.mxu1 %v9345_v41 }
 0x69f   :  { %6082 = vmatpush3.xpose.msra.mxu0 %v9628_v32 }
 0x6a0   :  { %6083 = vmatprep.subr.mxu0 %v9637_v26 }
 0x6a1   :  { %5855 = vmatpush3.xpose.msra.mxu1 %v9353_v43 }
 0x6a2   :  { %5856 = vmatprep.subr.mxu1 %v9361_v59 }
 0x6a3   :  { %6084 = vmatpush3.xpose.msra.mxu0 %v9637_v26 }
 0x6a4   :  { %6085 = vmatprep.subr.mxu0 %v9646_v34 }
 0x6a5   :  { %5857 = vmatpush3.xpose.msra.mxu1 %v9371_v62 }
 0x6a6   :  { %5858 = vmatprep.subr.mxu1 %v9377_v13 }
 0x6a7   :  { %6086 = vmatpush3.xpose.msra.mxu0 %v9646_v34 }
 0x6a8   :  { %5927 = vmatprep.subr.mxu0 %v9087_v17 }
 0x6a9   :  { %5859 = vmatpush3.xpose.msra.mxu1 %v9387_v58 }
 0x6aa   :  { %5860 = vmatprep.subr.mxu1 %v9395_v38 }
 0x6ad   :  { %5861 = vmatpush3.xpose.msra.mxu1 %v9401_v39 }
 0x6ae   :  { %5862 = vmatprep.subr.mxu1 %v9409_v0 }
 0x6b1   :  { %5863 = vmatpush3.xpose.msra.mxu1 %v9417_v27 }
 0x6b2   :  { %5864 = vmatprep.subr.mxu1 %v10512_v21  ;;  %v9661_v30 = vpop.xlane.xlu0 %3751 }
 0x6b3   :  { %10513 = vst [vmem:[#allocation98_spill] sm:$0xff] %v9661_v30  ;;  %v3754_v51 = vsub.f32 %v9556_v31, %v9661_v30  ;;  %v10519_v31 = vld [vmem:[#allocation95_spill] sm:$0xff] }
 0x6b5   :  { %v3757_v17 = vmul.f32 1.442695, %v3754_v51  ;;  %5865 = vmatpush3.xpose.msra.mxu1 %v9435_v60  ;;  %v10518_v51 = vld [vmem:[#allocation94_spill] sm:$0xff] }
 0x6b6   :  { %5866 = vmatprep.subr.mxu1 %v9443_v24  ;;  %v9667_v7 = vpop.xlane.xlu0 %3748 }
 0x6b7   :  { %6335 = vpow2.f32 %v3757_v17  ;;  %v3753_v47 = vsub.f32 %v9559_v54, %v9667_v7 }
 0x6b9   :  { %v3755_v37 = vmul.f32 1.442695, %v3753_v47  ;;  %5867 = vmatpush3.xpose.msra.mxu1 %v10514_v15 }
 0x6ba   :  { %5868 = vmatprep.subr.mxu1 %v10515_v3 }
 0x6bb   :  { %6337 = vpow2.f32 %v3755_v37 }
 0x6bd   :  { %5869 = vmatpush3.xpose.msra.mxu1 %v10516_v49 }
 0x6be   :  { %5870 = vmatprep.subr.mxu1 %v10517_v46 }
 0x6c1   :  { %5871 = vmatpush3.xpose.msra.mxu1 %v10518_v51 }
 0x6c2   :  { %5872 = vmatprep.subr.mxu1 %v10519_v31 }
 0x6c4   :  { %v6336_v30 = vpop.eup %6335 }
 0x6c5   :  { %5873 = vmatpush3.xpose.msra.mxu1 %v9485_v35  ;;  %v3762_v17 = vsel %vm3374_vm13, %v6336_v30, 0.0  ;;  %v10522_v30 = vld [vmem:[#allocation19_spill] sm:$0xff] }
 0x6c6   :  { %5874 = vmatprep.subr.mxu1 %v9492_v40  ;;  %3763 = vadd.xlane.f32.xlu1 %v3762_v17  ;;  %v10523_v17 = vld [vmem:[#allocation77_spill] sm:$0xff] }
 0x6c8   :  { %v6338_v47 = vpop.eup %6337 }
 0x6c9   :  { %5875 = vmatpush3.xpose.msra.mxu1 %v9499_v61  ;;  %v3759_v37 = vsel %vm3374_vm13, %v6338_v47, 0.0  ;;  %v10524_v47 = vld [vmem:[#allocation21_spill] sm:$0xff] }
 0x6ca   :  { %5876 = vmatprep.subr.mxu1 %v9505_v48  ;;  %3760 = vadd.xlane.f32.xlu0 %v3759_v37  ;;  %v10525_v37 = vld [vmem:[#allocation78_spill] sm:$0xff] }
 0x6cd   :  { %5877 = vmatpush3.xpose.msra.mxu1 %v9511_v20 }
 0x6ce   :  { %5891 = vmatprep.subr.mxu1 %v9517_v4  ;;  %v6563_v4 = vld [vmem:[%s10183_s13 + $0x28] sm:$0xff] }
 0x6d0   :  { %5879 = vmatmul.mubr.f32.vlgmr.msra.gmra.mxu1 %v9581_v18  ;;  %v10520_v18 = vld [vmem:[#allocation17_spill] sm:$0xff] }
 0x6d1   :  { %5880 = vmatprep.mubr.f32.mxu1 %v9586_v25  ;;  %5892 = vmatpush3.xpose.msra.mxu1 %v9113_v53  ;;  %v6553_v53 = vld [vmem:[%s10183_s13 + $0x50] sm:$0xff] }
 0x6d2   :  { %5893 = vmatprep.subr.mxu1 %v9119_v63  ;;  %v6554_v63 = vld [vmem:[%s10183_s13 + $0xc8] sm:$0xff] }
 0x6d4   :  { %5881 = vmatmul.mubr.f32.gmra.mxu1 %v9586_v25  ;;  %v10521_v25 = vld [vmem:[#allocation18_spill] sm:$0xff] }
 0x6d5   :  { %5894 = vmatpush3.xpose.msra.mxu1 %v9125_v6  ;;  %v6555_v6 = vld [vmem:[%s10183_s13 + $0x48] sm:$0xff] }
 0x6d6   :  { %5895 = vmatprep.subr.mxu1 %v9131_v50  ;;  %v6556_v50 = vld [vmem:[%s10183_s13 + $0xc0] sm:$0xff] }
 0x6d9   :  { %5896 = vmatpush3.xpose.msra.mxu1 %v9137_v57  ;;  %v6557_v57 = vld [vmem:[%s10183_s13 + $0x40] sm:$0xff] }
 0x6da   :  { %5897 = vmatprep.subr.mxu1 %v9143_v44  ;;  %v6558_v44 = vld [vmem:[%s10183_s13 + $0xb8] sm:$0xff] }
 0x6dd   :  { %5898 = vmatpush3.xpose.msra.mxu1 %v9149_v28  ;;  %v6559_v28 = vld [vmem:[%s10183_s13 + $0x38] sm:$0xff] }
 0x6de   :  { %5899 = vmatprep.subr.mxu1 %v9155_v1  ;;  %v6560_v1 = vld [vmem:[%s10183_s13 + $0xb0] sm:$0xff] }
 0x6e1   :  { %5900 = vmatpush3.xpose.msra.mxu1 %v9161_v23  ;;  %v6561_v23 = vld [vmem:[%s10183_s13 + $0x30] sm:$0xff] }
 0x6e2   :  { %5901 = vmatprep.subr.mxu1 %v9167_v2  ;;  %v6562_v2 = vld [vmem:[%s10183_s13 + $0xa8] sm:$0xff] }
 0x6e5   :  { %5902 = vmatpush3.xpose.msra.mxu1 %v6553_v53 }
 0x6e6   :  { %5903 = vmatprep.subr.mxu1 %v6554_v63 }
 0x6e9   :  { %5904 = vmatpush3.xpose.msra.mxu1 %v6555_v6 }
 0x6ea   :  { %5905 = vmatprep.subr.mxu1 %v6556_v50 }
 0x6ed   :  { %5906 = vmatpush3.xpose.msra.mxu1 %v6557_v57 }
 0x6ee   :  { %5907 = vmatprep.subr.mxu1 %v6558_v44 }
 0x6f1   :  { %5908 = vmatpush3.xpose.msra.mxu1 %v6559_v28  ;;  %v10527_v28 = vld [vmem:[#allocation52_spill] sm:$0xff] }
 0x6f2   :  { %5909 = vmatprep.subr.mxu1 %v6560_v1 }
 0x6f5   :  { %5910 = vmatpush3.xpose.msra.mxu1 %v6561_v23  ;;  %v10528_v23 = vld [vmem:[#allocation50_spill] sm:$0xff] }
 0x6f6   :  { %5911 = vmatprep.subr.mxu1 %v6562_v2 }
 0x6f9   :  { %5912 = vmatpush3.xpose.msra.mxu1 %v6563_v4 }
 0x6fa   :  { %5913 = vmatprep.subr.mxu1 %v9184_v19 }
 0x6fd   :  { %5914 = vmatpush3.xpose.msra.mxu1 %v9190_v8  ;;  %v10526_v8 = vld [vmem:[#allocation23_spill] sm:$0xff] }
 0x6fe   :  { %5915 = vmatprep.subr.mxu1 %v9196_v36 }
 0x701   :  { %5916 = vmatpush3.xpose.msra.mxu1 %v9202_v45 }
 0x702   :  { %5917 = vmatprep.subr.mxu1 %v10520_v18 }
 0x705   :  { %5918 = vmatpush3.xpose.msra.mxu1 %v10521_v25  ;;  %v10529_v25 = vld [vmem:[#allocation54_spill] sm:$0xff] }
 0x706   :  { %5919 = vmatprep.subr.mxu1 %v10522_v30 }
 0x709   :  { %5920 = vmatpush3.xpose.msra.mxu1 %v10523_v17 }
 0x70a   :  { %5921 = vmatprep.subr.mxu1 %v10524_v47  ;;  %v10530_v47 = vld [vmem:[#allocation56_spill] sm:$0xff] }
 0x70d   :  { %5922 = vmatpush3.xpose.msra.mxu1 %v10525_v37 }
 0x70e   :  { %6090 = vmatprep.subr.mxu1 %v9591_v22 }
 0x74d   :  { %v4272_v50 = vpop.f32.mrf.mxu0 }
 0x74e   :  { %v4360_v2 = vadd.f32 %v4272_v50, %v10528_v23  ;;  %v10531_v23 = vld [vmem:[#allocation66_spill] sm:$0xff] }
 0x74f   :  { %v4274_v57 = vpop.f32.mrf.mxu0 }
 0x750   :  { %v6072_v19 = vpop.f32.mrf.mxu1  ;;  %v4361_v1 = vadd.f32 %v4274_v57, %v10527_v28  ;;  %v5205_v17 = vmul.f32 -1.442695, %v4360_v2 }
 0x751   :  { %v9743_v53 = vadd.f32 %v6072_v19, %v10526_v8  ;;  %v4278_v44 = vpop.f32.mrf.mxu0 }
 0x752   :  { %v4110_v36 = vpop.f32.mrf.mxu1  ;;  %v5207_v18 = vmul.f32 -1.442695, %v4361_v1  ;;  %v4364_v30 = vadd.f32 %v4278_v44, %v10529_v25 }
 0x753   :  { %v9746_v45 = vadd.f32 %v10526_v8, %v4110_v36  ;;  %v4122_v63 = vsel %vm3374_vm13, %v9743_v53, -inf  ;;  %v4280_v4 = vpop.f32.mrf.mxu0 }
 0x754   :  { %4123 = vmax.xlane.f32.xlu1 %v4122_v63  ;;  %v4365_v37 = vadd.f32 %v4280_v4, %v10530_v47  ;;  %6339 = vpow2.f32 %v5207_v18  ;;  %v5206_v19 = vmul.f32 -1.442695, %v4364_v30  ;;  %v10532_v18 = vld [vmem:[#allocation67_spill] sm:$0xff]  ;;  %v10533_v47 = vld [vmem:[#allocation68_spill] sm:$0xff] }
 0x755   :  { %v4119_v6 = vsel %vm3374_vm13, %v9746_v45, -inf  ;;  %6341 = vpow2.f32 %v5205_v17 }
 0x756   :  { %4120 = vmax.xlane.f32.xlu0 %v4119_v6  ;;  %v5208_v8 = vmul.f32 -1.442695, %v4365_v37  ;;  %6343 = vpow2.f32 %v5206_v19 }
 0x758   :  { %6345 = vpow2.f32 %v5208_v8  ;;  %v10534_v8 = vld [vmem:[#allocation69_spill] sm:$0xff] }
 0x761   :  { %v6340_v36 = vpop.eup %6339 }
 0x762   :  { %v6342_v63 = vpop.eup %6341  ;;  %v4386_v6 = vadd.f32 1.0, %v6340_v36 }
 0x763   :  { %v6344_v54 = vpop.eup %6343  ;;  %v4374_v57 = vadd.f32 1.0, %v6342_v63 }
 0x764   :  { %6347 = vrcp.f32 %v4386_v6  ;;  %v4375_v1 = vadd.f32 1.0, %v6344_v54 }
 0x765   :  { %v6346_v28 = vpop.eup %6345  ;;  %6349 = vrcp.f32 %v4374_v57 }
 0x766   :  { %v4387_v2 = vadd.f32 1.0, %v6346_v28 }
 0x771   :  { %v6348_v63 = vpop.eup %6347 }
 0x772   :  { %v6350_v6 = vpop.eup %6349  ;;  %v4406_v28 = vmul.f32 %v6348_v63, %v9574_v5 }
 0x790   :  { %v4349_v50 = vpop.f32.mrf.mxu1 }
 0x791   :  { %v4362_v44 = vadd.f32 %v4349_v50, %v10531_v23 }
 0x792   :  { %v4351_v4 = vpop.f32.mrf.mxu1 }
 0x793   :  { %6351 = vtanh.f32 %v4362_v44  ;;  %v4363_v25 = vadd.f32 %v4351_v4, %v10532_v18 }
 0x794   :  { %v4355_v30 = vpop.f32.mrf.mxu1  ;;  %6353 = vrcp.f32 %v4375_v1 }
 0x795   :  { %v5209_v17 = vmul.f32 -1.442695, %v4363_v25  ;;  %v4366_v37 = vadd.f32 %v4355_v30, %v10533_v47  ;;  %6355 = vrcp.f32 %v4387_v2 }
 0x796   :  { %v4357_v19 = vpop.f32.mrf.mxu1 }
 0x797   :  { %6357 = vpow2.f32 %v5209_v17  ;;  %v4367_v36 = vadd.f32 %v4357_v19, %v10534_v8 }
 0x798   :  { %6359 = vtanh.f32 %v4366_v37 }
 0x799   :  { %v5210_v54 = vmul.f32 -1.442695, %v4367_v36 }
 0x79b   :  { %6361 = vpow2.f32 %v5210_v54 }
 0x7a0   :  { %v6352_v57 = vpop.eup %6351 }
 0x7a1   :  { %v4408_v50 = vmul.f32 %v6352_v57, %v6350_v6  ;;  %v6354_v23 = vpop.eup %6353 }
 0x7a2   :  { %v6356_v44 = vpop.eup %6355 }
 0x7a3   :  { %v9761_v1 = vadd.f32 %v4408_v50, %v4406_v28  ;;  %v4407_v25 = vmul.f32 %v6356_v44, %v9578_v29  ;;  %v10539_v44 = vld [vmem:[#allocation70_spill] sm:$0xff] }
 0x7a4   :  { %v6358_v4 = vpop.eup %6357 }
 0x7a5   :  { %v6360_v18 = vpop.eup %6359  ;;  %v4400_v2 = vadd.f32 1.0, %v6358_v4  ;;  %6363 = vtanh.f32 %v9761_v1 }
 0x7a6   :  { %v4409_v30 = vmul.f32 %v6360_v18, %v6354_v23 }
 0x7a7   :  { %6365 = vrcp.f32 %v4400_v2 }
 0x7a8   :  { %v6362_v17 = vpop.eup %6361  ;;  %v9765_v47 = vadd.f32 %v4409_v30, %v4407_v25  ;;  %v10540_v25 = vld [vmem:[#allocation71_spill] sm:$0xff] }
 0x7a9   :  { %v4401_v37 = vadd.f32 1.0, %v6362_v17 }
 0x7aa   :  { %6367 = vtanh.f32 %v9765_v47 }
 0x7ab   :  { %6369 = vrcp.f32 %v4401_v37 }
 0x7b2   :  { %v6364_v5 = vpop.eup %6363 }
 0x7b4   :  { %v6366_v19 = vpop.eup %6365 }
 0x7b5   :  { %v9768_v8 = vmul.f32 %v6366_v19, %v6364_v5  ;;  %v10541_v5 = vld [vmem:[#allocation72_spill] sm:$0xff] }
 0x7b7   :  { %v6368_v36 = vpop.eup %6367  ;;  %6087 = vmatprep.mubr.f32.mxu0 %v9768_v8  ;;  %5923 = vmatprep.mubr.f32.mxu1 %v9768_v8 }
 0x7b8   :  { %v6370_v54 = vpop.eup %6369  ;;  %5924 = vmatmul.mubr.f32.vlgmr.msra.gmra.mxu1 %v9768_v8 }
 0x7b9   :  { %v9773_v29 = vmul.f32 %v6370_v54, %v6368_v36  ;;  %6091 = vmatpush3.xpose.msra.mxu1 %v9591_v22  ;;  %v10536_v22 = vld [vmem:[#allocation58_spill] sm:$0xff]  ;;  %v10542_v36 = vld [vmem:[#allocation73_spill] sm:$0xff] }
 0x7ba   :  { %6092 = vmatprep.subr.mxu1 %v9597_v42 }
 0x7bb   :  { %6088 = vmatmul.mubr.f32.vlgmr.msra.gmra.mxu0 %v9773_v29  ;;  %5925 = vmatprep.mubr.f32.mxu1 %v9773_v29 }
 0x7bc   :  { %5928 = vmatpush3.xpose.msra.mxu0 %v9287_v10  ;;  %5926 = vmatmul.mubr.f32.gmra.mxu1 %v9773_v29  ;;  %v9805_v10 = vpop.xlane.xlu1 %3391 }
 0x7bd   :  { %5959 = vmatprep.mubr.f32.mxu0 %v9768_v8  ;;  %5929 = vmatprep.subr.mxu0 %v9295_v9 }
 0x7be   :  { %6093 = vmatpush3.xpose.msra.mxu1 %v9597_v42 }
 0x7bf   :  { %6094 = vmatprep.subr.mxu1 %v9610_v55 }
 0x7c0   :  { %5930 = vmatpush3.xpose.msra.mxu0 %v9305_v12  ;;  %v9809_v9 = vpop.xlane.xlu1 %3763  ;;  %v9812_v12 = vpop.xlane.xlu0 %3760 }
 0x7c1   :  { %5931 = vmatprep.subr.mxu0 %v9311_v11 }
 0x7c2   :  { %6095 = vmatpush3.xpose.msra.mxu1 %v9610_v55 }
 0x7c3   :  { %6096 = vmatprep.subr.mxu1 %v9619_v16 }
 0x7c4   :  { %5932 = vmatpush3.xpose.msra.mxu0 %v9321_v52 }
 0x7c5   :  { %5933 = vmatprep.subr.mxu0 %v9327_v14 }
 0x7c6   :  { %6097 = vmatpush3.xpose.msra.mxu1 %v9619_v16 }
 0x7c7   :  { %6098 = vmatprep.subr.mxu1 %v9628_v32 }
 0x7c8   :  { %5934 = vmatpush3.xpose.msra.mxu0 %v9335_v56 }
 0x7c9   :  { %5935 = vmatprep.subr.mxu0 %v9345_v41 }
 0x7ca   :  { %6099 = vmatpush3.xpose.msra.mxu1 %v9628_v32  ;;  %v10537_v32 = vld [vmem:[#allocation62_spill] sm:$0xff] }
 0x7cb   :  { %6100 = vmatprep.subr.mxu1 %v9637_v26 }
 0x7cc   :  { %5936 = vmatpush3.xpose.msra.mxu0 %v9353_v43 }
 0x7cd   :  { %5937 = vmatprep.subr.mxu0 %v9361_v59 }
 0x7ce   :  { %6101 = vmatpush3.xpose.msra.mxu1 %v9637_v26 }
 0x7cf   :  { %6102 = vmatprep.subr.mxu1 %v9646_v34 }
 0x7d0   :  { %5938 = vmatpush3.xpose.msra.mxu0 %v9371_v62 }
 0x7d1   :  { %5939 = vmatprep.subr.mxu0 %v9377_v13 }
 0x7d2   :  { %6103 = vmatpush3.xpose.msra.mxu1 %v9646_v34 }
 0x7d4   :  { %5940 = vmatpush3.xpose.msra.mxu0 %v9387_v58  ;;  %v9845_v58 = vld [vmem:[%s10186_s16] ss:$0 sm:$0xff] }
 0x7d5   :  { %5941 = vmatprep.subr.mxu0 %v9395_v38 }
 0x7d8   :  { %5942 = vmatpush3.xpose.msra.mxu0 %v9401_v39 }
 0x7d9   :  { %5943 = vmatprep.subr.mxu0 %v9409_v0 }
 0x7dc   :  { %5944 = vmatpush3.xpose.msra.mxu0 %v9417_v27 }
 0x7dd   :  { %5945 = vmatprep.subr.mxu0 %v10512_v21  ;;  %v9816_v11 = vpop.xlane.xlu1 %4123  ;;  %v10538_v21 = vld [vmem:[#allocation64_spill] sm:$0xff] }
 0x7de   :  { %v4126_v52 = vsub.f32 %v9743_v53, %v9816_v11 }
 0x7df   :  { %v9820_v14 = vpop.xlane.xlu0 %4120 }
 0x7e0   :  { %v4129_v56 = vmul.f32 1.442695, %v4126_v52  ;;  %5946 = vmatpush3.xpose.msra.mxu0 %v9435_v60  ;;  %v4125_v41 = vsub.f32 %v9746_v45, %v9820_v14 }
 0x7e1   :  { %5947 = vmatprep.subr.mxu0 %v9443_v24 }
 0x7e2   :  { %6371 = vpow2.f32 %v4129_v56  ;;  %v4127_v0 = vmul.f32 1.442695, %v4125_v41 }
 0x7e4   :  { %6373 = vpow2.f32 %v4127_v0  ;;  %5948 = vmatpush3.xpose.msra.mxu0 %v10514_v15 }
 0x7e5   :  { %5949 = vmatprep.subr.mxu0 %v10515_v3 }
 0x7e8   :  { %5950 = vmatpush3.xpose.msra.mxu0 %v10516_v49 }
 0x7e9   :  { %5951 = vmatprep.subr.mxu0 %v10517_v46 }
 0x7ec   :  { %5952 = vmatpush3.xpose.msra.mxu0 %v10518_v51 }
 0x7ed   :  { %5953 = vmatprep.subr.mxu0 %v10519_v31 }
 0x7ef   :  { %v6372_v43 = vpop.eup %6371 }
 0x7f0   :  { %5954 = vmatpush3.xpose.msra.mxu0 %v9485_v35  ;;  %v4134_v59 = vsel %vm3374_vm13, %v6372_v43, 0.0 }
 0x7f1   :  { %v6374_v27 = vpop.eup %6373  ;;  %5955 = vmatprep.subr.mxu0 %v9492_v40  ;;  %4135 = vadd.xlane.f32.xlu1 %v4134_v59 }
 0x7f2   :  { %v4131_v62 = vsel %vm3374_vm13, %v6374_v27, 0.0 }
 0x7f3   :  { %4132 = vadd.xlane.f32.xlu0 %v4131_v62 }
 0x7f4   :  { %5956 = vmatpush3.xpose.msra.mxu0 %v9499_v61 }
 0x7f5   :  { %5957 = vmatprep.subr.mxu0 %v9505_v48 }
 0x7f8   :  { %5958 = vmatpush3.xpose.msra.mxu0 %v9511_v20  ;;  %v10535_v20 = vld [vmem:[#allocation60_spill] sm:$0xff] }
 0x7fb   :  { %5960 = vmatmul.mubr.f32.vlgmr.msra.gmra.mxu0 %v9768_v8 }
 0x7fc   :  { %5961 = vmatprep.mubr.f32.mxu0 %v9773_v29 }
 0x7ff   :  { %5962 = vmatmul.mubr.f32.gmra.mxu0 %v9773_v29 }
 0x878   :  { %v4644_v35 = vpop.f32.mrf.mxu1 }
 0x879   :  { %v4732_v42 = vadd.f32 %v4644_v35, %v10536_v22 }
 0x87a   :  { %v4646_v40 = vpop.f32.mrf.mxu1 }
 0x87b   :  { %v6089_v13 = vpop.f32.mrf.mxu0  ;;  %v4733_v31 = vadd.f32 %v4646_v40, %v10535_v20  ;;  %v5217_v34 = vmul.f32 -1.442695, %v4732_v42 }
 0x87c   :  { %v9848_v60 = vadd.f32 %v9845_v58, %v6089_v13  ;;  %v4650_v48 = vpop.f32.mrf.mxu1 }
 0x87d   :  { %v4482_v38 = vpop.f32.mrf.mxu0  ;;  %v5219_v16 = vmul.f32 -1.442695, %v4733_v31  ;;  %v4736_v26 = vadd.f32 %v4650_v48, %v10537_v32  ;;  %v9867_v32 = vpop.xlane.xlu1 %4135 }
 0x87e   :  { %v9851_v39 = vadd.f32 %v9845_v58, %v4482_v38  ;;  %v4494_v24 = vsel %vm3374_vm13, %v9848_v60, -inf  ;;  %v4652_v55 = vpop.f32.mrf.mxu1 }
 0x87f   :  { %4495 = vmax.xlane.f32.xlu1 %v4494_v24  ;;  %v4737_v15 = vadd.f32 %v4652_v55, %v10538_v21  ;;  %6375 = vpow2.f32 %v5219_v16  ;;  %v5218_v3 = vmul.f32 -1.442695, %v4736_v26  ;;  %v9869_v26 = vpop.xlane.xlu0 %4132 }
 0x880   :  { %v4491_v61 = vsel %vm3374_vm13, %v9851_v39, -inf  ;;  %6377 = vpow2.f32 %v5217_v34 }
 0x881   :  { %4492 = vmax.xlane.f32.xlu0 %v4491_v61  ;;  %v5220_v49 = vmul.f32 -1.442695, %v4737_v15  ;;  %6379 = vpow2.f32 %v5218_v3 }
 0x883   :  { %6381 = vpow2.f32 %v5220_v49 }
 0x88c   :  { %v6376_v46 = vpop.eup %6375 }
 0x88d   :  { %v6378_v51 = vpop.eup %6377  ;;  %v4758_v63 = vadd.f32 1.0, %v6376_v46 }
 0x88e   :  { %v6380_v6 = vpop.eup %6379  ;;  %v4746_v57 = vadd.f32 1.0, %v6378_v51 }
 0x88f   :  { %6383 = vrcp.f32 %v4758_v63  ;;  %v4747_v23 = vadd.f32 1.0, %v6380_v6 }
 0x890   :  { %v6382_v28 = vpop.eup %6381  ;;  %6385 = vrcp.f32 %v4746_v57 }
 0x891   :  { %v4759_v18 = vadd.f32 1.0, %v6382_v28 }
 0x89c   :  { %v6384_v52 = vpop.eup %6383 }
 0x89d   :  { %v6386_v56 = vpop.eup %6385  ;;  %v4778_v0 = vmul.f32 %v6384_v52, %v9761_v1 }
 0x8bb   :  { %v4721_v50 = vpop.f32.mrf.mxu0 }
 0x8bc   :  { %v4734_v4 = vadd.f32 %v4721_v50, %v10539_v44 }
 0x8bd   :  { %v4723_v2 = vpop.f32.mrf.mxu0 }
 0x8be   :  { %6387 = vtanh.f32 %v4734_v4  ;;  %v4735_v30 = vadd.f32 %v4723_v2, %v10540_v25  ;;  %v5169_v2 = vld [vmem:[%s10307_s19 + $0x10] sm:$0xff]  ;;  %v10543_v25 = vld [vmem:[#allocation10_spill] sm:$0xff] }
 0x8bf   :  { %v4727_v17 = vpop.f32.mrf.mxu0  ;;  %6389 = vrcp.f32 %v4747_v23 }
 0x8c0   :  { %v5221_v37 = vmul.f32 -1.442695, %v4735_v30  ;;  %v4738_v19 = vadd.f32 %v4727_v17, %v10541_v5  ;;  %6391 = vrcp.f32 %v4759_v18  ;;  %v5200_v18 = vld [vmem:[%s10180_s10 + $0x28] sm:$0xff]  ;;  %v5199_v30 = vld [vmem:[%s10180_s10 + $0x20] sm:$0xff]  ;;  %v10544_v17 = vld [vmem:[#allocation12_spill] sm:$0xff] }
 0x8c1   :  { %v4729_v8 = vpop.f32.mrf.mxu0  ;;  %v5211_v5 = vld [vmem:[%s10180_s10 + $0x30] sm:$0xff] }
 0x8c2   :  { %6393 = vpow2.f32 %v5221_v37  ;;  %v4739_v54 = vadd.f32 %v4729_v8, %v10542_v36  ;;  %v2862_v37 = vrot.slane %v5169_v2, %v10544_v17  ;;  %v10546_v36 = vld [vmem:[#allocation25_spill] sm:$0xff] }
 0x8c3   :  { %6395 = vtanh.f32 %v4738_v19  ;;  %v10545_v19 = vld [vmem:[#allocation13_spill] sm:$0xff] }
 0x8c4   :  { %v5222_v29 = vmul.f32 -1.442695, %v4739_v54  ;;  %v2876_v8 = vrot.slane %v5169_v2, %v10545_v19  ;;  %v2841_v54 = vrot.slane %v5169_v2, %v10546_v36 }
 0x8c6   :  { %6397 = vpow2.f32 %v5222_v29  ;;  %v10547_v29 = vld [vmem:[#allocation14_spill] sm:$0xff] }
 0x8c7   :  { %v2890_v52 = vrot.slane %v5169_v2, %v10547_v29  ;;  %v10564_v29 = vld [vmem:[#allocation32_spill] sm:$0xff] }
 0x8cb   :  { %v6388_v41 = vpop.eup %6387 }
 0x8cc   :  { %v4780_v43 = vmul.f32 %v6388_v41, %v6386_v56  ;;  %v6390_v59 = vpop.eup %6389  ;;  %v5223_v56 = vld [vmem:[%s10180_s10 + $0x40] sm:$0xff]  ;;  %v10548_v41 = vld [vmem:[#allocation11_spill] sm:$0xff] }
 0x8cd   :  { %v6392_v27 = vpop.eup %6391 }
 0x8ce   :  { %v4782_v62 = vadd.f32 %v4780_v43, %v4778_v0  ;;  %v4779_v61 = vmul.f32 %v6392_v27, %v9765_v47  ;;  %v2855_v0 = vrot.slane %v5169_v2, %v10548_v41  ;;  %v10549_v43 = vld [vmem:[#allocation27_spill] sm:$0xff]  ;;  %v10550_v27 = vld [vmem:[#allocation28_spill] sm:$0xff] }
 0x8cf   :  { %v6394_v13 = vpop.eup %6393 }
 0x8d0   :  { %v6396_v38 = vpop.eup %6395  ;;  %v4772_v24 = vadd.f32 1.0, %v6394_v13  ;;  %6399 = vtanh.f32 %v4782_v62  ;;  %v2883_v62 = vrot.slane %v5169_v2, %v10550_v27 }
 0x8d1   :  { %v4781_v35 = vmul.f32 %v6396_v38, %v6390_v59  ;;  %v2869_v59 = vrot.slane %v5169_v2, %v10549_v43 }
 0x8d2   :  { %6401 = vrcp.f32 %v4772_v24  ;;  %v10551_v24 = vld [vmem:[#allocation44_spill] sm:$0xff] }
 0x8d3   :  { %v6398_v40 = vpop.eup %6397  ;;  %v4783_v48 = vadd.f32 %v4781_v35, %v4779_v61  ;;  %v10552_v35 = vld [vmem:[#allocation75_spill] sm:$0xff] }
 0x8d4   :  { %v4773_v20 = vadd.f32 1.0, %v6398_v40  ;;  %v10553_v40 = vld [vmem:[#allocation87_spill] sm:$0xff] }
 0x8d5   :  { %6403 = vtanh.f32 %v4783_v48  ;;  %vm3410_vm14 = vcmp.eq.s32.totalorder %v10553_v40, %v10552_v35  ;;  %v10554_v48 = vld [vmem:[#allocation24_spill] sm:$0xff]  ;;  %v10567_v35 = vld [vmem:[#allocation15_spill] sm:$0xff] }
 0x8d6   :  { %6405 = vrcp.f32 %v4773_v20 }
 0x8dd   :  { %v6400_v31 = vpop.eup %6399 }
 0x8df   :  { %v6402_v22 = vpop.eup %6401 }
 0x8e0   :  { %v4786_v1 = vmul.f32 %v6402_v22, %v6400_v31 }
 0x8e2   :  { %v6404_v42 = vpop.eup %6403  ;;  %6104 = vmatprep.mubr.f32.mxu1 %v4786_v1  ;;  %v10555_v1 = vmov 0.0  }
 0x8e3   :  { %v6406_v55 = vpop.eup %6405 }
 0x8e4   :  { %v4787_v16 = vmul.f32 %v6406_v55, %v6404_v42  ;;  %v5178_v42 = vsel %vm3410_vm14, 1.0, %v10555_v1  ;;  %v10556_v55 = vld [vmem:[#allocation89_spill] sm:$0xff] }
 0x8e6   :  { %6105 = vmatmul.mubr.f32.vlgmr.msra.gmra.mxu1 %v4787_v16 }
 0x908   :  { %v9871_v47 = vpop.xlane.xlu1 %4495 }
 0x909   :  { %v4498_v34 = vsub.f32 %v9848_v60, %v9871_v47 }
 0x90a   :  { %v9875_v21 = vpop.xlane.xlu0 %4492 }
 0x90b   :  { %v4501_v15 = vmul.f32 1.442695, %v4498_v34  ;;  %v4497_v3 = vsub.f32 %v9851_v39, %v9875_v21 }
 0x90d   :  { %6407 = vpow2.f32 %v4501_v15  ;;  %v4499_v49 = vmul.f32 1.442695, %v4497_v3 }
 0x90f   :  { %6409 = vpow2.f32 %v4499_v49 }
 0x910   :  { %6411 = vlog2.f32 %v9805_v10 }
 0x911   :  { %6413 = vlog2.f32 %v9656_v33 }
 0x912   :  { %6415 = vlog2.f32 %v9812_v12 }
 0x913   :  { %6417 = vlog2.f32 %v9809_v9  ;;  %v10557_v9 = vld [vmem:[#allocation22_spill] sm:$0xff] }
 0x914   :  { %vm3409_vm15 = vcmp.eq.s32.totalorder %v10553_v40, %v10557_v9  ;;  %6419 = vlog2.f32 %v9867_v32  ;;  %v10568_v9 = vld [vmem:[#allocation42_spill] sm:$0xff] }
 0x915   :  { %6421 = vlog2.f32 %v9869_v26  ;;  %v10566_v26 = vld [vmem:[#allocation47_spill] sm:$0xff] }
 0x91a   :  { %v6408_v46 = vpop.eup %6407 }
 0x91b   :  { %v4506_v51 = vsel %vm3374_vm13, %v6408_v46, 0.0  ;;  %v10558_v46 = vld [vmem:[#allocation29_spill] sm:$0xff] }
 0x91c   :  { %v6410_v63 = vpop.eup %6409  ;;  %4507 = vadd.xlane.f32.xlu1 %v4506_v51 }
 0x91d   :  { %v4503_v6 = vsel %vm3374_vm13, %v6410_v63, 0.0  ;;  %v6412_v13 = vpop.eup %6411  ;;  %v5177_v63 = vsel %vm3409_vm15, 1.0, %v10555_v1 }
 0x91e   :  { %4504 = vadd.xlane.f32.xlu0 %v4503_v6  ;;  %v3396_v38 = vmul.f32 0.6931472, %v6412_v13  ;;  %v6414_v61 = vpop.eup %6413  ;;  %v10559_v6 = vld [vmem:[#allocation20_spill] sm:$0xff]  ;;  %v2923_v13 = vand.u32 2147483647, %v10566_v26 }
 0x91f   :  { %v3394_v31 = vmul.f32 0.6931472, %v6414_v61  ;;  %v6416_v22 = vpop.eup %6415  ;;  %vm3782_vm0 = vcmp.eq.s32.totalorder %v10553_v40, %v10559_v6 }
 0x920   :  { %v3398_v10 = vadd.f32 %v3396_v38, %v10551_v24  ;;  %v3766_v34 = vmul.f32 0.6931472, %v6416_v22  ;;  %v6418_v12 = vpop.eup %6417 }
 0x921   :  { %v3397_v16 = vadd.f32 %v3394_v31, %v10556_v55  ;;  %v3768_v3 = vmul.f32 0.6931472, %v6418_v12  ;;  %v6420_v61 = vpop.eup %6419  ;;  %v2931_v31 = vsub.f32 0.0, %v2923_v13 }
 0x922   :  { %v3400_v20 = vsub.f32 %v10554_v48, %v3398_v10  ;;  %v3769_v49 = vadd.f32 %v3766_v34, %v9667_v7  ;;  %v2302_v48 = vand.u32 2147483647, %v10567_v35 }
 0x923   :  { %v3399_v51 = vsub.f32 %v10558_v46, %v3397_v16 }
 0x924   :  { %v3416_v33 = vmul.f32 %v5178_v42, %v3400_v20  ;;  %v6422_v20 = vpop.eup %6421  ;;  %v4140_v42 = vmul.f32 0.6931472, %v6420_v61  ;;  %v2310_v34 = vsub.f32 0.0, %v2302_v48 }
 0x925   :  { %v4138_v12 = vmul.f32 0.6931472, %v6422_v20  ;;  %v2830_v20 = vmax.f32 %v10564_v29, 0.0 }
 0x926   :  { %v3420_v15 = vsel %vm3374_vm13, %v3416_v33, 0.0 }
 0x927   :  { %v4141_v6 = vadd.f32 %v4138_v12, %v9820_v14 }
 0x929   :  { %v4143_v14 = vsub.f32 %v9746_v45, %v4141_v6 }
 0x9a6   :  { %v6106_v57 = vpop.f32.mrf.mxu1 }
 0x9a7   :  { %v9882_v28 = vadd.f32 %v9845_v58, %v6106_v57  ;;  %v10560_v57 = vld [vmem:[#allocation98_spill] sm:$0xff]  ;;  %v4505_v36 = vpop.xlane.xlu0 %4504 }
 0x9a8   :  { %v4854_v50 = vpop.f32.mrf.mxu1  ;;  %6423 = vlog2.f32 %v4505_v36 }
 0x9a9   :  { %v9885_v23 = vadd.f32 %v9845_v58, %v4854_v50  ;;  %v4866_v44 = vsel %vm3374_vm13, %v9882_v28, -inf  ;;  %v2848_v58 = vrot.slane %v5169_v2, %v10543_v25  ;;  %v3770_v50 = vadd.f32 %v3768_v3, %v10560_v57  ;;  %v10562_v25 = vld [vmem:[#allocation79_spill] sm:$0xff] }
 0x9aa   :  { %4867 = vmax.xlane.f32.xlu1 %v4866_v44  ;;  %v3415_v44 = vmul.f32 %v5177_v63, %v3399_v51  ;;  %v5189_v2 = vsel %vm3782_vm0, 1.0, %v10555_v1  ;;  %vm3783_vm1 = vcmp.eq.s32.totalorder %v10553_v40, %v10562_v25  ;;  %v2924_v3 = vand.u32 2147483647, %v10568_v9 }
 0x9ab   :  { %v4863_v4 = vsel %vm3374_vm13, %v9885_v23, -inf  ;;  %v2324_v63 = vmul.f32 1.442695, %v2310_v34 }
 0x9ac   :  { %4864 = vmax.xlane.f32.xlu0 %v4863_v4  ;;  %v10561_v4 = vld [vmem:[#allocation97_spill] sm:$0xff] }
 0x9b5   :  { %v6424_v33 = vpop.eup %6423 }
 0x9b6   :  { %v4510_v46 = vmul.f32 0.6931472, %v6424_v33 }
 0x9bb   :  { %4152 = vperm.xlu1 %6140, %v5200_v18   ;;  %v3771_v18 = vsub.f32 %v10561_v4, %v3769_v49  ;;  %v4142_v49 = vadd.f32 %v4140_v42, %v9816_v11  ;;  %v5212_v42 = vld [vmem:[%s10180_s10 + $0x38] sm:$0xff] }
 0x9bd   :  { %v3788_v7 = vmul.f32 %v5189_v2, %v3771_v18  ;;  %v4144_v4 = vsub.f32 %v9743_v53, %v4142_v49 }
 0x9bf   :  { %2850 = vbcast.lane.b32.xlu1 %v2848_v58, 256  ;;  %v3417_v58 = vsel %vm3374_vm13, %v3415_v44, 0.0  ;;  %v4513_v44 = vadd.f32 %v4510_v46, %v9875_v21 }
 0x9c2   :  { %4149 = vperm.xlu0 %6139, %v5199_v30   ;;  %v10563_v30 = vld [vmem:[#allocation96_spill] sm:$0xff] }
 0x9c3   :  { %2864 = vbcast.lane.b32.xlu1 %v2862_v37, 256  ;;  %v3772_v17 = vsub.f32 %v10563_v30, %v3770_v50  ;;  %v5190_v37 = vsel %vm3783_vm1, 1.0, %v10555_v1  ;;  %v2932_v50 = vsub.f32 0.0, %v2924_v3 }
 0x9c5   :  { %v3789_v19 = vmul.f32 %v5190_v37, %v3772_v17  ;;  %v2946_v30 = vmul.f32 1.442695, %v2932_v50  ;;  %v4515_v37 = vsub.f32 %v9851_v39, %v4513_v44 }
 0x9c6   :  { %4521 = vperm.xlu0 %6139, %v5211_v5   ;;  %v3790_v5 = vsel %vm3374_vm13, %v3788_v7, 0.0 }
 0x9c7   :  { %2878 = vbcast.lane.b32.xlu1 %v2876_v8, 256  ;;  %v3793_v8 = vsel %vm3374_vm13, %v3789_v19, 0.0 }
 0x9ca   :  { %2843 = vbcast.lane.b32.xlu0 %v2841_v54, 256  ;;  %v9944_v54 = vpop.xlane.xlu1 %4507 }
 0x9cb   :  { %2892 = vbcast.lane.b32.xlu1 %v2890_v52, 256  ;;  %v2919_v52 = vand.u32 2147483647, %v10564_v29 }
 0x9cd   :  { %v2927_v41 = vsub.f32 0.0, %v2919_v52 }
 0x9ce   :  { %4893 = vperm.xlu0 %6139, %v5223_v56  }
 0x9cf   :  { %v2936_v38 = vmul.f32 1.442695, %v2927_v41 }
 0x9d2   :  { %2857 = vbcast.lane.b32.xlu0 %v2855_v0, 256  ;;  %v10565_v0 = vld [vmem:[#allocation40_spill] sm:$0xff] }
 0x9d3   :  { %v2921_v43 = vand.u32 2147483647, %v10565_v0  ;;  %v2832_v34 = vmax.f32 %v10565_v0, 0.0 }
 0x9d5   :  { %v2929_v24 = vsub.f32 0.0, %v2921_v43 }
 0x9d6   :  { %2871 = vbcast.lane.b32.xlu0 %v2869_v59, 256 }
 0x9d7   :  { %v2940_v22 = vmul.f32 1.442695, %v2929_v24 }
 0x9da   :  { %2885 = vbcast.lane.b32.xlu0 %v2883_v62, 256 }
 0x9ef   :  { %3421 = vadd.xlane.f32.xlu1 %v3420_v15  ;;  %v2944_v15 = vmul.f32 1.442695, %v2931_v31 }
 0x9f9   :  { %3418 = vadd.xlane.f32.xlu0 %v3417_v58 }
 0x9fd   :  { %3791 = vadd.xlane.f32.xlu0 %v3790_v5 }
 0xa01   :  { %3794 = vadd.xlane.f32.xlu0 %v3793_v8 }
 0xa33   :  { %v9947_v56 = vpop.xlane.xlu1 %4867 }
 0xa34   :  { %v4870_v59 = vsub.f32 %v9882_v28, %v9947_v56 }
 0xa35   :  { %v9952_v27 = vpop.xlane.xlu0 %4864 }
 0xa36   :  { %v4873_v62 = vmul.f32 1.442695, %v4870_v59  ;;  %v4869_v32 = vsub.f32 %v9885_v23, %v9952_v27 }
 0xa37   :  { %v4153_v55 = vpop.permute.xlu1 %4152 }
 0xa38   :  { %6425 = vpow2.f32 %v4873_v62  ;;  %v4871_v10 = vmul.f32 1.442695, %v4869_v32  ;;  %vm4155_vm2 = vcmp.eq.s32.totalorder %v10553_v40, %v4153_v55 }
 0xa39   :  { %v5202_v57 = vsel %vm4155_vm2, 1.0, %v10555_v1  ;;  %vm3433_vm2 = vcmask 7168  }
 0xa3a   :  { %6427 = vpow2.f32 %v4871_v10  ;;  %v4161_v25 = vmul.f32 %v5202_v57, %v4144_v4 }
 0xa3b   :  { %6429 = vpow2.f32 %v2936_v38  ;;  %v2851_v62 = vpop.permute.xlu1 %2850 }
 0xa3c   :  { %6431 = vpow2.f32 %v2940_v22  ;;  %v4165_v5 = vsel %vm3374_vm13, %v4161_v25, 0.0  ;;  %v2903_v61 = vmul.f32 %v2851_v62, %v10564_v29  ;;  %v5224_v29 = vld [vmem:[%s10180_s10 + $0x48] sm:$0xff]  ;;  %v10570_v25 = vld [vmem:[#allocation76_spill] sm:$0xff] }
 0xa3d   :  { %v4150_v16 = vpop.permute.xlu0 %4149  ;;  %6433 = vpow2.f32 %v2944_v15  ;;  %v10574_v62 = vld [vmem:[#allocation31_spill] sm:$0xff] }
 0xa3e   :  { %vm4154_vm3 = vcmp.eq.s32.totalorder %v10553_v40, %v4150_v16  ;;  %6435 = vpow2.f32 %v2324_v63  ;;  %v2911_v33 = vsub.f32 %v2830_v20, %v2903_v61  ;;  %v2834_v63 = vmax.f32 %v10566_v26, 0.0  ;;  %v10576_v61 = vld [vmem:[#allocation30_spill] sm:$0xff] }
 0xa3f   :  { %v5201_v18 = vsel %vm4154_vm3, 1.0, %v10555_v1  ;;  %6437 = vpow2.f32 %v2946_v30  ;;  %v2865_v10 = vpop.permute.xlu1 %2864  ;;  %v10571_v30 = vld [vmem:[#allocation81_spill] sm:$0xff]  ;;  %v2920_v20 = vand.u32 2147483647, %v10576_v61 }
 0xa40   :  { %v4160_v17 = vmul.f32 %v5201_v18, %v4143_v14  ;;  %v2905_v55 = vmul.f32 %v2865_v10, %v10565_v0  ;;  %v10569_v0 = vld [vmem:[#allocation80_spill] sm:$0xff]  ;;  %v2286_v14 = vmul.f32 %v10570_v25, %v10567_v35 }
 0xa41   :  { %v4522_v51 = vpop.permute.xlu0 %4521 }
 0xa42   :  { %vm4526_vm4 = vcmp.eq.s32.totalorder %v10553_v40, %v4522_v51  ;;  %v4162_v45 = vsel %vm3374_vm13, %v4160_v17, 0.0  ;;  %v2913_v46 = vsub.f32 %v2832_v34, %v2905_v55 }
 0xa43   :  { %v5213_v7 = vsel %vm4526_vm4, 1.0, %v10555_v1  ;;  %v2879_v16 = vpop.permute.xlu1 %2878 }
 0xa44   :  { %v4532_v19 = vmul.f32 %v5213_v7, %v4515_v37  ;;  %v2907_v51 = vmul.f32 %v2879_v16, %v10566_v26 }
 0xa45   :  { %v6426_v11 = vpop.eup %6425  ;;  %v9976_v41 = vpop.permute.xlu0 %2843 }
 0xa46   :  { %v4878_v2 = vsel %vm3374_vm13, %v6426_v11, 0.0  ;;  %v4534_v52 = vsel %vm3374_vm13, %v4532_v19, 0.0  ;;  %v2915_v4 = vsub.f32 %v2834_v63, %v2907_v51 }
 0xa47   :  { %v6428_v58 = vpop.eup %6427  ;;  %4879 = vadd.xlane.f32.xlu1 %v4878_v2  ;;  %v2213_v2 = vmax.f32 %v10567_v35, 0.0  ;;  %v2893_v16 = vpop.permute.xlu1 %2892 }
 0xa48   :  { %v4875_v21 = vsel %vm3374_vm13, %v6428_v58, 0.0  ;;  %v6430_v53 = vpop.eup %6429 }
 0xa49   :  { %4876 = vadd.xlane.f32.xlu0 %v4875_v21  ;;  %v2951_v8 = vadd.f32 1.0, %v6430_v53  ;;  %v6432_v36 = vpop.eup %6431  ;;  %v9978_v13 = vpop.permute.xlu0 %4893  ;;  %v2294_v37 = vsub.f32 %v2213_v2, %v2286_v14  ;;  %v2835_v53 = vmax.f32 %v10568_v9, 0.0 }
 0xa4a   :  { %v6434_v43 = vpop.eup %6433  ;;  %v2953_v39 = vadd.f32 1.0, %v6432_v36  ;;  %vm4898_vm15 = vcmp.eq.s32.totalorder %v10553_v40, %v9978_v13 }
 0xa4b   :  { %4166 = vadd.xlane.f32.xlu1 %v4165_v5  ;;  %6439 = vlog2.f32 %v2951_v8  ;;  %v6436_v59 = vpop.eup %6435  ;;  %v2955_v32 = vadd.f32 1.0, %v6434_v43  ;;  %v10572_v8 = vld [vmem:[#allocation83_spill] sm:$0xff]  ;;  %v10573_v43 = vld [vmem:[#allocation86_spill] sm:$0xff] }
 0xa4c   :  { %6441 = vlog2.f32 %v2953_v39  ;;  %v2334_v38 = vadd.f32 1.0, %v6436_v59  ;;  %v6438_v24 = vpop.eup %6437 }
 0xa4d   :  { %4163 = vadd.xlane.f32.xlu0 %v4162_v45  ;;  %6443 = vlog2.f32 %v2955_v32  ;;  %v9981_v48 = vpop.permute.xlu0 %2857  ;;  %v2956_v31 = vadd.f32 1.0, %v6438_v24  ;;  %v2918_v32 = vand.u32 2147483647, %v10574_v62 }
 0xa4e   :  { %6445 = vlog2.f32 %v2334_v38 }
 0xa4f   :  { %4535 = vadd.xlane.f32.xlu1 %v4534_v52  ;;  %6447 = vlog2.f32 %v2956_v31  ;;  %v2926_v10 = vsub.f32 0.0, %v2918_v32 }
 0xa50   :  { %6449 = vlog2.f32 %v9944_v54 }
 0xa51   :  { %v9989_v3 = vpop.permute.xlu0 %2871 }
 0xa55   :  { %v2886_v18 = vpop.permute.xlu0 %2885 }
 0xa56   :  { %v2908_v17 = vmul.f32 %v2886_v18, %v10568_v9  ;;  %v10575_v9 = vld [vmem:[#allocation49_spill] sm:$0xff] }
 0xa57   :  { %v2925_v24 = vand.u32 2147483647, %v10575_v9  ;;  %v2909_v13 = vmul.f32 %v2893_v16, %v10575_v9 }
 0xa58   :  { %v6440_v22 = vpop.eup %6439  ;;  %v2916_v36 = vsub.f32 %v2835_v53, %v2908_v17 }
 0xa59   :  { %v2961_v12 = vmul.f32 0.6931472, %v6440_v22  ;;  %v6442_v15 = vpop.eup %6441  ;;  %v2933_v31 = vsub.f32 0.0, %v2925_v24  ;;  %v2934_v22 = vmul.f32 1.442695, %v2926_v10 }
 0xa5a   :  { %v2965_v6 = vmul.f32 0.6931472, %v6442_v15  ;;  %v6444_v57 = vpop.eup %6443 }
 0xa5b   :  { %v2975_v49 = vadd.f32 %v2961_v12, %v2911_v33  ;;  %v6446_v11 = vpop.eup %6445  ;;  %v2969_v58 = vmul.f32 0.6931472, %v6444_v57  ;;  %v10577_v33 = vld [vmem:[#allocation33_spill] sm:$0xff]  ;;  %v2948_v12 = vmul.f32 1.442695, %v2933_v31  ;;  %6451 = vpow2.f32 %v2934_v22 }
 0xa5c   :  { %v2977_v44 = vadd.f32 %v2965_v6, %v2913_v46  ;;  %v2349_v7 = vmul.f32 0.6931472, %v6446_v11  ;;  %v6448_v5 = vpop.eup %6447  ;;  %v2922_v55 = vand.u32 2147483647, %v10577_v33  ;;  %v2833_v22 = vmax.f32 %v10577_v33, 0.0 }
 0xa5d   :  { %v2983_v50 = vmul.f32 %v2975_v49, %v10569_v0  ;;  %v2979_v26 = vadd.f32 %v2969_v58, %v2915_v4  ;;  %v2971_v52 = vmul.f32 0.6931472, %v6448_v5  ;;  %6453 = vpow2.f32 %v2948_v12  ;;  %v6450_v63 = vpop.eup %6449 }
 0xa5e   :  { %v2985_v21 = vmul.f32 %v2977_v44, %v10571_v30  ;;  %v2358_v19 = vadd.f32 %v2349_v7, %v2294_v37  ;;  %v4512_v0 = vmul.f32 0.6931472, %v6450_v63  ;;  %v10580_v63 = vld [vmem:[#allocation82_spill] sm:$0xff] }
 0xa5f   :  { %v2987_v45 = vmul.f32 %v2979_v26, %v10572_v8  ;;  %v2980_v35 = vadd.f32 %v2971_v52, %v2916_v36  ;;  %v2902_v36 = vmul.f32 %v9976_v41, %v10574_v62  ;;  %v2829_v52 = vmax.f32 %v10574_v62, 0.0 }
 0xa60   :  { %4524 = vperm.xlu1 %6140, %v5212_v42   ;;  %v2366_v39 = vmul.f32 %v2358_v19, %v10573_v43  ;;  %v2928_v42 = vsub.f32 0.0, %v2920_v20  ;;  %v4514_v4 = vadd.f32 %v4512_v0, %v9871_v47  ;;  %v5225_v19 = vsel %vm4898_vm15, 1.0, %v10555_v1 }
 0xa61   :  { %v2988_v59 = vmul.f32 %v2980_v35, %v10573_v43  ;;  %v2904_v43 = vmul.f32 %v9981_v48, %v10576_v61  ;;  %v2906_v62 = vmul.f32 %v9989_v3, %v10577_v33  ;;  %v10578_v48 = vld [vmem:[#allocation26_spill] sm:$0xff]  ;;  %v10582_v3 = vld [vmem:[#allocation84_spill] sm:$0xff] }
 0xa62   :  { %v2938_v15 = vmul.f32 1.442695, %v2928_v42  ;;  %v4516_v14 = vsub.f32 %v9848_v60, %v4514_v4 }
 0xa64   :  { %4896 = vperm.xlu1 %6140, %v5224_v29   ;;  %v2930_v29 = vsub.f32 0.0, %v2922_v55  ;;  %6455 = vpow2.f32 %v2938_v15  ;;  %v2914_v15 = vsub.f32 %v2833_v22, %v2906_v62 }
 0xa66   :  { %v2942_v51 = vmul.f32 1.442695, %v2930_v29 }
 0xa68   :  { %3002 = vperm.xlu1 %6140, %v2983_v50   ;;  %v6452_v44 = vpop.eup %6451 }
 0xa69   :  { %v2950_v18 = vadd.f32 1.0, %v6452_v44  ;;  %v10581_v44 = vld [vmem:[#allocation102_spill] sm:$0xff] }
 0xa6a   :  { %v6454_v11 = vpop.eup %6453  ;;  %v2303_v4 = vand.u32 2147483647, %v10581_v44 }
 0xa6b   :  { %v2957_v7 = vadd.f32 1.0, %v6454_v11 }
 0xa6c   :  { %3008 = vperm.xlu1 %6140, %v2985_v21   ;;  %v2311_v11 = vsub.f32 0.0, %v2303_v4 }
 0xa70   :  { %3014 = vperm.xlu1 %6140, %v2987_v45  }
 0xa71   :  { %v6456_v25 = vpop.eup %6455 }
 0xa72   :  { %v2952_v26 = vadd.f32 1.0, %v6456_v25 }
 0xa74   :  { %2395 = vperm.xlu1 %6140, %v2366_v39  }
 0xa78   :  { %3017 = vperm.xlu1 %6140, %v2988_v59   ;;  %v10015_v49 = vpop.xlane.xlu1 %3421  ;;  %v2831_v59 = vmax.f32 %v10576_v61, 0.0  ;;  %v10579_v61 = vld [vmem:[#allocation85_spill] sm:$0xff] }
 0xa7a   :  { %v2912_v41 = vsub.f32 %v2831_v59, %v2904_v43 }
 0xa82   :  { %v10007_v38 = vpop.xlane.xlu0 %3418 }
 0xa86   :  { %v10013_v34 = vpop.xlane.xlu0 %3791 }
 0xa8a   :  { %v10017_v46 = vpop.xlane.xlu0 %3794 }
 0xad0   :  { %v10019_v54 = vpop.xlane.xlu1 %4879 }
 0xad2   :  { %v4877_v6 = vpop.xlane.xlu0 %4876 }
 0xad3   :  { %6457 = vlog2.f32 %v4877_v6 }
 0xad4   :  { %6459 = vpow2.f32 %v2942_v51  ;;  %v10021_v57 = vpop.xlane.xlu1 %4166 }
 0xad5   :  { %6461 = vlog2.f32 %v2950_v18  ;;  %v2326_v18 = vmul.f32 1.442695, %v2311_v11 }
 0xad6   :  { %6463 = vlog2.f32 %v2957_v7 }
 0xad7   :  { %6465 = vlog2.f32 %v2952_v26 }
 0xad8   :  { %v10023_v50 = vpop.xlane.xlu1 %4535 }
 0xadc   :  { %v4525_v2 = vpop.permute.xlu1 %4524 }
 0xadd   :  { %vm4527_vm14 = vcmp.eq.s32.totalorder %v10553_v40, %v4525_v2 }
 0xade   :  { %v5214_v58 = vsel %vm4527_vm14, 1.0, %v10555_v1 }
 0xadf   :  { %v4533_v30 = vmul.f32 %v5214_v58, %v4516_v14 }
 0xae0   :  { %v6458_v21 = vpop.eup %6457  ;;  %v4897_v58 = vpop.permute.xlu1 %4896 }
 0xae1   :  { %v6460_v17 = vpop.eup %6459  ;;  %v4882_v37 = vmul.f32 0.6931472, %v6458_v21  ;;  %v4537_v53 = vsel %vm3374_vm13, %v4533_v30, 0.0  ;;  %vm4899_vm0 = vcmp.eq.s32.totalorder %v10553_v40, %v4897_v58 }
 0xae2   :  { %4538 = vadd.xlane.f32.xlu0 %v4537_v53  ;;  %v2954_v47 = vadd.f32 1.0, %v6460_v17  ;;  %v6462_v35 = vpop.eup %6461  ;;  %v5226_v26 = vsel %vm4899_vm0, 1.0, %v10555_v1  ;;  %v2214_v53 = vmax.f32 %v10581_v44, 0.0 }
 0xae3   :  { %v4885_v60 = vadd.f32 %v4882_v37, %v9952_v27  ;;  %v2910_v27 = vsub.f32 %v2829_v52, %v2902_v36  ;;  %v6464_v39 = vpop.eup %6463  ;;  %v2959_v32 = vmul.f32 0.6931472, %v6462_v35  ;;  %v10071_v52 = vld [vmem:[%s10181_s11 + $0x8] sm:$0xff]  ;;  %v10073_v35 = vpop.xlane.xlu0 %4163 }
 0xae4   :  { %6467 = vlog2.f32 %v2954_v47  ;;  %v6466_v24 = vpop.eup %6465  ;;  %v2973_v31 = vmul.f32 0.6931472, %v6464_v39  ;;  %v3003_v40 = vpop.permute.xlu1 %3002  ;;  %vm4543_vm1 = vcmp.gt.s32.totalorder %v10071_v52, 3  ;;  %vm3799_vm4 = vcmp.gt.s32.totalorder %v10071_v52, 1 }
 0xae5   :  { %v4887_v5 = vsub.f32 %v9885_v23, %v4885_v60  ;;  %v2836_v23 = vmax.f32 %v10575_v9, 0.0  ;;  %v2974_v20 = vadd.f32 %v2959_v32, %v2910_v27  ;;  %v2963_v42 = vmul.f32 0.6931472, %v6466_v24  ;;  %v10583_v60 = vld [vmem:[#allocation74_spill] sm:$0xff] }
 0xae6   :  { %6469 = vlog2.f32 %v10019_v54  ;;  %v5216_v43 = vsel %vm4543_vm1, 1.0, %v10555_v1  ;;  %vm4915_vm14 = vcmp.gt.s32.totalorder %v10071_v52, 4  ;;  %vm3426_vm0 = vcmp.gt.s32.totalorder %v10071_v52, 0 }
 0xae7   :  { %v4904_v8 = vmul.f32 %v5225_v19, %v4887_v5  ;;  %v2917_v10 = vsub.f32 %v2836_v23, %v2909_v13  ;;  %v2982_v12 = vmul.f32 %v2974_v20, %v10578_v48  ;;  %v2976_v9 = vadd.f32 %v2963_v42, %v2912_v41 }
 0xae8   :  { %6471 = vpow2.f32 %v2326_v18  ;;  %v4540_v13 = vsub.f32 0.0, %v10023_v50 }
 0xae9   :  { %v4906_v45 = vsel %vm3374_vm13, %v4904_v8, 0.0  ;;  %v2981_v16 = vadd.f32 %v2973_v31, %v2917_v10  ;;  %v2984_v6 = vmul.f32 %v2976_v9, %v10580_v63  ;;  %v3009_v8 = vpop.permute.xlu1 %3008  ;;  %v10584_v31 = vld [vmem:[#allocation88_spill] sm:$0xff] }
 0xaea   :  { %4907 = vadd.xlane.f32.xlu1 %v4906_v45  ;;  %v10065_v45 = vld [vmem:[%s10181_s11] sm:$0xff]  ;;  %s6108_s11 = spop %6107 }
 0xaeb   :  { %v2989_v51 = vmul.f32 %v2981_v16, %v10579_v61  ;;  %vm3798_vm3 = vcmp.gt.s32.totalorder %v10065_v45, 1  ;;  %vm3425_vm15 = vcmp.gt.s32.totalorder %v10065_v45, 0 }
 0xaed   :  { %v3015_v36 = vpop.permute.xlu1 %3014 }
 0xaee   :  { %v3045_v63 = vrot.slane %v3015_v36, %v10584_v31  ;;  %v3423_v36 = vsub.f32 0.0, %v10007_v38 }
 0xaf1   :  { %v6468_v55 = vpop.eup %6467  ;;  %v10079_v59 = vpop.permute.xlu1 %2395 }
 0xaf2   :  { %v2967_v29 = vmul.f32 0.6931472, %v6468_v55  ;;  %v3029_v55 = vrot.slane %v3003_v40, %v10584_v31  ;;  %v10585_v40 = vld [vmem:[#allocation35_spill] sm:$0xff] }
 0xaf3   :  { %v6470_v2 = vpop.eup %6469 }
 0xaf4   :  { %v2978_v0 = vadd.f32 %v2967_v29, %v2914_v15  ;;  %v4884_v25 = vmul.f32 0.6931472, %v6470_v2  ;;  %v3037_v15 = vrot.slane %v3009_v8, %v10584_v31  ;;  %v2419_v8 = vrot.slane %v10585_v40, %v10584_v31 }
 0xaf5   :  { %v6472_v7 = vpop.eup %6471  ;;  %v3018_v50 = vpop.permute.xlu1 %3017 }
 0xaf6   :  { %v2986_v33 = vmul.f32 %v2978_v0, %v10582_v3  ;;  %v4886_v14 = vadd.f32 %v4884_v25, %v9947_v56  ;;  %v2335_v21 = vadd.f32 1.0, %v6472_v7  ;;  %v2287_v56 = vmul.f32 %v10583_v60, %v10581_v44 }
 0xaf7   :  { %v10099_v0 = vsel %vm3798_vm3, 1.0, %v10555_v1  ;;  %v3049_v44 = vrot.slane %v3018_v50, %v10584_v31 }
 0xaf8   :  { %2999 = vperm.xlu0 %6139, %v2982_v12   ;;  %v4888_v30 = vsub.f32 %v9882_v28, %v4886_v14  ;;  %6473 = vlog2.f32 %v2335_v21  ;;  %v2295_v5 = vsub.f32 %v2214_v53, %v2287_v56  ;;  %v3820_v3 = vsel %vm3433_vm2, %v10099_v0, 0.0 }
 0xaf9   :  { %v4565_v53 = vsel %vm3433_vm2, %v5216_v43, 0.0  ;;  %v5228_v56 = vsel %vm4915_vm14, 1.0, %v10555_v1 }
 0xafa   :  { %v4905_v17 = vmul.f32 %v5226_v26, %v4888_v30 }
 0xafb   :  { %3020 = vperm.xlu1 %6140, %v2989_v51  }
 0xafc   :  { %3005 = vperm.xlu0 %6139, %v2984_v6   ;;  %v4909_v54 = vsel %vm3374_vm13, %v4905_v17, 0.0  ;;  %vm4542_vm13 = vcmp.gt.s32.totalorder %v10065_v45, 3 }
 0xafd   :  { %v5215_v27 = vsel %vm4542_vm13, 1.0, %v10555_v1 }
 0xafe   :  { %v4548_v39 = vmul.f32 %v5215_v27, %v4540_v13 }
 0xb00   :  { %3011 = vperm.xlu0 %6139, %v2986_v33   ;;  %v4550_v10 = vsel %vm3433_vm2, %v4548_v39, 0.0  ;;  %v5192_v33 = vsel %vm3799_vm4, 1.0, %v10555_v1  ;;  %v3424_v39 = vsub.f32 0.0, %v10015_v49 }
 0xb01   :  { %v3821_v2 = vsel %vm3433_vm2, %v5192_v33, 0.0 }
 0xb02   :  { %v3822_v21 = vadd.f32 %v3821_v2, %v3820_v3 }
 0xb05   :  { %v6474_v37 = vpop.eup %6473 }
 0xb06   :  { %v2351_v47 = vmul.f32 0.6931472, %v6474_v37  ;;  %v4564_v37 = vsel %vm3433_vm2, %v5215_v27, 0.0  ;;  %v10586_v27 = vld [vmem:[#allocation34_spill] sm:$0xff] }
 0xb08   :  { %v2359_v19 = vadd.f32 %v2351_v47, %v2295_v5  ;;  %v4566_v47 = vadd.f32 %v4565_v53, %v4564_v37 }
 0xb0a   :  { %v2367_v28 = vmul.f32 %v2359_v19, %v10579_v61  ;;  %v4937_v19 = vsel %vm3433_vm2, %v5228_v56, 0.0 }
 0xb1f   :  { %4910 = vadd.xlane.f32.xlu0 %v4909_v54 }
 0xb35   :  { %2398 = vperm.xlu0 %6139, %v2367_v28  }
 0xb6b   :  { %v4539_v23 = vpop.xlane.xlu0 %4538 }
 0xb6c   :  { %v4541_v32 = vsub.f32 0.0, %v4539_v23  ;;  %v5179_v23 = vsel %vm3425_vm15, 1.0, %v10555_v1 }
 0xb6e   :  { %v4549_v24 = vmul.f32 %v5216_v43, %v4541_v32  ;;  %v2423_v43 = vrot.slane %v10586_v27, %v10584_v31  ;;  %v2427_v32 = vrot.slane %v10079_v59, %v10584_v31  ;;  %v3797_v59 = vsub.f32 0.0, %v10017_v46 }
 0xb6f   :  { %v4169_v46 = vsub.f32 0.0, %v10021_v57 }
 0xb70   :  { %v4551_v20 = vsel %vm3433_vm2, %v4549_v24, 0.0  ;;  %v10587_v24 = vld [vmem:[#allocation16_spill] sm:$0xff] }
 0xb71   :  { %v10083_v41 = vadd.f32 %v4551_v20, %v4550_v10  ;;  %v2435_v10 = vsel %vm1808_vm8, %v2419_v8, %v10587_v24  ;;  %v3431_v20 = vmul.f32 %v5179_v23, %v3423_v36 }
 0xb72   :  { %v2436_v38 = vsel %vm1810_vm9, %v2423_v43, %v2435_v10 }
 0xb73   :  { %v3000_v62 = vpop.permute.xlu0 %2999  ;;  %v10086_v42 = vpop.xlane.xlu1 %4907  ;;  %v3434_v49 = vsel %vm3433_vm2, %v3431_v20, 0.0 }
 0xb74   :  { %v3025_v22 = vrot.slane %v3000_v62, %v10584_v31 }
 0xb76   :  { %v3054_v12 = vsel %vm1802_vm5, %v3029_v55, %v3025_v22  ;;  %vm4171_vm5 = vcmp.gt.s32.totalorder %v10071_v52, 2  ;;  %v2437_v22 = vsel %vm1812_vm10, %v2427_v32, %v2436_v38 }
 0xb77   :  { %v3006_v16 = vpop.permute.xlu0 %3005  ;;  %v3021_v61 = vpop.permute.xlu1 %3020  ;;  %v5204_v7 = vsel %vm4171_vm5, 1.0, %v10555_v1 }
 0xb78   :  { %v3033_v48 = vrot.slane %v3006_v16, %v10584_v31  ;;  %v3053_v11 = vrot.slane %v3021_v61, %v10584_v31  ;;  %v4193_v26 = vsel %vm3433_vm2, %v5204_v7, 0.0 }
 0xb7a   :  { %v3055_v9 = vsel %vm1804_vm6, %v3033_v48, %v3054_v12  ;;  %vm4170_vm6 = vcmp.gt.s32.totalorder %v10065_v45, 2  ;;  %v3448_v12 = vsel %vm3433_vm2, %v5179_v23, 0.0 }
 0xb7b   :  { %v3012_v29 = vpop.permute.xlu0 %3011  ;;  %v3056_v6 = vsel %vm1806_vm7, %v3037_v15, %v3055_v9  ;;  %v5203_v30 = vsel %vm4170_vm6, 1.0, %v10555_v1  ;;  %vm4914_vm7 = vcmp.gt.s32.totalorder %v10065_v45, 4  ;;  %v5180_v45 = vsel %vm3426_vm0, 1.0, %v10555_v1 }
 0xb7c   :  { %v3041_v51 = vrot.slane %v3012_v29, %v10584_v31  ;;  %v4192_v17 = vsel %vm3433_vm2, %v5203_v30, 0.0  ;;  %v5227_v60 = vsel %vm4914_vm7, 1.0, %v10555_v1  ;;  %v3432_v62 = vmul.f32 %v5180_v45, %v3424_v39 }
 0xb7d   :  { %v4194_v54 = vadd.f32 %v4193_v26, %v4192_v17  ;;  %v4936_v5 = vsel %vm3433_vm2, %v5227_v60, 0.0  ;;  %v3449_v16 = vsel %vm3433_vm2, %v5180_v45, 0.0  ;;  %v3805_v15 = vmul.f32 %v5192_v33, %v3797_v59 }
 0xb7e   :  { %v3057_v4 = vsel %vm1808_vm8, %v3041_v51, %v3056_v6  ;;  %v4938_v28 = vadd.f32 %v4937_v19, %v4936_v5  ;;  %v3435_v48 = vsel %vm3433_vm2, %v3432_v62, 0.0  ;;  %v4168_v29 = vsub.f32 0.0, %v10073_v35 }
 0xb7f   :  { %v3058_v18 = vsel %vm1810_vm9, %v3045_v63, %v3057_v4  ;;  %v3436_v9 = vadd.f32 %v3435_v48, %v3434_v49  ;;  %v3450_v61 = vadd.f32 %v3449_v16, %v3448_v12  ;;  %v3807_v63 = vsel %vm3433_vm2, %v3805_v15, 0.0 }
 0xb80   :  { %v3059_v25 = vsel %vm1812_vm10, %v3049_v44, %v3058_v18  ;;  %v4176_v6 = vmul.f32 %v5203_v30, %v4168_v29  ;;  %v4177_v4 = vmul.f32 %v5204_v7, %v4169_v46  ;;  %v4912_v33 = vsub.f32 0.0, %v10086_v42 }
 0xb81   :  { %v3060_v14 = vsel %vm1814_vm11, %v3053_v11, %v3059_v25  ;;  %vm3075_vm8 = vcmask 0  }
 0xb82   :  { %v3062_v58 = vsel %vm1817_vm12, %v3060_v14, 0.0  ;;  %v4179_v35 = vsel %vm3433_vm2, %v4177_v4, 0.0  ;;  %v4920_v57 = vmul.f32 %v5227_v60, %v4912_v33 }
 0xb83   :  { %3063 = vadd.xlane.f32.xlu1 %v3062_v58 }
 0xb84   :  { %v4922_v25 = vsel %vm3433_vm2, %v4920_v57, 0.0 }
 0xb87   :  { %3823 = vadd.xlane.f32.xlu1 %v3822_v21 }
 0xb8b   :  { %4195 = vadd.xlane.f32.xlu1 %v4194_v54 }
 0xb8f   :  { %4567 = vadd.xlane.f32.xlu1 %v4566_v47 }
 0xb93   :  { %4939 = vadd.xlane.f32.xlu1 %v4938_v28 }
 0xba8   :  { %v4911_v13 = vpop.xlane.xlu0 %4910 }
 0xba9   :  { %v4913_v11 = vsub.f32 0.0, %v4911_v13 }
 0xbb0   :  { %v2399_v52 = vpop.permute.xlu0 %2398 }
 0xbb1   :  { %v2431_v50 = vrot.slane %v2399_v52, %v10584_v31  ;;  %v3796_v31 = vsub.f32 0.0, %v10013_v34  ;;  %v4178_v34 = vsel %vm3433_vm2, %v4176_v6, 0.0 }
 0xbb2   :  { %v4180_v18 = vadd.f32 %v4179_v35, %v4178_v34 }
 0xbb3   :  { %v2438_v55 = vsel %vm1814_vm11, %v2431_v50, %v2437_v22  ;;  %v3804_v51 = vmul.f32 %v10099_v0, %v3796_v31  ;;  %v4921_v0 = vmul.f32 %v5228_v56, %v4913_v11 }
 0xbb4   :  { %v2440_v1 = vsel %vm1817_vm12, %v2438_v55, 0.0 }
 0xbb5   :  { %2441 = vadd.xlane.f32.xlu0 %v2440_v1  ;;  %v3806_v44 = vsel %vm3433_vm2, %v3804_v51, 0.0  ;;  %v4923_v2 = vsel %vm3433_vm2, %v4921_v0, 0.0 }
 0xbb6   :  { %v3808_v3 = vadd.f32 %v3807_v63, %v3806_v44  ;;  %v4924_v14 = vadd.f32 %v4923_v2, %v4922_v25 }
 0xbb9   :  { %3437 = vadd.xlane.f32.xlu0 %v3436_v9 }
 0xbbd   :  { %3451 = vadd.xlane.f32.xlu0 %v3450_v61 }
 0xbc1   :  { %3809 = vadd.xlane.f32.xlu0 %v3808_v3 }
 0xbc5   :  { %4181 = vadd.xlane.f32.xlu0 %v4180_v18 }
 0xbc9   :  { %4553 = vadd.xlane.f32.xlu0 %v10083_v41 }
 0xbcd   :  { %4925 = vadd.xlane.f32.xlu0 %v4924_v14 }
 0xc0c   :  { %v3064_v58 = vpop.xlane.xlu1 %3063 }
 0xc0d   :  { %v3065_v7 = vrot.slane %v3064_v58, 4 }
 0xc0f   :  { %v3066_v21 = vadd.f32 %v3065_v7, %v3064_v58 }
 0xc10   :  { %v3824_v30 = vpop.xlane.xlu1 %3823 }
 0xc11   :  { %v3067_v26 = vrot.slane %v3066_v21, 2  ;;  %v3825_v56 = vrot.slane %v3824_v30, 4 }
 0xc13   :  { %v3068_v60 = vadd.f32 %v3067_v26, %v3066_v21  ;;  %v3826_v40 = vadd.f32 %v3825_v56, %v3824_v30 }
 0xc14   :  { %v4196_v42 = vpop.xlane.xlu1 %4195 }
 0xc15   :  { %v4197_v36 = vrot.slane %v4196_v42, 4  ;;  %v3069_v13 = vrot.slane %v3068_v60, 1  ;;  %v3827_v24 = vrot.slane %v3826_v40, 2 }
 0xc17   :  { %v4198_v10 = vadd.f32 %v4197_v36, %v4196_v42  ;;  %v3070_v52 = vadd.f32 %v3069_v13, %v3068_v60  ;;  %v3828_v9 = vadd.f32 %v3827_v24, %v3826_v40  ;;  %v1828_v13 = vstv %s6108_s11 }
 0xc18   :  { %v4568_v28 = vpop.xlane.xlu1 %4567 }
 0xc19   :  { %v4569_v38 = vrot.slane %v4568_v28, 4  ;;  %v4199_v16 = vrot.slane %v4198_v10, 2  ;;  %v3829_v3 = vrot.slane %v3828_v9, 1 }
 0xc1b   :  { %v4570_v48 = vadd.f32 %v4569_v38, %v4568_v28  ;;  %v4200_v34 = vadd.f32 %v4199_v16, %v4198_v10  ;;  %v3830_v14 = vadd.f32 %v3829_v3, %v3828_v9 }
 0xc1c   :  { %v4940_v55 = vpop.xlane.xlu1 %4939 }
 0xc1d   :  { %v4941_v31 = vrot.slane %v4940_v55, 4  ;;  %v4571_v6 = vrot.slane %v4570_v48, 2  ;;  %v4201_v58 = vrot.slane %v4200_v34, 1 }
 0xc1f   :  { %v4942_v44 = vadd.f32 %v4941_v31, %v4940_v55  ;;  %v4572_v7 = vadd.f32 %v4571_v6, %v4570_v48 }
 0xc21   :  { %v4943_v2 = vrot.slane %v4942_v44, 2  ;;  %v4573_v56 = vrot.slane %v4572_v7, 1 }
 0xc3e   :  { %v2442_v17 = vpop.xlane.xlu0 %2441 }
 0xc3f   :  { %v2443_v54 = vrot.slane %v2442_v17, 4 }
 0xc41   :  { %v2444_v37 = vadd.f32 %v2443_v54, %v2442_v17 }
 0xc42   :  { %v3438_v53 = vpop.xlane.xlu0 %3437 }
 0xc43   :  { %v2445_v47 = vrot.slane %v2444_v37, 2  ;;  %v3439_v5 = vrot.slane %v3438_v53, 4 }
 0xc45   :  { %v3440_v19 = vadd.f32 %v3439_v5, %v3438_v53  ;;  %v2446_v41 = vadd.f32 %v2445_v47, %v2444_v37  ;;  %v4944_v37 = vadd.f32 %v4943_v2, %v4942_v44  ;;  %v4202_v53 = vadd.f32 %v4201_v58, %v4200_v34 }
 0xc46   :  { %v3452_v8 = vpop.xlane.xlu0 %3451 }
 0xc47   :  { %v3441_v27 = vrot.slane %v3440_v19, 2  ;;  %v3453_v43 = vrot.slane %v3452_v8, 4  ;;  %v2447_v23 = vrot.slane %v2446_v41, 1  ;;  %v4945_v28 = vrot.slane %v4944_v37, 1 }
 0xc49   :  { %v3454_v39 = vadd.f32 %v3453_v43, %v3452_v8  ;;  %v2448_v32 = vadd.f32 %v2447_v23, %v2446_v41  ;;  %v3442_v45 = vadd.f32 %v3441_v27, %v3440_v19  ;;  %v4574_v41 = vadd.f32 %v4573_v56, %v4572_v7 }
 0xc4a   :  { %v3810_v20 = vpop.xlane.xlu0 %3809  ;;  %v4946_v36 = vadd.f32 %v4945_v28, %v4944_v37 }
 0xc4b   :  { %v3455_v50 = vrot.slane %v3454_v39, 2  ;;  %v3811_v62 = vrot.slane %v3810_v20, 4  ;;  %6109 = vpush %v2448_v32  ;;  %v3443_v22 = vrot.slane %v3442_v45, 1 }
 0xc4c   :  { %6111 = vpush %v3070_v52 }
 0xc4d   :  { %v3812_v49 = vadd.f32 %v3811_v62, %v3810_v20  ;;  %v3444_v59 = vadd.f32 %v3443_v22, %v3442_v45  ;;  %v3456_v1 = vadd.f32 %v3455_v50, %v3454_v39 }
 0xc4e   :  { %v4182_v12 = vpop.xlane.xlu0 %4181 }
 0xc4f   :  { %v3813_v15 = vrot.slane %v3812_v49, 2  ;;  %v4183_v29 = vrot.slane %v4182_v12, 4  ;;  %6113 = vpush %v3444_v59  ;;  %v3457_v61 = vrot.slane %v3456_v1, 1 }
 0xc51   :  { %v4184_v51 = vadd.f32 %v4183_v29, %v4182_v12  ;;  %v3458_v46 = vadd.f32 %v3457_v61, %v3456_v1  ;;  %v3814_v63 = vadd.f32 %v3813_v15, %v3812_v49 }
 0xc52   :  { %v4554_v4 = vpop.xlane.xlu0 %4553 }
 0xc53   :  { %v4185_v11 = vrot.slane %v4184_v51, 2  ;;  %v4555_v35 = vrot.slane %v4554_v4, 4  ;;  %6115 = vpush %v3458_v46  ;;  %v3815_v33 = vrot.slane %v3814_v63, 1 }
 0xc55   :  { %v4556_v18 = vadd.f32 %v4555_v35, %v4554_v4  ;;  %v3816_v0 = vadd.f32 %v3815_v33, %v3814_v63  ;;  %v4186_v57 = vadd.f32 %v4185_v11, %v4184_v51 }
 0xc56   :  { %v4926_v25 = vpop.xlane.xlu0 %4925 }
 0xc57   :  { %v4557_v30 = vrot.slane %v4556_v18, 2  ;;  %v4927_v21 = vrot.slane %v4926_v25, 4  ;;  %6117 = vpush %v3816_v0  ;;  %v4187_v26 = vrot.slane %v4186_v57, 1 }
 0xc58   :  { %6119 = vpush %v3830_v14 }
 0xc59   :  { %v4928_v17 = vadd.f32 %v4927_v21, %v4926_v25  ;;  %v4188_v54 = vadd.f32 %v4187_v26, %v4186_v57  ;;  %v4558_v42 = vadd.f32 %v4557_v30, %v4556_v18 }
 0xc5b   :  { %v4929_v60 = vrot.slane %v4928_v17, 2  ;;  %6121 = vpush %v4188_v54  ;;  %v4559_v47 = vrot.slane %v4558_v42, 1 }
 0xc5c   :  { %6123 = vpush %v4202_v53 }
 0xc5d   :  { %v4930_v5 = vadd.f32 %v4929_v60, %v4928_v17  ;;  %v4560_v19 = vadd.f32 %v4559_v47, %v4558_v42 }
 0xc5f   :  { %6125 = vpush %v4560_v19  ;;  %v4931_v40 = vrot.slane %v4930_v5, 1 }
 0xc60   :  { %6127 = vpush %v4574_v41 }
 0xc61   :  { %v4932_v8 = vadd.f32 %v4931_v40, %v4930_v5 }
 0xc63   :  { %6129 = vpush %v4932_v8 }
 0xc64   :  { %6131 = vpush %v4946_v36 }
 0xc7c   :  { %s6110_s30 = spop %6109 }
 0xc7d   :  { %v2450_v27 = vstv %s6110_s30  ;;  %s6112_s7 = spop %6111 }
 0xc7e   :  { %v2451_v43 = vadd.f32 %v2450_v27, %v1828_v13  ;;  %v3072_v23 = vstv %s6112_s7 }
 0xc80   :  { %v3073_v39 = vadd.f32 %v3072_v23, %v2451_v43 }
 0xc82   :  { %v3074_v32 = vmul.f32 0.055555556, %v3073_v39 }
 0xc84   :  { %3076 = vst.msk [vmem:[#allocation4] sm:$0x1] %vm3075_vm8, %v3074_v32 }
 0xc85   :  { %6576 = shalt.err (!%p6573_p4)
}
 0xc86   :  { %4964 = dma.vmem_to_hbm [thread:$0]  %s4962_s6, 16, %s10187_s17, [#allocation5]  }
 0xc87   :  { %s6114_s13 = spop %6113  ;;  %s6614_s17 = smov [#allocation6]  }
 0xc88   :  { %s6116_s9 = spop %6115  ;;  %v3446_v49 = vstv %s6114_s13  ;;  %s4971_s19 = sshll.u32 %s6614_s17, 4  ;;  %s4972_s19 = int_to_ptr.vmem [resolvable:$true] %s4971_s19 }
 0xc89   :  { %s6118_s16 = spop %6117  ;;  %v3460_v24 = vstv %s6116_s9  ;;  %s6585_s25 = scalar_lea.vmem %s4972_s19, 16 }
 0xc8a   :  { %s6120_s12 = spop %6119  ;;  %v3818_v55 = vstv %s6118_s16  ;;  %p6586_p5 = scmp.ne.s32.totalorder %s4972_s19, %s6585_s25 }
 0xc8b   :  { %v3832_v45 = vstv %s6120_s12  ;;  %v3819_v1 = vadd.f32 %v3818_v55, %v3446_v49  ;;  %s6589_s5 = scalar_lea.vmem %s4972_s19, 32  ;;  %p6590_p6 = scmp.lt.s32.totalorder %s4972_s19, %s4972_s19 }
 0xc8c   :  { %s6122_s15 = spop %6121  ;;  %v3833_v20 = vadd.f32 %v3832_v45, %v3460_v24  ;;  %p6591_p7 = scmp.lt.s32.totalorder %s6589_s5, %s6585_s25 }
 0xc8d   :  { %s6124_s21 = spop %6123  ;;  %v4190_v59 = vstv %s6122_s15 }
 0xc8e   :  { %v4204_v10 = vstv %s6124_s21  ;;  %v4191_v48 = vadd.f32 %v4190_v59, %v3819_v1  ;;  %p6592_p8 = por %p6591_p7, %p6590_p6 }
 0xc8f   :  { %v4205_v38 = vadd.f32 %v4204_v10, %v3833_v20 }
 0xc90   :  { %s6126_s2 = spop %6125  ;;  %p6593_p9 = pnand %p6592_p8, %p6586_p5 }
 0xc91   :  { %s6128_s23 = spop %6127  ;;  %v4562_v16 = vstv %s6126_s2 }
 0xc92   :  { %v4576_v52 = vstv %s6128_s23  ;;  %v4563_v31 = vadd.f32 %v4562_v16, %v4191_v48 }
 0xc93   :  { %v4577_v50 = vadd.f32 %v4576_v52, %v4205_v38 }
 0xc94   :  { %s6130_s24 = spop %6129 }
 0xc95   :  { %s6132_s4 = spop %6131  ;;  %v4934_v12 = vstv %s6130_s24 }
 0xc96   :  { %v4948_v62 = vstv %s6132_s4  ;;  %v4935_v9 = vadd.f32 %v4934_v12, %v4563_v31 }
 0xc97   :  { %v4949_v22 = vadd.f32 %v4948_v62, %v4577_v50 }
 0xc99   :  { %6475 = vrcp.f32 %v4949_v22  ;;  %vm4950_vm9 = vcmp.gt.f32.partialorder %v4949_v22, 0.0 }
 0xca6   :  { %v6476_v15 = vpop.eup %6475 }
 0xca7   :  { %v4952_v29 = vmul.f32 %v6476_v15, %v4935_v9 }
 0xca9   :  { %v4953_v61 = vsel %vm4950_vm9, %v4952_v29, %v4935_v9 }
 0xcaa   :  { %4954 = vst.msk [vmem:[#allocation6] sm:$0x1] %vm3075_vm8, %v4953_v61 }
 0xcab   :  { %6596 = shalt.err (!%p6593_p9)
}
 0xcac   :  { %4974 = dma.vmem_to_hbm [thread:$0]  %s4972_s19, 16, %s10188_s18, [#allocation7]  }
 0xcad   :  { %6605 = dma.done.wait [#allocation5], 16  }
 0xcae   :  { %6606 = vsyncadd [#allocation5], 4294967280 }
 0xcaf   :  { %6607 = dma.done.wait [#allocation7], 16  }
 0xcb0   :  { %6608 = vsyncadd [#allocation7], 4294967280 }
 0xcb1   :  { %4981 = vsyncpa [#allocation5], 1 }
 0xcb2   :  { %4982 = vsyncpa [#allocation7], 1 }

</bundles_post_ra>
